<compile_context>
chip_gen: v7x
topology: tpu7x:2x2x1
jax: 0.10.0
libtpu: 0.0.40
codegen_flags: <defaults>
</compile_context>

<pallas_src>
import functools

import jax
import jax.numpy as jnp
from jax.experimental import pallas as pl
from jax.experimental.pallas import tpu as pltpu


def _focal_loss_kernel(logits_ref, targets_ref, weight_ref, out_ref,
                       *, alpha, gamma):
    x = logits_ref[...].astype(jnp.float32)      # (tm, C) logits tile
    t = targets_ref[...]                          # (tm, 1) int32 labels
    w = weight_ref[...].astype(jnp.float32)       # (1, C) per-class weights

    tm, c = x.shape

    # Bool target mask (no float one-hot).
    class_ids = jax.lax.broadcasted_iota(jnp.int32, (tm, c), 1)
    mask = class_ids == t                         # (tm, C) bool

    # Row-wise max + logsumexp; no full (tm, C) log-softmax is materialized.
    m = jnp.max(x, axis=-1, keepdims=True)                            # (tm, 1)
    lse = jnp.log(jnp.sum(jnp.exp(x - m), axis=-1, keepdims=True))    # (tm, 1)

    # Gather logit and class weight at the target class via masked sums.
    x_t = jnp.sum(jnp.where(mask, x, 0.0), axis=-1, keepdims=True)    # (tm, 1)
    w_t = jnp.sum(jnp.where(mask, w, 0.0), axis=-1, keepdims=True)    # (tm, 1)

    logpt = x_t - m - lse                         # log_softmax at target
    pt = jnp.exp(logpt)
    one_minus_pt = jnp.maximum(1.0 - pt, 0.0)     # clamp: insurance vs. NaN

    g = float(gamma)
    if g.is_integer() and 0 <= int(g) <= 4:       # static fast path (gamma=2)
        focal = jnp.ones_like(one_minus_pt)
        for _ in range(int(g)):
            focal = focal * one_minus_pt
    else:
        focal = one_minus_pt ** g

    # Per-example loss for this tile (lane width 1, but output traffic is
    # ~1/C of the logits traffic, so this is negligible).
    out_ref[...] = (-alpha) * focal * (logpt * w_t)


def _choose_row_tile(n, c, itemsize, *, target_bytes=2 * 1024 * 1024,
                     max_rows=1024):
    """Pick a row tile that moves ~target_bytes of logits per grid step."""
    tm = target_bytes // max(1, c * itemsize)
    tm = (tm // 128) * 128
    tm = max(128, min(max_rows, tm))
    return int(tm)


def focal_loss(logits, targets, *, alpha=1.0, gamma=2.0, weight=None,
               reduction="mean", block_rows=None):
    """Pallas implementation of FocalLoss.forward for 2-D logits (N, C)."""
    assert reduction in ("mean", "sum", "none")
    n, c = logits.shape
    itemsize = jnp.dtype(logits.dtype).itemsize

    if block_rows is None:
        tm = _choose_row_tile(n, c, itemsize)
    else:
        tm = max(128, (int(block_rows) // 128) * 128)
    num_tiles = pl.cdiv(n, tm)

    if weight is None:
        weight = jnp.ones((c,), jnp.float32)

    t2 = targets.astype(jnp.int32).reshape(n, 1)
    w2 = jnp.asarray(weight, jnp.float32).reshape(1, c)

    kernel = functools.partial(_focal_loss_kernel,
                               alpha=float(alpha), gamma=float(gamma))

    # VMEM budget: double-buffered inputs + f32 temporaries, generation-safe
    # cap (48 MiB fits v7x's 64 MiB physical; well under v5e/v6e's 128 MiB).
    tile_in_bytes = tm * c * itemsize
    tile_f32_bytes = tm * c * 4
    need = (2 * tile_in_bytes + 6 * tile_f32_bytes
            + 4 * tm * 4 + 2 * c * 4 + (1 << 20))
    vmem_limit = int(min(48 * 2**20, max(32 * 2**20, need)))

    cost = pl.CostEstimate(
        flops=8 * n * c,
        transcendentals=n * c + 2 * n,
        bytes_accessed=n * c * itemsize + n * 4 + n * 4 + c * 4,
    )

    per_example = pl.pallas_call(
        kernel,
        out_shape=jax.ShapeDtypeStruct((n, 1), jnp.float32),
        grid_spec=pltpu.PrefetchScalarGridSpec(
            num_scalar_prefetch=0,
            grid=(num_tiles,),
            in_specs=[
                pl.BlockSpec((tm, c), lambda i: (i, 0)),   # logits tile
                pl.BlockSpec((tm, 1), lambda i: (i, 0)),   # targets tile
                pl.BlockSpec((1, c), lambda i: (0, 0)),    # class weights
            ],
            out_specs=pl.BlockSpec((tm, 1), lambda i: (i, 0)),
        ),
        compiler_params=pltpu.CompilerParams(
            dimension_semantics=("parallel",),
            vmem_limit_bytes=vmem_limit,
        ),
        cost_estimate=cost,
    )(logits, t2, w2)

    per_example = per_example[:, 0]
    if reduction == "mean":
        return jnp.mean(per_example)
    if reduction == "sum":
        return jnp.sum(per_example)
    return per_example


def _focal_loss_ref(logits, targets, *, alpha=1.0, gamma=2.0, weight=None,
                    reduction="mean"):
    """Plain-JAX reference mirroring the PyTorch module."""
    logp = jax.nn.log_softmax(logits.astype(jnp.float32), axis=1)
    logpt = jnp.take_along_axis(logp, targets[:, None], axis=1)[:, 0]
    pt = jnp.exp(logpt)
    if weight is not None:
        logpt = logpt * jnp.asarray(weight, jnp.float32)[targets]
    loss = -alpha * (1.0 - pt) ** gamma * logpt
    if reduction == "mean":
        return loss.mean()
    if reduction == "sum":
        return loss.sum()
    return loss


if __name__ == "__main__":
    key = jax.random.PRNGKey(0)
    k_logits, k_targets, k_w = jax.random.split(key, 3)

    N, C = 8, 16
    logits = jax.random.normal(k_logits, (N, C), dtype=jnp.float32)
    targets = jax.random.randint(k_targets, (N,), 0, C, dtype=jnp.int32)
    class_w = jax.random.uniform(k_w, (C,), jnp.float32, 0.5, 1.5)

    # 1) default: alpha=1, gamma=2, mean
    out = jax.block_until_ready(
        focal_loss(logits, targets, alpha=1.0, gamma=2.0, reduction="mean"))
    ref = _focal_loss_ref(logits, targets, alpha=1.0, gamma=2.0,
                          reduction="mean")
    assert jnp.allclose(out, ref, rtol=1e-5, atol=1e-5), (out, ref)

    # 2) per-class weights, sum reduction
    out = jax.block_until_ready(
        focal_loss(logits, targets, alpha=0.5, gamma=2.0, weight=class_w,
                   reduction="sum"))
    ref = _focal_loss_ref(logits, targets, alpha=0.5, gamma=2.0,
                          weight=class_w, reduction="sum")
    assert jnp.allclose(out, ref, rtol=1e-5, atol=1e-5), (out, ref)

    # 3) non-integer gamma, reduction='none' (per-example losses)
    out = jax.block_until_ready(
        focal_loss(logits, targets, alpha=1.0, gamma=1.5, reduction="none"))
    ref = _focal_loss_ref(logits, targets, alpha=1.0, gamma=1.5,
                          reduction="none")
    assert out.shape == (N,)
    assert jnp.allclose(out, ref, rtol=1e-5, atol=1e-5), (out, ref)

    print("KERNEL_OK")
</pallas_src>

<mosaic_0001>
module attributes {stable_mosaic.version = 11 : i64} {
  func.func @_focal_loss_kernel(%arg0: i32, %arg1: memref<1024x16xf32, #tpu.memory_space<vmem>>, %arg2: memref<1024x1xi32, #tpu.memory_space<vmem>>, %arg3: memref<1x16xf32, #tpu.memory_space<vmem>>, %arg4: memref<1024x1xf32, #tpu.memory_space<vmem>>) attributes {dimension_semantics = [#tpu.dimension_semantics<parallel>], iteration_bounds = array<i64: 1>, scalar_prefetch = 0 : i64, scratch_operands = 0 : i64, tpu.core_type = #tpu.core_type<tc>, window_params = [{transform_indices = @transform_0, window_bounds = array<i64: 1024, 16>}, {transform_indices = @transform_1, window_bounds = array<i64: 1024, 1>}, {pipeline_mode = #tpu.pipeline_mode<synchronous>, transform_indices = @transform_2, window_bounds = array<i64: 1, 16>}, {transform_indices = @transform_3, window_bounds = array<i64: 1024, 1>}]} {
    %c0 = arith.constant 0 : index
    %c0_0 = arith.constant 0 : index
    %0 = vector.load %arg1[%c0, %c0_0] : memref<1024x16xf32, #tpu.memory_space<vmem>>, vector<1024x16xf32>
    %c0_1 = arith.constant 0 : index
    %c0_2 = arith.constant 0 : index
    %1 = vector.load %arg2[%c0_1, %c0_2] : memref<1024x1xi32, #tpu.memory_space<vmem>>, vector<1024x1xi32>
    %c0_3 = arith.constant 0 : index
    %c0_4 = arith.constant 0 : index
    %2 = vector.load %arg3[%c0_3, %c0_4] : memref<1x16xf32, #tpu.memory_space<vmem>>, vector<1x16xf32>
    %3 = tpu.iota {dimensions = array<i32: 1>} : vector<1024x16xi32>
    %4 = vector.broadcast %1 : vector<1024x1xi32> to vector<1024x16xi32>
    %5 = arith.cmpi eq, %3, %4 : vector<1024x16xi32>
    %cst = arith.constant dense<0xFF800000> : vector<1024xf32>
    %6 = vector.multi_reduction <maximumf>, %0, %cst [1] : vector<1024x16xf32> to vector<1024xf32>
    %7 = vector.shape_cast %6 : vector<1024xf32> to vector<1024x1xf32>
    %8 = vector.broadcast %7 : vector<1024x1xf32> to vector<1024x16xf32>
    %9 = arith.subf %0, %8 : vector<1024x16xf32>
    %10 = math.exp %9 : vector<1024x16xf32>
    %cst_5 = arith.constant dense<0.000000e+00> : vector<1024xf32>
    %11 = vector.multi_reduction <add>, %10, %cst_5 [1] : vector<1024x16xf32> to vector<1024xf32>
    %12 = vector.shape_cast %11 : vector<1024xf32> to vector<1024x1xf32>
    %13 = math.log %12 : vector<1024x1xf32>
    %cst_6 = arith.constant 0.000000e+00 : f32
    %14 = vector.broadcast %cst_6 : f32 to vector<1024x16xf32>
    %15 = arith.select %5, %0, %14 : vector<1024x16xi1>, vector<1024x16xf32>
    %cst_7 = arith.constant dense<0.000000e+00> : vector<1024xf32>
    %16 = vector.multi_reduction <add>, %15, %cst_7 [1] : vector<1024x16xf32> to vector<1024xf32>
    %17 = vector.shape_cast %16 : vector<1024xf32> to vector<1024x1xf32>
    %cst_8 = arith.constant 0.000000e+00 : f32
    %18 = vector.shape_cast %2 : vector<1x16xf32> to vector<1x16xf32>
    %19 = vector.broadcast %18 : vector<1x16xf32> to vector<1024x16xf32>
    %20 = vector.broadcast %cst_8 : f32 to vector<1024x16xf32>
    %21 = arith.select %5, %19, %20 : vector<1024x16xi1>, vector<1024x16xf32>
    %cst_9 = arith.constant dense<0.000000e+00> : vector<1024xf32>
    %22 = vector.multi_reduction <add>, %21, %cst_9 [1] : vector<1024x16xf32> to vector<1024xf32>
    %23 = vector.shape_cast %22 : vector<1024xf32> to vector<1024x1xf32>
    %24 = arith.subf %17, %7 : vector<1024x1xf32>
    %25 = arith.subf %24, %13 : vector<1024x1xf32>
    %26 = math.exp %25 : vector<1024x1xf32>
    %cst_10 = arith.constant 1.000000e+00 : f32
    %27 = vector.broadcast %cst_10 : f32 to vector<1024x1xf32>
    %28 = arith.subf %27, %26 : vector<1024x1xf32>
    %cst_11 = arith.constant 0.000000e+00 : f32
    %29 = vector.broadcast %cst_11 : f32 to vector<1024x1xf32>
    %30 = arith.maximumf %28, %29 : vector<1024x1xf32>
    %cst_12 = arith.constant 1.000000e+00 : f32
    %31 = vector.broadcast %cst_12 : f32 to vector<1024x1xf32>
    %32 = arith.mulf %31, %30 : vector<1024x1xf32>
    %33 = arith.mulf %32, %30 : vector<1024x1xf32>
    %cst_13 = arith.constant -1.000000e+00 : f32
    %34 = vector.broadcast %cst_13 : f32 to vector<1024x1xf32>
    %35 = arith.mulf %34, %33 : vector<1024x1xf32>
    %36 = arith.mulf %25, %23 : vector<1024x1xf32>
    %37 = arith.mulf %35, %36 : vector<1024x1xf32>
    %c0_14 = arith.constant 0 : index
    %c0_15 = arith.constant 0 : index
    %38 = vector.load %arg4[%c0_14, %c0_15] : memref<1024x1xf32, #tpu.memory_space<vmem>>, vector<1024x1xf32>
    tpu.vector_store %arg4[%c0_14, %c0_15], %37 {strides = array<i32>} : memref<1024x1xf32, #tpu.memory_space<vmem>>, vector<1024x1xf32>,
    return
  }
  func.func @transform_0(%arg0: i32) -> (i32, i32) {
    %c0_i32 = arith.constant 0 : i32
    %c0_i32_0 = arith.constant 0 : i32
    return %arg0, %c0_i32 : i32, i32
  }
  func.func @transform_1(%arg0: i32) -> (i32, i32) {
    %c0_i32 = arith.constant 0 : i32
    %c0_i32_0 = arith.constant 0 : i32
    return %arg0, %c0_i32 : i32, i32
  }
  func.func @transform_2(%arg0: i32) -> (i32, i32) {
    %c0_i32 = arith.constant 0 : i32
    %c0_i32_0 = arith.constant 0 : i32
    %c0_i32_1 = arith.constant 0 : i32
    return %c0_i32, %c0_i32_0 : i32, i32
  }
  func.func @transform_3(%arg0: i32) -> (i32, i32) {
    %c0_i32 = arith.constant 0 : i32
    %c0_i32_0 = arith.constant 0 : i32
    return %arg0, %c0_i32 : i32, i32
  }
}

</mosaic_0001>

<bundles_post_ra>
// kernel: tpu_custom_call.1
= control target key start
LH: loop header
LB: loop body
LE: loop exit
PB: predicated region body
PF: predicated region fallthrough
CT: control target
= control target key end

     0   :  { %v5683_v2 = vmov 0   ;;  %vm785_vm0 = vcmask 130048   ;;  %s10858_s0 = inlined_call_operand.vmem [shape: f32[8,16], index: 0, kind: input, shape index: {}]   ;;  %s10859_s1 = inlined_call_operand.vmem [shape: s32[8,1], index: 1, kind: input, shape index: {}]   ;;  %s10860_s2 = inlined_call_operand.vmem [shape: f32[1,16], index: 2, kind: input, shape index: {}]   ;;  %s10861_s3 = inlined_call_operand.vmem [shape: f32[8,1], index: 3, kind: output, shape index: {}]  }
   0x1   :  { %v144_v0 = vld [vmem:[%s10859_s1 + $0x10] sm:$0xff]  ;;  %v142_v1 = vld [vmem:[%s10859_s1] sm:$0xff]  ;;  %4676 = vset.pattern.permute.xlu1 %v5683_v2  ;;  %4675 = vset.pattern.permute.xlu0 %v5683_v2  ;;  %v145_v3 = vld [vmem:[%s10859_s1 + $0x18] sm:$0xff] }
   0x2   :  { %280 = vperm.xlu1 %4676, %v144_v0   ;;  %274 = vperm.xlu0 %4675, %v142_v1   ;;  %v143_v4 = vld [vmem:[%s10859_s1 + $0x8] sm:$0xff]  ;;  %v146_v6 = vld [vmem:[%s10859_s1 + $0x20] sm:$0xff]  ;;  %v149_v7 = vld [vmem:[%s10859_s1 + $0x38] sm:$0xff] }
   0x3   :  { %v147_v5 = vld [vmem:[%s10859_s1 + $0x28] sm:$0xff]  ;;  %v148_v8 = vld [vmem:[%s10859_s1 + $0x30] sm:$0xff]  ;;  %v150_v10 = vld [vmem:[%s10859_s1 + $0x40] sm:$0xff] }
   0x4   :  { %v151_v9 = vld [vmem:[%s10859_s1 + $0x48] sm:$0xff]  ;;  %v153_v11 = vld [vmem:[%s10859_s1 + $0x58] sm:$0xff]  ;;  %v152_v12 = vld [vmem:[%s10859_s1 + $0x50] sm:$0xff] }
   0x5   :  { %v155_v13 = vld [vmem:[%s10859_s1 + $0x68] sm:$0xff]  ;;  %v154_v14 = vld [vmem:[%s10859_s1 + $0x60] sm:$0xff]  ;;  %v157_v15 = vld [vmem:[%s10859_s1 + $0x78] sm:$0xff] }
   0x6   :  { %283 = vperm.xlu1 %4676, %v145_v3   ;;  %277 = vperm.xlu0 %4675, %v143_v4   ;;  %v156_v16 = vld [vmem:[%s10859_s1 + $0x70] sm:$0xff]  ;;  %v159_v17 = vld [vmem:[%s10859_s1 + $0x88] sm:$0xff]  ;;  %v158_v18 = vld [vmem:[%s10859_s1 + $0x80] sm:$0xff] }
   0x7   :  { %v161_v19 = vld [vmem:[%s10859_s1 + $0x98] sm:$0xff]  ;;  %v160_v20 = vld [vmem:[%s10859_s1 + $0x90] sm:$0xff]  ;;  %v163_v21 = vld [vmem:[%s10859_s1 + $0xa8] sm:$0xff] }
   0x8   :  { %v162_v22 = vld [vmem:[%s10859_s1 + $0xa0] sm:$0xff]  ;;  %v165_v23 = vld [vmem:[%s10859_s1 + $0xb8] sm:$0xff]  ;;  %v164_v24 = vld [vmem:[%s10859_s1 + $0xb0] sm:$0xff] }
   0x9   :  { %v167_v25 = vld [vmem:[%s10859_s1 + $0xc8] sm:$0xff]  ;;  %v166_v26 = vld [vmem:[%s10859_s1 + $0xc0] sm:$0xff]  ;;  %v169_v27 = vld [vmem:[%s10859_s1 + $0xd8] sm:$0xff] }
   0xa   :  { %289 = vperm.xlu1 %4676, %v147_v5   ;;  %286 = vperm.xlu0 %4675, %v146_v6   ;;  %v168_v28 = vld [vmem:[%s10859_s1 + $0xd0] sm:$0xff]  ;;  %v171_v29 = vld [vmem:[%s10859_s1 + $0xe8] sm:$0xff]  ;;  %v170_v30 = vld [vmem:[%s10859_s1 + $0xe0] sm:$0xff] }
   0xb   :  { %v173_v31 = vld [vmem:[%s10859_s1 + $0xf8] sm:$0xff]  ;;  %v172_v32 = vld [vmem:[%s10859_s1 + $0xf0] sm:$0xff]  ;;  %v175_v33 = vld [vmem:[%s10859_s1 + $0x108] sm:$0xff] }
   0xc   :  { %v174_v34 = vld [vmem:[%s10859_s1 + $0x100] sm:$0xff]  ;;  %v177_v35 = vld [vmem:[%s10859_s1 + $0x118] sm:$0xff]  ;;  %v176_v36 = vld [vmem:[%s10859_s1 + $0x110] sm:$0xff] }
   0xd   :  { %v179_v37 = vld [vmem:[%s10859_s1 + $0x128] sm:$0xff]  ;;  %v178_v38 = vld [vmem:[%s10859_s1 + $0x120] sm:$0xff]  ;;  %v181_v39 = vld [vmem:[%s10859_s1 + $0x138] sm:$0xff] }
   0xe   :  { %295 = vperm.xlu1 %4676, %v149_v7   ;;  %292 = vperm.xlu0 %4675, %v148_v8   ;;  %v180_v40 = vld [vmem:[%s10859_s1 + $0x130] sm:$0xff]  ;;  %v183_v41 = vld [vmem:[%s10859_s1 + $0x148] sm:$0xff]  ;;  %v182_v42 = vld [vmem:[%s10859_s1 + $0x140] sm:$0xff] }
   0xf   :  { %v185_v43 = vld [vmem:[%s10859_s1 + $0x158] sm:$0xff]  ;;  %v184_v44 = vld [vmem:[%s10859_s1 + $0x150] sm:$0xff]  ;;  %v187_v45 = vld [vmem:[%s10859_s1 + $0x168] sm:$0xff] }
  0x10   :  { %v186_v46 = vld [vmem:[%s10859_s1 + $0x160] sm:$0xff]  ;;  %v189_v47 = vld [vmem:[%s10859_s1 + $0x178] sm:$0xff]  ;;  %v188_v48 = vld [vmem:[%s10859_s1 + $0x170] sm:$0xff] }
  0x11   :  { %v191_v49 = vld [vmem:[%s10859_s1 + $0x188] sm:$0xff]  ;;  %v190_v50 = vld [vmem:[%s10859_s1 + $0x180] sm:$0xff]  ;;  %v193_v51 = vld [vmem:[%s10859_s1 + $0x198] sm:$0xff] }
  0x12   :  { %301 = vperm.xlu1 %4676, %v151_v9   ;;  %298 = vperm.xlu0 %4675, %v150_v10   ;;  %v192_v52 = vld [vmem:[%s10859_s1 + $0x190] sm:$0xff]  ;;  %v195_v53 = vld [vmem:[%s10859_s1 + $0x1a8] sm:$0xff]  ;;  %v194_v54 = vld [vmem:[%s10859_s1 + $0x1a0] sm:$0xff] }
  0x13   :  { %v197_v55 = vld [vmem:[%s10859_s1 + $0x1b8] sm:$0xff]  ;;  %v196_v56 = vld [vmem:[%s10859_s1 + $0x1b0] sm:$0xff]  ;;  %v199_v57 = vld [vmem:[%s10859_s1 + $0x1c8] sm:$0xff] }
  0x14   :  { %v198_v58 = vld [vmem:[%s10859_s1 + $0x1c0] sm:$0xff]  ;;  %v201_v59 = vld [vmem:[%s10859_s1 + $0x1d8] sm:$0xff]  ;;  %v200_v60 = vld [vmem:[%s10859_s1 + $0x1d0] sm:$0xff] }
  0x15   :  { %v203_v61 = vld [vmem:[%s10859_s1 + $0x1e8] sm:$0xff]  ;;  %v202_v62 = vld [vmem:[%s10859_s1 + $0x1e0] sm:$0xff]  ;;  %v205_v63 = vld [vmem:[%s10859_s1 + $0x1f8] sm:$0xff] }
  0x16   :  { %307 = vperm.xlu1 %4676, %v153_v11   ;;  %304 = vperm.xlu0 %4675, %v152_v12   ;;  %v204_v0 = vld [vmem:[%s10859_s1 + $0x1f0] sm:$0xff]  ;;  %v207_v1 = vld [vmem:[%s10859_s1 + $0x208] sm:$0xff]  ;;  %v206_v2 = vld [vmem:[%s10859_s1 + $0x200] sm:$0xff] }
  0x17   :  { %v209_v5 = vld [vmem:[%s10859_s1 + $0x218] sm:$0xff]  ;;  %v208_v6 = vld [vmem:[%s10859_s1 + $0x210] sm:$0xff]  ;;  %v211_v9 = vld [vmem:[%s10859_s1 + $0x228] sm:$0xff] }
  0x18   :  { %v210_v10 = vld [vmem:[%s10859_s1 + $0x220] sm:$0xff] }
  0x1a   :  { %313 = vperm.xlu1 %4676, %v155_v13   ;;  %310 = vperm.xlu0 %4675, %v154_v14   ;;  %v213_v13 = vld [vmem:[%s10859_s1 + $0x238] sm:$0xff]  ;;  %v212_v14 = vld [vmem:[%s10859_s1 + $0x230] sm:$0xff] }
  0x1e   :  { %319 = vperm.xlu1 %4676, %v157_v15   ;;  %316 = vperm.xlu0 %4675, %v156_v16  }
  0x22   :  { %325 = vperm.xlu1 %4676, %v159_v17   ;;  %322 = vperm.xlu0 %4675, %v158_v18   ;;  %v215_v17 = vld [vmem:[%s10859_s1 + $0x248] sm:$0xff]  ;;  %v214_v18 = vld [vmem:[%s10859_s1 + $0x240] sm:$0xff] }
  0x26   :  { %331 = vperm.xlu1 %4676, %v161_v19   ;;  %328 = vperm.xlu0 %4675, %v160_v20  }
  0x2a   :  { %337 = vperm.xlu1 %4676, %v163_v21   ;;  %334 = vperm.xlu0 %4675, %v162_v22   ;;  %v217_v21 = vld [vmem:[%s10859_s1 + $0x258] sm:$0xff]  ;;  %v216_v22 = vld [vmem:[%s10859_s1 + $0x250] sm:$0xff] }
  0x2e   :  { %343 = vperm.xlu1 %4676, %v165_v23   ;;  %340 = vperm.xlu0 %4675, %v164_v24  }
  0x32   :  { %349 = vperm.xlu1 %4676, %v167_v25   ;;  %346 = vperm.xlu0 %4675, %v166_v26   ;;  %v219_v25 = vld [vmem:[%s10859_s1 + $0x268] sm:$0xff]  ;;  %v218_v26 = vld [vmem:[%s10859_s1 + $0x260] sm:$0xff] }
  0x36   :  { %355 = vperm.xlu1 %4676, %v169_v27   ;;  %352 = vperm.xlu0 %4675, %v168_v28  }
  0x3a   :  { %361 = vperm.xlu1 %4676, %v171_v29   ;;  %358 = vperm.xlu0 %4675, %v170_v30   ;;  %v221_v29 = vld [vmem:[%s10859_s1 + $0x278] sm:$0xff]  ;;  %v220_v30 = vld [vmem:[%s10859_s1 + $0x270] sm:$0xff] }
  0x3e   :  { %367 = vperm.xlu1 %4676, %v173_v31   ;;  %364 = vperm.xlu0 %4675, %v172_v32  }
  0x42   :  { %373 = vperm.xlu1 %4676, %v175_v33   ;;  %370 = vperm.xlu0 %4675, %v174_v34   ;;  %v223_v33 = vld [vmem:[%s10859_s1 + $0x288] sm:$0xff]  ;;  %v222_v34 = vld [vmem:[%s10859_s1 + $0x280] sm:$0xff] }
  0x46   :  { %379 = vperm.xlu1 %4676, %v177_v35   ;;  %376 = vperm.xlu0 %4675, %v176_v36  }
  0x4a   :  { %385 = vperm.xlu1 %4676, %v179_v37   ;;  %382 = vperm.xlu0 %4675, %v178_v38   ;;  %v225_v37 = vld [vmem:[%s10859_s1 + $0x298] sm:$0xff]  ;;  %v224_v38 = vld [vmem:[%s10859_s1 + $0x290] sm:$0xff] }
  0x4e   :  { %391 = vperm.xlu1 %4676, %v181_v39   ;;  %388 = vperm.xlu0 %4675, %v180_v40  }
  0x52   :  { %397 = vperm.xlu1 %4676, %v183_v41   ;;  %394 = vperm.xlu0 %4675, %v182_v42   ;;  %v227_v41 = vld [vmem:[%s10859_s1 + $0x2a8] sm:$0xff]  ;;  %v226_v42 = vld [vmem:[%s10859_s1 + $0x2a0] sm:$0xff] }
  0x56   :  { %403 = vperm.xlu1 %4676, %v185_v43   ;;  %400 = vperm.xlu0 %4675, %v184_v44  }
  0x5a   :  { %409 = vperm.xlu1 %4676, %v187_v45   ;;  %406 = vperm.xlu0 %4675, %v186_v46   ;;  %v229_v45 = vld [vmem:[%s10859_s1 + $0x2b8] sm:$0xff]  ;;  %v228_v46 = vld [vmem:[%s10859_s1 + $0x2b0] sm:$0xff] }
  0x5e   :  { %415 = vperm.xlu1 %4676, %v189_v47   ;;  %412 = vperm.xlu0 %4675, %v188_v48  }
  0x62   :  { %421 = vperm.xlu1 %4676, %v191_v49   ;;  %418 = vperm.xlu0 %4675, %v190_v50   ;;  %v231_v49 = vld [vmem:[%s10859_s1 + $0x2c8] sm:$0xff]  ;;  %v230_v50 = vld [vmem:[%s10859_s1 + $0x2c0] sm:$0xff] }
  0x66   :  { %427 = vperm.xlu1 %4676, %v193_v51   ;;  %424 = vperm.xlu0 %4675, %v192_v52  }
  0x6a   :  { %433 = vperm.xlu1 %4676, %v195_v53   ;;  %430 = vperm.xlu0 %4675, %v194_v54   ;;  %v233_v53 = vld [vmem:[%s10859_s1 + $0x2d8] sm:$0xff]  ;;  %v232_v54 = vld [vmem:[%s10859_s1 + $0x2d0] sm:$0xff] }
  0x6e   :  { %439 = vperm.xlu1 %4676, %v197_v55   ;;  %436 = vperm.xlu0 %4675, %v196_v56  }
  0x72   :  { %445 = vperm.xlu1 %4676, %v199_v57   ;;  %442 = vperm.xlu0 %4675, %v198_v58   ;;  %v235_v57 = vld [vmem:[%s10859_s1 + $0x2e8] sm:$0xff]  ;;  %v234_v58 = vld [vmem:[%s10859_s1 + $0x2e0] sm:$0xff] }
  0x76   :  { %451 = vperm.xlu1 %4676, %v201_v59   ;;  %448 = vperm.xlu0 %4675, %v200_v60  }
  0x7a   :  { %457 = vperm.xlu1 %4676, %v203_v61   ;;  %454 = vperm.xlu0 %4675, %v202_v62   ;;  %v237_v61 = vld [vmem:[%s10859_s1 + $0x2f8] sm:$0xff]  ;;  %v236_v62 = vld [vmem:[%s10859_s1 + $0x2f0] sm:$0xff] }
  0x7e   :  { %463 = vperm.xlu1 %4676, %v205_v63   ;;  %460 = vperm.xlu0 %4675, %v204_v0  }
  0x81   :  { %v5902_v3 = vpop.permute.xlu1 %280  ;;  %v5904_v4 = vpop.permute.xlu0 %274 }
  0x82   :  { %11339 = vst [vmem:[#allocation3_spill] sm:$0xff] %v5902_v3  ;;  %11340 = vst [vmem:[#allocation4_spill] sm:$0xff] %v5904_v4  ;;  %469 = vperm.xlu1 %4676, %v207_v1   ;;  %466 = vperm.xlu0 %4675, %v206_v2   ;;  %v239_v1 = vld [vmem:[%s10859_s1 + $0x308] sm:$0xff]  ;;  %v238_v2 = vld [vmem:[%s10859_s1 + $0x300] sm:$0xff] }
  0x85   :  { %v5912_v7 = vpop.permute.xlu1 %283  ;;  %v5914_v8 = vpop.permute.xlu0 %277 }
  0x86   :  { %11341 = vst [vmem:[#allocation5_spill] sm:$0xff] %v5912_v7  ;;  %11342 = vst [vmem:[#allocation6_spill] sm:$0xff] %v5914_v8  ;;  %475 = vperm.xlu1 %4676, %v209_v5   ;;  %472 = vperm.xlu0 %4675, %v208_v6  }
  0x89   :  { %v5922_v11 = vpop.permute.xlu1 %289  ;;  %v5924_v12 = vpop.permute.xlu0 %286 }
  0x8a   :  { %11343 = vst [vmem:[#allocation7_spill] sm:$0xff] %v5922_v11  ;;  %11344 = vst [vmem:[#allocation8_spill] sm:$0xff] %v5924_v12  ;;  %481 = vperm.xlu1 %4676, %v211_v9   ;;  %478 = vperm.xlu0 %4675, %v210_v10   ;;  %v241_v9 = vld [vmem:[%s10859_s1 + $0x318] sm:$0xff]  ;;  %v240_v10 = vld [vmem:[%s10859_s1 + $0x310] sm:$0xff] }
  0x8d   :  { %v5932_v15 = vpop.permute.xlu1 %295  ;;  %v5934_v16 = vpop.permute.xlu0 %292 }
  0x8e   :  { %11345 = vst [vmem:[#allocation9_spill] sm:$0xff] %v5932_v15  ;;  %11346 = vst [vmem:[#allocation10_spill] sm:$0xff] %v5934_v16  ;;  %487 = vperm.xlu1 %4676, %v213_v13   ;;  %484 = vperm.xlu0 %4675, %v212_v14  }
  0x91   :  { %v5942_v19 = vpop.permute.xlu1 %301  ;;  %v5944_v20 = vpop.permute.xlu0 %298 }
  0x92   :  { %11347 = vst [vmem:[#allocation11_spill] sm:$0xff] %v5942_v19  ;;  %11348 = vst [vmem:[#allocation12_spill] sm:$0xff] %v5944_v20  ;;  %493 = vperm.xlu1 %4676, %v215_v17   ;;  %490 = vperm.xlu0 %4675, %v214_v18   ;;  %v243_v17 = vld [vmem:[%s10859_s1 + $0x328] sm:$0xff]  ;;  %v242_v18 = vld [vmem:[%s10859_s1 + $0x320] sm:$0xff] }
  0x95   :  { %v5952_v23 = vpop.permute.xlu1 %307  ;;  %v5954_v24 = vpop.permute.xlu0 %304 }
  0x96   :  { %11349 = vst [vmem:[#allocation13_spill] sm:$0xff] %v5952_v23  ;;  %11350 = vst [vmem:[#allocation14_spill] sm:$0xff] %v5954_v24  ;;  %499 = vperm.xlu1 %4676, %v217_v21   ;;  %496 = vperm.xlu0 %4675, %v216_v22  }
  0x99   :  { %v5962_v27 = vpop.permute.xlu1 %313  ;;  %v5964_v28 = vpop.permute.xlu0 %310 }
  0x9a   :  { %11351 = vst [vmem:[#allocation15_spill] sm:$0xff] %v5962_v27  ;;  %11352 = vst [vmem:[#allocation16_spill] sm:$0xff] %v5964_v28  ;;  %505 = vperm.xlu1 %4676, %v219_v25   ;;  %502 = vperm.xlu0 %4675, %v218_v26   ;;  %v245_v25 = vld [vmem:[%s10859_s1 + $0x338] sm:$0xff]  ;;  %v244_v26 = vld [vmem:[%s10859_s1 + $0x330] sm:$0xff] }
  0x9d   :  { %v5972_v31 = vpop.permute.xlu1 %319  ;;  %v5974_v32 = vpop.permute.xlu0 %316 }
  0x9e   :  { %11353 = vst [vmem:[#allocation17_spill] sm:$0xff] %v5972_v31  ;;  %11354 = vst [vmem:[#allocation18_spill] sm:$0xff] %v5974_v32  ;;  %511 = vperm.xlu1 %4676, %v221_v29   ;;  %508 = vperm.xlu0 %4675, %v220_v30  }
  0xa1   :  { %v5982_v35 = vpop.permute.xlu1 %325  ;;  %v5984_v36 = vpop.permute.xlu0 %322 }
  0xa2   :  { %11355 = vst [vmem:[#allocation19_spill] sm:$0xff] %v5982_v35  ;;  %11356 = vst [vmem:[#allocation20_spill] sm:$0xff] %v5984_v36  ;;  %517 = vperm.xlu1 %4676, %v223_v33   ;;  %514 = vperm.xlu0 %4675, %v222_v34   ;;  %v247_v33 = vld [vmem:[%s10859_s1 + $0x348] sm:$0xff]  ;;  %v246_v34 = vld [vmem:[%s10859_s1 + $0x340] sm:$0xff] }
  0xa5   :  { %v5992_v39 = vpop.permute.xlu1 %331  ;;  %v5994_v40 = vpop.permute.xlu0 %328 }
  0xa6   :  { %11357 = vst [vmem:[#allocation21_spill] sm:$0xff] %v5992_v39  ;;  %11358 = vst [vmem:[#allocation22_spill] sm:$0xff] %v5994_v40  ;;  %523 = vperm.xlu1 %4676, %v225_v37   ;;  %520 = vperm.xlu0 %4675, %v224_v38  }
  0xa9   :  { %v6002_v43 = vpop.permute.xlu1 %337  ;;  %v6004_v44 = vpop.permute.xlu0 %334 }
  0xaa   :  { %11359 = vst [vmem:[#allocation23_spill] sm:$0xff] %v6002_v43  ;;  %11360 = vst [vmem:[#allocation24_spill] sm:$0xff] %v6004_v44  ;;  %529 = vperm.xlu1 %4676, %v227_v41   ;;  %526 = vperm.xlu0 %4675, %v226_v42   ;;  %v249_v41 = vld [vmem:[%s10859_s1 + $0x358] sm:$0xff]  ;;  %v248_v42 = vld [vmem:[%s10859_s1 + $0x350] sm:$0xff] }
  0xad   :  { %v6012_v47 = vpop.permute.xlu1 %343  ;;  %v6014_v48 = vpop.permute.xlu0 %340 }
  0xae   :  { %11361 = vst [vmem:[#allocation25_spill] sm:$0xff] %v6012_v47  ;;  %11362 = vst [vmem:[#allocation26_spill] sm:$0xff] %v6014_v48  ;;  %535 = vperm.xlu1 %4676, %v229_v45   ;;  %532 = vperm.xlu0 %4675, %v228_v46  }
  0xb1   :  { %v6022_v51 = vpop.permute.xlu1 %349  ;;  %v6024_v52 = vpop.permute.xlu0 %346 }
  0xb2   :  { %11363 = vst [vmem:[#allocation27_spill] sm:$0xff] %v6022_v51  ;;  %11364 = vst [vmem:[#allocation28_spill] sm:$0xff] %v6024_v52  ;;  %541 = vperm.xlu1 %4676, %v231_v49   ;;  %538 = vperm.xlu0 %4675, %v230_v50   ;;  %v251_v49 = vld [vmem:[%s10859_s1 + $0x368] sm:$0xff]  ;;  %v250_v50 = vld [vmem:[%s10859_s1 + $0x360] sm:$0xff] }
  0xb5   :  { %v6032_v55 = vpop.permute.xlu1 %355  ;;  %v6034_v56 = vpop.permute.xlu0 %352 }
  0xb6   :  { %11365 = vst [vmem:[#allocation29_spill] sm:$0xff] %v6032_v55  ;;  %11366 = vst [vmem:[#allocation30_spill] sm:$0xff] %v6034_v56  ;;  %547 = vperm.xlu1 %4676, %v233_v53   ;;  %544 = vperm.xlu0 %4675, %v232_v54  }
  0xb9   :  { %v6042_v59 = vpop.permute.xlu1 %361  ;;  %v6044_v60 = vpop.permute.xlu0 %358 }
  0xba   :  { %11367 = vst [vmem:[#allocation31_spill] sm:$0xff] %v6042_v59  ;;  %11368 = vst [vmem:[#allocation32_spill] sm:$0xff] %v6044_v60  ;;  %553 = vperm.xlu1 %4676, %v235_v57   ;;  %550 = vperm.xlu0 %4675, %v234_v58   ;;  %v253_v57 = vld [vmem:[%s10859_s1 + $0x378] sm:$0xff]  ;;  %v252_v58 = vld [vmem:[%s10859_s1 + $0x370] sm:$0xff] }
  0xbd   :  { %v6052_v63 = vpop.permute.xlu1 %367  ;;  %v6054_v0 = vpop.permute.xlu0 %364 }
  0xbe   :  { %11369 = vst [vmem:[#allocation33_spill] sm:$0xff] %v6052_v63  ;;  %11370 = vst [vmem:[#allocation34_spill] sm:$0xff] %v6054_v0  ;;  %559 = vperm.xlu1 %4676, %v237_v61   ;;  %556 = vperm.xlu0 %4675, %v236_v62  }
  0xc1   :  { %v6062_v5 = vpop.permute.xlu1 %373  ;;  %v6064_v6 = vpop.permute.xlu0 %370 }
  0xc2   :  { %11371 = vst [vmem:[#allocation35_spill] sm:$0xff] %v6062_v5  ;;  %11372 = vst [vmem:[#allocation36_spill] sm:$0xff] %v6064_v6  ;;  %565 = vperm.xlu1 %4676, %v239_v1   ;;  %562 = vperm.xlu0 %4675, %v238_v2   ;;  %v255_v1 = vld [vmem:[%s10859_s1 + $0x388] sm:$0xff]  ;;  %v254_v2 = vld [vmem:[%s10859_s1 + $0x380] sm:$0xff] }
  0xc5   :  { %v6072_v13 = vpop.permute.xlu1 %379  ;;  %v6074_v14 = vpop.permute.xlu0 %376 }
  0xc6   :  { %11373 = vst [vmem:[#allocation37_spill] sm:$0xff] %v6072_v13  ;;  %11374 = vst [vmem:[#allocation38_spill] sm:$0xff] %v6074_v14  ;;  %571 = vperm.xlu1 %4676, %v241_v9   ;;  %568 = vperm.xlu0 %4675, %v240_v10  }
  0xc9   :  { %v6082_v21 = vpop.permute.xlu1 %385  ;;  %v6084_v22 = vpop.permute.xlu0 %382 }
  0xca   :  { %11375 = vst [vmem:[#allocation39_spill] sm:$0xff] %v6082_v21  ;;  %11376 = vst [vmem:[#allocation40_spill] sm:$0xff] %v6084_v22  ;;  %577 = vperm.xlu1 %4676, %v243_v17   ;;  %574 = vperm.xlu0 %4675, %v242_v18   ;;  %v257_v17 = vld [vmem:[%s10859_s1 + $0x398] sm:$0xff]  ;;  %v256_v18 = vld [vmem:[%s10859_s1 + $0x390] sm:$0xff] }
  0xcb   :  { %v36_v22 = vld [vmem:[%s10858_s0 + $0xb0] sm:$0xff] }
  0xcc   :  { %v852_v13 = vsel %vm785_vm0, %v36_v22, -inf  ;;  %v39_v22 = vld [vmem:[%s10858_s0 + $0xc8] sm:$0xff] }
  0xcd   :  { %v6092_v29 = vpop.permute.xlu1 %391  ;;  %v6094_v30 = vpop.permute.xlu0 %388 }
  0xce   :  { %11377 = vst [vmem:[#allocation41_spill] sm:$0xff] %v6092_v29  ;;  %11378 = vst [vmem:[#allocation42_spill] sm:$0xff] %v6094_v30  ;;  %583 = vperm.xlu1 %4676, %v245_v25   ;;  %580 = vperm.xlu0 %4675, %v244_v26   ;;  %v34_v30 = vld [vmem:[%s10858_s0 + $0xa0] sm:$0xff] }
  0xd1   :  { %v6102_v37 = vpop.permute.xlu1 %397  ;;  %v6104_v38 = vpop.permute.xlu0 %394 }
  0xd2   :  { %11379 = vst [vmem:[#allocation43_spill] sm:$0xff] %v6102_v37  ;;  %11380 = vst [vmem:[#allocation44_spill] sm:$0xff] %v6104_v38  ;;  %589 = vperm.xlu1 %4676, %v247_v33   ;;  %586 = vperm.xlu0 %4675, %v246_v34   ;;  %v259_v33 = vld [vmem:[%s10859_s1 + $0x3a8] sm:$0xff]  ;;  %v258_v34 = vld [vmem:[%s10859_s1 + $0x3a0] sm:$0xff] }
  0xd5   :  { %v6112_v45 = vpop.permute.xlu1 %403  ;;  %v6114_v46 = vpop.permute.xlu0 %400 }
  0xd6   :  { %11381 = vst [vmem:[#allocation45_spill] sm:$0xff] %v6112_v45  ;;  %11382 = vst [vmem:[#allocation46_spill] sm:$0xff] %v6114_v46  ;;  %595 = vperm.xlu1 %4676, %v249_v41   ;;  %592 = vperm.xlu0 %4675, %v248_v42   ;;  %v6385_v46 = vld [vmem:[%s10858_s0 + $0x80] sm:$0xff] }
  0xd9   :  { %v6122_v53 = vpop.permute.xlu1 %409  ;;  %v6124_v54 = vpop.permute.xlu0 %406 }
  0xda   :  { %11383 = vst [vmem:[#allocation47_spill] sm:$0xff] %v6122_v53  ;;  %11384 = vst [vmem:[#allocation48_spill] sm:$0xff] %v6124_v54  ;;  %601 = vperm.xlu1 %4676, %v251_v49   ;;  %598 = vperm.xlu0 %4675, %v250_v50   ;;  %v261_v49 = vld [vmem:[%s10859_s1 + $0x3b8] sm:$0xff]  ;;  %v260_v50 = vld [vmem:[%s10859_s1 + $0x3b0] sm:$0xff] }
  0xdb   :  { %v6367_v54 = vld [vmem:[%s10858_s0 + $0x70] sm:$0xff] }
  0xdd   :  { %v6132_v61 = vpop.permute.xlu1 %415  ;;  %v6134_v62 = vpop.permute.xlu0 %412 }
  0xde   :  { %11385 = vst [vmem:[#allocation49_spill] sm:$0xff] %v6132_v61  ;;  %11386 = vst [vmem:[#allocation50_spill] sm:$0xff] %v6134_v62  ;;  %607 = vperm.xlu1 %4676, %v253_v57   ;;  %604 = vperm.xlu0 %4675, %v252_v58  }
  0xe1   :  { %v6142_v9 = vpop.permute.xlu1 %421  ;;  %v6144_v10 = vpop.permute.xlu0 %418 }
  0xe2   :  { %11387 = vst [vmem:[#allocation51_spill] sm:$0xff] %v6142_v9  ;;  %11388 = vst [vmem:[#allocation52_spill] sm:$0xff] %v6144_v10  ;;  %613 = vperm.xlu1 %4676, %v255_v1   ;;  %610 = vperm.xlu0 %4675, %v254_v2   ;;  %v263_v1 = vld [vmem:[%s10859_s1 + $0x3c8] sm:$0xff]  ;;  %v262_v2 = vld [vmem:[%s10859_s1 + $0x3c0] sm:$0xff] }
  0xe3   :  { %v6335_v10 = vld [vmem:[%s10858_s0 + $0x50] sm:$0xff] }
  0xe5   :  { %v6152_v25 = vpop.permute.xlu1 %427  ;;  %v6154_v26 = vpop.permute.xlu0 %424 }
  0xe6   :  { %11389 = vst [vmem:[#allocation53_spill] sm:$0xff] %v6152_v25  ;;  %11390 = vst [vmem:[#allocation54_spill] sm:$0xff] %v6154_v26  ;;  %619 = vperm.xlu1 %4676, %v257_v17   ;;  %616 = vperm.xlu0 %4675, %v256_v18   ;;  %v6317_v26 = vld [vmem:[%s10858_s0 + $0x40] sm:$0xff] }
  0xe9   :  { %v6162_v41 = vpop.permute.xlu1 %433  ;;  %v6164_v42 = vpop.permute.xlu0 %430 }
  0xea   :  { %11391 = vst [vmem:[#allocation55_spill] sm:$0xff] %v6162_v41  ;;  %11392 = vst [vmem:[#allocation56_spill] sm:$0xff] %v6164_v42  ;;  %625 = vperm.xlu1 %4676, %v259_v33   ;;  %622 = vperm.xlu0 %4675, %v258_v34   ;;  %v265_v33 = vld [vmem:[%s10859_s1 + $0x3d8] sm:$0xff]  ;;  %v264_v34 = vld [vmem:[%s10859_s1 + $0x3d0] sm:$0xff] }
  0xed   :  { %v6172_v57 = vpop.permute.xlu1 %439  ;;  %v6174_v58 = vpop.permute.xlu0 %436 }
  0xee   :  { %11393 = vst [vmem:[#allocation57_spill] sm:$0xff] %v6172_v57  ;;  %11394 = vst [vmem:[#allocation58_spill] sm:$0xff] %v6174_v58  ;;  %631 = vperm.xlu1 %4676, %v261_v49   ;;  %628 = vperm.xlu0 %4675, %v260_v50  }
  0xf1   :  { %v6182_v17 = vpop.permute.xlu1 %445  ;;  %v6184_v18 = vpop.permute.xlu0 %442 }
  0xf2   :  { %11395 = vst [vmem:[#allocation59_spill] sm:$0xff] %v6182_v17  ;;  %11396 = vst [vmem:[#allocation60_spill] sm:$0xff] %v6184_v18  ;;  %637 = vperm.xlu1 %4676, %v263_v1   ;;  %634 = vperm.xlu0 %4675, %v262_v2   ;;  %v267_v17 = vld [vmem:[%s10859_s1 + $0x3e8] sm:$0xff]  ;;  %v266_v1 = vld [vmem:[%s10859_s1 + $0x3e0] sm:$0xff] }
  0xf5   :  { %v6192_v49 = vpop.permute.xlu1 %451  ;;  %v6194_v50 = vpop.permute.xlu0 %448 }
  0xf6   :  { %11397 = vst [vmem:[#allocation61_spill] sm:$0xff] %v6192_v49  ;;  %11398 = vst [vmem:[#allocation62_spill] sm:$0xff] %v6194_v50  ;;  %643 = vperm.xlu1 %4676, %v265_v33   ;;  %640 = vperm.xlu0 %4675, %v264_v34   ;;  %v269_v49 = vld [vmem:[%s10859_s1 + $0x3f8] sm:$0xff]  ;;  %v268_v33 = vld [vmem:[%s10859_s1 + $0x3f0] sm:$0xff] }
  0xf9   :  { %v6202_v2 = vpop.permute.xlu1 %457  ;;  %v6204_v18 = vpop.permute.xlu0 %454 }
  0xfa   :  { %11399 = vst [vmem:[#allocation63_spill] sm:$0xff] %v6202_v2  ;;  %11400 = vst [vmem:[#allocation64_spill] sm:$0xff] %v6204_v18  ;;  %649 = vperm.xlu1 %4676, %v267_v17   ;;  %646 = vperm.xlu0 %4675, %v266_v1  }
  0xfd   :  { %v6212_v34 = vpop.permute.xlu1 %463  ;;  %v6214_v50 = vpop.permute.xlu0 %460 }
  0xfe   :  { %11401 = vst [vmem:[#allocation65_spill] sm:$0xff] %v6212_v34  ;;  %11402 = vst [vmem:[#allocation66_spill] sm:$0xff] %v6214_v50  ;;  %655 = vperm.xlu1 %4676, %v269_v49   ;;  %652 = vperm.xlu0 %4675, %v268_v33  }
 0x101   :  { %v6216_v57 = vpop.permute.xlu1 %469  ;;  %v6218_v2 = vpop.permute.xlu0 %466 }
 0x102   :  { %11403 = vst [vmem:[#allocation67_spill] sm:$0xff] %v6216_v57  ;;  %11404 = vst [vmem:[#allocation68_spill] sm:$0xff] %v6218_v2 }
 0x105   :  { %v6220_v17 = vpop.permute.xlu1 %475  ;;  %v6222_v1 = vpop.permute.xlu0 %472 }
 0x106   :  { %11405 = vst [vmem:[#allocation69_spill] sm:$0xff] %v6220_v17  ;;  %11406 = vst [vmem:[#allocation70_spill] sm:$0xff] %v6222_v1 }
 0x109   :  { %v6224_v18 = vpop.permute.xlu1 %481  ;;  %v6226_v58 = vpop.permute.xlu0 %478 }
 0x10a   :  { %11407 = vst [vmem:[#allocation71_spill] sm:$0xff] %v6224_v18  ;;  %11408 = vst [vmem:[#allocation72_spill] sm:$0xff] %v6226_v58  ;;  %v6247_v18 = vld [vmem:[%s10858_s0] sm:$0xff] }
 0x10b   :  { %v6283_v58 = vld [vmem:[%s10858_s0 + $0x20] sm:$0xff] }
 0x10d   :  { %v6228_v41 = vpop.permute.xlu1 %487  ;;  %v6230_v42 = vpop.permute.xlu0 %484 }
 0x10e   :  { %11409 = vst [vmem:[#allocation73_spill] sm:$0xff] %v6228_v41  ;;  %11410 = vst [vmem:[#allocation74_spill] sm:$0xff] %v6230_v42  ;;  %v786_v41 = vsel %vm785_vm0, %v6247_v18, -inf }
 0x111   :  { %v6232_v34 = vpop.permute.xlu1 %493  ;;  %v6234_v49 = vpop.permute.xlu0 %490 }
 0x112   :  { %11411 = vst [vmem:[#allocation75_spill] sm:$0xff] %v6232_v34  ;;  %11412 = vst [vmem:[#allocation76_spill] sm:$0xff] %v6234_v49 }
 0x115   :  { %v6236_v33 = vpop.permute.xlu1 %499  ;;  %v6238_v57 = vpop.permute.xlu0 %496 }
 0x116   :  { %11413 = vst [vmem:[#allocation77_spill] sm:$0xff] %v6236_v33  ;;  %11414 = vst [vmem:[#allocation78_spill] sm:$0xff] %v6238_v57  ;;  %v6265_v33 = vld [vmem:[%s10858_s0 + $0x8] sm:$0xff] }
 0x117   :  { %v789_v57 = vsel %vm785_vm0, %v6265_v33, -inf }
 0x119   :  { %v6240_v2 = vpop.permute.xlu1 %505  ;;  %v6242_v17 = vpop.permute.xlu0 %502 }
 0x11a   :  { %11415 = vst [vmem:[#allocation79_spill] sm:$0xff] %v6240_v2  ;;  %11416 = vst [vmem:[#allocation80_spill] sm:$0xff] %v6242_v17  ;;  %v6258_v2 = vld [vmem:[%s10858_s0 + $0x10] sm:$0xff] }
 0x11b   :  { %v792_v17 = vsel %vm785_vm0, %v6258_v2, -inf }
 0x11d   :  { %v6251_v34 = vpop.permute.xlu1 %511  ;;  %v6253_v49 = vpop.permute.xlu0 %508  ;;  %787 = vmax.xlane.f32.xlu0 %v786_v41  ;;  %v6276_v41 = vld [vmem:[%s10858_s0 + $0x18] sm:$0xff] }
 0x11e   :  { %11417 = vst [vmem:[#allocation81_spill] sm:$0xff] %v6251_v34  ;;  %11418 = vst [vmem:[#allocation82_spill] sm:$0xff] %v6253_v49  ;;  %v795_v42 = vsel %vm785_vm0, %v6276_v41, -inf }
 0x121   :  { %v6269_v34 = vpop.permute.xlu1 %517  ;;  %v6271_v49 = vpop.permute.xlu0 %514  ;;  %793 = vmax.xlane.f32.xlu0 %v792_v17  ;;  %v6292_v17 = vld [vmem:[%s10858_s0 + $0x28] sm:$0xff] }
 0x122   :  { %11419 = vst [vmem:[#allocation83_spill] sm:$0xff] %v6269_v34  ;;  %11420 = vst [vmem:[#allocation84_spill] sm:$0xff] %v6271_v49  ;;  %790 = vmax.xlane.f32.xlu1 %v789_v57  ;;  %v798_v34 = vsel %vm785_vm0, %v6283_v58, -inf  ;;  %v801_v57 = vsel %vm785_vm0, %v6292_v17, -inf  ;;  %v6299_v49 = vld [vmem:[%s10858_s0 + $0x30] sm:$0xff] }
 0x125   :  { %v6287_v1 = vpop.permute.xlu0 %520  ;;  %796 = vmax.xlane.f32.xlu0 %v795_v42  ;;  %v6301_v50 = vpop.permute.xlu1 %523 }
 0x126   :  { %11421 = vst [vmem:[#allocation85_spill] sm:$0xff] %v6287_v1  ;;  %799 = vmax.xlane.f32.xlu1 %v798_v34  ;;  %11422 = vst [vmem:[#allocation86_spill] sm:$0xff] %v6301_v50  ;;  %v804_v1 = vsel %vm785_vm0, %v6299_v49, -inf  ;;  %v6310_v34 = vld [vmem:[%s10858_s0 + $0x38] sm:$0xff]  ;;  %v810_v50 = vsel %vm785_vm0, %v6317_v26, -inf }
 0x127   :  { %v807_v25 = vsel %vm785_vm0, %v6310_v34, -inf }
 0x129   :  { %v6305_v42 = vpop.permute.xlu0 %526  ;;  %802 = vmax.xlane.f32.xlu0 %v801_v57  ;;  %v6321_v9 = vpop.permute.xlu1 %529  ;;  %v6326_v57 = vld [vmem:[%s10858_s0 + $0x48] sm:$0xff] }
 0x12a   :  { %11423 = vst [vmem:[#allocation87_spill] sm:$0xff] %v6305_v42  ;;  %805 = vmax.xlane.f32.xlu1 %v804_v1  ;;  %11424 = vst [vmem:[#allocation88_spill] sm:$0xff] %v6321_v9  ;;  %v813_v42 = vsel %vm785_vm0, %v6326_v57, -inf  ;;  %v816_v9 = vsel %vm785_vm0, %v6335_v10, -inf }
 0x12d   :  { %808 = vmax.xlane.f32.xlu0 %v807_v25  ;;  %v6328_v1 = vpop.permute.xlu0 %532  ;;  %v6342_v25 = vld [vmem:[%s10858_s0 + $0x58] sm:$0xff]  ;;  %v6351_v61 = vpop.permute.xlu1 %535 }
 0x12e   :  { %11425 = vst [vmem:[#allocation89_spill] sm:$0xff] %v6328_v1  ;;  %811 = vmax.xlane.f32.xlu1 %v810_v50  ;;  %v819_v50 = vsel %vm785_vm0, %v6342_v25, -inf  ;;  %v6349_v1 = vld [vmem:[%s10858_s0 + $0x60] sm:$0xff]  ;;  %11426 = vst [vmem:[#allocation90_spill] sm:$0xff] %v6351_v61  ;;  %v828_v61 = vsel %vm785_vm0, %v6367_v54, -inf }
 0x12f   :  { %v822_v62 = vsel %vm785_vm0, %v6349_v1, -inf }
 0x131   :  { %814 = vmax.xlane.f32.xlu0 %v813_v42  ;;  %v6355_v42 = vpop.permute.xlu0 %538  ;;  %v6371_v45 = vpop.permute.xlu1 %541 }
 0x132   :  { %817 = vmax.xlane.f32.xlu1 %v816_v9  ;;  %11427 = vst [vmem:[#allocation91_spill] sm:$0xff] %v6355_v42  ;;  %v6360_v9 = vld [vmem:[%s10858_s0 + $0x68] sm:$0xff]  ;;  %11428 = vst [vmem:[#allocation92_spill] sm:$0xff] %v6371_v45  ;;  %v834_v45 = vsel %vm785_vm0, %v6385_v46, -inf }
 0x133   :  { %v825_v53 = vsel %vm785_vm0, %v6360_v9, -inf }
 0x135   :  { %820 = vmax.xlane.f32.xlu0 %v819_v50  ;;  %v6376_v50 = vld [vmem:[%s10858_s0 + $0x78] sm:$0xff]  ;;  %v6401_v37 = vpop.permute.xlu1 %547 }
 0x136   :  { %823 = vmax.xlane.f32.xlu1 %v822_v62  ;;  %v6378_v62 = vpop.permute.xlu0 %544  ;;  %v831_v42 = vsel %vm785_vm0, %v6376_v50, -inf  ;;  %11430 = vst [vmem:[#allocation94_spill] sm:$0xff] %v6401_v37  ;;  %v846_v37 = vsel %vm785_vm0, %v34_v30, -inf }
 0x137   :  { %11429 = vst [vmem:[#allocation93_spill] sm:$0xff] %v6378_v62  ;;  %v6399_v62 = vld [vmem:[%s10858_s0 + $0x90] sm:$0xff] }
 0x138   :  { %v840_v38 = vsel %vm785_vm0, %v6399_v62, -inf }
 0x139   :  { %826 = vmax.xlane.f32.xlu0 %v825_v53  ;;  %v6392_v53 = vld [vmem:[%s10858_s0 + $0x88] sm:$0xff]  ;;  %v6418_v21 = vpop.permute.xlu1 %553 }
 0x13a   :  { %829 = vmax.xlane.f32.xlu1 %v828_v61  ;;  %v837_v61 = vsel %vm785_vm0, %v6392_v53, -inf  ;;  %11432 = vst [vmem:[#allocation96_spill] sm:$0xff] %v6418_v21 }
 0x13d   :  { %832 = vmax.xlane.f32.xlu0 %v831_v42  ;;  %v6405_v42 = vpop.permute.xlu0 %550 }
 0x13e   :  { %835 = vmax.xlane.f32.xlu1 %v834_v45  ;;  %11431 = vst [vmem:[#allocation95_spill] sm:$0xff] %v6405_v42  ;;  %v6410_v45 = vld [vmem:[%s10858_s0 + $0x98] sm:$0xff] }
 0x13f   :  { %v843_v29 = vsel %vm785_vm0, %v6410_v45, -inf }
 0x141   :  { %838 = vmax.xlane.f32.xlu0 %v837_v61  ;;  %v35_v61 = vld [vmem:[%s10858_s0 + $0xa8] sm:$0xff]  ;;  %v6423_v42 = vpop.permute.xlu0 %556 }
 0x142   :  { %841 = vmax.xlane.f32.xlu1 %v840_v38  ;;  %11433 = vst [vmem:[#allocation97_spill] sm:$0xff] %v6423_v42  ;;  %v849_v38 = vsel %vm785_vm0, %v35_v61, -inf  ;;  %v6437_v42 = vpop.permute.xlu1 %559 }
 0x143   :  { %11434 = vst [vmem:[#allocation98_spill] sm:$0xff] %v6437_v42 }
 0x145   :  { %844 = vmax.xlane.f32.xlu0 %v843_v29  ;;  %v37_v29 = vld [vmem:[%s10858_s0 + $0xb8] sm:$0xff]  ;;  %v6440_v21 = vpop.permute.xlu0 %562 }
 0x146   :  { %847 = vmax.xlane.f32.xlu1 %v846_v37  ;;  %v855_v30 = vsel %vm785_vm0, %v37_v29, -inf  ;;  %v38_v37 = vld [vmem:[%s10858_s0 + $0xc0] sm:$0xff]  ;;  %11435 = vst [vmem:[#allocation99_spill] sm:$0xff] %v6440_v21  ;;  %v6450_v14 = vpop.permute.xlu1 %565 }
 0x147   :  { %v858_v61 = vsel %vm785_vm0, %v38_v37, -inf  ;;  %11436 = vst [vmem:[#allocation100_spill] sm:$0xff] %v6450_v14 }
 0x149   :  { %850 = vmax.xlane.f32.xlu0 %v849_v38  ;;  %v40_v38 = vld [vmem:[%s10858_s0 + $0xd0] sm:$0xff]  ;;  %v6455_v37 = vpop.permute.xlu0 %568 }
 0x14a   :  { %853 = vmax.xlane.f32.xlu1 %v852_v13  ;;  %v861_v13 = vsel %vm785_vm0, %v39_v22, -inf  ;;  %v864_v29 = vsel %vm785_vm0, %v40_v38, -inf  ;;  %11437 = vst [vmem:[#allocation101_spill] sm:$0xff] %v6455_v37  ;;  %v42_v22 = vld [vmem:[%s10858_s0 + $0xe0] sm:$0xff]  ;;  %v6469_v37 = vpop.permute.xlu1 %571 }
 0x14b   :  { %v870_v21 = vsel %vm785_vm0, %v42_v22, -inf  ;;  %11438 = vst [vmem:[#allocation102_spill] sm:$0xff] %v6469_v37  ;;  %v46_v22 = vld [vmem:[%s10858_s0 + $0x100] sm:$0xff] }
 0x14d   :  { %856 = vmax.xlane.f32.xlu0 %v855_v30  ;;  %v41_v30 = vld [vmem:[%s10858_s0 + $0xd8] sm:$0xff]  ;;  %v6472_v14 = vpop.permute.xlu0 %574 }
 0x14e   :  { %859 = vmax.xlane.f32.xlu1 %v858_v61  ;;  %v867_v61 = vsel %vm785_vm0, %v41_v30, -inf  ;;  %11439 = vst [vmem:[#allocation103_spill] sm:$0xff] %v6472_v14  ;;  %v6482_v42 = vpop.permute.xlu1 %577 }
 0x14f   :  { %11440 = vst [vmem:[#allocation104_spill] sm:$0xff] %v6482_v42 }
 0x151   :  { %862 = vmax.xlane.f32.xlu0 %v861_v13  ;;  %v43_v13 = vld [vmem:[%s10858_s0 + $0xe8] sm:$0xff] }
 0x152   :  { %865 = vmax.xlane.f32.xlu1 %v864_v29  ;;  %v873_v38 = vsel %vm785_vm0, %v43_v13, -inf  ;;  %v44_v29 = vld [vmem:[%s10858_s0 + $0xf0] sm:$0xff]  ;;  %v882_v13 = vsel %vm785_vm0, %v46_v22, -inf }
 0x153   :  { %v876_v30 = vsel %vm785_vm0, %v44_v29, -inf  ;;  %v6487_v29 = vpop.permute.xlu0 %580 }
 0x154   :  { %11441 = vst [vmem:[#allocation105_spill] sm:$0xff] %v6487_v29  ;;  %v6501_v29 = vpop.permute.xlu1 %583 }
 0x155   :  { %868 = vmax.xlane.f32.xlu0 %v867_v61  ;;  %v45_v61 = vld [vmem:[%s10858_s0 + $0xf8] sm:$0xff]  ;;  %11442 = vst [vmem:[#allocation106_spill] sm:$0xff] %v6501_v29 }
 0x156   :  { %871 = vmax.xlane.f32.xlu1 %v870_v21  ;;  %v879_v21 = vsel %vm785_vm0, %v45_v61, -inf  ;;  %v48_v61 = vld [vmem:[%s10858_s0 + $0x110] sm:$0xff] }
 0x157   :  { %v888_v14 = vsel %vm785_vm0, %v48_v61, -inf  ;;  %v6504_v42 = vpop.permute.xlu0 %586  ;;  %v52_v61 = vld [vmem:[%s10858_s0 + $0x130] sm:$0xff] }
 0x158   :  { %11443 = vst [vmem:[#allocation107_spill] sm:$0xff] %v6504_v42  ;;  %v6514_v37 = vpop.permute.xlu1 %589 }
 0x159   :  { %874 = vmax.xlane.f32.xlu0 %v873_v38  ;;  %v47_v38 = vld [vmem:[%s10858_s0 + $0x108] sm:$0xff]  ;;  %11444 = vst [vmem:[#allocation108_spill] sm:$0xff] %v6514_v37 }
 0x15a   :  { %877 = vmax.xlane.f32.xlu1 %v876_v30  ;;  %v885_v30 = vsel %vm785_vm0, %v47_v38, -inf }
 0x15d   :  { %880 = vmax.xlane.f32.xlu0 %v879_v21  ;;  %v49_v21 = vld [vmem:[%s10858_s0 + $0x118] sm:$0xff] }
 0x15e   :  { %883 = vmax.xlane.f32.xlu1 %v882_v13  ;;  %v891_v22 = vsel %vm785_vm0, %v49_v21, -inf  ;;  %v50_v13 = vld [vmem:[%s10858_s0 + $0x120] sm:$0xff]  ;;  %v900_v21 = vsel %vm785_vm0, %v52_v61, -inf }
 0x15f   :  { %v894_v38 = vsel %vm785_vm0, %v50_v13, -inf  ;;  %v6519_v13 = vpop.permute.xlu0 %592 }
 0x160   :  { %11445 = vst [vmem:[#allocation109_spill] sm:$0xff] %v6519_v13  ;;  %v6533_v13 = vpop.permute.xlu1 %595 }
 0x161   :  { %886 = vmax.xlane.f32.xlu0 %v885_v30  ;;  %v51_v30 = vld [vmem:[%s10858_s0 + $0x128] sm:$0xff]  ;;  %11446 = vst [vmem:[#allocation110_spill] sm:$0xff] %v6533_v13 }
 0x162   :  { %889 = vmax.xlane.f32.xlu1 %v888_v14  ;;  %v897_v14 = vsel %vm785_vm0, %v51_v30, -inf  ;;  %v54_v30 = vld [vmem:[%s10858_s0 + $0x140] sm:$0xff] }
 0x163   :  { %v906_v42 = vsel %vm785_vm0, %v54_v30, -inf  ;;  %v6536_v37 = vpop.permute.xlu0 %598  ;;  %v58_v30 = vld [vmem:[%s10858_s0 + $0x160] sm:$0xff] }
 0x164   :  { %11447 = vst [vmem:[#allocation111_spill] sm:$0xff] %v6536_v37  ;;  %v6546_v29 = vpop.permute.xlu1 %601 }
 0x165   :  { %892 = vmax.xlane.f32.xlu0 %v891_v22  ;;  %v53_v22 = vld [vmem:[%s10858_s0 + $0x138] sm:$0xff]  ;;  %11448 = vst [vmem:[#allocation112_spill] sm:$0xff] %v6546_v29 }
 0x166   :  { %895 = vmax.xlane.f32.xlu1 %v894_v38  ;;  %v903_v38 = vsel %vm785_vm0, %v53_v22, -inf }
 0x169   :  { %898 = vmax.xlane.f32.xlu0 %v897_v14  ;;  %v55_v14 = vld [vmem:[%s10858_s0 + $0x148] sm:$0xff] }
 0x16a   :  { %901 = vmax.xlane.f32.xlu1 %v900_v21  ;;  %v909_v61 = vsel %vm785_vm0, %v55_v14, -inf  ;;  %v56_v21 = vld [vmem:[%s10858_s0 + $0x150] sm:$0xff]  ;;  %v918_v14 = vsel %vm785_vm0, %v58_v30, -inf }
 0x16b   :  { %v912_v22 = vsel %vm785_vm0, %v56_v21, -inf  ;;  %v6551_v21 = vpop.permute.xlu0 %604 }
 0x16c   :  { %11449 = vst [vmem:[#allocation113_spill] sm:$0xff] %v6551_v21  ;;  %v6565_v21 = vpop.permute.xlu1 %607 }
 0x16d   :  { %904 = vmax.xlane.f32.xlu0 %v903_v38  ;;  %v57_v38 = vld [vmem:[%s10858_s0 + $0x158] sm:$0xff]  ;;  %11450 = vst [vmem:[#allocation114_spill] sm:$0xff] %v6565_v21 }
 0x16e   :  { %907 = vmax.xlane.f32.xlu1 %v906_v42  ;;  %v915_v42 = vsel %vm785_vm0, %v57_v38, -inf  ;;  %v60_v38 = vld [vmem:[%s10858_s0 + $0x170] sm:$0xff] }
 0x16f   :  { %v924_v37 = vsel %vm785_vm0, %v60_v38, -inf  ;;  %v6568_v29 = vpop.permute.xlu0 %610  ;;  %v64_v38 = vld [vmem:[%s10858_s0 + $0x190] sm:$0xff] }
 0x170   :  { %11451 = vst [vmem:[#allocation115_spill] sm:$0xff] %v6568_v29  ;;  %v6578_v13 = vpop.permute.xlu1 %613 }
 0x171   :  { %910 = vmax.xlane.f32.xlu0 %v909_v61  ;;  %v59_v61 = vld [vmem:[%s10858_s0 + $0x168] sm:$0xff]  ;;  %11452 = vst [vmem:[#allocation116_spill] sm:$0xff] %v6578_v13 }
 0x172   :  { %913 = vmax.xlane.f32.xlu1 %v912_v22  ;;  %v921_v22 = vsel %vm785_vm0, %v59_v61, -inf }
 0x175   :  { %916 = vmax.xlane.f32.xlu0 %v915_v42  ;;  %v61_v42 = vld [vmem:[%s10858_s0 + $0x178] sm:$0xff] }
 0x176   :  { %919 = vmax.xlane.f32.xlu1 %v918_v14  ;;  %v927_v30 = vsel %vm785_vm0, %v61_v42, -inf  ;;  %v62_v14 = vld [vmem:[%s10858_s0 + $0x180] sm:$0xff]  ;;  %v936_v42 = vsel %vm785_vm0, %v64_v38, -inf }
 0x177   :  { %v930_v61 = vsel %vm785_vm0, %v62_v14, -inf  ;;  %v6583_v14 = vpop.permute.xlu0 %616 }
 0x178   :  { %11453 = vst [vmem:[#allocation117_spill] sm:$0xff] %v6583_v14  ;;  %v6597_v14 = vpop.permute.xlu1 %619 }
 0x179   :  { %922 = vmax.xlane.f32.xlu0 %v921_v22  ;;  %v63_v22 = vld [vmem:[%s10858_s0 + $0x188] sm:$0xff]  ;;  %11454 = vst [vmem:[#allocation118_spill] sm:$0xff] %v6597_v14 }
 0x17a   :  { %925 = vmax.xlane.f32.xlu1 %v924_v37  ;;  %v933_v37 = vsel %vm785_vm0, %v63_v22, -inf  ;;  %v66_v22 = vld [vmem:[%s10858_s0 + $0x1a0] sm:$0xff] }
 0x17b   :  { %v942_v29 = vsel %vm785_vm0, %v66_v22, -inf  ;;  %v6600_v13 = vpop.permute.xlu0 %622  ;;  %v70_v22 = vld [vmem:[%s10858_s0 + $0x1c0] sm:$0xff] }
 0x17c   :  { %11455 = vst [vmem:[#allocation119_spill] sm:$0xff] %v6600_v13  ;;  %v6610_v21 = vpop.permute.xlu1 %625 }
 0x17d   :  { %928 = vmax.xlane.f32.xlu0 %v927_v30  ;;  %v65_v30 = vld [vmem:[%s10858_s0 + $0x198] sm:$0xff]  ;;  %11456 = vst [vmem:[#allocation120_spill] sm:$0xff] %v6610_v21 }
 0x17e   :  { %931 = vmax.xlane.f32.xlu1 %v930_v61  ;;  %v939_v61 = vsel %vm785_vm0, %v65_v30, -inf }
 0x181   :  { %934 = vmax.xlane.f32.xlu0 %v933_v37  ;;  %v67_v37 = vld [vmem:[%s10858_s0 + $0x1a8] sm:$0xff] }
 0x182   :  { %937 = vmax.xlane.f32.xlu1 %v936_v42  ;;  %v945_v38 = vsel %vm785_vm0, %v67_v37, -inf  ;;  %v68_v42 = vld [vmem:[%s10858_s0 + $0x1b0] sm:$0xff]  ;;  %v954_v37 = vsel %vm785_vm0, %v70_v22, -inf }
 0x183   :  { %v948_v30 = vsel %vm785_vm0, %v68_v42, -inf  ;;  %v6615_v42 = vpop.permute.xlu0 %628 }
 0x184   :  { %11457 = vst [vmem:[#allocation121_spill] sm:$0xff] %v6615_v42  ;;  %v6629_v42 = vpop.permute.xlu1 %631 }
 0x185   :  { %940 = vmax.xlane.f32.xlu0 %v939_v61  ;;  %v69_v61 = vld [vmem:[%s10858_s0 + $0x1b8] sm:$0xff]  ;;  %11458 = vst [vmem:[#allocation122_spill] sm:$0xff] %v6629_v42 }
 0x186   :  { %943 = vmax.xlane.f32.xlu1 %v942_v29  ;;  %v951_v29 = vsel %vm785_vm0, %v69_v61, -inf  ;;  %v72_v61 = vld [vmem:[%s10858_s0 + $0x1d0] sm:$0xff] }
 0x187   :  { %v960_v13 = vsel %vm785_vm0, %v72_v61, -inf  ;;  %v6632_v21 = vpop.permute.xlu0 %634  ;;  %v76_v61 = vld [vmem:[%s10858_s0 + $0x1f0] sm:$0xff] }
 0x188   :  { %11459 = vst [vmem:[#allocation123_spill] sm:$0xff] %v6632_v21  ;;  %v6642_v14 = vpop.permute.xlu1 %637 }
 0x189   :  { %946 = vmax.xlane.f32.xlu0 %v945_v38  ;;  %v71_v38 = vld [vmem:[%s10858_s0 + $0x1c8] sm:$0xff]  ;;  %11460 = vst [vmem:[#allocation124_spill] sm:$0xff] %v6642_v14 }
 0x18a   :  { %949 = vmax.xlane.f32.xlu1 %v948_v30  ;;  %v957_v30 = vsel %vm785_vm0, %v71_v38, -inf }
 0x18d   :  { %952 = vmax.xlane.f32.xlu0 %v951_v29  ;;  %v73_v29 = vld [vmem:[%s10858_s0 + $0x1d8] sm:$0xff] }
 0x18e   :  { %955 = vmax.xlane.f32.xlu1 %v954_v37  ;;  %v963_v22 = vsel %vm785_vm0, %v73_v29, -inf  ;;  %v74_v37 = vld [vmem:[%s10858_s0 + $0x1e0] sm:$0xff]  ;;  %v972_v29 = vsel %vm785_vm0, %v76_v61, -inf }
 0x18f   :  { %v966_v38 = vsel %vm785_vm0, %v74_v37, -inf  ;;  %v6647_v37 = vpop.permute.xlu0 %640 }
 0x190   :  { %11461 = vst [vmem:[#allocation125_spill] sm:$0xff] %v6647_v37  ;;  %v6661_v37 = vpop.permute.xlu1 %643 }
 0x191   :  { %958 = vmax.xlane.f32.xlu0 %v957_v30  ;;  %v75_v30 = vld [vmem:[%s10858_s0 + $0x1e8] sm:$0xff]  ;;  %11462 = vst [vmem:[#allocation126_spill] sm:$0xff] %v6661_v37 }
 0x192   :  { %961 = vmax.xlane.f32.xlu1 %v960_v13  ;;  %v969_v13 = vsel %vm785_vm0, %v75_v30, -inf  ;;  %v78_v30 = vld [vmem:[%s10858_s0 + $0x200] sm:$0xff] }
 0x193   :  { %v978_v21 = vsel %vm785_vm0, %v78_v30, -inf  ;;  %v6664_v14 = vpop.permute.xlu0 %646  ;;  %v82_v30 = vld [vmem:[%s10858_s0 + $0x220] sm:$0xff] }
 0x194   :  { %11463 = vst [vmem:[#allocation127_spill] sm:$0xff] %v6664_v14  ;;  %v6674_v42 = vpop.permute.xlu1 %649 }
 0x195   :  { %964 = vmax.xlane.f32.xlu0 %v963_v22  ;;  %v77_v22 = vld [vmem:[%s10858_s0 + $0x1f8] sm:$0xff]  ;;  %11464 = vst [vmem:[#allocation128_spill] sm:$0xff] %v6674_v42 }
 0x196   :  { %967 = vmax.xlane.f32.xlu1 %v966_v38  ;;  %v975_v38 = vsel %vm785_vm0, %v77_v22, -inf }
 0x199   :  { %970 = vmax.xlane.f32.xlu0 %v969_v13  ;;  %v79_v13 = vld [vmem:[%s10858_s0 + $0x208] sm:$0xff] }
 0x19a   :  { %973 = vmax.xlane.f32.xlu1 %v972_v29  ;;  %v981_v61 = vsel %vm785_vm0, %v79_v13, -inf  ;;  %v80_v29 = vld [vmem:[%s10858_s0 + $0x210] sm:$0xff]  ;;  %v990_v13 = vsel %vm785_vm0, %v82_v30, -inf }
 0x19b   :  { %v984_v22 = vsel %vm785_vm0, %v80_v29, -inf  ;;  %v6679_v29 = vpop.permute.xlu0 %652 }
 0x19c   :  { %11465 = vst [vmem:[#allocation129_spill] sm:$0xff] %v6679_v29 }
 0x19d   :  { %976 = vmax.xlane.f32.xlu0 %v975_v38  ;;  %v81_v38 = vld [vmem:[%s10858_s0 + $0x218] sm:$0xff] }
 0x19e   :  { %979 = vmax.xlane.f32.xlu1 %v978_v21  ;;  %v987_v21 = vsel %vm785_vm0, %v81_v38, -inf  ;;  %v84_v38 = vld [vmem:[%s10858_s0 + $0x230] sm:$0xff] }
 0x19f   :  { %v996_v14 = vsel %vm785_vm0, %v84_v38, -inf }
 0x1a1   :  { %982 = vmax.xlane.f32.xlu0 %v981_v61  ;;  %v83_v61 = vld [vmem:[%s10858_s0 + $0x228] sm:$0xff] }
 0x1a2   :  { %985 = vmax.xlane.f32.xlu1 %v984_v22  ;;  %v993_v22 = vsel %vm785_vm0, %v83_v61, -inf  ;;  %v6695_v61 = vpop.permute.xlu1 %655 }
 0x1a3   :  { %11467 = vst [vmem:[#allocation131_spill] sm:$0xff] %v6695_v61 }
 0x1a5   :  { %988 = vmax.xlane.f32.xlu0 %v987_v21  ;;  %v85_v21 = vld [vmem:[%s10858_s0 + $0x238] sm:$0xff] }
 0x1a6   :  { %991 = vmax.xlane.f32.xlu1 %v990_v13  ;;  %v999_v42 = vsel %vm785_vm0, %v85_v21, -inf  ;;  %v86_v13 = vld [vmem:[%s10858_s0 + $0x240] sm:$0xff]  ;;  %v88_v21 = vld [vmem:[%s10858_s0 + $0x250] sm:$0xff] }
 0x1a7   :  { %v1002_v29 = vsel %vm785_vm0, %v86_v13, -inf  ;;  %v1008_v61 = vsel %vm785_vm0, %v88_v21, -inf }
 0x1a9   :  { %994 = vmax.xlane.f32.xlu0 %v993_v22  ;;  %v87_v22 = vld [vmem:[%s10858_s0 + $0x248] sm:$0xff] }
 0x1aa   :  { %997 = vmax.xlane.f32.xlu1 %v996_v14  ;;  %v6689_v30 = vpop.xlane.xlu0 %787  ;;  %v1005_v14 = vsel %vm785_vm0, %v87_v22, -inf  ;;  %v90_v22 = vld [vmem:[%s10858_s0 + $0x260] sm:$0xff] }
 0x1ab   :  { %11466 = vst [vmem:[#allocation130_spill] sm:$0xff] %v6689_v30  ;;  %v1014_v6 = vsel %vm785_vm0, %v90_v22, -inf }
 0x1ad   :  { %1000 = vmax.xlane.f32.xlu0 %v999_v42  ;;  %v89_v42 = vld [vmem:[%s10858_s0 + $0x258] sm:$0xff] }
 0x1ae   :  { %1003 = vmax.xlane.f32.xlu1 %v1002_v29  ;;  %v6701_v38 = vpop.xlane.xlu0 %793  ;;  %v1011_v29 = vsel %vm785_vm0, %v89_v42, -inf  ;;  %v92_v42 = vld [vmem:[%s10858_s0 + $0x270] sm:$0xff] }
 0x1af   :  { %11468 = vst [vmem:[#allocation132_spill] sm:$0xff] %v6701_v38  ;;  %v6707_v37 = vpop.xlane.xlu1 %790  ;;  %v1020_v0 = vsel %vm785_vm0, %v92_v42, -inf }
 0x1b0   :  { %11469 = vst [vmem:[#allocation133_spill] sm:$0xff] %v6707_v37 }
 0x1b1   :  { %1006 = vmax.xlane.f32.xlu0 %v1005_v14  ;;  %v91_v14 = vld [vmem:[%s10858_s0 + $0x268] sm:$0xff] }
 0x1b2   :  { %1009 = vmax.xlane.f32.xlu1 %v1008_v61  ;;  %v6713_v13 = vpop.xlane.xlu0 %796  ;;  %v1017_v61 = vsel %vm785_vm0, %v91_v14, -inf  ;;  %v94_v14 = vld [vmem:[%s10858_s0 + $0x280] sm:$0xff] }
 0x1b3   :  { %v6719_v5 = vpop.xlane.xlu1 %799  ;;  %v1026_v60 = vsel %vm785_vm0, %v94_v14, -inf }
 0x1b4   :  { %11470 = vst [vmem:[#allocation134_spill] sm:$0xff] %v6719_v5 }
 0x1b5   :  { %1012 = vmax.xlane.f32.xlu0 %v1011_v29  ;;  %v93_v29 = vld [vmem:[%s10858_s0 + $0x278] sm:$0xff] }
 0x1b6   :  { %1015 = vmax.xlane.f32.xlu1 %v1014_v6  ;;  %v6725_v21 = vpop.xlane.xlu0 %802  ;;  %v1023_v6 = vsel %vm785_vm0, %v93_v29, -inf  ;;  %v96_v29 = vld [vmem:[%s10858_s0 + $0x290] sm:$0xff] }
 0x1b7   :  { %11471 = vst [vmem:[#allocation135_spill] sm:$0xff] %v6725_v21  ;;  %v6731_v63 = vpop.xlane.xlu1 %805  ;;  %v1032_v56 = vsel %vm785_vm0, %v96_v29, -inf }
 0x1b8   :  { %11472 = vst [vmem:[#allocation136_spill] sm:$0xff] %v6731_v63 }
 0x1b9   :  { %1018 = vmax.xlane.f32.xlu0 %v1017_v61  ;;  %v95_v61 = vld [vmem:[%s10858_s0 + $0x288] sm:$0xff] }
 0x1ba   :  { %1021 = vmax.xlane.f32.xlu1 %v1020_v0  ;;  %v6737_v22 = vpop.xlane.xlu0 %808  ;;  %v1029_v0 = vsel %vm785_vm0, %v95_v61, -inf  ;;  %v98_v61 = vld [vmem:[%s10858_s0 + $0x2a0] sm:$0xff] }
 0x1bb   :  { %11473 = vst [vmem:[#allocation137_spill] sm:$0xff] %v6737_v22  ;;  %v6743_v59 = vpop.xlane.xlu1 %811  ;;  %v1038_v52 = vsel %vm785_vm0, %v98_v61, -inf }
 0x1bc   :  { %11474 = vst [vmem:[#allocation138_spill] sm:$0xff] %v6743_v59 }
 0x1bd   :  { %1024 = vmax.xlane.f32.xlu0 %v1023_v6  ;;  %v97_v6 = vld [vmem:[%s10858_s0 + $0x298] sm:$0xff] }
 0x1be   :  { %1027 = vmax.xlane.f32.xlu1 %v1026_v60  ;;  %v6749_v42 = vpop.xlane.xlu0 %814  ;;  %v1035_v60 = vsel %vm785_vm0, %v97_v6, -inf  ;;  %v100_v6 = vld [vmem:[%s10858_s0 + $0x2b0] sm:$0xff] }
 0x1bf   :  { %11475 = vst [vmem:[#allocation139_spill] sm:$0xff] %v6749_v42  ;;  %v6755_v55 = vpop.xlane.xlu1 %817  ;;  %v1044_v48 = vsel %vm785_vm0, %v100_v6, -inf }
 0x1c0   :  { %11476 = vst [vmem:[#allocation140_spill] sm:$0xff] %v6755_v55 }
 0x1c1   :  { %1030 = vmax.xlane.f32.xlu0 %v1029_v0  ;;  %v99_v0 = vld [vmem:[%s10858_s0 + $0x2a8] sm:$0xff] }
 0x1c2   :  { %1033 = vmax.xlane.f32.xlu1 %v1032_v56  ;;  %v6761_v14 = vpop.xlane.xlu0 %820  ;;  %v1041_v56 = vsel %vm785_vm0, %v99_v0, -inf  ;;  %v102_v0 = vld [vmem:[%s10858_s0 + $0x2c0] sm:$0xff] }
 0x1c3   :  { %11477 = vst [vmem:[#allocation141_spill] sm:$0xff] %v6761_v14  ;;  %v6767_v51 = vpop.xlane.xlu1 %823  ;;  %v1050_v44 = vsel %vm785_vm0, %v102_v0, -inf }
 0x1c4   :  { %11478 = vst [vmem:[#allocation142_spill] sm:$0xff] %v6767_v51 }
 0x1c5   :  { %1036 = vmax.xlane.f32.xlu0 %v1035_v60  ;;  %v101_v60 = vld [vmem:[%s10858_s0 + $0x2b8] sm:$0xff] }
 0x1c6   :  { %1039 = vmax.xlane.f32.xlu1 %v1038_v52  ;;  %v6773_v29 = vpop.xlane.xlu0 %826  ;;  %v1047_v52 = vsel %vm785_vm0, %v101_v60, -inf  ;;  %v104_v60 = vld [vmem:[%s10858_s0 + $0x2d0] sm:$0xff] }
 0x1c7   :  { %11479 = vst [vmem:[#allocation143_spill] sm:$0xff] %v6773_v29  ;;  %v6779_v47 = vpop.xlane.xlu1 %829  ;;  %v1056_v40 = vsel %vm785_vm0, %v104_v60, -inf }
 0x1c8   :  { %11480 = vst [vmem:[#allocation144_spill] sm:$0xff] %v6779_v47 }
 0x1c9   :  { %1042 = vmax.xlane.f32.xlu0 %v1041_v56  ;;  %v103_v56 = vld [vmem:[%s10858_s0 + $0x2c8] sm:$0xff] }
 0x1ca   :  { %1045 = vmax.xlane.f32.xlu1 %v1044_v48  ;;  %v6785_v61 = vpop.xlane.xlu0 %832  ;;  %v1053_v48 = vsel %vm785_vm0, %v103_v56, -inf  ;;  %v106_v56 = vld [vmem:[%s10858_s0 + $0x2e0] sm:$0xff] }
 0x1cb   :  { %11481 = vst [vmem:[#allocation145_spill] sm:$0xff] %v6785_v61  ;;  %v6791_v43 = vpop.xlane.xlu1 %835  ;;  %v1062_v36 = vsel %vm785_vm0, %v106_v56, -inf }
 0x1cc   :  { %11482 = vst [vmem:[#allocation146_spill] sm:$0xff] %v6791_v43 }
 0x1cd   :  { %1048 = vmax.xlane.f32.xlu0 %v1047_v52  ;;  %v105_v52 = vld [vmem:[%s10858_s0 + $0x2d8] sm:$0xff] }
 0x1ce   :  { %1051 = vmax.xlane.f32.xlu1 %v1050_v44  ;;  %v6797_v6 = vpop.xlane.xlu0 %838  ;;  %v1059_v44 = vsel %vm785_vm0, %v105_v52, -inf  ;;  %v108_v52 = vld [vmem:[%s10858_s0 + $0x2f0] sm:$0xff] }
 0x1cf   :  { %11483 = vst [vmem:[#allocation147_spill] sm:$0xff] %v6797_v6  ;;  %v6803_v39 = vpop.xlane.xlu1 %841  ;;  %v1068_v32 = vsel %vm785_vm0, %v108_v52, -inf }
 0x1d0   :  { %11484 = vst [vmem:[#allocation148_spill] sm:$0xff] %v6803_v39 }
 0x1d1   :  { %1054 = vmax.xlane.f32.xlu0 %v1053_v48  ;;  %v107_v48 = vld [vmem:[%s10858_s0 + $0x2e8] sm:$0xff] }
 0x1d2   :  { %1057 = vmax.xlane.f32.xlu1 %v1056_v40  ;;  %v6809_v0 = vpop.xlane.xlu0 %844  ;;  %v1065_v40 = vsel %vm785_vm0, %v107_v48, -inf  ;;  %v110_v48 = vld [vmem:[%s10858_s0 + $0x300] sm:$0xff] }
 0x1d3   :  { %11485 = vst [vmem:[#allocation149_spill] sm:$0xff] %v6809_v0  ;;  %v6815_v35 = vpop.xlane.xlu1 %847  ;;  %v1074_v28 = vsel %vm785_vm0, %v110_v48, -inf }
 0x1d4   :  { %11486 = vst [vmem:[#allocation150_spill] sm:$0xff] %v6815_v35 }
 0x1d5   :  { %1060 = vmax.xlane.f32.xlu0 %v1059_v44  ;;  %v109_v44 = vld [vmem:[%s10858_s0 + $0x2f8] sm:$0xff] }
 0x1d6   :  { %1063 = vmax.xlane.f32.xlu1 %v1062_v36  ;;  %v6821_v60 = vpop.xlane.xlu0 %850  ;;  %v1071_v36 = vsel %vm785_vm0, %v109_v44, -inf  ;;  %v112_v44 = vld [vmem:[%s10858_s0 + $0x310] sm:$0xff] }
 0x1d7   :  { %11487 = vst [vmem:[#allocation151_spill] sm:$0xff] %v6821_v60  ;;  %v6827_v31 = vpop.xlane.xlu1 %853  ;;  %v1080_v24 = vsel %vm785_vm0, %v112_v44, -inf }
 0x1d8   :  { %11488 = vst [vmem:[#allocation152_spill] sm:$0xff] %v6827_v31 }
 0x1d9   :  { %1066 = vmax.xlane.f32.xlu0 %v1065_v40  ;;  %v111_v40 = vld [vmem:[%s10858_s0 + $0x308] sm:$0xff] }
 0x1da   :  { %1069 = vmax.xlane.f32.xlu1 %v1068_v32  ;;  %v6833_v56 = vpop.xlane.xlu0 %856  ;;  %v1077_v32 = vsel %vm785_vm0, %v111_v40, -inf  ;;  %v114_v40 = vld [vmem:[%s10858_s0 + $0x320] sm:$0xff] }
 0x1db   :  { %11489 = vst [vmem:[#allocation153_spill] sm:$0xff] %v6833_v56  ;;  %v6839_v27 = vpop.xlane.xlu1 %859  ;;  %v1086_v20 = vsel %vm785_vm0, %v114_v40, -inf }
 0x1dc   :  { %11490 = vst [vmem:[#allocation154_spill] sm:$0xff] %v6839_v27 }
 0x1dd   :  { %1072 = vmax.xlane.f32.xlu0 %v1071_v36  ;;  %v113_v36 = vld [vmem:[%s10858_s0 + $0x318] sm:$0xff] }
 0x1de   :  { %1075 = vmax.xlane.f32.xlu1 %v1074_v28  ;;  %v6845_v52 = vpop.xlane.xlu0 %862  ;;  %v1083_v28 = vsel %vm785_vm0, %v113_v36, -inf  ;;  %v116_v36 = vld [vmem:[%s10858_s0 + $0x330] sm:$0xff] }
 0x1df   :  { %11491 = vst [vmem:[#allocation155_spill] sm:$0xff] %v6845_v52  ;;  %v6851_v23 = vpop.xlane.xlu1 %865  ;;  %v1092_v16 = vsel %vm785_vm0, %v116_v36, -inf }
 0x1e0   :  { %11492 = vst [vmem:[#allocation156_spill] sm:$0xff] %v6851_v23 }
 0x1e1   :  { %1078 = vmax.xlane.f32.xlu0 %v1077_v32  ;;  %v115_v32 = vld [vmem:[%s10858_s0 + $0x328] sm:$0xff] }
 0x1e2   :  { %1081 = vmax.xlane.f32.xlu1 %v1080_v24  ;;  %v6857_v48 = vpop.xlane.xlu0 %868  ;;  %v1089_v24 = vsel %vm785_vm0, %v115_v32, -inf  ;;  %v118_v32 = vld [vmem:[%s10858_s0 + $0x340] sm:$0xff] }
 0x1e3   :  { %11493 = vst [vmem:[#allocation157_spill] sm:$0xff] %v6857_v48  ;;  %v6863_v19 = vpop.xlane.xlu1 %871  ;;  %v1098_v12 = vsel %vm785_vm0, %v118_v32, -inf }
 0x1e4   :  { %11494 = vst [vmem:[#allocation158_spill] sm:$0xff] %v6863_v19 }
 0x1e5   :  { %1084 = vmax.xlane.f32.xlu0 %v1083_v28  ;;  %v117_v28 = vld [vmem:[%s10858_s0 + $0x338] sm:$0xff] }
 0x1e6   :  { %1087 = vmax.xlane.f32.xlu1 %v1086_v20  ;;  %v6869_v44 = vpop.xlane.xlu0 %874  ;;  %v1095_v20 = vsel %vm785_vm0, %v117_v28, -inf  ;;  %v120_v28 = vld [vmem:[%s10858_s0 + $0x350] sm:$0xff] }
 0x1e7   :  { %11495 = vst [vmem:[#allocation159_spill] sm:$0xff] %v6869_v44  ;;  %v6875_v15 = vpop.xlane.xlu1 %877  ;;  %v1104_v3 = vsel %vm785_vm0, %v120_v28, -inf }
 0x1e8   :  { %11496 = vst [vmem:[#allocation160_spill] sm:$0xff] %v6875_v15 }
 0x1e9   :  { %1090 = vmax.xlane.f32.xlu0 %v1089_v24  ;;  %v119_v24 = vld [vmem:[%s10858_s0 + $0x348] sm:$0xff] }
 0x1ea   :  { %1093 = vmax.xlane.f32.xlu1 %v1092_v16  ;;  %v6881_v40 = vpop.xlane.xlu0 %880  ;;  %v1101_v16 = vsel %vm785_vm0, %v119_v24, -inf  ;;  %v122_v24 = vld [vmem:[%s10858_s0 + $0x360] sm:$0xff] }
 0x1eb   :  { %11497 = vst [vmem:[#allocation161_spill] sm:$0xff] %v6881_v40  ;;  %v6887_v11 = vpop.xlane.xlu1 %883  ;;  %v1110_v4 = vsel %vm785_vm0, %v122_v24, -inf }
 0x1ec   :  { %11498 = vst [vmem:[#allocation162_spill] sm:$0xff] %v6887_v11 }
 0x1ed   :  { %1096 = vmax.xlane.f32.xlu0 %v1095_v20  ;;  %v121_v20 = vld [vmem:[%s10858_s0 + $0x358] sm:$0xff] }
 0x1ee   :  { %1099 = vmax.xlane.f32.xlu1 %v1098_v12  ;;  %v6893_v36 = vpop.xlane.xlu0 %886  ;;  %v1107_v12 = vsel %vm785_vm0, %v121_v20, -inf  ;;  %v124_v20 = vld [vmem:[%s10858_s0 + $0x370] sm:$0xff] }
 0x1ef   :  { %11499 = vst [vmem:[#allocation163_spill] sm:$0xff] %v6893_v36  ;;  %v6899_v7 = vpop.xlane.xlu1 %889 }
 0x1f0   :  { %11500 = vst [vmem:[#allocation164_spill] sm:$0xff] %v6899_v7 }
 0x1f1   :  { %1102 = vmax.xlane.f32.xlu0 %v1101_v16  ;;  %v123_v16 = vld [vmem:[%s10858_s0 + $0x368] sm:$0xff] }
 0x1f2   :  { %1105 = vmax.xlane.f32.xlu1 %v1104_v3  ;;  %v6905_v32 = vpop.xlane.xlu0 %892  ;;  %v1113_v3 = vsel %vm785_vm0, %v123_v16, -inf  ;;  %v126_v16 = vld [vmem:[%s10858_s0 + $0x380] sm:$0xff] }
 0x1f3   :  { %11501 = vst [vmem:[#allocation165_spill] sm:$0xff] %v6905_v32  ;;  %v6911_v8 = vpop.xlane.xlu1 %895 }
 0x1f4   :  { %11502 = vst [vmem:[#allocation166_spill] sm:$0xff] %v6911_v8  ;;  %v1116_v8 = vsel %vm785_vm0, %v124_v20, -inf }
 0x1f5   :  { %1108 = vmax.xlane.f32.xlu0 %v1107_v12  ;;  %v125_v12 = vld [vmem:[%s10858_s0 + $0x378] sm:$0xff] }
 0x1f6   :  { %1111 = vmax.xlane.f32.xlu1 %v1110_v4  ;;  %v6917_v28 = vpop.xlane.xlu0 %898  ;;  %v1119_v4 = vsel %vm785_vm0, %v125_v12, -inf  ;;  %v128_v12 = vld [vmem:[%s10858_s0 + $0x390] sm:$0xff] }
 0x1f7   :  { %11503 = vst [vmem:[#allocation167_spill] sm:$0xff] %v6917_v28  ;;  %v6923_v32 = vpop.xlane.xlu1 %901 }
 0x1f8   :  { %11504 = vst [vmem:[#allocation168_spill] sm:$0xff] %v6923_v32  ;;  %v1122_v32 = vsel %vm785_vm0, %v126_v16, -inf }
 0x1f9   :  { %1114 = vmax.xlane.f32.xlu0 %v1113_v3  ;;  %v127_v3 = vld [vmem:[%s10858_s0 + $0x388] sm:$0xff] }
 0x1fa   :  { %1117 = vmax.xlane.f32.xlu1 %v1116_v8  ;;  %v6929_v24 = vpop.xlane.xlu0 %904  ;;  %v1125_v8 = vsel %vm785_vm0, %v127_v3, -inf  ;;  %v130_v3 = vld [vmem:[%s10858_s0 + $0x3a0] sm:$0xff] }
 0x1fb   :  { %11505 = vst [vmem:[#allocation169_spill] sm:$0xff] %v6929_v24  ;;  %v6935_v28 = vpop.xlane.xlu1 %907 }
 0x1fc   :  { %11506 = vst [vmem:[#allocation170_spill] sm:$0xff] %v6935_v28  ;;  %v1128_v28 = vsel %vm785_vm0, %v128_v12, -inf }
 0x1fd   :  { %1120 = vmax.xlane.f32.xlu0 %v1119_v4  ;;  %v129_v4 = vld [vmem:[%s10858_s0 + $0x398] sm:$0xff] }
 0x1fe   :  { %1123 = vmax.xlane.f32.xlu1 %v1122_v32  ;;  %v6941_v20 = vpop.xlane.xlu0 %910  ;;  %v1131_v32 = vsel %vm785_vm0, %v129_v4, -inf  ;;  %v132_v4 = vld [vmem:[%s10858_s0 + $0x3b0] sm:$0xff] }
 0x1ff   :  { %11507 = vst [vmem:[#allocation171_spill] sm:$0xff] %v6941_v20  ;;  %v6947_v24 = vpop.xlane.xlu1 %913 }
 0x200   :  { %11508 = vst [vmem:[#allocation172_spill] sm:$0xff] %v6947_v24  ;;  %v1134_v24 = vsel %vm785_vm0, %v130_v3, -inf }
 0x201   :  { %1126 = vmax.xlane.f32.xlu0 %v1125_v8  ;;  %v131_v8 = vld [vmem:[%s10858_s0 + $0x3a8] sm:$0xff] }
 0x202   :  { %1129 = vmax.xlane.f32.xlu1 %v1128_v28  ;;  %v6953_v16 = vpop.xlane.xlu0 %916  ;;  %v1137_v28 = vsel %vm785_vm0, %v131_v8, -inf }
 0x203   :  { %11509 = vst [vmem:[#allocation173_spill] sm:$0xff] %v6953_v16  ;;  %v6959_v20 = vpop.xlane.xlu1 %919 }
 0x204   :  { %11510 = vst [vmem:[#allocation174_spill] sm:$0xff] %v6959_v20  ;;  %v1140_v20 = vsel %vm785_vm0, %v132_v4, -inf  ;;  %v1171_v4 = vsub.f32 %v6265_v33, %v6707_v37  ;;  %v136_v33 = vld [vmem:[%s10858_s0 + $0x3d0] sm:$0xff] }
 0x205   :  { %1132 = vmax.xlane.f32.xlu0 %v1131_v32  ;;  %v1170_v32 = vsub.f32 %v6247_v18, %v6689_v30  ;;  %v1172_v30 = vsub.f32 %v6258_v2, %v6701_v38  ;;  %v1152_v2 = vsel %vm785_vm0, %v136_v33, -inf }
 0x206   :  { %1135 = vmax.xlane.f32.xlu1 %v1134_v24  ;;  %v6965_v12 = vpop.xlane.xlu0 %922  ;;  %v133_v24 = vld [vmem:[%s10858_s0 + $0x3b8] sm:$0xff]  ;;  %v1300_v37 = vmul.f32 1.442695, %v1171_v4 }
 0x207   :  { %11511 = vst [vmem:[#allocation175_spill] sm:$0xff] %v6965_v12  ;;  %v6971_v16 = vpop.xlane.xlu1 %925  ;;  %v1143_v8 = vsel %vm785_vm0, %v133_v24, -inf  ;;  %v134_v12 = vld [vmem:[%s10858_s0 + $0x3c0] sm:$0xff] }
 0x208   :  { %11512 = vst [vmem:[#allocation176_spill] sm:$0xff] %v6971_v16  ;;  %v1146_v18 = vsel %vm785_vm0, %v134_v12, -inf  ;;  %v1173_v12 = vsub.f32 %v6276_v41, %v6713_v13  ;;  %v138_v41 = vld [vmem:[%s10858_s0 + $0x3e0] sm:$0xff] }
 0x209   :  { %1138 = vmax.xlane.f32.xlu0 %v1137_v28  ;;  %v1298_v28 = vmul.f32 1.442695, %v1170_v32 }
 0x20a   :  { %1141 = vmax.xlane.f32.xlu1 %v1140_v20  ;;  %v6979_v3 = vpop.xlane.xlu0 %928  ;;  %v135_v20 = vld [vmem:[%s10858_s0 + $0x3c8] sm:$0xff] }
 0x20b   :  { %11513 = vst [vmem:[#allocation177_spill] sm:$0xff] %v6979_v3  ;;  %v6987_v16 = vpop.xlane.xlu1 %931  ;;  %v1149_v3 = vsel %vm785_vm0, %v135_v20, -inf  ;;  %4677 = vpow2.f32 %v1298_v28  ;;  %v137_v20 = vld [vmem:[%s10858_s0 + $0x3d8] sm:$0xff]  ;;  %v1304_v28 = vmul.f32 1.442695, %v1173_v12 }
 0x20c   :  { %11514 = vst [vmem:[#allocation178_spill] sm:$0xff] %v6987_v16  ;;  %v1155_v4 = vsel %vm785_vm0, %v137_v20, -inf  ;;  %4679 = vpow2.f32 %v1300_v37  ;;  %v139_v20 = vld [vmem:[%s10858_s0 + $0x3e8] sm:$0xff] }
 0x20d   :  { %1144 = vmax.xlane.f32.xlu0 %v1143_v8  ;;  %v1302_v8 = vmul.f32 1.442695, %v1172_v30  ;;  %v1175_v30 = vsub.f32 %v6292_v17, %v6725_v21  ;;  %v1161_v12 = vsel %vm785_vm0, %v139_v20, -inf  ;;  %v140_v17 = vld [vmem:[%s10858_s0 + $0x3f0] sm:$0xff]  ;;  %v141_v20 = vld [vmem:[%s10858_s0 + $0x3f8] sm:$0xff] }
 0x20e   :  { %1147 = vmax.xlane.f32.xlu1 %v1146_v18  ;;  %v6995_v24 = vpop.xlane.xlu0 %934  ;;  %v1174_v18 = vsub.f32 %v6283_v58, %v6719_v5 }
 0x20f   :  { %11515 = vst [vmem:[#allocation179_spill] sm:$0xff] %v6995_v24  ;;  %v7003_v32 = vpop.xlane.xlu1 %937  ;;  %4681 = vpow2.f32 %v1302_v8  ;;  %v1308_v8 = vmul.f32 1.442695, %v1175_v30 }
 0x210   :  { %11516 = vst [vmem:[#allocation180_spill] sm:$0xff] %v7003_v32  ;;  %v1306_v33 = vmul.f32 1.442695, %v1174_v18  ;;  %4683 = vpow2.f32 %v1304_v28  ;;  %v1177_v18 = vsub.f32 %v6310_v34, %v6737_v22  ;;  %v1167_v34 = vsel %vm785_vm0, %v141_v20, -inf }
 0x211   :  { %1150 = vmax.xlane.f32.xlu0 %v1149_v3  ;;  %v1158_v3 = vsel %vm785_vm0, %v138_v41, -inf }
 0x212   :  { %1153 = vmax.xlane.f32.xlu1 %v1152_v2  ;;  %v7011_v38 = vpop.xlane.xlu0 %940  ;;  %v1176_v2 = vsub.f32 %v6299_v49, %v6731_v63  ;;  %4685 = vpow2.f32 %v1306_v33  ;;  %v1312_v30 = vmul.f32 1.442695, %v1177_v18  ;;  %v1179_v33 = vsub.f32 %v6326_v57, %v6749_v42 }
 0x213   :  { %11517 = vst [vmem:[#allocation181_spill] sm:$0xff] %v7011_v38  ;;  %v7019_v58 = vpop.xlane.xlu1 %943  ;;  %4687 = vpow2.f32 %v1308_v8  ;;  %v1181_v57 = vsub.f32 %v6342_v25, %v6761_v14  ;;  %v1183_v25 = vsub.f32 %v6360_v9, %v6773_v29  ;;  %v1185_v9 = vsub.f32 %v6376_v50, %v6785_v61 }
 0x214   :  { %11518 = vst [vmem:[#allocation182_spill] sm:$0xff] %v7019_v58  ;;  %v1310_v41 = vmul.f32 1.442695, %v1176_v2  ;;  %v1316_v8 = vmul.f32 1.442695, %v1179_v33  ;;  %v1187_v50 = vsub.f32 %v6392_v53, %v6797_v6  ;;  %v1189_v53 = vsub.f32 %v6410_v45, %v6809_v0 }
 0x215   :  { %1156 = vmax.xlane.f32.xlu0 %v1155_v4  ;;  %v1164_v4 = vsel %vm785_vm0, %v140_v17, -inf  ;;  %v4678_v63 = vpop.eup %4677  ;;  %v1320_v33 = vmul.f32 1.442695, %v1181_v57  ;;  %v1324_v57 = vmul.f32 1.442695, %v1183_v25 }
 0x216   :  { %1159 = vmax.xlane.f32.xlu1 %v1158_v3  ;;  %v7027_v37 = vpop.xlane.xlu0 %946  ;;  %v1178_v3 = vsub.f32 %v6317_v26, %v6743_v59  ;;  %4689 = vpow2.f32 %v1310_v41  ;;  %v4680_v17 = vpop.eup %4679  ;;  %v1328_v25 = vmul.f32 1.442695, %v1185_v9  ;;  %v1332_v9 = vmul.f32 1.442695, %v1187_v50 }
 0x217   :  { %11519 = vst [vmem:[#allocation183_spill] sm:$0xff] %v7027_v37  ;;  %v7035_v49 = vpop.xlane.xlu1 %949  ;;  %4691 = vpow2.f32 %v1312_v30  ;;  %v1336_v45 = vmul.f32 1.442695, %v1189_v53 }
 0x218   :  { %11520 = vst [vmem:[#allocation184_spill] sm:$0xff] %v7035_v49  ;;  %v1314_v26 = vmul.f32 1.442695, %v1178_v3  ;;  %v1557_v3 = vsel %vm785_vm0, %v4680_v17, 0.0 }
 0x219   :  { %1162 = vmax.xlane.f32.xlu0 %v1161_v12  ;;  %v1180_v12 = vsub.f32 %v6335_v10, %v6755_v55  ;;  %v4682_v59 = vpop.eup %4681  ;;  %v1182_v10 = vsub.f32 %v6349_v1, %v6767_v51  ;;  %v1184_v1 = vsub.f32 %v6367_v54, %v6779_v47  ;;  %v1186_v54 = vsub.f32 %v6385_v46, %v6791_v43 }
 0x21a   :  { %1165 = vmax.xlane.f32.xlu1 %v1164_v4  ;;  %v7043_v28 = vpop.xlane.xlu0 %952  ;;  %v1554_v4 = vsel %vm785_vm0, %v4678_v63, 0.0  ;;  %4693 = vpow2.f32 %v1314_v26  ;;  %v4684_v20 = vpop.eup %4683  ;;  %v1560_v63 = vsel %vm785_vm0, %v4682_v59, 0.0  ;;  %v1188_v46 = vsub.f32 %v6399_v62, %v6803_v39  ;;  %v5445_v62 = vld [vmem:[%s10858_s0 + $0xa0] sm:$0xff] }
 0x21b   :  { %11521 = vst [vmem:[#allocation185_spill] sm:$0xff] %v7043_v28  ;;  %v7048_v2 = vpop.xlane.xlu1 %955  ;;  %v1318_v41 = vmul.f32 1.442695, %v1180_v12  ;;  %4695 = vpow2.f32 %v1316_v8  ;;  %v1322_v12 = vmul.f32 1.442695, %v1182_v10  ;;  %v1563_v17 = vsel %vm785_vm0, %v4684_v20, 0.0 }
 0x21c   :  { %11522 = vst [vmem:[#allocation186_spill] sm:$0xff] %v7048_v2  ;;  %v1326_v10 = vmul.f32 1.442695, %v1184_v1  ;;  %v1330_v1 = vmul.f32 1.442695, %v1186_v54 }
 0x21d   :  { %1168 = vmax.xlane.f32.xlu0 %v1167_v34  ;;  %v4686_v34 = vpop.eup %4685  ;;  %4697 = vpow2.f32 %v1318_v41  ;;  %v1334_v54 = vmul.f32 1.442695, %v1188_v46 }
 0x21e   :  { %1555 = vadd.xlane.f32.xlu1 %v1554_v4  ;;  %v7053_v22 = vpop.xlane.xlu0 %958  ;;  %v4688_v4 = vpop.eup %4687  ;;  %v1566_v59 = vsel %vm785_vm0, %v4686_v34, 0.0  ;;  %4699 = vpow2.f32 %v1320_v33 }
 0x21f   :  { %11523 = vst [vmem:[#allocation187_spill] sm:$0xff] %v7053_v22  ;;  %v7057_v18 = vpop.xlane.xlu1 %961  ;;  %4701 = vpow2.f32 %v1322_v12  ;;  %v1569_v20 = vsel %vm785_vm0, %v4688_v4, 0.0 }
 0x220   :  { %11524 = vst [vmem:[#allocation188_spill] sm:$0xff] %v7057_v18  ;;  %4703 = vpow2.f32 %v1324_v57 }
 0x221   :  { %1558 = vadd.xlane.f32.xlu0 %v1557_v3  ;;  %v4690_v3 = vpop.eup %4689  ;;  %4705 = vpow2.f32 %v1326_v10 }
 0x222   :  { %1561 = vadd.xlane.f32.xlu1 %v1560_v63  ;;  %v7063_v30 = vpop.xlane.xlu0 %964  ;;  %v4692_v63 = vpop.eup %4691  ;;  %v1572_v34 = vsel %vm785_vm0, %v4690_v3, 0.0  ;;  %4707 = vpow2.f32 %v1328_v25 }
 0x223   :  { %11525 = vst [vmem:[#allocation189_spill] sm:$0xff] %v7063_v30  ;;  %v7067_v26 = vpop.xlane.xlu1 %967  ;;  %v1575_v4 = vsel %vm785_vm0, %v4692_v63, 0.0  ;;  %4709 = vpow2.f32 %v1330_v1  ;;  %v1190_v63 = vsub.f32 %v5445_v62, %v6815_v35  ;;  %v5446_v1 = vld [vmem:[%s10858_s0 + $0xa8] sm:$0xff] }
 0x224   :  { %11526 = vst [vmem:[#allocation190_spill] sm:$0xff] %v7067_v26  ;;  %4711 = vpow2.f32 %v1332_v9  ;;  %v1191_v46 = vsub.f32 %v5446_v1, %v6821_v60 }
 0x225   :  { %1564 = vadd.xlane.f32.xlu0 %v1563_v17  ;;  %v4694_v17 = vpop.eup %4693  ;;  %4713 = vpow2.f32 %v1334_v54  ;;  %v5448_v54 = vld [vmem:[%s10858_s0 + $0xb8] sm:$0xff] }
 0x226   :  { %1567 = vadd.xlane.f32.xlu1 %v1566_v59  ;;  %v7073_v8 = vpop.xlane.xlu0 %970  ;;  %v4696_v59 = vpop.eup %4695  ;;  %v1578_v3 = vsel %vm785_vm0, %v4694_v17, 0.0  ;;  %4715 = vpow2.f32 %v1336_v45  ;;  %v1340_v1 = vmul.f32 1.442695, %v1191_v46 }
 0x227   :  { %11527 = vst [vmem:[#allocation191_spill] sm:$0xff] %v7073_v8  ;;  %v7077_v41 = vpop.xlane.xlu1 %973 }
 0x228   :  { %11528 = vst [vmem:[#allocation192_spill] sm:$0xff] %v7077_v41 }
 0x229   :  { %1570 = vadd.xlane.f32.xlu0 %v1569_v20  ;;  %v4698_v20 = vpop.eup %4697 }
 0x22a   :  { %1573 = vadd.xlane.f32.xlu1 %v1572_v34  ;;  %v7083_v33 = vpop.xlane.xlu0 %976  ;;  %v1581_v34 = vsel %vm785_vm0, %v4696_v59, 0.0  ;;  %v4700_v17 = vpop.eup %4699  ;;  %v1584_v25 = vsel %vm785_vm0, %v4698_v20, 0.0  ;;  %v1338_v59 = vmul.f32 1.442695, %v1190_v63  ;;  %v5447_v20 = vld [vmem:[%s10858_s0 + $0xb0] sm:$0xff]  ;;  %v1193_v63 = vsub.f32 %v5448_v54, %v6833_v56 }
 0x22b   :  { %11529 = vst [vmem:[#allocation193_spill] sm:$0xff] %v7083_v33  ;;  %v7087_v12 = vpop.xlane.xlu1 %979  ;;  %v4702_v50 = vpop.eup %4701  ;;  %v1192_v62 = vsub.f32 %v5447_v20, %v6827_v31 }
 0x22c   :  { %11530 = vst [vmem:[#allocation194_spill] sm:$0xff] %v7087_v12  ;;  %v4704_v9 = vpop.eup %4703  ;;  %v1590_v53 = vsel %vm785_vm0, %v4702_v50, 0.0  ;;  %4717 = vpow2.f32 %v1338_v59  ;;  %v5449_v50 = vld [vmem:[%s10858_s0 + $0xc0] sm:$0xff]  ;;  %v1344_v54 = vmul.f32 1.442695, %v1193_v63  ;;  %v5450_v59 = vld [vmem:[%s10858_s0 + $0xc8] sm:$0xff] }
 0x22d   :  { %1576 = vadd.xlane.f32.xlu0 %v1575_v4  ;;  %v1194_v20 = vsub.f32 %v5449_v50, %v6839_v27  ;;  %4719 = vpow2.f32 %v1340_v1 }
 0x22e   :  { %1579 = vadd.xlane.f32.xlu1 %v1578_v3  ;;  %v7093_v57 = vpop.xlane.xlu0 %982 }
 0x22f   :  { %11531 = vst [vmem:[#allocation195_spill] sm:$0xff] %v7093_v57  ;;  %v7097_v10 = vpop.xlane.xlu1 %985 }
 0x230   :  { %11532 = vst [vmem:[#allocation196_spill] sm:$0xff] %v7097_v10 }
 0x231   :  { %1582 = vadd.xlane.f32.xlu0 %v1581_v34  ;;  %v1587_v34 = vsel %vm785_vm0, %v4700_v17, 0.0  ;;  %v1342_v17 = vmul.f32 1.442695, %v1192_v62  ;;  %v1195_v62 = vsub.f32 %v5450_v59, %v6845_v52 }
 0x232   :  { %1585 = vadd.xlane.f32.xlu1 %v1584_v25  ;;  %v7105_v4 = vpop.xlane.xlu0 %988  ;;  %v4706_v25 = vpop.eup %4705 }
 0x233   :  { %11533 = vst [vmem:[#allocation197_spill] sm:$0xff] %v7105_v4  ;;  %v7111_v3 = vpop.xlane.xlu1 %991  ;;  %v4708_v45 = vpop.eup %4707  ;;  %v1596_v46 = vsel %vm785_vm0, %v4706_v25, 0.0  ;;  %4721 = vpow2.f32 %v1342_v17  ;;  %v5451_v25 = vld [vmem:[%s10858_s0 + $0xd0] sm:$0xff]  ;;  %v1348_v59 = vmul.f32 1.442695, %v1195_v62  ;;  %v5452_v17 = vld [vmem:[%s10858_s0 + $0xd8] sm:$0xff] }
 0x234   :  { %11534 = vst [vmem:[#allocation198_spill] sm:$0xff] %v7111_v3  ;;  %v1196_v50 = vsub.f32 %v5451_v25, %v6851_v23  ;;  %4723 = vpow2.f32 %v1344_v54 }
 0x235   :  { %1588 = vadd.xlane.f32.xlu0 %v1587_v34  ;;  %v1593_v34 = vsel %vm785_vm0, %v4704_v9, 0.0  ;;  %v1346_v9 = vmul.f32 1.442695, %v1194_v20  ;;  %v1197_v20 = vsub.f32 %v5452_v17, %v6857_v48 }
 0x236   :  { %1591 = vadd.xlane.f32.xlu1 %v1590_v53  ;;  %v7119_v35 = vpop.xlane.xlu0 %994  ;;  %v4710_v53 = vpop.eup %4709 }
 0x237   :  { %11535 = vst [vmem:[#allocation199_spill] sm:$0xff] %v7119_v35  ;;  %v7125_v60 = vpop.xlane.xlu1 %997  ;;  %v4712_v1 = vpop.eup %4711  ;;  %v1602_v63 = vsel %vm785_vm0, %v4710_v53, 0.0  ;;  %4725 = vpow2.f32 %v1346_v9  ;;  %v5453_v53 = vld [vmem:[%s10858_s0 + $0xe0] sm:$0xff]  ;;  %v1352_v17 = vmul.f32 1.442695, %v1197_v20  ;;  %v5454_v9 = vld [vmem:[%s10858_s0 + $0xe8] sm:$0xff] }
 0x238   :  { %11536 = vst [vmem:[#allocation200_spill] sm:$0xff] %v7125_v60  ;;  %v1198_v25 = vsub.f32 %v5453_v53, %v6863_v19  ;;  %4727 = vpow2.f32 %v1348_v59 }
 0x239   :  { %1594 = vadd.xlane.f32.xlu0 %v1593_v34  ;;  %v1599_v34 = vsel %vm785_vm0, %v4708_v45, 0.0  ;;  %v1350_v45 = vmul.f32 1.442695, %v1196_v50  ;;  %v1199_v50 = vsub.f32 %v5454_v9, %v6869_v44 }
 0x23a   :  { %1597 = vadd.xlane.f32.xlu1 %v1596_v46  ;;  %v7133_v31 = vpop.xlane.xlu0 %1000  ;;  %v4714_v46 = vpop.eup %4713 }
 0x23b   :  { %11537 = vst [vmem:[#allocation201_spill] sm:$0xff] %v7133_v31  ;;  %v7139_v56 = vpop.xlane.xlu1 %1003  ;;  %v4716_v54 = vpop.eup %4715  ;;  %v1608_v62 = vsel %vm785_vm0, %v4714_v46, 0.0  ;;  %4729 = vpow2.f32 %v1350_v45  ;;  %v5455_v46 = vld [vmem:[%s10858_s0 + $0xf0] sm:$0xff]  ;;  %v1356_v9 = vmul.f32 1.442695, %v1199_v50  ;;  %v5456_v45 = vld [vmem:[%s10858_s0 + $0xf8] sm:$0xff] }
 0x23c   :  { %11538 = vst [vmem:[#allocation202_spill] sm:$0xff] %v7139_v56  ;;  %v1200_v53 = vsub.f32 %v5455_v46, %v6875_v15  ;;  %4731 = vpow2.f32 %v1352_v17 }
 0x23d   :  { %1600 = vadd.xlane.f32.xlu0 %v1599_v34  ;;  %v1605_v34 = vsel %vm785_vm0, %v4712_v1, 0.0  ;;  %v1354_v1 = vmul.f32 1.442695, %v1198_v25  ;;  %v1201_v25 = vsub.f32 %v5456_v45, %v6881_v40 }
 0x23e   :  { %1603 = vadd.xlane.f32.xlu1 %v1602_v63  ;;  %v7147_v27 = vpop.xlane.xlu0 %1006  ;;  %v4718_v63 = vpop.eup %4717 }
 0x23f   :  { %11539 = vst [vmem:[#allocation203_spill] sm:$0xff] %v7147_v27  ;;  %v7153_v52 = vpop.xlane.xlu1 %1009  ;;  %v4720_v59 = vpop.eup %4719  ;;  %v1614_v20 = vsel %vm785_vm0, %v4718_v63, 0.0  ;;  %4733 = vpow2.f32 %v1354_v1  ;;  %v5457_v63 = vld [vmem:[%s10858_s0 + $0x100] sm:$0xff]  ;;  %v1360_v45 = vmul.f32 1.442695, %v1201_v25  ;;  %v5458_v1 = vld [vmem:[%s10858_s0 + $0x108] sm:$0xff] }
 0x240   :  { %11540 = vst [vmem:[#allocation204_spill] sm:$0xff] %v7153_v52  ;;  %v1202_v46 = vsub.f32 %v5457_v63, %v6887_v11  ;;  %4735 = vpow2.f32 %v1356_v9 }
 0x241   :  { %1606 = vadd.xlane.f32.xlu0 %v1605_v34  ;;  %v1611_v34 = vsel %vm785_vm0, %v4716_v54, 0.0  ;;  %v1358_v54 = vmul.f32 1.442695, %v1200_v53  ;;  %v1203_v53 = vsub.f32 %v5458_v1, %v6893_v36 }
 0x242   :  { %1609 = vadd.xlane.f32.xlu1 %v1608_v62  ;;  %v7161_v23 = vpop.xlane.xlu0 %1012  ;;  %v4722_v62 = vpop.eup %4721 }
 0x243   :  { %11541 = vst [vmem:[#allocation205_spill] sm:$0xff] %v7161_v23  ;;  %v7167_v48 = vpop.xlane.xlu1 %1015  ;;  %v4724_v17 = vpop.eup %4723  ;;  %v1620_v50 = vsel %vm785_vm0, %v4722_v62, 0.0  ;;  %4737 = vpow2.f32 %v1358_v54  ;;  %v5459_v62 = vld [vmem:[%s10858_s0 + $0x110] sm:$0xff]  ;;  %v1364_v1 = vmul.f32 1.442695, %v1203_v53  ;;  %v5460_v54 = vld [vmem:[%s10858_s0 + $0x118] sm:$0xff] }
 0x244   :  { %11542 = vst [vmem:[#allocation206_spill] sm:$0xff] %v7167_v48  ;;  %v1204_v63 = vsub.f32 %v5459_v62, %v6899_v7  ;;  %4739 = vpow2.f32 %v1360_v45  ;;  %v11550_v62 = vld [vmem:[#allocation166_spill] sm:$0xff] }
 0x245   :  { %1612 = vadd.xlane.f32.xlu0 %v1611_v34  ;;  %v1617_v34 = vsel %vm785_vm0, %v4720_v59, 0.0  ;;  %v1362_v59 = vmul.f32 1.442695, %v1202_v46  ;;  %v11548_v46 = vld [vmem:[#allocation165_spill] sm:$0xff] }
 0x246   :  { %1615 = vadd.xlane.f32.xlu1 %v1614_v20  ;;  %v7175_v19 = vpop.xlane.xlu0 %1018  ;;  %v4726_v20 = vpop.eup %4725  ;;  %v1205_v36 = vsub.f32 %v5460_v54, %v11548_v46 }
 0x247   :  { %11543 = vst [vmem:[#allocation207_spill] sm:$0xff] %v7175_v19  ;;  %v7181_v44 = vpop.xlane.xlu1 %1021  ;;  %v4728_v9 = vpop.eup %4727  ;;  %v1626_v25 = vsel %vm785_vm0, %v4726_v20, 0.0  ;;  %4741 = vpow2.f32 %v1362_v59  ;;  %v5461_v20 = vld [vmem:[%s10858_s0 + $0x120] sm:$0xff]  ;;  %v5462_v59 = vld [vmem:[%s10858_s0 + $0x128] sm:$0xff] }
 0x248   :  { %11544 = vst [vmem:[#allocation208_spill] sm:$0xff] %v7181_v44  ;;  %4743 = vpow2.f32 %v1364_v1  ;;  %v1368_v54 = vmul.f32 1.442695, %v1205_v36 }
 0x249   :  { %1618 = vadd.xlane.f32.xlu0 %v1617_v34  ;;  %v1623_v34 = vsel %vm785_vm0, %v4724_v17, 0.0  ;;  %v1366_v17 = vmul.f32 1.442695, %v1204_v63  ;;  %v11552_v63 = vld [vmem:[#allocation167_spill] sm:$0xff] }
 0x24a   :  { %1621 = vadd.xlane.f32.xlu1 %v1620_v50  ;;  %v7189_v15 = vpop.xlane.xlu0 %1024  ;;  %v4730_v50 = vpop.eup %4729  ;;  %v1207_v46 = vsub.f32 %v5462_v59, %v11552_v63 }
 0x24b   :  { %11545 = vst [vmem:[#allocation209_spill] sm:$0xff] %v7189_v15  ;;  %v7195_v40 = vpop.xlane.xlu1 %1027  ;;  %v4732_v45 = vpop.eup %4731  ;;  %v1632_v53 = vsel %vm785_vm0, %v4730_v50, 0.0  ;;  %4745 = vpow2.f32 %v1366_v17  ;;  %v5463_v50 = vld [vmem:[%s10858_s0 + $0x130] sm:$0xff]  ;;  %v5464_v17 = vld [vmem:[%s10858_s0 + $0x138] sm:$0xff] }
 0x24c   :  { %11546 = vst [vmem:[#allocation210_spill] sm:$0xff] %v7195_v40  ;;  %v4734_v7 = vpop.eup %4733  ;;  %4747 = vpow2.f32 %v1368_v54  ;;  %v1372_v59 = vmul.f32 1.442695, %v1207_v46 }
 0x24d   :  { %1624 = vadd.xlane.f32.xlu0 %v1623_v34  ;;  %v1206_v34 = vsub.f32 %v5461_v20, %v11550_v62  ;;  %v11554_v20 = vld [vmem:[#allocation168_spill] sm:$0xff]  ;;  %v4736_v1 = vpop.eup %4735  ;;  %v1638_v36 = vsel %vm785_vm0, %v4734_v7, 0.0  ;;  %v5465_v7 = vld [vmem:[%s10858_s0 + $0x140] sm:$0xff] }
 0x24e   :  { %1627 = vadd.xlane.f32.xlu1 %v1626_v25  ;;  %v7203_v11 = vpop.xlane.xlu0 %1030  ;;  %v1629_v25 = vsel %vm785_vm0, %v4728_v9, 0.0  ;;  %v4738_v62 = vpop.eup %4737 }
 0x24f   :  { %11547 = vst [vmem:[#allocation211_spill] sm:$0xff] %v7203_v11  ;;  %v7209_v0 = vpop.xlane.xlu1 %1033  ;;  %v1370_v9 = vmul.f32 1.442695, %v1206_v34  ;;  %v11556_v34 = vld [vmem:[#allocation169_spill] sm:$0xff]  ;;  %v4740_v54 = vpop.eup %4739  ;;  %v1644_v46 = vsel %vm785_vm0, %v4738_v62, 0.0 }
 0x250   :  { %11549 = vst [vmem:[#allocation212_spill] sm:$0xff] %v7209_v0  ;;  %v1209_v63 = vsub.f32 %v5464_v17, %v11556_v34  ;;  %v5467_v62 = vld [vmem:[%s10858_s0 + $0x150] sm:$0xff] }
 0x251   :  { %1630 = vadd.xlane.f32.xlu0 %v1629_v25  ;;  %v1208_v25 = vsub.f32 %v5463_v50, %v11554_v20  ;;  %4749 = vpow2.f32 %v1370_v9  ;;  %v11558_v50 = vld [vmem:[#allocation170_spill] sm:$0xff]  ;;  %v4742_v20 = vpop.eup %4741  ;;  %v5466_v9 = vld [vmem:[%s10858_s0 + $0x148] sm:$0xff] }
 0x252   :  { %1633 = vadd.xlane.f32.xlu1 %v1632_v53  ;;  %v7217_v39 = vpop.xlane.xlu0 %1036  ;;  %v1635_v53 = vsel %vm785_vm0, %v4732_v45, 0.0  ;;  %4751 = vpow2.f32 %v1372_v59  ;;  %v1376_v17 = vmul.f32 1.442695, %v1209_v63  ;;  %v4744_v59 = vpop.eup %4743  ;;  %v1650_v63 = vsel %vm785_vm0, %v4742_v20, 0.0  ;;  %v5469_v20 = vld [vmem:[%s10858_s0 + $0x160] sm:$0xff] }
 0x253   :  { %11551 = vst [vmem:[#allocation213_spill] sm:$0xff] %v7217_v39  ;;  %v7223_v6 = vpop.xlane.xlu1 %1039  ;;  %v1374_v45 = vmul.f32 1.442695, %v1208_v25  ;;  %v11560_v25 = vld [vmem:[#allocation171_spill] sm:$0xff] }
 0x254   :  { %11553 = vst [vmem:[#allocation214_spill] sm:$0xff] %v7223_v6  ;;  %v1211_v34 = vsub.f32 %v5466_v9, %v11560_v25 }
 0x255   :  { %1636 = vadd.xlane.f32.xlu0 %v1635_v53  ;;  %v1210_v53 = vsub.f32 %v5465_v7, %v11558_v50  ;;  %4753 = vpow2.f32 %v1374_v45  ;;  %v11562_v7 = vld [vmem:[#allocation172_spill] sm:$0xff]  ;;  %v4746_v50 = vpop.eup %4745  ;;  %v5468_v45 = vld [vmem:[%s10858_s0 + $0x158] sm:$0xff] }
 0x256   :  { %1639 = vadd.xlane.f32.xlu1 %v1638_v36  ;;  %v7231_v43 = vpop.xlane.xlu0 %1042  ;;  %v1641_v36 = vsel %vm785_vm0, %v4736_v1, 0.0  ;;  %4755 = vpow2.f32 %v1376_v17  ;;  %v1380_v9 = vmul.f32 1.442695, %v1211_v34  ;;  %v4748_v17 = vpop.eup %4747  ;;  %v1656_v34 = vsel %vm785_vm0, %v4746_v50, 0.0  ;;  %v5471_v50 = vld [vmem:[%s10858_s0 + $0x170] sm:$0xff] }
 0x257   :  { %11555 = vst [vmem:[#allocation215_spill] sm:$0xff] %v7231_v43  ;;  %v7237_v61 = vpop.xlane.xlu1 %1045  ;;  %v1378_v1 = vmul.f32 1.442695, %v1210_v53  ;;  %v11564_v53 = vld [vmem:[#allocation173_spill] sm:$0xff] }
 0x258   :  { %11557 = vst [vmem:[#allocation216_spill] sm:$0xff] %v7237_v61  ;;  %v1213_v25 = vsub.f32 %v5468_v45, %v11564_v53 }
 0x259   :  { %1642 = vadd.xlane.f32.xlu0 %v1641_v36  ;;  %v1212_v36 = vsub.f32 %v5467_v62, %v11562_v7  ;;  %4757 = vpow2.f32 %v1378_v1  ;;  %v11566_v62 = vld [vmem:[#allocation174_spill] sm:$0xff]  ;;  %v5470_v1 = vld [vmem:[%s10858_s0 + $0x168] sm:$0xff] }
 0x25a   :  { %1645 = vadd.xlane.f32.xlu1 %v1644_v46  ;;  %v7245_v47 = vpop.xlane.xlu0 %1048  ;;  %v1647_v46 = vsel %vm785_vm0, %v4740_v54, 0.0  ;;  %4759 = vpow2.f32 %v1380_v9  ;;  %v1384_v45 = vmul.f32 1.442695, %v1213_v25 }
 0x25b   :  { %11559 = vst [vmem:[#allocation217_spill] sm:$0xff] %v7245_v47  ;;  %v7251_v29 = vpop.xlane.xlu1 %1051  ;;  %v1382_v54 = vmul.f32 1.442695, %v1212_v36  ;;  %v4750_v7 = vpop.eup %4749  ;;  %v11568_v36 = vld [vmem:[#allocation175_spill] sm:$0xff] }
 0x25c   :  { %11561 = vst [vmem:[#allocation218_spill] sm:$0xff] %v7251_v29  ;;  %v1215_v53 = vsub.f32 %v5470_v1, %v11568_v36  ;;  %v4752_v9 = vpop.eup %4751  ;;  %v1662_v25 = vsel %vm785_vm0, %v4750_v7, 0.0  ;;  %v5473_v7 = vld [vmem:[%s10858_s0 + $0x180] sm:$0xff] }
 0x25d   :  { %1648 = vadd.xlane.f32.xlu0 %v1647_v46  ;;  %v1214_v46 = vsub.f32 %v5469_v20, %v11566_v62  ;;  %4761 = vpow2.f32 %v1382_v54  ;;  %v11570_v20 = vld [vmem:[#allocation176_spill] sm:$0xff]  ;;  %v5472_v54 = vld [vmem:[%s10858_s0 + $0x178] sm:$0xff] }
 0x25e   :  { %1651 = vadd.xlane.f32.xlu1 %v1650_v63  ;;  %v7259_v51 = vpop.xlane.xlu0 %1054  ;;  %v1653_v63 = vsel %vm785_vm0, %v4744_v59, 0.0  ;;  %4763 = vpow2.f32 %v1384_v45  ;;  %v1388_v1 = vmul.f32 1.442695, %v1215_v53 }
 0x25f   :  { %11563 = vst [vmem:[#allocation219_spill] sm:$0xff] %v7259_v51  ;;  %v7265_v14 = vpop.xlane.xlu1 %1057  ;;  %v1386_v59 = vmul.f32 1.442695, %v1214_v46  ;;  %v4754_v62 = vpop.eup %4753  ;;  %v11572_v46 = vld [vmem:[#allocation177_spill] sm:$0xff] }
 0x260   :  { %11565 = vst [vmem:[#allocation220_spill] sm:$0xff] %v7265_v14  ;;  %v1217_v36 = vsub.f32 %v5472_v54, %v11572_v46  ;;  %v4756_v45 = vpop.eup %4755  ;;  %v1668_v53 = vsel %vm785_vm0, %v4754_v62, 0.0  ;;  %v5475_v62 = vld [vmem:[%s10858_s0 + $0x190] sm:$0xff] }
 0x261   :  { %1654 = vadd.xlane.f32.xlu0 %v1653_v63  ;;  %v1216_v63 = vsub.f32 %v5471_v50, %v11570_v20  ;;  %4765 = vpow2.f32 %v1386_v59  ;;  %v1218_v50 = vsub.f32 %v5473_v7, %v6987_v16  ;;  %v5474_v59 = vld [vmem:[%s10858_s0 + $0x188] sm:$0xff]  ;;  %v1220_v7 = vsub.f32 %v5475_v62, %v7003_v32 }
 0x262   :  { %1657 = vadd.xlane.f32.xlu1 %v1656_v34  ;;  %v7273_v55 = vpop.xlane.xlu0 %1060  ;;  %v1659_v34 = vsel %vm785_vm0, %v4748_v17, 0.0  ;;  %4767 = vpow2.f32 %v1388_v1  ;;  %v1392_v54 = vmul.f32 1.442695, %v1217_v36 }
 0x263   :  { %11567 = vst [vmem:[#allocation221_spill] sm:$0xff] %v7273_v55  ;;  %v7279_v42 = vpop.xlane.xlu1 %1063  ;;  %v1390_v17 = vmul.f32 1.442695, %v1216_v63  ;;  %v1219_v63 = vsub.f32 %v5474_v59, %v6995_v24 }
 0x264   :  { %11569 = vst [vmem:[#allocation222_spill] sm:$0xff] %v7279_v42 }
 0x265   :  { %1660 = vadd.xlane.f32.xlu0 %v1659_v34  ;;  %v1665_v34 = vsel %vm785_vm0, %v4752_v9, 0.0  ;;  %4769 = vpow2.f32 %v1390_v17  ;;  %v1394_v9 = vmul.f32 1.442695, %v1218_v50  ;;  %v1396_v59 = vmul.f32 1.442695, %v1219_v63  ;;  %v5476_v17 = vld [vmem:[%s10858_s0 + $0x198] sm:$0xff] }
 0x266   :  { %1663 = vadd.xlane.f32.xlu1 %v1662_v25  ;;  %v7287_v21 = vpop.xlane.xlu0 %1066  ;;  %v4758_v25 = vpop.eup %4757  ;;  %4771 = vpow2.f32 %v1392_v54  ;;  %v1221_v50 = vsub.f32 %v5476_v17, %v7011_v38 }
 0x267   :  { %11571 = vst [vmem:[#allocation223_spill] sm:$0xff] %v7287_v21  ;;  %v7293_v5 = vpop.xlane.xlu1 %1069  ;;  %v4760_v1 = vpop.eup %4759  ;;  %v1674_v36 = vsel %vm785_vm0, %v4758_v25, 0.0  ;;  %4773 = vpow2.f32 %v1394_v9  ;;  %v5477_v25 = vld [vmem:[%s10858_s0 + $0x1a0] sm:$0xff]  ;;  %v5478_v9 = vld [vmem:[%s10858_s0 + $0x1a8] sm:$0xff] }
 0x268   :  { %11573 = vst [vmem:[#allocation224_spill] sm:$0xff] %v7293_v5  ;;  %v1222_v62 = vsub.f32 %v5477_v25, %v7019_v58  ;;  %4775 = vpow2.f32 %v1396_v59  ;;  %v1400_v17 = vmul.f32 1.442695, %v1221_v50 }
 0x269   :  { %1666 = vadd.xlane.f32.xlu0 %v1665_v34  ;;  %v1671_v34 = vsel %vm785_vm0, %v4756_v45, 0.0  ;;  %v1398_v45 = vmul.f32 1.442695, %v1220_v7  ;;  %v1223_v7 = vsub.f32 %v5478_v9, %v7027_v37 }
 0x26a   :  { %1669 = vadd.xlane.f32.xlu1 %v1668_v53  ;;  %v7301_v20 = vpop.xlane.xlu0 %1072  ;;  %v4762_v53 = vpop.eup %4761 }
 0x26b   :  { %11574 = vst [vmem:[#allocation225_spill] sm:$0xff] %v7301_v20  ;;  %v7307_v46 = vpop.xlane.xlu1 %1075  ;;  %v4764_v54 = vpop.eup %4763  ;;  %v1680_v63 = vsel %vm785_vm0, %v4762_v53, 0.0  ;;  %4777 = vpow2.f32 %v1398_v45  ;;  %v5479_v53 = vld [vmem:[%s10858_s0 + $0x1b0] sm:$0xff]  ;;  %v1404_v9 = vmul.f32 1.442695, %v1223_v7  ;;  %v5480_v45 = vld [vmem:[%s10858_s0 + $0x1b8] sm:$0xff] }
 0x26c   :  { %11575 = vst [vmem:[#allocation226_spill] sm:$0xff] %v7307_v46  ;;  %v1224_v25 = vsub.f32 %v5479_v53, %v7035_v49  ;;  %4779 = vpow2.f32 %v1400_v17 }
 0x26d   :  { %1672 = vadd.xlane.f32.xlu0 %v1671_v34  ;;  %v1677_v34 = vsel %vm785_vm0, %v4760_v1, 0.0  ;;  %v1402_v1 = vmul.f32 1.442695, %v1222_v62  ;;  %v1225_v62 = vsub.f32 %v5480_v45, %v7043_v28 }
 0x26e   :  { %1675 = vadd.xlane.f32.xlu1 %v1674_v36  ;;  %v7315_v16 = vpop.xlane.xlu0 %1078  ;;  %v4766_v36 = vpop.eup %4765 }
 0x26f   :  { %11576 = vst [vmem:[#allocation227_spill] sm:$0xff] %v7315_v16  ;;  %v7321_v24 = vpop.xlane.xlu1 %1081  ;;  %v4768_v59 = vpop.eup %4767  ;;  %v1686_v50 = vsel %vm785_vm0, %v4766_v36, 0.0  ;;  %4781 = vpow2.f32 %v1402_v1  ;;  %v5481_v36 = vld [vmem:[%s10858_s0 + $0x1c0] sm:$0xff]  ;;  %v1408_v45 = vmul.f32 1.442695, %v1225_v62  ;;  %v5482_v1 = vld [vmem:[%s10858_s0 + $0x1c8] sm:$0xff] }
 0x270   :  { %11577 = vst [vmem:[#allocation228_spill] sm:$0xff] %v7321_v24  ;;  %v1226_v53 = vsub.f32 %v5481_v36, %v7048_v2  ;;  %4783 = vpow2.f32 %v1404_v9 }
 0x271   :  { %1678 = vadd.xlane.f32.xlu0 %v1677_v34  ;;  %v1683_v34 = vsel %vm785_vm0, %v4764_v54, 0.0  ;;  %v1406_v54 = vmul.f32 1.442695, %v1224_v25  ;;  %v1227_v25 = vsub.f32 %v5482_v1, %v7053_v22 }
 0x272   :  { %1681 = vadd.xlane.f32.xlu1 %v1680_v63  ;;  %v7329_v32 = vpop.xlane.xlu0 %1084  ;;  %v4770_v63 = vpop.eup %4769 }
 0x273   :  { %11578 = vst [vmem:[#allocation229_spill] sm:$0xff] %v7329_v32  ;;  %v7335_v38 = vpop.xlane.xlu1 %1087  ;;  %v4772_v17 = vpop.eup %4771  ;;  %v1692_v7 = vsel %vm785_vm0, %v4770_v63, 0.0  ;;  %4785 = vpow2.f32 %v1406_v54  ;;  %v5483_v63 = vld [vmem:[%s10858_s0 + $0x1d0] sm:$0xff]  ;;  %v1412_v1 = vmul.f32 1.442695, %v1227_v25  ;;  %v5484_v54 = vld [vmem:[%s10858_s0 + $0x1d8] sm:$0xff] }
 0x274   :  { %11579 = vst [vmem:[#allocation230_spill] sm:$0xff] %v7335_v38  ;;  %v1228_v36 = vsub.f32 %v5483_v63, %v7057_v18  ;;  %4787 = vpow2.f32 %v1408_v45 }
 0x275   :  { %1684 = vadd.xlane.f32.xlu0 %v1683_v34  ;;  %v1689_v34 = vsel %vm785_vm0, %v4768_v59, 0.0  ;;  %v1410_v59 = vmul.f32 1.442695, %v1226_v53  ;;  %v1229_v53 = vsub.f32 %v5484_v54, %v7063_v30 }
 0x276   :  { %1687 = vadd.xlane.f32.xlu1 %v1686_v50  ;;  %v7343_v58 = vpop.xlane.xlu0 %1090  ;;  %v4774_v50 = vpop.eup %4773 }
 0x277   :  { %11580 = vst [vmem:[#allocation231_spill] sm:$0xff] %v7343_v58  ;;  %v7349_v37 = vpop.xlane.xlu1 %1093  ;;  %v4776_v9 = vpop.eup %4775  ;;  %v1698_v62 = vsel %vm785_vm0, %v4774_v50, 0.0  ;;  %4789 = vpow2.f32 %v1410_v59  ;;  %v5485_v50 = vld [vmem:[%s10858_s0 + $0x1e0] sm:$0xff]  ;;  %v1416_v54 = vmul.f32 1.442695, %v1229_v53  ;;  %v5486_v59 = vld [vmem:[%s10858_s0 + $0x1e8] sm:$0xff] }
 0x278   :  { %11581 = vst [vmem:[#allocation232_spill] sm:$0xff] %v7349_v37  ;;  %v1230_v63 = vsub.f32 %v5485_v50, %v7067_v26  ;;  %4791 = vpow2.f32 %v1412_v1 }
 0x279   :  { %1690 = vadd.xlane.f32.xlu0 %v1689_v34  ;;  %v1695_v34 = vsel %vm785_vm0, %v4772_v17, 0.0  ;;  %v1414_v17 = vmul.f32 1.442695, %v1228_v36  ;;  %v1231_v36 = vsub.f32 %v5486_v59, %v7073_v8 }
 0x27a   :  { %1693 = vadd.xlane.f32.xlu1 %v1692_v7  ;;  %v7357_v49 = vpop.xlane.xlu0 %1096  ;;  %v4778_v7 = vpop.eup %4777 }
 0x27b   :  { %11582 = vst [vmem:[#allocation233_spill] sm:$0xff] %v7357_v49  ;;  %v7363_v28 = vpop.xlane.xlu1 %1099  ;;  %v4780_v45 = vpop.eup %4779  ;;  %v1704_v25 = vsel %vm785_vm0, %v4778_v7, 0.0  ;;  %4793 = vpow2.f32 %v1414_v17  ;;  %v5487_v7 = vld [vmem:[%s10858_s0 + $0x1f0] sm:$0xff]  ;;  %v1420_v59 = vmul.f32 1.442695, %v1231_v36  ;;  %v5488_v17 = vld [vmem:[%s10858_s0 + $0x1f8] sm:$0xff] }
 0x27c   :  { %11583 = vst [vmem:[#allocation234_spill] sm:$0xff] %v7363_v28  ;;  %v1232_v50 = vsub.f32 %v5487_v7, %v7077_v41  ;;  %4795 = vpow2.f32 %v1416_v54 }
 0x27d   :  { %1696 = vadd.xlane.f32.xlu0 %v1695_v34  ;;  %v1701_v34 = vsel %vm785_vm0, %v4776_v9, 0.0  ;;  %v1418_v9 = vmul.f32 1.442695, %v1230_v63  ;;  %v1233_v63 = vsub.f32 %v5488_v17, %v7083_v33 }
 0x27e   :  { %1699 = vadd.xlane.f32.xlu1 %v1698_v62  ;;  %v7371_v2 = vpop.xlane.xlu0 %1102  ;;  %v4782_v62 = vpop.eup %4781 }
 0x27f   :  { %11584 = vst [vmem:[#allocation235_spill] sm:$0xff] %v7371_v2  ;;  %v7377_v22 = vpop.xlane.xlu1 %1105  ;;  %v4784_v1 = vpop.eup %4783  ;;  %v1710_v53 = vsel %vm785_vm0, %v4782_v62, 0.0  ;;  %4797 = vpow2.f32 %v1418_v9  ;;  %v5489_v62 = vld [vmem:[%s10858_s0 + $0x200] sm:$0xff]  ;;  %v1424_v17 = vmul.f32 1.442695, %v1233_v63  ;;  %v5490_v9 = vld [vmem:[%s10858_s0 + $0x208] sm:$0xff] }
 0x280   :  { %11585 = vst [vmem:[#allocation236_spill] sm:$0xff] %v7377_v22  ;;  %v1234_v7 = vsub.f32 %v5489_v62, %v7087_v12  ;;  %4799 = vpow2.f32 %v1420_v59 }
 0x281   :  { %1702 = vadd.xlane.f32.xlu0 %v1701_v34  ;;  %v1707_v34 = vsel %vm785_vm0, %v4780_v45, 0.0  ;;  %v1422_v45 = vmul.f32 1.442695, %v1232_v50  ;;  %v1235_v50 = vsub.f32 %v5490_v9, %v7093_v57 }
 0x282   :  { %1705 = vadd.xlane.f32.xlu1 %v1704_v25  ;;  %v7385_v18 = vpop.xlane.xlu0 %1108  ;;  %v4786_v25 = vpop.eup %4785 }
 0x283   :  { %11586 = vst [vmem:[#allocation237_spill] sm:$0xff] %v7385_v18  ;;  %v7391_v30 = vpop.xlane.xlu1 %1111  ;;  %v4788_v54 = vpop.eup %4787  ;;  %v1716_v36 = vsel %vm785_vm0, %v4786_v25, 0.0  ;;  %4801 = vpow2.f32 %v1422_v45  ;;  %v5491_v25 = vld [vmem:[%s10858_s0 + $0x210] sm:$0xff]  ;;  %v1428_v9 = vmul.f32 1.442695, %v1235_v50  ;;  %v5492_v45 = vld [vmem:[%s10858_s0 + $0x218] sm:$0xff] }
 0x284   :  { %11587 = vst [vmem:[#allocation238_spill] sm:$0xff] %v7391_v30  ;;  %v1236_v62 = vsub.f32 %v5491_v25, %v7097_v10  ;;  %4803 = vpow2.f32 %v1424_v17 }
 0x285   :  { %1708 = vadd.xlane.f32.xlu0 %v1707_v34  ;;  %v1713_v34 = vsel %vm785_vm0, %v4784_v1, 0.0  ;;  %v1426_v1 = vmul.f32 1.442695, %v1234_v7  ;;  %v1237_v7 = vsub.f32 %v5492_v45, %v7105_v4 }
 0x286   :  { %1711 = vadd.xlane.f32.xlu1 %v1710_v53  ;;  %v7399_v26 = vpop.xlane.xlu0 %1114  ;;  %v4790_v53 = vpop.eup %4789 }
 0x287   :  { %11588 = vst [vmem:[#allocation239_spill] sm:$0xff] %v7399_v26  ;;  %v7405_v8 = vpop.xlane.xlu1 %1117  ;;  %v4792_v59 = vpop.eup %4791  ;;  %v1722_v63 = vsel %vm785_vm0, %v4790_v53, 0.0  ;;  %4805 = vpow2.f32 %v1426_v1  ;;  %v5493_v53 = vld [vmem:[%s10858_s0 + $0x220] sm:$0xff]  ;;  %v1432_v45 = vmul.f32 1.442695, %v1237_v7  ;;  %v5494_v1 = vld [vmem:[%s10858_s0 + $0x228] sm:$0xff] }
 0x288   :  { %11589 = vst [vmem:[#allocation240_spill] sm:$0xff] %v7405_v8  ;;  %v1238_v25 = vsub.f32 %v5493_v53, %v7111_v3  ;;  %4807 = vpow2.f32 %v1428_v9 }
 0x289   :  { %1714 = vadd.xlane.f32.xlu0 %v1713_v34  ;;  %v1719_v34 = vsel %vm785_vm0, %v4788_v54, 0.0  ;;  %v1430_v54 = vmul.f32 1.442695, %v1236_v62  ;;  %v1239_v62 = vsub.f32 %v5494_v1, %v7119_v35 }
 0x28a   :  { %1717 = vadd.xlane.f32.xlu1 %v1716_v36  ;;  %v7413_v41 = vpop.xlane.xlu0 %1120  ;;  %v4794_v36 = vpop.eup %4793 }
 0x28b   :  { %11590 = vst [vmem:[#allocation241_spill] sm:$0xff] %v7413_v41  ;;  %v7419_v33 = vpop.xlane.xlu1 %1123  ;;  %v4796_v17 = vpop.eup %4795  ;;  %v1728_v50 = vsel %vm785_vm0, %v4794_v36, 0.0  ;;  %4809 = vpow2.f32 %v1430_v54  ;;  %v5495_v36 = vld [vmem:[%s10858_s0 + $0x230] sm:$0xff]  ;;  %v1436_v1 = vmul.f32 1.442695, %v1239_v62  ;;  %v5496_v54 = vld [vmem:[%s10858_s0 + $0x238] sm:$0xff] }
 0x28c   :  { %11591 = vst [vmem:[#allocation242_spill] sm:$0xff] %v7419_v33  ;;  %v1240_v53 = vsub.f32 %v5495_v36, %v7125_v60  ;;  %4811 = vpow2.f32 %v1432_v45 }
 0x28d   :  { %1720 = vadd.xlane.f32.xlu0 %v1719_v34  ;;  %v1725_v34 = vsel %vm785_vm0, %v4792_v59, 0.0  ;;  %v1434_v59 = vmul.f32 1.442695, %v1238_v25  ;;  %v1241_v25 = vsub.f32 %v5496_v54, %v7133_v31 }
 0x28e   :  { %1723 = vadd.xlane.f32.xlu1 %v1722_v63  ;;  %v7427_v12 = vpop.xlane.xlu0 %1126  ;;  %v4798_v63 = vpop.eup %4797 }
 0x28f   :  { %11592 = vst [vmem:[#allocation243_spill] sm:$0xff] %v7427_v12  ;;  %v7433_v57 = vpop.xlane.xlu1 %1129  ;;  %v4800_v9 = vpop.eup %4799  ;;  %v1734_v7 = vsel %vm785_vm0, %v4798_v63, 0.0  ;;  %4813 = vpow2.f32 %v1434_v59  ;;  %v5497_v63 = vld [vmem:[%s10858_s0 + $0x240] sm:$0xff]  ;;  %v1440_v54 = vmul.f32 1.442695, %v1241_v25  ;;  %v5498_v59 = vld [vmem:[%s10858_s0 + $0x248] sm:$0xff] }
 0x290   :  { %11593 = vst [vmem:[#allocation244_spill] sm:$0xff] %v7433_v57  ;;  %v1242_v36 = vsub.f32 %v5497_v63, %v7139_v56  ;;  %4815 = vpow2.f32 %v1436_v1 }
 0x291   :  { %1726 = vadd.xlane.f32.xlu0 %v1725_v34  ;;  %v1731_v34 = vsel %vm785_vm0, %v4796_v17, 0.0  ;;  %v1438_v17 = vmul.f32 1.442695, %v1240_v53  ;;  %v1243_v53 = vsub.f32 %v5498_v59, %v7147_v27 }
 0x292   :  { %1729 = vadd.xlane.f32.xlu1 %v1728_v50  ;;  %v7441_v10 = vpop.xlane.xlu0 %1132  ;;  %v4802_v50 = vpop.eup %4801 }
 0x293   :  { %11594 = vst [vmem:[#allocation245_spill] sm:$0xff] %v7441_v10  ;;  %v7447_v4 = vpop.xlane.xlu1 %1135  ;;  %v4804_v45 = vpop.eup %4803  ;;  %v1740_v62 = vsel %vm785_vm0, %v4802_v50, 0.0  ;;  %4817 = vpow2.f32 %v1438_v17  ;;  %v5499_v50 = vld [vmem:[%s10858_s0 + $0x250] sm:$0xff]  ;;  %v1444_v59 = vmul.f32 1.442695, %v1243_v53  ;;  %v5500_v17 = vld [vmem:[%s10858_s0 + $0x258] sm:$0xff] }
 0x294   :  { %11595 = vst [vmem:[#allocation246_spill] sm:$0xff] %v7447_v4  ;;  %v1244_v63 = vsub.f32 %v5499_v50, %v7153_v52  ;;  %4819 = vpow2.f32 %v1440_v54 }
 0x295   :  { %1732 = vadd.xlane.f32.xlu0 %v1731_v34  ;;  %v1737_v34 = vsel %vm785_vm0, %v4800_v9, 0.0  ;;  %v1442_v9 = vmul.f32 1.442695, %v1242_v36  ;;  %v1245_v36 = vsub.f32 %v5500_v17, %v7161_v23 }
 0x296   :  { %1735 = vadd.xlane.f32.xlu1 %v1734_v7  ;;  %v7455_v3 = vpop.xlane.xlu0 %1138  ;;  %v4806_v7 = vpop.eup %4805 }
 0x297   :  { %11596 = vst [vmem:[#allocation247_spill] sm:$0xff] %v7455_v3  ;;  %v7461_v35 = vpop.xlane.xlu1 %1141  ;;  %v4808_v1 = vpop.eup %4807  ;;  %v1746_v25 = vsel %vm785_vm0, %v4806_v7, 0.0  ;;  %4821 = vpow2.f32 %v1442_v9  ;;  %v5501_v7 = vld [vmem:[%s10858_s0 + $0x260] sm:$0xff]  ;;  %v1448_v17 = vmul.f32 1.442695, %v1245_v36  ;;  %v5502_v9 = vld [vmem:[%s10858_s0 + $0x268] sm:$0xff] }
 0x298   :  { %11597 = vst [vmem:[#allocation248_spill] sm:$0xff] %v7461_v35  ;;  %v1246_v50 = vsub.f32 %v5501_v7, %v7167_v48  ;;  %4823 = vpow2.f32 %v1444_v59 }
 0x299   :  { %1738 = vadd.xlane.f32.xlu0 %v1737_v34  ;;  %v1743_v34 = vsel %vm785_vm0, %v4804_v45, 0.0  ;;  %v1446_v45 = vmul.f32 1.442695, %v1244_v63  ;;  %v1247_v63 = vsub.f32 %v5502_v9, %v7175_v19 }
 0x29a   :  { %1741 = vadd.xlane.f32.xlu1 %v1740_v62  ;;  %v7469_v60 = vpop.xlane.xlu0 %1144  ;;  %v4810_v62 = vpop.eup %4809 }
 0x29b   :  { %11598 = vst [vmem:[#allocation249_spill] sm:$0xff] %v7469_v60  ;;  %v7475_v31 = vpop.xlane.xlu1 %1147  ;;  %v4812_v54 = vpop.eup %4811  ;;  %v1752_v53 = vsel %vm785_vm0, %v4810_v62, 0.0  ;;  %4825 = vpow2.f32 %v1446_v45  ;;  %v5503_v62 = vld [vmem:[%s10858_s0 + $0x270] sm:$0xff]  ;;  %v1452_v9 = vmul.f32 1.442695, %v1247_v63  ;;  %v5504_v45 = vld [vmem:[%s10858_s0 + $0x278] sm:$0xff] }
 0x29c   :  { %11599 = vst [vmem:[#allocation250_spill] sm:$0xff] %v7475_v31  ;;  %v1248_v7 = vsub.f32 %v5503_v62, %v7181_v44  ;;  %4827 = vpow2.f32 %v1448_v17 }
 0x29d   :  { %1744 = vadd.xlane.f32.xlu0 %v1743_v34  ;;  %v1749_v34 = vsel %vm785_vm0, %v4808_v1, 0.0  ;;  %v1450_v1 = vmul.f32 1.442695, %v1246_v50  ;;  %v1249_v50 = vsub.f32 %v5504_v45, %v7189_v15 }
 0x29e   :  { %1747 = vadd.xlane.f32.xlu1 %v1746_v25  ;;  %v7483_v56 = vpop.xlane.xlu0 %1150  ;;  %v4814_v25 = vpop.eup %4813 }
 0x29f   :  { %11600 = vst [vmem:[#allocation251_spill] sm:$0xff] %v7483_v56  ;;  %v7489_v27 = vpop.xlane.xlu1 %1153  ;;  %v4816_v59 = vpop.eup %4815  ;;  %v1758_v36 = vsel %vm785_vm0, %v4814_v25, 0.0  ;;  %4829 = vpow2.f32 %v1450_v1  ;;  %v5505_v25 = vld [vmem:[%s10858_s0 + $0x280] sm:$0xff]  ;;  %v1456_v45 = vmul.f32 1.442695, %v1249_v50  ;;  %v5506_v1 = vld [vmem:[%s10858_s0 + $0x288] sm:$0xff] }
 0x2a0   :  { %11601 = vst [vmem:[#allocation252_spill] sm:$0xff] %v7489_v27  ;;  %v1250_v62 = vsub.f32 %v5505_v25, %v7195_v40  ;;  %4831 = vpow2.f32 %v1452_v9 }
 0x2a1   :  { %1750 = vadd.xlane.f32.xlu0 %v1749_v34  ;;  %v1755_v34 = vsel %vm785_vm0, %v4812_v54, 0.0  ;;  %v1454_v54 = vmul.f32 1.442695, %v1248_v7  ;;  %v1251_v7 = vsub.f32 %v5506_v1, %v7203_v11 }
 0x2a2   :  { %1753 = vadd.xlane.f32.xlu1 %v1752_v53  ;;  %v7497_v52 = vpop.xlane.xlu0 %1156  ;;  %v4818_v53 = vpop.eup %4817 }
 0x2a3   :  { %11602 = vst [vmem:[#allocation253_spill] sm:$0xff] %v7497_v52  ;;  %v7503_v23 = vpop.xlane.xlu1 %1159  ;;  %v4820_v17 = vpop.eup %4819  ;;  %v1764_v63 = vsel %vm785_vm0, %v4818_v53, 0.0  ;;  %4833 = vpow2.f32 %v1454_v54  ;;  %v5507_v53 = vld [vmem:[%s10858_s0 + $0x290] sm:$0xff]  ;;  %v1460_v1 = vmul.f32 1.442695, %v1251_v7  ;;  %v5508_v54 = vld [vmem:[%s10858_s0 + $0x298] sm:$0xff] }
 0x2a4   :  { %11603 = vst [vmem:[#allocation254_spill] sm:$0xff] %v7503_v23  ;;  %v1252_v25 = vsub.f32 %v5507_v53, %v7209_v0  ;;  %4835 = vpow2.f32 %v1456_v45 }
 0x2a5   :  { %1756 = vadd.xlane.f32.xlu0 %v1755_v34  ;;  %v1761_v34 = vsel %vm785_vm0, %v4816_v59, 0.0  ;;  %v1458_v59 = vmul.f32 1.442695, %v1250_v62  ;;  %v1253_v62 = vsub.f32 %v5508_v54, %v7217_v39 }
 0x2a6   :  { %1759 = vadd.xlane.f32.xlu1 %v1758_v36  ;;  %v7511_v48 = vpop.xlane.xlu0 %1162  ;;  %v4822_v36 = vpop.eup %4821 }
 0x2a7   :  { %11604 = vst [vmem:[#allocation255_spill] sm:$0xff] %v7511_v48  ;;  %v7517_v19 = vpop.xlane.xlu1 %1165  ;;  %v4824_v9 = vpop.eup %4823  ;;  %v1770_v50 = vsel %vm785_vm0, %v4822_v36, 0.0  ;;  %4837 = vpow2.f32 %v1458_v59  ;;  %v5509_v36 = vld [vmem:[%s10858_s0 + $0x2a0] sm:$0xff]  ;;  %v1464_v54 = vmul.f32 1.442695, %v1253_v62  ;;  %v5510_v59 = vld [vmem:[%s10858_s0 + $0x2a8] sm:$0xff] }
 0x2a8   :  { %11605 = vst [vmem:[#allocation256_spill] sm:$0xff] %v7517_v19  ;;  %v1254_v53 = vsub.f32 %v5509_v36, %v7223_v6  ;;  %4839 = vpow2.f32 %v1460_v1 }
 0x2a9   :  { %1762 = vadd.xlane.f32.xlu0 %v1761_v34  ;;  %v1767_v34 = vsel %vm785_vm0, %v4820_v17, 0.0  ;;  %v1462_v17 = vmul.f32 1.442695, %v1252_v25  ;;  %v1255_v25 = vsub.f32 %v5510_v59, %v7231_v43 }
 0x2aa   :  { %1765 = vadd.xlane.f32.xlu1 %v1764_v63  ;;  %v7525_v44 = vpop.xlane.xlu0 %1168  ;;  %v4826_v63 = vpop.eup %4825 }
 0x2ab   :  { %11606 = vst [vmem:[#allocation257_spill] sm:$0xff] %v7525_v44  ;;  %v7531_v15 = vpop.xlane.xlu1 %1555  ;;  %v4828_v45 = vpop.eup %4827  ;;  %v1776_v7 = vsel %vm785_vm0, %v4826_v63, 0.0  ;;  %4841 = vpow2.f32 %v1462_v17  ;;  %v5511_v63 = vld [vmem:[%s10858_s0 + $0x2b0] sm:$0xff]  ;;  %v1468_v59 = vmul.f32 1.442695, %v1255_v25  ;;  %v5512_v17 = vld [vmem:[%s10858_s0 + $0x2b8] sm:$0xff] }
 0x2ac   :  { %v1256_v36 = vsub.f32 %v5511_v63, %v7237_v61  ;;  %4843 = vpow2.f32 %v1464_v54 }
 0x2ad   :  { %1768 = vadd.xlane.f32.xlu0 %v1767_v34  ;;  %v1773_v34 = vsel %vm785_vm0, %v4824_v9, 0.0  ;;  %v1466_v9 = vmul.f32 1.442695, %v1254_v53  ;;  %v1257_v53 = vsub.f32 %v5512_v17, %v7245_v47 }
 0x2ae   :  { %1771 = vadd.xlane.f32.xlu1 %v1770_v50  ;;  %v7539_v40 = vpop.xlane.xlu0 %1558  ;;  %v4830_v50 = vpop.eup %4829 }
 0x2af   :  { %v7545_v11 = vpop.xlane.xlu1 %1561  ;;  %v4832_v1 = vpop.eup %4831  ;;  %v1782_v62 = vsel %vm785_vm0, %v4830_v50, 0.0  ;;  %4845 = vpow2.f32 %v1466_v9  ;;  %v5513_v50 = vld [vmem:[%s10858_s0 + $0x2c0] sm:$0xff]  ;;  %v1472_v17 = vmul.f32 1.442695, %v1257_v53  ;;  %v5514_v9 = vld [vmem:[%s10858_s0 + $0x2c8] sm:$0xff] }
 0x2b0   :  { %v1258_v63 = vsub.f32 %v5513_v50, %v7251_v29  ;;  %4847 = vpow2.f32 %v1468_v59 }
 0x2b1   :  { %1774 = vadd.xlane.f32.xlu0 %v1773_v34  ;;  %v1779_v34 = vsel %vm785_vm0, %v4828_v45, 0.0  ;;  %v1470_v45 = vmul.f32 1.442695, %v1256_v36  ;;  %v1259_v36 = vsub.f32 %v5514_v9, %v7259_v51 }
 0x2b2   :  { %1777 = vadd.xlane.f32.xlu1 %v1776_v7  ;;  %v7553_v0 = vpop.xlane.xlu0 %1564  ;;  %v4834_v7 = vpop.eup %4833 }
 0x2b3   :  { %v7559_v39 = vpop.xlane.xlu1 %1567  ;;  %v4836_v54 = vpop.eup %4835  ;;  %v1788_v25 = vsel %vm785_vm0, %v4834_v7, 0.0  ;;  %4849 = vpow2.f32 %v1470_v45  ;;  %v5515_v7 = vld [vmem:[%s10858_s0 + $0x2d0] sm:$0xff]  ;;  %v1476_v9 = vmul.f32 1.442695, %v1259_v36  ;;  %v5516_v45 = vld [vmem:[%s10858_s0 + $0x2d8] sm:$0xff] }
 0x2b4   :  { %v1260_v50 = vsub.f32 %v5515_v7, %v7265_v14  ;;  %4851 = vpow2.f32 %v1472_v17 }
 0x2b5   :  { %1780 = vadd.xlane.f32.xlu0 %v1779_v34  ;;  %v1785_v34 = vsel %vm785_vm0, %v4832_v1, 0.0  ;;  %v1474_v1 = vmul.f32 1.442695, %v1258_v63  ;;  %v1261_v63 = vsub.f32 %v5516_v45, %v7273_v55 }
 0x2b6   :  { %1783 = vadd.xlane.f32.xlu1 %v1782_v62  ;;  %v7567_v6 = vpop.xlane.xlu0 %1570  ;;  %v4838_v62 = vpop.eup %4837 }
 0x2b7   :  { %v7573_v43 = vpop.xlane.xlu1 %1573  ;;  %v4840_v59 = vpop.eup %4839  ;;  %v1794_v53 = vsel %vm785_vm0, %v4838_v62, 0.0  ;;  %4853 = vpow2.f32 %v1474_v1  ;;  %v5517_v62 = vld [vmem:[%s10858_s0 + $0x2e0] sm:$0xff]  ;;  %v1480_v45 = vmul.f32 1.442695, %v1261_v63  ;;  %v5518_v1 = vld [vmem:[%s10858_s0 + $0x2e8] sm:$0xff] }
 0x2b8   :  { %v1262_v7 = vsub.f32 %v5517_v62, %v7279_v42  ;;  %4855 = vpow2.f32 %v1476_v9 }
 0x2b9   :  { %1786 = vadd.xlane.f32.xlu0 %v1785_v34  ;;  %v1791_v34 = vsel %vm785_vm0, %v4836_v54, 0.0  ;;  %v1478_v54 = vmul.f32 1.442695, %v1260_v50  ;;  %v1263_v50 = vsub.f32 %v5518_v1, %v7287_v21 }
 0x2ba   :  { %1789 = vadd.xlane.f32.xlu1 %v1788_v25  ;;  %v7581_v61 = vpop.xlane.xlu0 %1576  ;;  %v4842_v25 = vpop.eup %4841 }
 0x2bb   :  { %v7587_v47 = vpop.xlane.xlu1 %1579  ;;  %v4844_v17 = vpop.eup %4843  ;;  %v1800_v36 = vsel %vm785_vm0, %v4842_v25, 0.0  ;;  %4857 = vpow2.f32 %v1478_v54  ;;  %v5519_v25 = vld [vmem:[%s10858_s0 + $0x2f0] sm:$0xff]  ;;  %v1484_v1 = vmul.f32 1.442695, %v1263_v50  ;;  %v5520_v54 = vld [vmem:[%s10858_s0 + $0x2f8] sm:$0xff] }
 0x2bc   :  { %v1264_v62 = vsub.f32 %v5519_v25, %v7293_v5  ;;  %4859 = vpow2.f32 %v1480_v45 }
 0x2bd   :  { %1792 = vadd.xlane.f32.xlu0 %v1791_v34  ;;  %v1797_v34 = vsel %vm785_vm0, %v4840_v59, 0.0  ;;  %v1482_v59 = vmul.f32 1.442695, %v1262_v7  ;;  %v1265_v7 = vsub.f32 %v5520_v54, %v7301_v20 }
 0x2be   :  { %1795 = vadd.xlane.f32.xlu1 %v1794_v53  ;;  %v7595_v29 = vpop.xlane.xlu0 %1582  ;;  %v4846_v53 = vpop.eup %4845 }
 0x2bf   :  { %v7601_v51 = vpop.xlane.xlu1 %1585  ;;  %v4848_v9 = vpop.eup %4847  ;;  %v1806_v63 = vsel %vm785_vm0, %v4846_v53, 0.0  ;;  %4861 = vpow2.f32 %v1482_v59  ;;  %v5521_v53 = vld [vmem:[%s10858_s0 + $0x300] sm:$0xff]  ;;  %v1488_v54 = vmul.f32 1.442695, %v1265_v7  ;;  %v5522_v59 = vld [vmem:[%s10858_s0 + $0x308] sm:$0xff] }
 0x2c0   :  { %v1266_v25 = vsub.f32 %v5521_v53, %v7307_v46  ;;  %4863 = vpow2.f32 %v1484_v1 }
 0x2c1   :  { %1798 = vadd.xlane.f32.xlu0 %v1797_v34  ;;  %v1803_v34 = vsel %vm785_vm0, %v4844_v17, 0.0  ;;  %v1486_v17 = vmul.f32 1.442695, %v1264_v62  ;;  %v1267_v62 = vsub.f32 %v5522_v59, %v7315_v16 }
 0x2c2   :  { %1801 = vadd.xlane.f32.xlu1 %v1800_v36  ;;  %v7609_v14 = vpop.xlane.xlu0 %1588  ;;  %v4850_v36 = vpop.eup %4849 }
 0x2c3   :  { %v7615_v55 = vpop.xlane.xlu1 %1591  ;;  %v4852_v45 = vpop.eup %4851  ;;  %v1812_v50 = vsel %vm785_vm0, %v4850_v36, 0.0  ;;  %4865 = vpow2.f32 %v1486_v17  ;;  %v5523_v36 = vld [vmem:[%s10858_s0 + $0x310] sm:$0xff]  ;;  %v1492_v59 = vmul.f32 1.442695, %v1267_v62  ;;  %v5524_v17 = vld [vmem:[%s10858_s0 + $0x318] sm:$0xff] }
 0x2c4   :  { %v1268_v53 = vsub.f32 %v5523_v36, %v7321_v24  ;;  %4867 = vpow2.f32 %v1488_v54 }
 0x2c5   :  { %1804 = vadd.xlane.f32.xlu0 %v1803_v34  ;;  %v1809_v34 = vsel %vm785_vm0, %v4848_v9, 0.0  ;;  %v1490_v9 = vmul.f32 1.442695, %v1266_v25  ;;  %v1269_v25 = vsub.f32 %v5524_v17, %v7329_v32 }
 0x2c6   :  { %1807 = vadd.xlane.f32.xlu1 %v1806_v63  ;;  %v7623_v42 = vpop.xlane.xlu0 %1594  ;;  %v4854_v63 = vpop.eup %4853 }
 0x2c7   :  { %v7629_v21 = vpop.xlane.xlu1 %1597  ;;  %v4856_v1 = vpop.eup %4855  ;;  %v1818_v7 = vsel %vm785_vm0, %v4854_v63, 0.0  ;;  %4869 = vpow2.f32 %v1490_v9  ;;  %v5525_v63 = vld [vmem:[%s10858_s0 + $0x320] sm:$0xff]  ;;  %v1496_v17 = vmul.f32 1.442695, %v1269_v25  ;;  %v5526_v9 = vld [vmem:[%s10858_s0 + $0x328] sm:$0xff] }
 0x2c8   :  { %v1270_v36 = vsub.f32 %v5525_v63, %v7335_v38  ;;  %4871 = vpow2.f32 %v1492_v59 }
 0x2c9   :  { %1810 = vadd.xlane.f32.xlu0 %v1809_v34  ;;  %v1815_v34 = vsel %vm785_vm0, %v4852_v45, 0.0  ;;  %v1494_v45 = vmul.f32 1.442695, %v1268_v53  ;;  %v1271_v53 = vsub.f32 %v5526_v9, %v7343_v58 }
 0x2ca   :  { %1813 = vadd.xlane.f32.xlu1 %v1812_v50  ;;  %v7637_v5 = vpop.xlane.xlu0 %1600  ;;  %v4858_v50 = vpop.eup %4857 }
 0x2cb   :  { %v7643_v20 = vpop.xlane.xlu1 %1603  ;;  %v4860_v54 = vpop.eup %4859  ;;  %v1824_v62 = vsel %vm785_vm0, %v4858_v50, 0.0  ;;  %4873 = vpow2.f32 %v1494_v45  ;;  %v5527_v50 = vld [vmem:[%s10858_s0 + $0x330] sm:$0xff]  ;;  %v1500_v9 = vmul.f32 1.442695, %v1271_v53  ;;  %v5528_v45 = vld [vmem:[%s10858_s0 + $0x338] sm:$0xff] }
 0x2cc   :  { %v1272_v63 = vsub.f32 %v5527_v50, %v7349_v37  ;;  %4875 = vpow2.f32 %v1496_v17 }
 0x2cd   :  { %1816 = vadd.xlane.f32.xlu0 %v1815_v34  ;;  %v1821_v34 = vsel %vm785_vm0, %v4856_v1, 0.0  ;;  %v1498_v1 = vmul.f32 1.442695, %v1270_v36  ;;  %v1273_v36 = vsub.f32 %v5528_v45, %v7357_v49 }
 0x2ce   :  { %1819 = vadd.xlane.f32.xlu1 %v1818_v7  ;;  %v7651_v46 = vpop.xlane.xlu0 %1606  ;;  %v4862_v7 = vpop.eup %4861 }
 0x2cf   :  { %v7657_v16 = vpop.xlane.xlu1 %1609  ;;  %v4864_v59 = vpop.eup %4863  ;;  %v1830_v25 = vsel %vm785_vm0, %v4862_v7, 0.0  ;;  %4877 = vpow2.f32 %v1498_v1  ;;  %v5529_v7 = vld [vmem:[%s10858_s0 + $0x340] sm:$0xff]  ;;  %v1504_v45 = vmul.f32 1.442695, %v1273_v36  ;;  %v5530_v1 = vld [vmem:[%s10858_s0 + $0x348] sm:$0xff] }
 0x2d0   :  { %v1274_v50 = vsub.f32 %v5529_v7, %v7363_v28  ;;  %4879 = vpow2.f32 %v1500_v9 }
 0x2d1   :  { %1822 = vadd.xlane.f32.xlu0 %v1821_v34  ;;  %v1827_v34 = vsel %vm785_vm0, %v4860_v54, 0.0  ;;  %v1502_v54 = vmul.f32 1.442695, %v1272_v63  ;;  %v1275_v63 = vsub.f32 %v5530_v1, %v7371_v2 }
 0x2d2   :  { %1825 = vadd.xlane.f32.xlu1 %v1824_v62  ;;  %v7665_v24 = vpop.xlane.xlu0 %1612  ;;  %v4866_v62 = vpop.eup %4865 }
 0x2d3   :  { %v7671_v32 = vpop.xlane.xlu1 %1615  ;;  %v4868_v17 = vpop.eup %4867  ;;  %v1836_v53 = vsel %vm785_vm0, %v4866_v62, 0.0  ;;  %4881 = vpow2.f32 %v1502_v54  ;;  %v5531_v62 = vld [vmem:[%s10858_s0 + $0x350] sm:$0xff]  ;;  %v1508_v1 = vmul.f32 1.442695, %v1275_v63  ;;  %v5532_v54 = vld [vmem:[%s10858_s0 + $0x358] sm:$0xff] }
 0x2d4   :  { %v1276_v7 = vsub.f32 %v5531_v62, %v7377_v22  ;;  %4883 = vpow2.f32 %v1504_v45 }
 0x2d5   :  { %1828 = vadd.xlane.f32.xlu0 %v1827_v34  ;;  %v1833_v34 = vsel %vm785_vm0, %v4864_v59, 0.0  ;;  %v1506_v59 = vmul.f32 1.442695, %v1274_v50  ;;  %v1277_v50 = vsub.f32 %v5532_v54, %v7385_v18 }
 0x2d6   :  { %1831 = vadd.xlane.f32.xlu1 %v1830_v25  ;;  %v7679_v38 = vpop.xlane.xlu0 %1618  ;;  %v4870_v25 = vpop.eup %4869 }
 0x2d7   :  { %v7685_v58 = vpop.xlane.xlu1 %1621  ;;  %v4872_v9 = vpop.eup %4871  ;;  %v1842_v36 = vsel %vm785_vm0, %v4870_v25, 0.0  ;;  %4885 = vpow2.f32 %v1506_v59  ;;  %v5533_v25 = vld [vmem:[%s10858_s0 + $0x360] sm:$0xff]  ;;  %v1512_v54 = vmul.f32 1.442695, %v1277_v50  ;;  %v5534_v59 = vld [vmem:[%s10858_s0 + $0x368] sm:$0xff] }
 0x2d8   :  { %v1278_v62 = vsub.f32 %v5533_v25, %v7391_v30  ;;  %4887 = vpow2.f32 %v1508_v1 }
 0x2d9   :  { %1834 = vadd.xlane.f32.xlu0 %v1833_v34  ;;  %v1839_v34 = vsel %vm785_vm0, %v4868_v17, 0.0  ;;  %v1510_v17 = vmul.f32 1.442695, %v1276_v7  ;;  %v1279_v7 = vsub.f32 %v5534_v59, %v7399_v26 }
 0x2da   :  { %1837 = vadd.xlane.f32.xlu1 %v1836_v53  ;;  %v7693_v37 = vpop.xlane.xlu0 %1624  ;;  %v4874_v53 = vpop.eup %4873 }
 0x2db   :  { %v7699_v49 = vpop.xlane.xlu1 %1627  ;;  %v4876_v45 = vpop.eup %4875  ;;  %v1848_v63 = vsel %vm785_vm0, %v4874_v53, 0.0  ;;  %4889 = vpow2.f32 %v1510_v17  ;;  %v5535_v53 = vld [vmem:[%s10858_s0 + $0x370] sm:$0xff]  ;;  %v1516_v59 = vmul.f32 1.442695, %v1279_v7  ;;  %v5536_v17 = vld [vmem:[%s10858_s0 + $0x378] sm:$0xff] }
 0x2dc   :  { %v1280_v25 = vsub.f32 %v5535_v53, %v7405_v8  ;;  %4891 = vpow2.f32 %v1512_v54 }
 0x2dd   :  { %1840 = vadd.xlane.f32.xlu0 %v1839_v34  ;;  %v1845_v34 = vsel %vm785_vm0, %v4872_v9, 0.0  ;;  %v1514_v9 = vmul.f32 1.442695, %v1278_v62  ;;  %v1281_v62 = vsub.f32 %v5536_v17, %v7413_v41 }
 0x2de   :  { %1843 = vadd.xlane.f32.xlu1 %v1842_v36  ;;  %v7707_v28 = vpop.xlane.xlu0 %1630  ;;  %v4878_v36 = vpop.eup %4877 }
 0x2df   :  { %v7713_v2 = vpop.xlane.xlu1 %1633  ;;  %v4880_v1 = vpop.eup %4879  ;;  %v1854_v50 = vsel %vm785_vm0, %v4878_v36, 0.0  ;;  %4893 = vpow2.f32 %v1514_v9  ;;  %v5537_v36 = vld [vmem:[%s10858_s0 + $0x380] sm:$0xff]  ;;  %v1520_v17 = vmul.f32 1.442695, %v1281_v62  ;;  %v5538_v9 = vld [vmem:[%s10858_s0 + $0x388] sm:$0xff] }
 0x2e0   :  { %v1282_v53 = vsub.f32 %v5537_v36, %v7419_v33  ;;  %4895 = vpow2.f32 %v1516_v59 }
 0x2e1   :  { %1846 = vadd.xlane.f32.xlu0 %v1845_v34  ;;  %v1851_v34 = vsel %vm785_vm0, %v4876_v45, 0.0  ;;  %v1518_v45 = vmul.f32 1.442695, %v1280_v25  ;;  %v1283_v25 = vsub.f32 %v5538_v9, %v7427_v12 }
 0x2e2   :  { %1849 = vadd.xlane.f32.xlu1 %v1848_v63  ;;  %v7721_v22 = vpop.xlane.xlu0 %1636  ;;  %v4882_v63 = vpop.eup %4881 }
 0x2e3   :  { %v7727_v18 = vpop.xlane.xlu1 %1639  ;;  %v4884_v54 = vpop.eup %4883  ;;  %v1860_v7 = vsel %vm785_vm0, %v4882_v63, 0.0  ;;  %4897 = vpow2.f32 %v1518_v45  ;;  %v5539_v63 = vld [vmem:[%s10858_s0 + $0x390] sm:$0xff]  ;;  %v1524_v9 = vmul.f32 1.442695, %v1283_v25  ;;  %v5540_v45 = vld [vmem:[%s10858_s0 + $0x398] sm:$0xff] }
 0x2e4   :  { %v1284_v36 = vsub.f32 %v5539_v63, %v7433_v57  ;;  %4899 = vpow2.f32 %v1520_v17 }
 0x2e5   :  { %1852 = vadd.xlane.f32.xlu0 %v1851_v34  ;;  %v1857_v34 = vsel %vm785_vm0, %v4880_v1, 0.0  ;;  %v1522_v1 = vmul.f32 1.442695, %v1282_v53  ;;  %v1285_v53 = vsub.f32 %v5540_v45, %v7441_v10 }
 0x2e6   :  { %1855 = vadd.xlane.f32.xlu1 %v1854_v50  ;;  %v7735_v30 = vpop.xlane.xlu0 %1642  ;;  %v4886_v50 = vpop.eup %4885 }
 0x2e7   :  { %v7741_v26 = vpop.xlane.xlu1 %1645  ;;  %v4888_v59 = vpop.eup %4887  ;;  %v1866_v62 = vsel %vm785_vm0, %v4886_v50, 0.0  ;;  %4901 = vpow2.f32 %v1522_v1  ;;  %v5541_v50 = vld [vmem:[%s10858_s0 + $0x3a0] sm:$0xff]  ;;  %v1528_v45 = vmul.f32 1.442695, %v1285_v53  ;;  %v5542_v1 = vld [vmem:[%s10858_s0 + $0x3a8] sm:$0xff] }
 0x2e8   :  { %v1286_v63 = vsub.f32 %v5541_v50, %v7447_v4  ;;  %4903 = vpow2.f32 %v1524_v9 }
 0x2e9   :  { %1858 = vadd.xlane.f32.xlu0 %v1857_v34  ;;  %v1863_v34 = vsel %vm785_vm0, %v4884_v54, 0.0  ;;  %v1526_v54 = vmul.f32 1.442695, %v1284_v36  ;;  %v1287_v36 = vsub.f32 %v5542_v1, %v7455_v3 }
 0x2ea   :  { %1861 = vadd.xlane.f32.xlu1 %v1860_v7  ;;  %v7749_v8 = vpop.xlane.xlu0 %1648  ;;  %v4890_v7 = vpop.eup %4889 }
 0x2eb   :  { %v7755_v41 = vpop.xlane.xlu1 %1651  ;;  %v4892_v17 = vpop.eup %4891  ;;  %v1872_v25 = vsel %vm785_vm0, %v4890_v7, 0.0  ;;  %4905 = vpow2.f32 %v1526_v54  ;;  %v5543_v7 = vld [vmem:[%s10858_s0 + $0x3b0] sm:$0xff]  ;;  %v1532_v1 = vmul.f32 1.442695, %v1287_v36  ;;  %v5544_v54 = vld [vmem:[%s10858_s0 + $0x3b8] sm:$0xff] }
 0x2ec   :  { %v1288_v50 = vsub.f32 %v5543_v7, %v7461_v35  ;;  %4907 = vpow2.f32 %v1528_v45 }
 0x2ed   :  { %1864 = vadd.xlane.f32.xlu0 %v1863_v34  ;;  %v1869_v34 = vsel %vm785_vm0, %v4888_v59, 0.0  ;;  %v1530_v59 = vmul.f32 1.442695, %v1286_v63  ;;  %v1289_v63 = vsub.f32 %v5544_v54, %v7469_v60 }
 0x2ee   :  { %1867 = vadd.xlane.f32.xlu1 %v1866_v62  ;;  %v7763_v33 = vpop.xlane.xlu0 %1654  ;;  %v4894_v62 = vpop.eup %4893 }
 0x2ef   :  { %v7769_v12 = vpop.xlane.xlu1 %1657  ;;  %v4896_v9 = vpop.eup %4895  ;;  %v1878_v53 = vsel %vm785_vm0, %v4894_v62, 0.0  ;;  %4909 = vpow2.f32 %v1530_v59  ;;  %v5545_v62 = vld [vmem:[%s10858_s0 + $0x3c0] sm:$0xff]  ;;  %v1536_v54 = vmul.f32 1.442695, %v1289_v63  ;;  %v5546_v59 = vld [vmem:[%s10858_s0 + $0x3c8] sm:$0xff] }
 0x2f0   :  { %v1290_v7 = vsub.f32 %v5545_v62, %v7475_v31  ;;  %4911 = vpow2.f32 %v1532_v1 }
 0x2f1   :  { %1870 = vadd.xlane.f32.xlu0 %v1869_v34  ;;  %v1875_v34 = vsel %vm785_vm0, %v4892_v17, 0.0  ;;  %v1534_v17 = vmul.f32 1.442695, %v1288_v50  ;;  %v1291_v50 = vsub.f32 %v5546_v59, %v7483_v56 }
 0x2f2   :  { %1873 = vadd.xlane.f32.xlu1 %v1872_v25  ;;  %v7777_v57 = vpop.xlane.xlu0 %1660  ;;  %v4898_v25 = vpop.eup %4897 }
 0x2f3   :  { %v7783_v10 = vpop.xlane.xlu1 %1663  ;;  %v4900_v45 = vpop.eup %4899  ;;  %v1884_v36 = vsel %vm785_vm0, %v4898_v25, 0.0  ;;  %4913 = vpow2.f32 %v1534_v17  ;;  %v5547_v25 = vld [vmem:[%s10858_s0 + $0x3d0] sm:$0xff]  ;;  %v1540_v59 = vmul.f32 1.442695, %v1291_v50  ;;  %v5548_v17 = vld [vmem:[%s10858_s0 + $0x3d8] sm:$0xff] }
 0x2f4   :  { %v1292_v62 = vsub.f32 %v5547_v25, %v7489_v27  ;;  %4915 = vpow2.f32 %v1536_v54 }
 0x2f5   :  { %1876 = vadd.xlane.f32.xlu0 %v1875_v34  ;;  %v1881_v34 = vsel %vm785_vm0, %v4896_v9, 0.0  ;;  %v1538_v9 = vmul.f32 1.442695, %v1290_v7  ;;  %v1293_v7 = vsub.f32 %v5548_v17, %v7497_v52 }
 0x2f6   :  { %1879 = vadd.xlane.f32.xlu1 %v1878_v53  ;;  %v7791_v4 = vpop.xlane.xlu0 %1666  ;;  %v4902_v53 = vpop.eup %4901 }
 0x2f7   :  { %v7797_v3 = vpop.xlane.xlu1 %1669  ;;  %v4904_v1 = vpop.eup %4903  ;;  %v1890_v63 = vsel %vm785_vm0, %v4902_v53, 0.0  ;;  %4917 = vpow2.f32 %v1538_v9  ;;  %v5549_v53 = vld [vmem:[%s10858_s0 + $0x3e0] sm:$0xff]  ;;  %v1544_v17 = vmul.f32 1.442695, %v1293_v7  ;;  %v5550_v9 = vld [vmem:[%s10858_s0 + $0x3e8] sm:$0xff] }
 0x2f8   :  { %v1294_v25 = vsub.f32 %v5549_v53, %v7503_v23  ;;  %4919 = vpow2.f32 %v1540_v59 }
 0x2f9   :  { %1882 = vadd.xlane.f32.xlu0 %v1881_v34  ;;  %v1887_v34 = vsel %vm785_vm0, %v4900_v45, 0.0  ;;  %v1542_v45 = vmul.f32 1.442695, %v1292_v62  ;;  %v1295_v62 = vsub.f32 %v5550_v9, %v7511_v48 }
 0x2fa   :  { %1885 = vadd.xlane.f32.xlu1 %v1884_v36  ;;  %v7805_v35 = vpop.xlane.xlu0 %1672  ;;  %v4906_v36 = vpop.eup %4905 }
 0x2fb   :  { %v7811_v60 = vpop.xlane.xlu1 %1675  ;;  %v4908_v54 = vpop.eup %4907  ;;  %v1896_v50 = vsel %vm785_vm0, %v4906_v36, 0.0  ;;  %4921 = vpow2.f32 %v1542_v45  ;;  %v5551_v36 = vld [vmem:[%s10858_s0 + $0x3f0] sm:$0xff]  ;;  %v1548_v9 = vmul.f32 1.442695, %v1295_v62  ;;  %v5552_v45 = vld [vmem:[%s10858_s0 + $0x3f8] sm:$0xff] }
 0x2fc   :  { %v1296_v53 = vsub.f32 %v5551_v36, %v7517_v19  ;;  %4923 = vpow2.f32 %v1544_v17 }
 0x2fd   :  { %1888 = vadd.xlane.f32.xlu0 %v1887_v34  ;;  %v1893_v34 = vsel %vm785_vm0, %v4904_v1, 0.0  ;;  %v1546_v1 = vmul.f32 1.442695, %v1294_v25  ;;  %v1297_v25 = vsub.f32 %v5552_v45, %v7525_v44 }
 0x2fe   :  { %1891 = vadd.xlane.f32.xlu1 %v1890_v63  ;;  %v7819_v31 = vpop.xlane.xlu0 %1678  ;;  %v4910_v63 = vpop.eup %4909 }
 0x2ff   :  { %v7825_v56 = vpop.xlane.xlu1 %1681  ;;  %v4912_v59 = vpop.eup %4911  ;;  %v1902_v7 = vsel %vm785_vm0, %v4910_v63, 0.0  ;;  %4925 = vpow2.f32 %v1546_v1  ;;  %v1552_v62 = vmul.f32 1.442695, %v1297_v25 }
 0x300   :  { %v1905_v36 = vsel %vm785_vm0, %v4912_v59, 0.0  ;;  %4927 = vpow2.f32 %v1548_v9 }
 0x301   :  { %1894 = vadd.xlane.f32.xlu0 %v1893_v34  ;;  %v1899_v34 = vsel %vm785_vm0, %v4908_v54, 0.0  ;;  %v1550_v54 = vmul.f32 1.442695, %v1296_v53 }
 0x302   :  { %1897 = vadd.xlane.f32.xlu1 %v1896_v50  ;;  %v7833_v27 = vpop.xlane.xlu0 %1684  ;;  %v4914_v50 = vpop.eup %4913 }
 0x303   :  { %v7839_v52 = vpop.xlane.xlu1 %1687  ;;  %v1908_v63 = vsel %vm785_vm0, %v4914_v50, 0.0  ;;  %4929 = vpow2.f32 %v1550_v54  ;;  %v271_v50 = vlaneseq }
 0x304   :  { %4931 = vpow2.f32 %v1552_v62 }
 0x305   :  { %1900 = vadd.xlane.f32.xlu0 %v1899_v34  ;;  %v4916_v34 = vpop.eup %4915  ;;  %4933 = vlog2.f32 %v7531_v15 }
 0x306   :  { %1903 = vadd.xlane.f32.xlu1 %v1902_v7  ;;  %v7847_v23 = vpop.xlane.xlu0 %1690  ;;  %v4918_v7 = vpop.eup %4917  ;;  %v1911_v45 = vsel %vm785_vm0, %v4916_v34, 0.0  ;;  %4935 = vlog2.f32 %v7539_v40 }
 0x307   :  { %v7853_v48 = vpop.xlane.xlu1 %1693  ;;  %v4920_v44 = vpop.eup %4919  ;;  %v1914_v1 = vsel %vm785_vm0, %v4918_v7, 0.0  ;;  %4937 = vlog2.f32 %v7545_v11 }
 0x308   :  { %v4922_v53 = vpop.eup %4921  ;;  %v1917_v9 = vsel %vm785_vm0, %v4920_v44, 0.0  ;;  %4939 = vlog2.f32 %v7553_v0 }
 0x309   :  { %1906 = vadd.xlane.f32.xlu0 %v1905_v36  ;;  %v4924_v25 = vpop.eup %4923  ;;  %v1920_v54 = vsel %vm785_vm0, %v4922_v53, 0.0  ;;  %4941 = vlog2.f32 %v7559_v39 }
 0x30a   :  { %1909 = vadd.xlane.f32.xlu1 %v1908_v63  ;;  %v7857_v17 = vpop.xlane.xlu0 %1696  ;;  %v4926_v63 = vpop.eup %4925  ;;  %4943 = vlog2.f32 %v7567_v6  ;;  %v11762_v6 = vld [vmem:[#allocation130_spill] sm:$0xff] }
 0x30b   :  { %v7859_v19 = vpop.xlane.xlu1 %1699  ;;  %v1926_v62 = vsel %vm785_vm0, %v4926_v63, 0.0  ;;  %4945 = vlog2.f32 %v7573_v43  ;;  %v11763_v43 = vld [vmem:[#allocation77_spill] sm:$0xff] }
 0x30c   :  { %11607 = vst [vmem:[#allocation258_spill] sm:$0xff] %v7859_v19  ;;  %4947 = vlog2.f32 %v7581_v61 }
 0x30d   :  { %1912 = vadd.xlane.f32.xlu0 %v1911_v45  ;;  %v7871_v45 = vand.u32 127, %v271_v50  ;;  %4949 = vlog2.f32 %v7587_v47 }
 0x30e   :  { %1915 = vadd.xlane.f32.xlu1 %v1914_v1  ;;  %v7863_v59 = vpop.xlane.xlu0 %1702  ;;  %v1923_v1 = vsel %vm785_vm0, %v4924_v25, 0.0  ;;  %v11615_v25 = vld [vmem:[#allocation6_spill] sm:$0xff]  ;;  %4951 = vlog2.f32 %v7595_v29 }
 0x30f   :  { %11608 = vst [vmem:[#allocation259_spill] sm:$0xff] %v7863_v59  ;;  %v7865_v36 = vpop.xlane.xlu1 %1705  ;;  %v4928_v59 = vpop.eup %4927  ;;  %vm658_vm2 = vcmp.eq.s32.totalorder %v7871_v45, %v11615_v25  ;;  %v5556_v25 = vld [vmem:[%s10858_s0 + $0x18] sm:$0xff]  ;;  %4953 = vlog2.f32 %v7601_v51 }
 0x310   :  { %11609 = vst [vmem:[#allocation260_spill] sm:$0xff] %v7865_v36  ;;  %v4930_v36 = vpop.eup %4929  ;;  %v1929_v50 = vsel %vm785_vm0, %v4928_v59, 0.0  ;;  %4955 = vlog2.f32 %v7609_v14 }
 0x311   :  { %1918 = vadd.xlane.f32.xlu0 %v1917_v9  ;;  %v11613_v9 = vld [vmem:[#allocation4_spill] sm:$0xff]  ;;  %4957 = vlog2.f32 %v7615_v55 }
 0x312   :  { %1921 = vadd.xlane.f32.xlu1 %v1920_v54  ;;  %v7869_v34 = vpop.xlane.xlu0 %1708  ;;  %vm657_vm1 = vcmp.eq.s32.totalorder %v7871_v45, %v11613_v9  ;;  %v4932_v54 = vpop.eup %4931  ;;  %v11619_v9 = vld [vmem:[#allocation5_spill] sm:$0xff]  ;;  %4959 = vlog2.f32 %v7623_v42 }
 0x313   :  { %11610 = vst [vmem:[#allocation261_spill] sm:$0xff] %v7869_v34  ;;  %v7873_v7 = vpop.xlane.xlu1 %1711  ;;  %vm660_vm4 = vcmp.eq.s32.totalorder %v7871_v45, %v11619_v9  ;;  %v5558_v9 = vld [vmem:[%s10858_s0 + $0x28] sm:$0xff]  ;;  %4961 = vlog2.f32 %v7629_v21 }
 0x314   :  { %11611 = vst [vmem:[#allocation262_spill] sm:$0xff] %v7873_v7  ;;  %v1932_v7 = vsel %vm785_vm0, %v4930_v36, 0.0  ;;  %v1935_v36 = vsel %vm785_vm0, %v4932_v54, 0.0  ;;  %v5555_v54 = vld [vmem:[%s10858_s0 + $0x10] sm:$0xff]  ;;  %4963 = vlog2.f32 %v7637_v5 }
 0x315   :  { %1924 = vadd.xlane.f32.xlu0 %v1923_v1  ;;  %v5553_v1 = vld [vmem:[%s10858_s0] sm:$0xff] }
 0x316   :  { %1927 = vadd.xlane.f32.xlu1 %v1926_v62  ;;  %v7877_v44 = vpop.xlane.xlu0 %1714  ;;  %v2194_v62 = vsel %vm657_vm1, %v5553_v1, 0.0 }
 0x317   :  { %11612 = vst [vmem:[#allocation263_spill] sm:$0xff] %v7877_v44  ;;  %v7881_v53 = vpop.xlane.xlu1 %1717 }
 0x318   :  { %11614 = vst [vmem:[#allocation264_spill] sm:$0xff] %v7881_v53  ;;  %v11617_v53 = vld [vmem:[#allocation3_spill] sm:$0xff] }
 0x319   :  { %1930 = vadd.xlane.f32.xlu0 %v1929_v50  ;;  %vm659_vm3 = vcmp.eq.s32.totalorder %v7871_v45, %v11617_v53  ;;  %v5554_v50 = vld [vmem:[%s10858_s0 + $0x8] sm:$0xff]  ;;  %v11623_v53 = vld [vmem:[#allocation7_spill] sm:$0xff] }
 0x31a   :  { %1933 = vadd.xlane.f32.xlu1 %v1932_v7  ;;  %v7887_v63 = vpop.xlane.xlu0 %1720  ;;  %v2322_v7 = vsel %vm785_vm0, %v2194_v62, 0.0  ;;  %v2196_v62 = vsel %vm659_vm3, %v5555_v54, 0.0  ;;  %vm662_vm6 = vcmp.eq.s32.totalorder %v7871_v45, %v11623_v53  ;;  %v5560_v53 = vld [vmem:[%s10858_s0 + $0x38] sm:$0xff] }
 0x31b   :  { %11616 = vst [vmem:[#allocation265_spill] sm:$0xff] %v7887_v63  ;;  %v7897_v59 = vpop.xlane.xlu1 %1723  ;;  %v2195_v63 = vsel %vm658_vm2, %v5554_v50, 0.0 }
 0x31c   :  { %11618 = vst [vmem:[#allocation266_spill] sm:$0xff] %v7897_v59  ;;  %v2325_v50 = vsel %vm785_vm0, %v2195_v63, 0.0  ;;  %v5557_v63 = vld [vmem:[%s10858_s0 + $0x20] sm:$0xff] }
 0x31d   :  { %1936 = vadd.xlane.f32.xlu0 %v1935_v36  ;;  %v11621_v36 = vld [vmem:[#allocation8_spill] sm:$0xff] }
 0x31e   :  { %2323 = vadd.xlane.f32.xlu1 %v2322_v7  ;;  %v7909_v1 = vpop.xlane.xlu0 %1726  ;;  %vm661_vm5 = vcmp.eq.s32.totalorder %v7871_v45, %v11621_v36  ;;  %v2328_v7 = vsel %vm785_vm0, %v2196_v62, 0.0  ;;  %v11627_v36 = vld [vmem:[#allocation9_spill] sm:$0xff] }
 0x31f   :  { %11620 = vst [vmem:[#allocation267_spill] sm:$0xff] %v7909_v1  ;;  %v7919_v59 = vpop.xlane.xlu1 %1729  ;;  %v2197_v1 = vsel %vm660_vm4, %v5556_v25, 0.0  ;;  %v2198_v62 = vsel %vm661_vm5, %v5557_v63, 0.0  ;;  %vm664_vm8 = vcmp.eq.s32.totalorder %v7871_v45, %v11627_v36 }
 0x320   :  { %11622 = vst [vmem:[#allocation268_spill] sm:$0xff] %v7919_v59  ;;  %v2331_v25 = vsel %vm785_vm0, %v2197_v1, 0.0  ;;  %v5559_v1 = vld [vmem:[%s10858_s0 + $0x30] sm:$0xff] }
 0x321   :  { %2326 = vadd.xlane.f32.xlu0 %v2325_v50  ;;  %v11625_v50 = vld [vmem:[#allocation10_spill] sm:$0xff] }
 0x322   :  { %2329 = vadd.xlane.f32.xlu1 %v2328_v7  ;;  %v7931_v54 = vpop.xlane.xlu0 %1732  ;;  %vm663_vm7 = vcmp.eq.s32.totalorder %v7871_v45, %v11625_v50  ;;  %v2334_v7 = vsel %vm785_vm0, %v2198_v62, 0.0  ;;  %v11631_v50 = vld [vmem:[#allocation11_spill] sm:$0xff] }
 0x323   :  { %11624 = vst [vmem:[#allocation269_spill] sm:$0xff] %v7931_v54  ;;  %v7941_v59 = vpop.xlane.xlu1 %1735  ;;  %v2199_v54 = vsel %vm662_vm6, %v5558_v9, 0.0  ;;  %v2200_v62 = vsel %vm663_vm7, %v5559_v1, 0.0  ;;  %vm666_vm10 = vcmp.eq.s32.totalorder %v7871_v45, %v11631_v50 }
 0x324   :  { %11626 = vst [vmem:[#allocation270_spill] sm:$0xff] %v7941_v59  ;;  %v2337_v9 = vsel %vm785_vm0, %v2199_v54, 0.0  ;;  %v5561_v54 = vld [vmem:[%s10858_s0 + $0x40] sm:$0xff] }
 0x325   :  { %2332 = vadd.xlane.f32.xlu0 %v2331_v25  ;;  %v11629_v25 = vld [vmem:[#allocation12_spill] sm:$0xff] }
 0x326   :  { %2335 = vadd.xlane.f32.xlu1 %v2334_v7  ;;  %v7953_v63 = vpop.xlane.xlu0 %1738  ;;  %vm665_vm9 = vcmp.eq.s32.totalorder %v7871_v45, %v11629_v25  ;;  %v2340_v7 = vsel %vm785_vm0, %v2200_v62, 0.0  ;;  %v11635_v25 = vld [vmem:[#allocation13_spill] sm:$0xff] }
 0x327   :  { %11628 = vst [vmem:[#allocation271_spill] sm:$0xff] %v7953_v63  ;;  %v7963_v59 = vpop.xlane.xlu1 %1741  ;;  %v2201_v63 = vsel %vm664_vm8, %v5560_v53, 0.0  ;;  %v2202_v62 = vsel %vm665_vm9, %v5561_v54, 0.0  ;;  %vm11131_vm12 = vcmp.eq.s32.totalorder %v7871_v45, %v11635_v25 }
 0x328   :  { %11630 = vst [vmem:[#allocation272_spill] sm:$0xff] %v7963_v59  ;;  %v2343_v53 = vsel %vm785_vm0, %v2201_v63, 0.0  ;;  %v5563_v63 = vld [vmem:[%s10858_s0 + $0x50] sm:$0xff] }
 0x329   :  { %2338 = vadd.xlane.f32.xlu0 %v2337_v9  ;;  %v11633_v9 = vld [vmem:[#allocation14_spill] sm:$0xff] }
 0x32a   :  { %2341 = vadd.xlane.f32.xlu1 %v2340_v7  ;;  %v7975_v1 = vpop.xlane.xlu0 %1744  ;;  %vm667_vm11 = vcmp.eq.s32.totalorder %v7871_v45, %v11633_v9  ;;  %v2346_v7 = vsel %vm785_vm0, %v2202_v62, 0.0  ;;  %v11639_v9 = vld [vmem:[#allocation15_spill] sm:$0xff] }
 0x32b   :  { %11632 = vst [vmem:[#allocation273_spill] sm:$0xff] %v7975_v1  ;;  %v7985_v59 = vpop.xlane.xlu1 %1747  ;;  %v5562_v1 = vld [vmem:[%s10858_s0 + $0x48] sm:$0xff]  ;;  %v2204_v62 = vsel %vm667_vm11, %v5563_v63, 0.0  ;;  %vm11135_vm14 = vcmp.eq.s32.totalorder %v7871_v45, %v11639_v9 }
 0x32c   :  { %11634 = vst [vmem:[#allocation274_spill] sm:$0xff] %v7985_v59  ;;  %v2203_v36 = vsel %vm666_vm10, %v5562_v1, 0.0 }
 0x32d   :  { %2344 = vadd.xlane.f32.xlu0 %v2343_v53  ;;  %v11637_v53 = vld [vmem:[#allocation16_spill] sm:$0xff]  ;;  %v2349_v1 = vsel %vm785_vm0, %v2203_v36, 0.0  ;;  %v5565_v36 = vld [vmem:[%s10858_s0 + $0x60] sm:$0xff] }
 0x32e   :  { %2347 = vadd.xlane.f32.xlu1 %v2346_v7  ;;  %v7997_v54 = vpop.xlane.xlu0 %1750  ;;  %vm11130_vm13 = vcmp.eq.s32.totalorder %v7871_v45, %v11637_v53  ;;  %v2352_v7 = vsel %vm785_vm0, %v2204_v62, 0.0  ;;  %v11643_v53 = vld [vmem:[#allocation17_spill] sm:$0xff] }
 0x32f   :  { %11636 = vst [vmem:[#allocation275_spill] sm:$0xff] %v7997_v54  ;;  %v8007_v59 = vpop.xlane.xlu1 %1753  ;;  %v5564_v54 = vld [vmem:[%s10858_s0 + $0x58] sm:$0xff]  ;;  %v2206_v62 = vsel %vm11130_vm13, %v5565_v36, 0.0  ;;  %vm11139_vm13 = vcmp.eq.s32.totalorder %v7871_v45, %v11643_v53 }
 0x330   :  { %11638 = vst [vmem:[#allocation276_spill] sm:$0xff] %v8007_v59  ;;  %v2205_v50 = vsel %vm11131_vm12, %v5564_v54, 0.0 }
 0x331   :  { %2350 = vadd.xlane.f32.xlu0 %v2349_v1  ;;  %v11641_v1 = vld [vmem:[#allocation18_spill] sm:$0xff]  ;;  %v2355_v54 = vsel %vm785_vm0, %v2205_v50, 0.0  ;;  %v5567_v50 = vld [vmem:[%s10858_s0 + $0x70] sm:$0xff] }
 0x332   :  { %2353 = vadd.xlane.f32.xlu1 %v2352_v7  ;;  %v8019_v63 = vpop.xlane.xlu0 %1756  ;;  %vm11134_vm15 = vcmp.eq.s32.totalorder %v7871_v45, %v11641_v1  ;;  %v2358_v7 = vsel %vm785_vm0, %v2206_v62, 0.0  ;;  %v11647_v1 = vld [vmem:[#allocation19_spill] sm:$0xff] }
 0x333   :  { %11640 = vst [vmem:[#allocation277_spill] sm:$0xff] %v8019_v63  ;;  %v8029_v59 = vpop.xlane.xlu1 %1759  ;;  %v5566_v63 = vld [vmem:[%s10858_s0 + $0x68] sm:$0xff]  ;;  %v2208_v62 = vsel %vm11134_vm15, %v5567_v50, 0.0  ;;  %vm11143_vm15 = vcmp.eq.s32.totalorder %v7871_v45, %v11647_v1 }
 0x334   :  { %11642 = vst [vmem:[#allocation278_spill] sm:$0xff] %v8029_v59  ;;  %v2207_v25 = vsel %vm11135_vm14, %v5566_v63, 0.0 }
 0x335   :  { %2356 = vadd.xlane.f32.xlu0 %v2355_v54  ;;  %v11645_v54 = vld [vmem:[#allocation20_spill] sm:$0xff]  ;;  %v2361_v63 = vsel %vm785_vm0, %v2207_v25, 0.0  ;;  %v5569_v25 = vld [vmem:[%s10858_s0 + $0x80] sm:$0xff] }
 0x336   :  { %2359 = vadd.xlane.f32.xlu1 %v2358_v7  ;;  %v8041_v36 = vpop.xlane.xlu0 %1762  ;;  %vm11138_vm12 = vcmp.eq.s32.totalorder %v7871_v45, %v11645_v54  ;;  %v2364_v7 = vsel %vm785_vm0, %v2208_v62, 0.0  ;;  %v11651_v54 = vld [vmem:[#allocation21_spill] sm:$0xff] }
 0x337   :  { %11644 = vst [vmem:[#allocation279_spill] sm:$0xff] %v8041_v36  ;;  %v8051_v59 = vpop.xlane.xlu1 %1765  ;;  %v5568_v36 = vld [vmem:[%s10858_s0 + $0x78] sm:$0xff]  ;;  %v2210_v62 = vsel %vm11138_vm12, %v5569_v25, 0.0  ;;  %vm11147_vm12 = vcmp.eq.s32.totalorder %v7871_v45, %v11651_v54 }
 0x338   :  { %11646 = vst [vmem:[#allocation280_spill] sm:$0xff] %v8051_v59  ;;  %v2209_v9 = vsel %vm11139_vm13, %v5568_v36, 0.0 }
 0x339   :  { %2362 = vadd.xlane.f32.xlu0 %v2361_v63  ;;  %v11649_v63 = vld [vmem:[#allocation22_spill] sm:$0xff]  ;;  %v2367_v36 = vsel %vm785_vm0, %v2209_v9, 0.0  ;;  %v5571_v9 = vld [vmem:[%s10858_s0 + $0x90] sm:$0xff] }
 0x33a   :  { %2365 = vadd.xlane.f32.xlu1 %v2364_v7  ;;  %v8063_v50 = vpop.xlane.xlu0 %1768  ;;  %vm11142_vm14 = vcmp.eq.s32.totalorder %v7871_v45, %v11649_v63  ;;  %v2370_v7 = vsel %vm785_vm0, %v2210_v62, 0.0  ;;  %v11655_v63 = vld [vmem:[#allocation23_spill] sm:$0xff] }
 0x33b   :  { %11648 = vst [vmem:[#allocation281_spill] sm:$0xff] %v8063_v50  ;;  %v8073_v59 = vpop.xlane.xlu1 %1771  ;;  %v5570_v50 = vld [vmem:[%s10858_s0 + $0x88] sm:$0xff]  ;;  %v2212_v62 = vsel %vm11142_vm14, %v5571_v9, 0.0  ;;  %vm11151_vm14 = vcmp.eq.s32.totalorder %v7871_v45, %v11655_v63 }
 0x33c   :  { %11650 = vst [vmem:[#allocation282_spill] sm:$0xff] %v8073_v59  ;;  %v2211_v53 = vsel %vm11143_vm15, %v5570_v50, 0.0 }
 0x33d   :  { %2368 = vadd.xlane.f32.xlu0 %v2367_v36  ;;  %v11653_v36 = vld [vmem:[#allocation24_spill] sm:$0xff]  ;;  %v2373_v50 = vsel %vm785_vm0, %v2211_v53, 0.0  ;;  %v5573_v53 = vld [vmem:[%s10858_s0 + $0xa0] sm:$0xff] }
 0x33e   :  { %2371 = vadd.xlane.f32.xlu1 %v2370_v7  ;;  %v8085_v25 = vpop.xlane.xlu0 %1774  ;;  %vm11146_vm13 = vcmp.eq.s32.totalorder %v7871_v45, %v11653_v36  ;;  %v2376_v7 = vsel %vm785_vm0, %v2212_v62, 0.0  ;;  %v11659_v36 = vld [vmem:[#allocation25_spill] sm:$0xff] }
 0x33f   :  { %11652 = vst [vmem:[#allocation283_spill] sm:$0xff] %v8085_v25  ;;  %v8095_v59 = vpop.xlane.xlu1 %1777  ;;  %v5572_v25 = vld [vmem:[%s10858_s0 + $0x98] sm:$0xff]  ;;  %v2214_v62 = vsel %vm11146_vm13, %v5573_v53, 0.0  ;;  %vm11155_vm13 = vcmp.eq.s32.totalorder %v7871_v45, %v11659_v36 }
 0x340   :  { %11654 = vst [vmem:[#allocation284_spill] sm:$0xff] %v8095_v59  ;;  %v2213_v1 = vsel %vm11147_vm12, %v5572_v25, 0.0 }
 0x341   :  { %2374 = vadd.xlane.f32.xlu0 %v2373_v50  ;;  %v11657_v50 = vld [vmem:[#allocation26_spill] sm:$0xff]  ;;  %v2379_v25 = vsel %vm785_vm0, %v2213_v1, 0.0  ;;  %v5575_v1 = vld [vmem:[%s10858_s0 + $0xb0] sm:$0xff] }
 0x342   :  { %2377 = vadd.xlane.f32.xlu1 %v2376_v7  ;;  %v8107_v9 = vpop.xlane.xlu0 %1780  ;;  %vm11150_vm15 = vcmp.eq.s32.totalorder %v7871_v45, %v11657_v50  ;;  %v2382_v7 = vsel %vm785_vm0, %v2214_v62, 0.0  ;;  %v11663_v50 = vld [vmem:[#allocation27_spill] sm:$0xff] }
 0x343   :  { %11656 = vst [vmem:[#allocation285_spill] sm:$0xff] %v8107_v9  ;;  %v8117_v59 = vpop.xlane.xlu1 %1783  ;;  %v5574_v9 = vld [vmem:[%s10858_s0 + $0xa8] sm:$0xff]  ;;  %v2216_v62 = vsel %vm11150_vm15, %v5575_v1, 0.0  ;;  %vm11159_vm15 = vcmp.eq.s32.totalorder %v7871_v45, %v11663_v50 }
 0x344   :  { %11658 = vst [vmem:[#allocation286_spill] sm:$0xff] %v8117_v59  ;;  %v2215_v54 = vsel %vm11151_vm14, %v5574_v9, 0.0 }
 0x345   :  { %2380 = vadd.xlane.f32.xlu0 %v2379_v25  ;;  %v11661_v25 = vld [vmem:[#allocation28_spill] sm:$0xff]  ;;  %v2385_v9 = vsel %vm785_vm0, %v2215_v54, 0.0  ;;  %v5577_v54 = vld [vmem:[%s10858_s0 + $0xc0] sm:$0xff] }
 0x346   :  { %2383 = vadd.xlane.f32.xlu1 %v2382_v7  ;;  %v8129_v53 = vpop.xlane.xlu0 %1786  ;;  %vm11154_vm12 = vcmp.eq.s32.totalorder %v7871_v45, %v11661_v25  ;;  %v2388_v7 = vsel %vm785_vm0, %v2216_v62, 0.0  ;;  %v11667_v25 = vld [vmem:[#allocation29_spill] sm:$0xff] }
 0x347   :  { %11660 = vst [vmem:[#allocation287_spill] sm:$0xff] %v8129_v53  ;;  %v8139_v59 = vpop.xlane.xlu1 %1789  ;;  %v5576_v53 = vld [vmem:[%s10858_s0 + $0xb8] sm:$0xff]  ;;  %v2218_v62 = vsel %vm11154_vm12, %v5577_v54, 0.0  ;;  %vm11163_vm12 = vcmp.eq.s32.totalorder %v7871_v45, %v11667_v25 }
 0x348   :  { %11662 = vst [vmem:[#allocation288_spill] sm:$0xff] %v8139_v59  ;;  %v2217_v63 = vsel %vm11155_vm13, %v5576_v53, 0.0 }
 0x349   :  { %2386 = vadd.xlane.f32.xlu0 %v2385_v9  ;;  %v11665_v9 = vld [vmem:[#allocation30_spill] sm:$0xff]  ;;  %v2391_v53 = vsel %vm785_vm0, %v2217_v63, 0.0  ;;  %v5579_v63 = vld [vmem:[%s10858_s0 + $0xd0] sm:$0xff] }
 0x34a   :  { %2389 = vadd.xlane.f32.xlu1 %v2388_v7  ;;  %v8151_v1 = vpop.xlane.xlu0 %1792  ;;  %vm11158_vm14 = vcmp.eq.s32.totalorder %v7871_v45, %v11665_v9  ;;  %v2394_v7 = vsel %vm785_vm0, %v2218_v62, 0.0  ;;  %v11671_v9 = vld [vmem:[#allocation31_spill] sm:$0xff] }
 0x34b   :  { %11664 = vst [vmem:[#allocation289_spill] sm:$0xff] %v8151_v1  ;;  %v8161_v59 = vpop.xlane.xlu1 %1795  ;;  %v5578_v1 = vld [vmem:[%s10858_s0 + $0xc8] sm:$0xff]  ;;  %v2220_v62 = vsel %vm11158_vm14, %v5579_v63, 0.0  ;;  %vm11167_vm14 = vcmp.eq.s32.totalorder %v7871_v45, %v11671_v9 }
 0x34c   :  { %11666 = vst [vmem:[#allocation290_spill] sm:$0xff] %v8161_v59  ;;  %v2219_v36 = vsel %vm11159_vm15, %v5578_v1, 0.0 }
 0x34d   :  { %2392 = vadd.xlane.f32.xlu0 %v2391_v53  ;;  %v11669_v53 = vld [vmem:[#allocation32_spill] sm:$0xff]  ;;  %v2397_v1 = vsel %vm785_vm0, %v2219_v36, 0.0  ;;  %v5581_v36 = vld [vmem:[%s10858_s0 + $0xe0] sm:$0xff] }
 0x34e   :  { %2395 = vadd.xlane.f32.xlu1 %v2394_v7  ;;  %v8173_v54 = vpop.xlane.xlu0 %1798  ;;  %vm11162_vm13 = vcmp.eq.s32.totalorder %v7871_v45, %v11669_v53  ;;  %v2400_v7 = vsel %vm785_vm0, %v2220_v62, 0.0  ;;  %v11675_v53 = vld [vmem:[#allocation33_spill] sm:$0xff] }
 0x34f   :  { %11668 = vst [vmem:[#allocation291_spill] sm:$0xff] %v8173_v54  ;;  %v8183_v59 = vpop.xlane.xlu1 %1801  ;;  %v5580_v54 = vld [vmem:[%s10858_s0 + $0xd8] sm:$0xff]  ;;  %v2222_v62 = vsel %vm11162_vm13, %v5581_v36, 0.0  ;;  %vm11171_vm13 = vcmp.eq.s32.totalorder %v7871_v45, %v11675_v53 }
 0x350   :  { %11670 = vst [vmem:[#allocation292_spill] sm:$0xff] %v8183_v59  ;;  %v2221_v50 = vsel %vm11163_vm12, %v5580_v54, 0.0 }
 0x351   :  { %2398 = vadd.xlane.f32.xlu0 %v2397_v1  ;;  %v11673_v1 = vld [vmem:[#allocation34_spill] sm:$0xff]  ;;  %v2403_v54 = vsel %vm785_vm0, %v2221_v50, 0.0  ;;  %v5583_v50 = vld [vmem:[%s10858_s0 + $0xf0] sm:$0xff] }
 0x352   :  { %2401 = vadd.xlane.f32.xlu1 %v2400_v7  ;;  %v8195_v63 = vpop.xlane.xlu0 %1804  ;;  %vm11166_vm15 = vcmp.eq.s32.totalorder %v7871_v45, %v11673_v1  ;;  %v2406_v7 = vsel %vm785_vm0, %v2222_v62, 0.0  ;;  %v11679_v1 = vld [vmem:[#allocation35_spill] sm:$0xff] }
 0x353   :  { %11672 = vst [vmem:[#allocation293_spill] sm:$0xff] %v8195_v63  ;;  %v8205_v59 = vpop.xlane.xlu1 %1807  ;;  %v5582_v63 = vld [vmem:[%s10858_s0 + $0xe8] sm:$0xff]  ;;  %v2224_v62 = vsel %vm11166_vm15, %v5583_v50, 0.0  ;;  %vm11175_vm15 = vcmp.eq.s32.totalorder %v7871_v45, %v11679_v1 }
 0x354   :  { %11674 = vst [vmem:[#allocation294_spill] sm:$0xff] %v8205_v59  ;;  %v2223_v25 = vsel %vm11167_vm14, %v5582_v63, 0.0 }
 0x355   :  { %2404 = vadd.xlane.f32.xlu0 %v2403_v54  ;;  %v11677_v54 = vld [vmem:[#allocation36_spill] sm:$0xff]  ;;  %v2409_v63 = vsel %vm785_vm0, %v2223_v25, 0.0  ;;  %v5585_v25 = vld [vmem:[%s10858_s0 + $0x100] sm:$0xff] }
 0x356   :  { %2407 = vadd.xlane.f32.xlu1 %v2406_v7  ;;  %v8217_v36 = vpop.xlane.xlu0 %1810  ;;  %vm11170_vm12 = vcmp.eq.s32.totalorder %v7871_v45, %v11677_v54  ;;  %v2412_v7 = vsel %vm785_vm0, %v2224_v62, 0.0  ;;  %v11683_v54 = vld [vmem:[#allocation37_spill] sm:$0xff] }
 0x357   :  { %11676 = vst [vmem:[#allocation295_spill] sm:$0xff] %v8217_v36  ;;  %v8227_v59 = vpop.xlane.xlu1 %1813  ;;  %v5584_v36 = vld [vmem:[%s10858_s0 + $0xf8] sm:$0xff]  ;;  %v2226_v62 = vsel %vm11170_vm12, %v5585_v25, 0.0  ;;  %vm11179_vm12 = vcmp.eq.s32.totalorder %v7871_v45, %v11683_v54 }
 0x358   :  { %11678 = vst [vmem:[#allocation296_spill] sm:$0xff] %v8227_v59  ;;  %v2225_v9 = vsel %vm11171_vm13, %v5584_v36, 0.0 }
 0x359   :  { %2410 = vadd.xlane.f32.xlu0 %v2409_v63  ;;  %v11681_v63 = vld [vmem:[#allocation38_spill] sm:$0xff]  ;;  %v2415_v36 = vsel %vm785_vm0, %v2225_v9, 0.0  ;;  %v5587_v9 = vld [vmem:[%s10858_s0 + $0x110] sm:$0xff] }
 0x35a   :  { %2413 = vadd.xlane.f32.xlu1 %v2412_v7  ;;  %v8239_v50 = vpop.xlane.xlu0 %1816  ;;  %vm11174_vm14 = vcmp.eq.s32.totalorder %v7871_v45, %v11681_v63  ;;  %v2418_v7 = vsel %vm785_vm0, %v2226_v62, 0.0  ;;  %v11687_v63 = vld [vmem:[#allocation39_spill] sm:$0xff] }
 0x35b   :  { %11680 = vst [vmem:[#allocation297_spill] sm:$0xff] %v8239_v50  ;;  %v8249_v59 = vpop.xlane.xlu1 %1819  ;;  %v5586_v50 = vld [vmem:[%s10858_s0 + $0x108] sm:$0xff]  ;;  %v2228_v62 = vsel %vm11174_vm14, %v5587_v9, 0.0  ;;  %vm11183_vm14 = vcmp.eq.s32.totalorder %v7871_v45, %v11687_v63 }
 0x35c   :  { %11682 = vst [vmem:[#allocation298_spill] sm:$0xff] %v8249_v59  ;;  %v2227_v53 = vsel %vm11175_vm15, %v5586_v50, 0.0 }
 0x35d   :  { %2416 = vadd.xlane.f32.xlu0 %v2415_v36  ;;  %v11685_v36 = vld [vmem:[#allocation40_spill] sm:$0xff]  ;;  %v2421_v50 = vsel %vm785_vm0, %v2227_v53, 0.0  ;;  %v5589_v53 = vld [vmem:[%s10858_s0 + $0x120] sm:$0xff] }
 0x35e   :  { %2419 = vadd.xlane.f32.xlu1 %v2418_v7  ;;  %v8261_v25 = vpop.xlane.xlu0 %1822  ;;  %vm11178_vm13 = vcmp.eq.s32.totalorder %v7871_v45, %v11685_v36  ;;  %v2424_v7 = vsel %vm785_vm0, %v2228_v62, 0.0  ;;  %v11691_v36 = vld [vmem:[#allocation41_spill] sm:$0xff] }
 0x35f   :  { %11684 = vst [vmem:[#allocation299_spill] sm:$0xff] %v8261_v25  ;;  %v8271_v59 = vpop.xlane.xlu1 %1825  ;;  %v5588_v25 = vld [vmem:[%s10858_s0 + $0x118] sm:$0xff]  ;;  %v2230_v62 = vsel %vm11178_vm13, %v5589_v53, 0.0  ;;  %vm11187_vm13 = vcmp.eq.s32.totalorder %v7871_v45, %v11691_v36 }
 0x360   :  { %11686 = vst [vmem:[#allocation300_spill] sm:$0xff] %v8271_v59  ;;  %v2229_v1 = vsel %vm11179_vm12, %v5588_v25, 0.0 }
 0x361   :  { %2422 = vadd.xlane.f32.xlu0 %v2421_v50  ;;  %v11689_v50 = vld [vmem:[#allocation42_spill] sm:$0xff]  ;;  %v2427_v25 = vsel %vm785_vm0, %v2229_v1, 0.0  ;;  %v5591_v1 = vld [vmem:[%s10858_s0 + $0x130] sm:$0xff] }
 0x362   :  { %2425 = vadd.xlane.f32.xlu1 %v2424_v7  ;;  %v8283_v9 = vpop.xlane.xlu0 %1828  ;;  %vm11182_vm15 = vcmp.eq.s32.totalorder %v7871_v45, %v11689_v50  ;;  %v2430_v7 = vsel %vm785_vm0, %v2230_v62, 0.0  ;;  %v11695_v50 = vld [vmem:[#allocation43_spill] sm:$0xff] }
 0x363   :  { %11688 = vst [vmem:[#allocation301_spill] sm:$0xff] %v8283_v9  ;;  %v8293_v59 = vpop.xlane.xlu1 %1831  ;;  %v5590_v9 = vld [vmem:[%s10858_s0 + $0x128] sm:$0xff]  ;;  %v2232_v62 = vsel %vm11182_vm15, %v5591_v1, 0.0  ;;  %vm11191_vm15 = vcmp.eq.s32.totalorder %v7871_v45, %v11695_v50 }
 0x364   :  { %11690 = vst [vmem:[#allocation302_spill] sm:$0xff] %v8293_v59  ;;  %v2231_v54 = vsel %vm11183_vm14, %v5590_v9, 0.0 }
 0x365   :  { %2428 = vadd.xlane.f32.xlu0 %v2427_v25  ;;  %v11693_v25 = vld [vmem:[#allocation44_spill] sm:$0xff]  ;;  %v2433_v9 = vsel %vm785_vm0, %v2231_v54, 0.0  ;;  %v5593_v54 = vld [vmem:[%s10858_s0 + $0x140] sm:$0xff] }
 0x366   :  { %2431 = vadd.xlane.f32.xlu1 %v2430_v7  ;;  %v8305_v53 = vpop.xlane.xlu0 %1834  ;;  %vm11186_vm12 = vcmp.eq.s32.totalorder %v7871_v45, %v11693_v25  ;;  %v2436_v7 = vsel %vm785_vm0, %v2232_v62, 0.0  ;;  %v11699_v25 = vld [vmem:[#allocation45_spill] sm:$0xff] }
 0x367   :  { %11692 = vst [vmem:[#allocation303_spill] sm:$0xff] %v8305_v53  ;;  %v8315_v59 = vpop.xlane.xlu1 %1837  ;;  %v5592_v53 = vld [vmem:[%s10858_s0 + $0x138] sm:$0xff]  ;;  %v2234_v62 = vsel %vm11186_vm12, %v5593_v54, 0.0  ;;  %vm11195_vm12 = vcmp.eq.s32.totalorder %v7871_v45, %v11699_v25 }
 0x368   :  { %11694 = vst [vmem:[#allocation304_spill] sm:$0xff] %v8315_v59  ;;  %v2233_v63 = vsel %vm11187_vm13, %v5592_v53, 0.0 }
 0x369   :  { %2434 = vadd.xlane.f32.xlu0 %v2433_v9  ;;  %v11697_v9 = vld [vmem:[#allocation46_spill] sm:$0xff]  ;;  %v2439_v53 = vsel %vm785_vm0, %v2233_v63, 0.0  ;;  %v5595_v63 = vld [vmem:[%s10858_s0 + $0x150] sm:$0xff] }
 0x36a   :  { %2437 = vadd.xlane.f32.xlu1 %v2436_v7  ;;  %v8327_v1 = vpop.xlane.xlu0 %1840  ;;  %vm11190_vm14 = vcmp.eq.s32.totalorder %v7871_v45, %v11697_v9  ;;  %v2442_v7 = vsel %vm785_vm0, %v2234_v62, 0.0  ;;  %v11703_v9 = vld [vmem:[#allocation47_spill] sm:$0xff] }
 0x36b   :  { %11696 = vst [vmem:[#allocation305_spill] sm:$0xff] %v8327_v1  ;;  %v8337_v59 = vpop.xlane.xlu1 %1843  ;;  %v5594_v1 = vld [vmem:[%s10858_s0 + $0x148] sm:$0xff]  ;;  %v2236_v62 = vsel %vm11190_vm14, %v5595_v63, 0.0  ;;  %vm11199_vm14 = vcmp.eq.s32.totalorder %v7871_v45, %v11703_v9 }
 0x36c   :  { %11698 = vst [vmem:[#allocation306_spill] sm:$0xff] %v8337_v59  ;;  %v2235_v36 = vsel %vm11191_vm15, %v5594_v1, 0.0 }
 0x36d   :  { %2440 = vadd.xlane.f32.xlu0 %v2439_v53  ;;  %v11701_v53 = vld [vmem:[#allocation48_spill] sm:$0xff]  ;;  %v2445_v1 = vsel %vm785_vm0, %v2235_v36, 0.0  ;;  %v5597_v36 = vld [vmem:[%s10858_s0 + $0x160] sm:$0xff] }
 0x36e   :  { %2443 = vadd.xlane.f32.xlu1 %v2442_v7  ;;  %v8349_v54 = vpop.xlane.xlu0 %1846  ;;  %vm11194_vm13 = vcmp.eq.s32.totalorder %v7871_v45, %v11701_v53  ;;  %v2448_v7 = vsel %vm785_vm0, %v2236_v62, 0.0  ;;  %v11707_v53 = vld [vmem:[#allocation49_spill] sm:$0xff] }
 0x36f   :  { %11700 = vst [vmem:[#allocation307_spill] sm:$0xff] %v8349_v54  ;;  %v8359_v59 = vpop.xlane.xlu1 %1849  ;;  %v5596_v54 = vld [vmem:[%s10858_s0 + $0x158] sm:$0xff]  ;;  %v2238_v62 = vsel %vm11194_vm13, %v5597_v36, 0.0  ;;  %vm11203_vm13 = vcmp.eq.s32.totalorder %v7871_v45, %v11707_v53 }
 0x370   :  { %11702 = vst [vmem:[#allocation308_spill] sm:$0xff] %v8359_v59  ;;  %v2237_v50 = vsel %vm11195_vm12, %v5596_v54, 0.0 }
 0x371   :  { %2446 = vadd.xlane.f32.xlu0 %v2445_v1  ;;  %v11705_v1 = vld [vmem:[#allocation50_spill] sm:$0xff]  ;;  %v2451_v54 = vsel %vm785_vm0, %v2237_v50, 0.0  ;;  %v5599_v50 = vld [vmem:[%s10858_s0 + $0x170] sm:$0xff] }
 0x372   :  { %2449 = vadd.xlane.f32.xlu1 %v2448_v7  ;;  %v8371_v63 = vpop.xlane.xlu0 %1852  ;;  %vm11198_vm15 = vcmp.eq.s32.totalorder %v7871_v45, %v11705_v1  ;;  %v2454_v7 = vsel %vm785_vm0, %v2238_v62, 0.0  ;;  %v11711_v1 = vld [vmem:[#allocation51_spill] sm:$0xff] }
 0x373   :  { %11704 = vst [vmem:[#allocation309_spill] sm:$0xff] %v8371_v63  ;;  %v8381_v59 = vpop.xlane.xlu1 %1855  ;;  %v5598_v63 = vld [vmem:[%s10858_s0 + $0x168] sm:$0xff]  ;;  %v2240_v62 = vsel %vm11198_vm15, %v5599_v50, 0.0  ;;  %vm11207_vm15 = vcmp.eq.s32.totalorder %v7871_v45, %v11711_v1 }
 0x374   :  { %11706 = vst [vmem:[#allocation310_spill] sm:$0xff] %v8381_v59  ;;  %v2239_v25 = vsel %vm11199_vm14, %v5598_v63, 0.0 }
 0x375   :  { %2452 = vadd.xlane.f32.xlu0 %v2451_v54  ;;  %v11709_v54 = vld [vmem:[#allocation52_spill] sm:$0xff]  ;;  %v2457_v63 = vsel %vm785_vm0, %v2239_v25, 0.0  ;;  %v5601_v25 = vld [vmem:[%s10858_s0 + $0x180] sm:$0xff] }
 0x376   :  { %2455 = vadd.xlane.f32.xlu1 %v2454_v7  ;;  %v8393_v36 = vpop.xlane.xlu0 %1858  ;;  %vm11202_vm12 = vcmp.eq.s32.totalorder %v7871_v45, %v11709_v54  ;;  %v2460_v7 = vsel %vm785_vm0, %v2240_v62, 0.0  ;;  %v11715_v54 = vld [vmem:[#allocation53_spill] sm:$0xff] }
 0x377   :  { %11708 = vst [vmem:[#allocation311_spill] sm:$0xff] %v8393_v36  ;;  %v8403_v59 = vpop.xlane.xlu1 %1861  ;;  %v5600_v36 = vld [vmem:[%s10858_s0 + $0x178] sm:$0xff]  ;;  %v2242_v62 = vsel %vm11202_vm12, %v5601_v25, 0.0  ;;  %vm11211_vm12 = vcmp.eq.s32.totalorder %v7871_v45, %v11715_v54 }
 0x378   :  { %11710 = vst [vmem:[#allocation312_spill] sm:$0xff] %v8403_v59  ;;  %v2241_v9 = vsel %vm11203_vm13, %v5600_v36, 0.0 }
 0x379   :  { %2458 = vadd.xlane.f32.xlu0 %v2457_v63  ;;  %v11713_v63 = vld [vmem:[#allocation54_spill] sm:$0xff]  ;;  %v2463_v36 = vsel %vm785_vm0, %v2241_v9, 0.0  ;;  %v5603_v9 = vld [vmem:[%s10858_s0 + $0x190] sm:$0xff] }
 0x37a   :  { %2461 = vadd.xlane.f32.xlu1 %v2460_v7  ;;  %v8415_v50 = vpop.xlane.xlu0 %1864  ;;  %vm11206_vm14 = vcmp.eq.s32.totalorder %v7871_v45, %v11713_v63  ;;  %v2466_v7 = vsel %vm785_vm0, %v2242_v62, 0.0  ;;  %v11719_v63 = vld [vmem:[#allocation55_spill] sm:$0xff] }
 0x37b   :  { %11712 = vst [vmem:[#allocation313_spill] sm:$0xff] %v8415_v50  ;;  %v8425_v59 = vpop.xlane.xlu1 %1867  ;;  %v5602_v50 = vld [vmem:[%s10858_s0 + $0x188] sm:$0xff]  ;;  %v2244_v62 = vsel %vm11206_vm14, %v5603_v9, 0.0  ;;  %vm11215_vm14 = vcmp.eq.s32.totalorder %v7871_v45, %v11719_v63 }
 0x37c   :  { %11714 = vst [vmem:[#allocation314_spill] sm:$0xff] %v8425_v59  ;;  %v2243_v53 = vsel %vm11207_vm15, %v5602_v50, 0.0 }
 0x37d   :  { %2464 = vadd.xlane.f32.xlu0 %v2463_v36  ;;  %v11717_v36 = vld [vmem:[#allocation56_spill] sm:$0xff]  ;;  %v2469_v50 = vsel %vm785_vm0, %v2243_v53, 0.0  ;;  %v5605_v53 = vld [vmem:[%s10858_s0 + $0x1a0] sm:$0xff] }
 0x37e   :  { %2467 = vadd.xlane.f32.xlu1 %v2466_v7  ;;  %v8437_v25 = vpop.xlane.xlu0 %1870  ;;  %vm11210_vm13 = vcmp.eq.s32.totalorder %v7871_v45, %v11717_v36  ;;  %v2472_v7 = vsel %vm785_vm0, %v2244_v62, 0.0  ;;  %v11723_v36 = vld [vmem:[#allocation57_spill] sm:$0xff] }
 0x37f   :  { %11716 = vst [vmem:[#allocation315_spill] sm:$0xff] %v8437_v25  ;;  %v8447_v59 = vpop.xlane.xlu1 %1873  ;;  %v5604_v25 = vld [vmem:[%s10858_s0 + $0x198] sm:$0xff]  ;;  %v2246_v62 = vsel %vm11210_vm13, %v5605_v53, 0.0  ;;  %vm11219_vm13 = vcmp.eq.s32.totalorder %v7871_v45, %v11723_v36 }
 0x380   :  { %11718 = vst [vmem:[#allocation316_spill] sm:$0xff] %v8447_v59  ;;  %v2245_v1 = vsel %vm11211_vm12, %v5604_v25, 0.0 }
 0x381   :  { %2470 = vadd.xlane.f32.xlu0 %v2469_v50  ;;  %v11721_v50 = vld [vmem:[#allocation58_spill] sm:$0xff]  ;;  %v2475_v25 = vsel %vm785_vm0, %v2245_v1, 0.0  ;;  %v5607_v1 = vld [vmem:[%s10858_s0 + $0x1b0] sm:$0xff] }
 0x382   :  { %2473 = vadd.xlane.f32.xlu1 %v2472_v7  ;;  %v8459_v9 = vpop.xlane.xlu0 %1876  ;;  %vm11214_vm15 = vcmp.eq.s32.totalorder %v7871_v45, %v11721_v50  ;;  %v2478_v7 = vsel %vm785_vm0, %v2246_v62, 0.0  ;;  %v11727_v50 = vld [vmem:[#allocation59_spill] sm:$0xff] }
 0x383   :  { %11720 = vst [vmem:[#allocation317_spill] sm:$0xff] %v8459_v9  ;;  %v8469_v59 = vpop.xlane.xlu1 %1879  ;;  %v5606_v9 = vld [vmem:[%s10858_s0 + $0x1a8] sm:$0xff]  ;;  %v2248_v62 = vsel %vm11214_vm15, %v5607_v1, 0.0  ;;  %vm11223_vm15 = vcmp.eq.s32.totalorder %v7871_v45, %v11727_v50 }
 0x384   :  { %11722 = vst [vmem:[#allocation318_spill] sm:$0xff] %v8469_v59  ;;  %v2247_v54 = vsel %vm11215_vm14, %v5606_v9, 0.0 }
 0x385   :  { %2476 = vadd.xlane.f32.xlu0 %v2475_v25  ;;  %v11725_v25 = vld [vmem:[#allocation60_spill] sm:$0xff]  ;;  %v2481_v9 = vsel %vm785_vm0, %v2247_v54, 0.0  ;;  %v5609_v54 = vld [vmem:[%s10858_s0 + $0x1c0] sm:$0xff] }
 0x386   :  { %2479 = vadd.xlane.f32.xlu1 %v2478_v7  ;;  %v8481_v53 = vpop.xlane.xlu0 %1882  ;;  %vm11218_vm12 = vcmp.eq.s32.totalorder %v7871_v45, %v11725_v25  ;;  %v2484_v7 = vsel %vm785_vm0, %v2248_v62, 0.0  ;;  %v11731_v25 = vld [vmem:[#allocation61_spill] sm:$0xff] }
 0x387   :  { %11724 = vst [vmem:[#allocation319_spill] sm:$0xff] %v8481_v53  ;;  %v8491_v59 = vpop.xlane.xlu1 %1885  ;;  %v5608_v53 = vld [vmem:[%s10858_s0 + $0x1b8] sm:$0xff]  ;;  %v2250_v62 = vsel %vm11218_vm12, %v5609_v54, 0.0  ;;  %vm11227_vm12 = vcmp.eq.s32.totalorder %v7871_v45, %v11731_v25 }
 0x388   :  { %11726 = vst [vmem:[#allocation320_spill] sm:$0xff] %v8491_v59  ;;  %v2249_v63 = vsel %vm11219_vm13, %v5608_v53, 0.0 }
 0x389   :  { %2482 = vadd.xlane.f32.xlu0 %v2481_v9  ;;  %v11729_v9 = vld [vmem:[#allocation62_spill] sm:$0xff]  ;;  %v2487_v53 = vsel %vm785_vm0, %v2249_v63, 0.0  ;;  %v5611_v63 = vld [vmem:[%s10858_s0 + $0x1d0] sm:$0xff] }
 0x38a   :  { %2485 = vadd.xlane.f32.xlu1 %v2484_v7  ;;  %v8503_v1 = vpop.xlane.xlu0 %1888  ;;  %vm11222_vm14 = vcmp.eq.s32.totalorder %v7871_v45, %v11729_v9  ;;  %v2490_v7 = vsel %vm785_vm0, %v2250_v62, 0.0  ;;  %v11735_v9 = vld [vmem:[#allocation63_spill] sm:$0xff] }
 0x38b   :  { %11728 = vst [vmem:[#allocation321_spill] sm:$0xff] %v8503_v1  ;;  %v8513_v59 = vpop.xlane.xlu1 %1891  ;;  %v5610_v1 = vld [vmem:[%s10858_s0 + $0x1c8] sm:$0xff]  ;;  %v2252_v62 = vsel %vm11222_vm14, %v5611_v63, 0.0  ;;  %vm11231_vm14 = vcmp.eq.s32.totalorder %v7871_v45, %v11735_v9 }
 0x38c   :  { %11730 = vst [vmem:[#allocation322_spill] sm:$0xff] %v8513_v59  ;;  %v2251_v36 = vsel %vm11223_vm15, %v5610_v1, 0.0 }
 0x38d   :  { %2488 = vadd.xlane.f32.xlu0 %v2487_v53  ;;  %v11733_v53 = vld [vmem:[#allocation64_spill] sm:$0xff]  ;;  %v2493_v1 = vsel %vm785_vm0, %v2251_v36, 0.0  ;;  %v5613_v36 = vld [vmem:[%s10858_s0 + $0x1e0] sm:$0xff] }
 0x38e   :  { %2491 = vadd.xlane.f32.xlu1 %v2490_v7  ;;  %v8525_v54 = vpop.xlane.xlu0 %1894  ;;  %vm11226_vm13 = vcmp.eq.s32.totalorder %v7871_v45, %v11733_v53  ;;  %v2496_v7 = vsel %vm785_vm0, %v2252_v62, 0.0  ;;  %v11739_v53 = vld [vmem:[#allocation65_spill] sm:$0xff] }
 0x38f   :  { %11732 = vst [vmem:[#allocation323_spill] sm:$0xff] %v8525_v54  ;;  %v8535_v59 = vpop.xlane.xlu1 %1897  ;;  %v5612_v54 = vld [vmem:[%s10858_s0 + $0x1d8] sm:$0xff]  ;;  %v2254_v62 = vsel %vm11226_vm13, %v5613_v36, 0.0  ;;  %vm11235_vm13 = vcmp.eq.s32.totalorder %v7871_v45, %v11739_v53 }
 0x390   :  { %11734 = vst [vmem:[#allocation324_spill] sm:$0xff] %v8535_v59  ;;  %v2253_v50 = vsel %vm11227_vm12, %v5612_v54, 0.0 }
 0x391   :  { %2494 = vadd.xlane.f32.xlu0 %v2493_v1  ;;  %v11737_v1 = vld [vmem:[#allocation66_spill] sm:$0xff]  ;;  %v2499_v54 = vsel %vm785_vm0, %v2253_v50, 0.0  ;;  %v5615_v50 = vld [vmem:[%s10858_s0 + $0x1f0] sm:$0xff] }
 0x392   :  { %2497 = vadd.xlane.f32.xlu1 %v2496_v7  ;;  %v8547_v63 = vpop.xlane.xlu0 %1900  ;;  %vm11230_vm15 = vcmp.eq.s32.totalorder %v7871_v45, %v11737_v1  ;;  %v2502_v7 = vsel %vm785_vm0, %v2254_v62, 0.0  ;;  %v11743_v1 = vld [vmem:[#allocation67_spill] sm:$0xff] }
 0x393   :  { %11736 = vst [vmem:[#allocation325_spill] sm:$0xff] %v8547_v63  ;;  %v8557_v59 = vpop.xlane.xlu1 %1903  ;;  %v5614_v63 = vld [vmem:[%s10858_s0 + $0x1e8] sm:$0xff]  ;;  %v2256_v62 = vsel %vm11230_vm15, %v5615_v50, 0.0  ;;  %vm11238_vm15 = vcmp.eq.s32.totalorder %v7871_v45, %v11743_v1 }
 0x394   :  { %11738 = vst [vmem:[#allocation326_spill] sm:$0xff] %v8557_v59  ;;  %v2255_v25 = vsel %vm11231_vm14, %v5614_v63, 0.0  ;;  %v11767_v1 = vld [vmem:[#allocation132_spill] sm:$0xff] }
 0x395   :  { %2500 = vadd.xlane.f32.xlu0 %v2499_v54  ;;  %v11741_v54 = vld [vmem:[#allocation68_spill] sm:$0xff]  ;;  %v2505_v63 = vsel %vm785_vm0, %v2255_v25, 0.0  ;;  %v5617_v25 = vld [vmem:[%s10858_s0 + $0x200] sm:$0xff] }
 0x396   :  { %2503 = vadd.xlane.f32.xlu1 %v2502_v7  ;;  %v8569_v36 = vpop.xlane.xlu0 %1906  ;;  %vm11234_vm12 = vcmp.eq.s32.totalorder %v7871_v45, %v11741_v54  ;;  %v2508_v7 = vsel %vm785_vm0, %v2256_v62, 0.0  ;;  %v11747_v54 = vld [vmem:[#allocation69_spill] sm:$0xff] }
 0x397   :  { %11740 = vst [vmem:[#allocation327_spill] sm:$0xff] %v8569_v36  ;;  %v8579_v59 = vpop.xlane.xlu1 %1909  ;;  %v5616_v36 = vld [vmem:[%s10858_s0 + $0x1f8] sm:$0xff]  ;;  %v2258_v62 = vsel %vm11234_vm12, %v5617_v25, 0.0  ;;  %vm11240_vm12 = vcmp.eq.s32.totalorder %v7871_v45, %v11747_v54 }
 0x398   :  { %11742 = vst [vmem:[#allocation328_spill] sm:$0xff] %v8579_v59  ;;  %v2257_v9 = vsel %vm11235_vm13, %v5616_v36, 0.0 }
 0x399   :  { %2506 = vadd.xlane.f32.xlu0 %v2505_v63  ;;  %v11745_v63 = vld [vmem:[#allocation70_spill] sm:$0xff]  ;;  %v2511_v36 = vsel %vm785_vm0, %v2257_v9, 0.0  ;;  %v5619_v9 = vld [vmem:[%s10858_s0 + $0x210] sm:$0xff] }
 0x39a   :  { %2509 = vadd.xlane.f32.xlu1 %v2508_v7  ;;  %v8591_v50 = vpop.xlane.xlu0 %1912  ;;  %vm11237_vm14 = vcmp.eq.s32.totalorder %v7871_v45, %v11745_v63  ;;  %v2514_v7 = vsel %vm785_vm0, %v2258_v62, 0.0  ;;  %v11751_v63 = vld [vmem:[#allocation71_spill] sm:$0xff] }
 0x39b   :  { %11744 = vst [vmem:[#allocation329_spill] sm:$0xff] %v8591_v50  ;;  %v8601_v59 = vpop.xlane.xlu1 %1915  ;;  %v5618_v50 = vld [vmem:[%s10858_s0 + $0x208] sm:$0xff]  ;;  %v2260_v62 = vsel %vm11237_vm14, %v5619_v9, 0.0  ;;  %vm11243_vm14 = vcmp.eq.s32.totalorder %v7871_v45, %v11751_v63 }
 0x39c   :  { %11746 = vst [vmem:[#allocation330_spill] sm:$0xff] %v8601_v59  ;;  %v2259_v53 = vsel %vm11238_vm15, %v5618_v50, 0.0 }
 0x39d   :  { %2512 = vadd.xlane.f32.xlu0 %v2511_v36  ;;  %v11749_v36 = vld [vmem:[#allocation72_spill] sm:$0xff]  ;;  %v2517_v59 = vsel %vm785_vm0, %v2259_v53, 0.0 }
 0x39e   :  { %2515 = vadd.xlane.f32.xlu1 %v2514_v7  ;;  %v8613_v25 = vpop.xlane.xlu0 %1918  ;;  %vm11239_vm13 = vcmp.eq.s32.totalorder %v7871_v45, %v11749_v36  ;;  %v2520_v7 = vsel %vm785_vm0, %v2260_v62, 0.0  ;;  %v11753_v62 = vld [vmem:[#allocation74_spill] sm:$0xff] }
 0x39f   :  { %11748 = vst [vmem:[#allocation331_spill] sm:$0xff] %v8613_v25  ;;  %v8624_v50 = vpop.xlane.xlu1 %1921  ;;  %v5620_v25 = vld [vmem:[%s10858_s0 + $0x218] sm:$0xff]  ;;  %vm11242_vm15 = vcmp.eq.s32.totalorder %v7871_v45, %v11753_v62  ;;  %v11759_v62 = vld [vmem:[#allocation75_spill] sm:$0xff] }
 0x3a0   :  { %11750 = vst [vmem:[#allocation332_spill] sm:$0xff] %v8624_v50  ;;  %v2261_v9 = vsel %vm11240_vm12, %v5620_v25, 0.0  ;;  %v11755_v50 = vld [vmem:[#allocation73_spill] sm:$0xff] }
 0x3a1   :  { %2518 = vadd.xlane.f32.xlu0 %v2517_v59  ;;  %v5621_v59 = vld [vmem:[%s10858_s0 + $0x220] sm:$0xff]  ;;  %v2523_v40 = vsel %vm785_vm0, %v2261_v9, 0.0  ;;  %v5623_v9 = vld [vmem:[%s10858_s0 + $0x230] sm:$0xff] }
 0x3a2   :  { %2521 = vadd.xlane.f32.xlu1 %v2520_v7  ;;  %v8637_v15 = vpop.xlane.xlu0 %1924  ;;  %v2262_v53 = vsel %vm11239_vm13, %v5621_v59, 0.0  ;;  %vm728_vm13 = vcmp.eq.s32.totalorder %v7871_v45, %v11755_v50 }
 0x3a3   :  { %11752 = vst [vmem:[#allocation333_spill] sm:$0xff] %v8637_v15  ;;  %v8648_v25 = vpop.xlane.xlu1 %1927  ;;  %v2526_v7 = vsel %vm785_vm0, %v2262_v53, 0.0  ;;  %v5622_v15 = vld [vmem:[%s10858_s0 + $0x228] sm:$0xff]  ;;  %v2264_v53 = vsel %vm11242_vm15, %v5623_v9, 0.0  ;;  %vm11249_vm15 = vcmp.eq.s32.totalorder %v7871_v45, %v11759_v62 }
 0x3a4   :  { %11754 = vst [vmem:[#allocation334_spill] sm:$0xff] %v8648_v25  ;;  %v2263_v59 = vsel %vm11243_vm14, %v5622_v15, 0.0  ;;  %v5624_v25 = vld [vmem:[%s10858_s0 + $0x238] sm:$0xff] }
 0x3a5   :  { %2524 = vadd.xlane.f32.xlu0 %v2523_v40  ;;  %v11757_v40 = vld [vmem:[#allocation76_spill] sm:$0xff]  ;;  %v2529_v0 = vsel %vm785_vm0, %v2263_v59, 0.0  ;;  %v2265_v9 = vsel %vm728_vm13, %v5624_v25, 0.0  ;;  %v5625_v59 = vld [vmem:[%s10858_s0 + $0x240] sm:$0xff] }
 0x3a6   :  { %2527 = vadd.xlane.f32.xlu1 %v2526_v7  ;;  %v8661_v11 = vpop.xlane.xlu0 %1930  ;;  %vm11248_vm12 = vcmp.eq.s32.totalorder %v7871_v45, %v11757_v40  ;;  %v4934_v7 = vpop.eup %4933  ;;  %4965 = vlog2.f32 %v7643_v20 }
 0x3a7   :  { %11756 = vst [vmem:[#allocation335_spill] sm:$0xff] %v8661_v11  ;;  %v8672_v15 = vpop.xlane.xlu1 %1933  ;;  %v2532_v11 = vsel %vm785_vm0, %v2264_v53, 0.0  ;;  %v2266_v53 = vsel %vm11248_vm12, %v5625_v59, 0.0  ;;  %v1939_v50 = vmul.f32 0.6931472, %v4934_v7  ;;  %v5626_v59 = vld [vmem:[%s10858_s0 + $0x248] sm:$0xff]  ;;  %vm11254_vm12 = vcmp.eq.s32.totalorder %v7871_v45, %v11763_v43 }
 0x3a8   :  { %11758 = vst [vmem:[#allocation336_spill] sm:$0xff] %v8672_v15  ;;  %v4936_v15 = vpop.eup %4935  ;;  %v2538_v36 = vsel %vm785_vm0, %v2266_v53, 0.0  ;;  %v2267_v40 = vsel %vm11249_vm15, %v5626_v59, 0.0  ;;  %v11766_v59 = vld [vmem:[#allocation133_spill] sm:$0xff]  ;;  %4967 = vlog2.f32 %v7651_v46 }
 0x3a9   :  { %2530 = vadd.xlane.f32.xlu0 %v2529_v0  ;;  %v11761_v0 = vld [vmem:[#allocation78_spill] sm:$0xff]  ;;  %v4938_v63 = vpop.eup %4937  ;;  %v2541_v34 = vsel %vm785_vm0, %v2267_v40, 0.0  ;;  %4969 = vlog2.f32 %v7657_v16 }
 0x3aa   :  { %2533 = vadd.xlane.f32.xlu1 %v2532_v11  ;;  %v8685_v39 = vpop.xlane.xlu0 %1936  ;;  %vm11253_vm14 = vcmp.eq.s32.totalorder %v7871_v45, %v11761_v0  ;;  %v4940_v62 = vpop.eup %4939  ;;  %v1943_v54 = vmul.f32 0.6931472, %v4938_v63  ;;  %4971 = vlog2.f32 %v7665_v24 }
 0x3ab   :  { %11760 = vst [vmem:[#allocation337_spill] sm:$0xff] %v8685_v39  ;;  %v2324_v25 = vpop.xlane.xlu1 %2323  ;;  %v2535_v39 = vsel %vm785_vm0, %v2265_v9, 0.0  ;;  %v5627_v9 = vld [vmem:[%s10858_s0 + $0x250] sm:$0xff]  ;;  %v4942_v19 = vpop.eup %4941  ;;  %4973 = vlog2.f32 %v7671_v32 }
 0x3ac   :  { %v3224_v11 = vsub.f32 %v2324_v25, %v11762_v6  ;;  %v11765_v25 = vld [vmem:[#allocation80_spill] sm:$0xff]  ;;  %v1941_v6 = vmul.f32 0.6931472, %v4936_v15 }
 0x3ad   :  { %2536 = vadd.xlane.f32.xlu0 %v2535_v39  ;;  %v2268_v39 = vsel %vm11253_vm14, %v5627_v9, 0.0  ;;  %vm11255_vm15 = vcmp.eq.s32.totalorder %v7871_v45, %v11765_v25  ;;  %v11771_v9 = vld [vmem:[#allocation82_spill] sm:$0xff] }
 0x3ae   :  { %2539 = vadd.xlane.f32.xlu1 %v2538_v36  ;;  %v2327_v7 = vpop.xlane.xlu0 %2326  ;;  %v8714_v53 = vsub.f32 %v3224_v11, %v1939_v50  ;;  %v2544_v50 = vsel %vm785_vm0, %v2268_v39, 0.0  ;;  %v5628_v11 = vld [vmem:[%s10858_s0 + $0x258] sm:$0xff]  ;;  %v1945_v39 = vmul.f32 0.6931472, %v4940_v62  ;;  %v11774_v62 = vld [vmem:[#allocation81_spill] sm:$0xff] }
 0x3af   :  { %v3225_v61 = vsub.f32 %v2327_v7, %v11766_v59  ;;  %v2330_v36 = vpop.xlane.xlu1 %2329  ;;  %v2269_v47 = vsel %vm11254_vm12, %v5628_v11, 0.0  ;;  %v11769_v7 = vld [vmem:[#allocation79_spill] sm:$0xff]  ;;  %vm11257_vm12 = vcmp.eq.s32.totalorder %v7871_v45, %v11771_v9  ;;  %v4944_v59 = vpop.eup %4943  ;;  %4975 = vlog2.f32 %v7679_v38 }
 0x3b0   :  { %11764 = vst [vmem:[#allocation78_spill] sm:$0xff] %v8714_v53  ;;  %v3226_v44 = vsub.f32 %v2330_v36, %v11767_v1  ;;  %vm11256_vm14 = vcmp.eq.s32.totalorder %v7871_v45, %v11769_v7  ;;  %v11772_v36 = vld [vmem:[#allocation134_spill] sm:$0xff]  ;;  %v2547_v11 = vsel %vm785_vm0, %v2269_v47, 0.0  ;;  %v5631_v47 = vld [vmem:[%s10858_s0 + $0x270] sm:$0xff] }
 0x3b1   :  { %2542 = vadd.xlane.f32.xlu0 %v2541_v34  ;;  %v8729_v15 = vsub.f32 %v3225_v61, %v1941_v6  ;;  %v5629_v34 = vld [vmem:[%s10858_s0 + $0x260] sm:$0xff]  ;;  %v1947_v61 = vmul.f32 0.6931472, %v4942_v19 }
 0x3b2   :  { %2545 = vadd.xlane.f32.xlu1 %v2544_v50  ;;  %v2333_v1 = vpop.xlane.xlu0 %2332  ;;  %v2270_v63 = vsel %vm11255_vm15, %v5629_v34, 0.0  ;;  %v8740_v40 = vsub.f32 %v3226_v44, %v1943_v54  ;;  %v5630_v54 = vld [vmem:[%s10858_s0 + $0x268] sm:$0xff]  ;;  %vm11258_vm15 = vcmp.eq.s32.totalorder %v7871_v45, %v11774_v62 }
 0x3b3   :  { %11768 = vst [vmem:[#allocation130_spill] sm:$0xff] %v8729_v15  ;;  %v3227_v29 = vsub.f32 %v2333_v1, %v6713_v13  ;;  %v2336_v6 = vpop.xlane.xlu1 %2335  ;;  %v4946_v15 = vpop.eup %4945  ;;  %v2550_v44 = vsel %vm785_vm0, %v2270_v63, 0.0  ;;  %v2271_v51 = vsel %vm11256_vm14, %v5630_v54, 0.0  ;;  %v2272_v1 = vsel %vm11257_vm12, %v5631_v47, 0.0  ;;  %v11776_v63 = vld [vmem:[#allocation84_spill] sm:$0xff] }
 0x3b4   :  { %11770 = vst [vmem:[#allocation77_spill] sm:$0xff] %v8740_v40  ;;  %v3228_v50 = vsub.f32 %v2336_v6, %v11772_v36  ;;  %vm11259_vm14 = vcmp.eq.s32.totalorder %v7871_v45, %v11776_v63  ;;  %v4948_v36 = vpop.eup %4947  ;;  %4977 = vlog2.f32 %v7685_v58 }
 0x3b5   :  { %2548 = vadd.xlane.f32.xlu0 %v2547_v11  ;;  %v8755_v13 = vsub.f32 %v3227_v29, %v1945_v39  ;;  %v1949_v39 = vmul.f32 0.6931472, %v4944_v59  ;;  %v11777_v29 = vld [vmem:[#allocation135_spill] sm:$0xff]  ;;  %v1951_v11 = vmul.f32 0.6931472, %v4946_v15  ;;  %v4950_v40 = vpop.eup %4949  ;;  %4979 = vlog2.f32 %v7693_v37 }
 0x3b6   :  { %2551 = vadd.xlane.f32.xlu1 %v2550_v44  ;;  %v2339_v19 = vpop.xlane.xlu0 %2338  ;;  %v8766_v34 = vsub.f32 %v3228_v50, %v1947_v61  ;;  %v11778_v44 = vld [vmem:[#allocation136_spill] sm:$0xff]  ;;  %v2556_v61 = vsel %vm785_vm0, %v2272_v1, 0.0  ;;  %v5632_v50 = vld [vmem:[%s10858_s0 + $0x278] sm:$0xff]  ;;  %v11782_v1 = vld [vmem:[#allocation85_spill] sm:$0xff]  ;;  %4981 = vlog2.f32 %v7699_v49 }
 0x3b7   :  { %11773 = vst [vmem:[#allocation80_spill] sm:$0xff] %v8755_v13  ;;  %v3229_v14 = vsub.f32 %v2339_v19, %v11777_v29  ;;  %v2342_v6 = vpop.xlane.xlu1 %2341  ;;  %v2553_v13 = vsel %vm785_vm0, %v2271_v51, 0.0  ;;  %v2273_v55 = vsel %vm11258_vm15, %v5632_v50, 0.0  ;;  %v11780_v19 = vld [vmem:[#allocation83_spill] sm:$0xff]  ;;  %vm11261_vm15 = vcmp.eq.s32.totalorder %v7871_v45, %v11782_v1  ;;  %v11783_v29 = vld [vmem:[#allocation137_spill] sm:$0xff] }
 0x3b8   :  { %11775 = vst [vmem:[#allocation133_spill] sm:$0xff] %v8766_v34  ;;  %v3230_v54 = vsub.f32 %v2342_v6, %v11778_v44  ;;  %vm11260_vm12 = vcmp.eq.s32.totalorder %v7871_v45, %v11780_v19  ;;  %v5633_v51 = vld [vmem:[%s10858_s0 + $0x280] sm:$0xff]  ;;  %v4952_v6 = vpop.eup %4951  ;;  %v1955_v44 = vmul.f32 0.6931472, %v4950_v40  ;;  %4983 = vlog2.f32 %v7707_v28 }
 0x3b9   :  { %2554 = vadd.xlane.f32.xlu0 %v2553_v13  ;;  %v8781_v59 = vsub.f32 %v3229_v14, %v1949_v39  ;;  %v2274_v13 = vsel %vm11259_vm14, %v5633_v51, 0.0  ;;  %v1953_v39 = vmul.f32 0.6931472, %v4948_v36  ;;  %v4954_v34 = vpop.eup %4953  ;;  %4985 = vlog2.f32 %v7713_v2 }
 0x3ba   :  { %2557 = vadd.xlane.f32.xlu1 %v2556_v61  ;;  %v2345_v15 = vpop.xlane.xlu0 %2344  ;;  %v8792_v47 = vsub.f32 %v3230_v54, %v1951_v11  ;;  %v11784_v61 = vld [vmem:[#allocation138_spill] sm:$0xff]  ;;  %v2562_v11 = vsel %vm785_vm0, %v2274_v13, 0.0  ;;  %v5634_v54 = vld [vmem:[%s10858_s0 + $0x288] sm:$0xff]  ;;  %v11788_v13 = vld [vmem:[#allocation87_spill] sm:$0xff] }
 0x3bb   :  { %11779 = vst [vmem:[#allocation132_spill] sm:$0xff] %v8781_v59  ;;  %v3231_v42 = vsub.f32 %v2345_v15, %v11783_v29  ;;  %v2348_v14 = vpop.xlane.xlu1 %2347  ;;  %v2559_v59 = vsel %vm785_vm0, %v2273_v55, 0.0  ;;  %v2275_v21 = vsel %vm11260_vm12, %v5634_v54, 0.0  ;;  %v11786_v15 = vld [vmem:[#allocation86_spill] sm:$0xff]  ;;  %v5635_v55 = vld [vmem:[%s10858_s0 + $0x290] sm:$0xff]  ;;  %vm11263_vm12 = vcmp.eq.s32.totalorder %v7871_v45, %v11788_v13  ;;  %v11789_v29 = vld [vmem:[#allocation139_spill] sm:$0xff] }
 0x3bc   :  { %11781 = vst [vmem:[#allocation79_spill] sm:$0xff] %v8792_v47  ;;  %v3232_v50 = vsub.f32 %v2348_v14, %v11784_v61  ;;  %vm11262_vm14 = vcmp.eq.s32.totalorder %v7871_v45, %v11786_v15  ;;  %v4956_v14 = vpop.eup %4955  ;;  %v1959_v61 = vmul.f32 0.6931472, %v4954_v34  ;;  %4987 = vlog2.f32 %v7721_v22 }
 0x3bd   :  { %2560 = vadd.xlane.f32.xlu0 %v2559_v59  ;;  %v8807_v36 = vsub.f32 %v3231_v42, %v1953_v39  ;;  %v2276_v59 = vsel %vm11261_vm15, %v5635_v55, 0.0  ;;  %v1957_v39 = vmul.f32 0.6931472, %v4952_v6  ;;  %v4958_v47 = vpop.eup %4957  ;;  %4989 = vlog2.f32 %v7727_v18 }
 0x3be   :  { %2563 = vadd.xlane.f32.xlu1 %v2562_v11  ;;  %v2351_v40 = vpop.xlane.xlu0 %2350  ;;  %v8818_v51 = vsub.f32 %v3232_v50, %v1955_v44  ;;  %v11790_v11 = vld [vmem:[#allocation140_spill] sm:$0xff]  ;;  %v2568_v44 = vsel %vm785_vm0, %v2276_v59, 0.0  ;;  %v5636_v50 = vld [vmem:[%s10858_s0 + $0x298] sm:$0xff]  ;;  %v11794_v59 = vld [vmem:[#allocation89_spill] sm:$0xff] }
 0x3bf   :  { %11785 = vst [vmem:[#allocation82_spill] sm:$0xff] %v8807_v36  ;;  %v3233_v5 = vsub.f32 %v2351_v40, %v11789_v29  ;;  %v2354_v42 = vpop.xlane.xlu1 %2353  ;;  %v2565_v36 = vsel %vm785_vm0, %v2275_v21, 0.0  ;;  %v2277_v20 = vsel %vm11262_vm14, %v5636_v50, 0.0  ;;  %v11792_v40 = vld [vmem:[#allocation88_spill] sm:$0xff]  ;;  %v5637_v21 = vld [vmem:[%s10858_s0 + $0x2a0] sm:$0xff]  ;;  %vm11265_vm14 = vcmp.eq.s32.totalorder %v7871_v45, %v11794_v59  ;;  %v11795_v29 = vld [vmem:[#allocation141_spill] sm:$0xff] }
 0x3c0   :  { %11787 = vst [vmem:[#allocation134_spill] sm:$0xff] %v8818_v51  ;;  %v3234_v54 = vsub.f32 %v2354_v42, %v11790_v11  ;;  %vm11264_vm15 = vcmp.eq.s32.totalorder %v7871_v45, %v11792_v40  ;;  %v4960_v42 = vpop.eup %4959  ;;  %v1963_v11 = vmul.f32 0.6931472, %v4958_v47  ;;  %4991 = vlog2.f32 %v7735_v30 }
 0x3c1   :  { %2566 = vadd.xlane.f32.xlu0 %v2565_v36  ;;  %v8833_v6 = vsub.f32 %v3233_v5, %v1957_v39  ;;  %v2278_v36 = vsel %vm11263_vm12, %v5637_v21, 0.0  ;;  %v1961_v39 = vmul.f32 0.6931472, %v4956_v14  ;;  %v4962_v51 = vpop.eup %4961  ;;  %4993 = vlog2.f32 %v7741_v26 }
 0x3c2   :  { %2569 = vadd.xlane.f32.xlu1 %v2568_v44  ;;  %v2357_v34 = vpop.xlane.xlu0 %2356  ;;  %v8844_v55 = vsub.f32 %v3234_v54, %v1959_v61  ;;  %v11796_v44 = vld [vmem:[#allocation142_spill] sm:$0xff]  ;;  %v2574_v61 = vsel %vm785_vm0, %v2278_v36, 0.0  ;;  %v5638_v54 = vld [vmem:[%s10858_s0 + $0x2a8] sm:$0xff]  ;;  %v11800_v36 = vld [vmem:[#allocation91_spill] sm:$0xff] }
 0x3c3   :  { %11791 = vst [vmem:[#allocation81_spill] sm:$0xff] %v8833_v6  ;;  %v3235_v46 = vsub.f32 %v2357_v34, %v11795_v29  ;;  %v2360_v5 = vpop.xlane.xlu1 %2359  ;;  %v2571_v6 = vsel %vm785_vm0, %v2277_v20, 0.0  ;;  %v2279_v16 = vsel %vm11264_vm15, %v5638_v54, 0.0  ;;  %v11798_v34 = vld [vmem:[#allocation90_spill] sm:$0xff]  ;;  %v5639_v20 = vld [vmem:[%s10858_s0 + $0x2b0] sm:$0xff]  ;;  %vm11267_vm15 = vcmp.eq.s32.totalorder %v7871_v45, %v11800_v36  ;;  %v11801_v29 = vld [vmem:[#allocation143_spill] sm:$0xff] }
 0x3c4   :  { %11793 = vst [vmem:[#allocation84_spill] sm:$0xff] %v8844_v55  ;;  %v3236_v50 = vsub.f32 %v2360_v5, %v11796_v44  ;;  %vm11266_vm12 = vcmp.eq.s32.totalorder %v7871_v45, %v11798_v34  ;;  %v4964_v5 = vpop.eup %4963  ;;  %v1967_v44 = vmul.f32 0.6931472, %v4962_v51  ;;  %4995 = vlog2.f32 %v7749_v8 }
 0x3c5   :  { %2572 = vadd.xlane.f32.xlu0 %v2571_v6  ;;  %v8859_v14 = vsub.f32 %v3235_v46, %v1961_v39  ;;  %v2280_v6 = vsel %vm11265_vm14, %v5639_v20, 0.0  ;;  %v1965_v39 = vmul.f32 0.6931472, %v4960_v42  ;;  %v4966_v55 = vpop.eup %4965  ;;  %4997 = vlog2.f32 %v7755_v41 }
 0x3c6   :  { %2575 = vadd.xlane.f32.xlu1 %v2574_v61  ;;  %v2363_v47 = vpop.xlane.xlu0 %2362  ;;  %v8870_v21 = vsub.f32 %v3236_v50, %v1963_v11  ;;  %v11802_v61 = vld [vmem:[#allocation144_spill] sm:$0xff]  ;;  %v2580_v11 = vsel %vm785_vm0, %v2280_v6, 0.0  ;;  %v5640_v50 = vld [vmem:[%s10858_s0 + $0x2b8] sm:$0xff]  ;;  %v11806_v6 = vld [vmem:[#allocation93_spill] sm:$0xff] }
 0x3c7   :  { %11797 = vst [vmem:[#allocation135_spill] sm:$0xff] %v8859_v14  ;;  %v3237_v24 = vsub.f32 %v2363_v47, %v11801_v29  ;;  %v2366_v46 = vpop.xlane.xlu1 %2365  ;;  %v2577_v14 = vsel %vm785_vm0, %v2279_v16, 0.0  ;;  %v2281_v32 = vsel %vm11266_vm12, %v5640_v50, 0.0  ;;  %v11804_v47 = vld [vmem:[#allocation92_spill] sm:$0xff]  ;;  %v5641_v16 = vld [vmem:[%s10858_s0 + $0x2c0] sm:$0xff]  ;;  %vm11269_vm12 = vcmp.eq.s32.totalorder %v7871_v45, %v11806_v6  ;;  %v11807_v29 = vld [vmem:[#allocation145_spill] sm:$0xff] }
 0x3c8   :  { %11799 = vst [vmem:[#allocation136_spill] sm:$0xff] %v8870_v21  ;;  %v3238_v54 = vsub.f32 %v2366_v46, %v11802_v61  ;;  %vm11268_vm14 = vcmp.eq.s32.totalorder %v7871_v45, %v11804_v47  ;;  %v4968_v46 = vpop.eup %4967  ;;  %v1971_v61 = vmul.f32 0.6931472, %v4966_v55  ;;  %4999 = vlog2.f32 %v7763_v33 }
 0x3c9   :  { %2578 = vadd.xlane.f32.xlu0 %v2577_v14  ;;  %v8885_v42 = vsub.f32 %v3237_v24, %v1965_v39  ;;  %v2282_v14 = vsel %vm11267_vm15, %v5641_v16, 0.0  ;;  %v1969_v39 = vmul.f32 0.6931472, %v4964_v5  ;;  %v4970_v21 = vpop.eup %4969  ;;  %5001 = vlog2.f32 %v7769_v12 }
 0x3ca   :  { %2581 = vadd.xlane.f32.xlu1 %v2580_v11  ;;  %v2369_v51 = vpop.xlane.xlu0 %2368  ;;  %v8896_v20 = vsub.f32 %v3238_v54, %v1967_v44  ;;  %v11808_v11 = vld [vmem:[#allocation146_spill] sm:$0xff]  ;;  %v2586_v44 = vsel %vm785_vm0, %v2282_v14, 0.0  ;;  %v5642_v54 = vld [vmem:[%s10858_s0 + $0x2c8] sm:$0xff]  ;;  %v11812_v14 = vld [vmem:[#allocation95_spill] sm:$0xff] }
 0x3cb   :  { %11803 = vst [vmem:[#allocation83_spill] sm:$0xff] %v8885_v42  ;;  %v3239_v38 = vsub.f32 %v2369_v51, %v11807_v29  ;;  %v2372_v24 = vpop.xlane.xlu1 %2371  ;;  %v2583_v42 = vsel %vm785_vm0, %v2281_v32, 0.0  ;;  %v2283_v58 = vsel %vm11268_vm14, %v5642_v54, 0.0  ;;  %v11810_v51 = vld [vmem:[#allocation94_spill] sm:$0xff]  ;;  %v5643_v32 = vld [vmem:[%s10858_s0 + $0x2d0] sm:$0xff]  ;;  %vm11271_vm14 = vcmp.eq.s32.totalorder %v7871_v45, %v11812_v14  ;;  %v11813_v29 = vld [vmem:[#allocation147_spill] sm:$0xff] }
 0x3cc   :  { %11805 = vst [vmem:[#allocation85_spill] sm:$0xff] %v8896_v20  ;;  %v3240_v50 = vsub.f32 %v2372_v24, %v11808_v11  ;;  %vm11270_vm15 = vcmp.eq.s32.totalorder %v7871_v45, %v11810_v51  ;;  %v4972_v24 = vpop.eup %4971  ;;  %v1975_v11 = vmul.f32 0.6931472, %v4970_v21  ;;  %5003 = vlog2.f32 %v7777_v57 }
 0x3cd   :  { %2584 = vadd.xlane.f32.xlu0 %v2583_v42  ;;  %v8911_v5 = vsub.f32 %v3239_v38, %v1969_v39  ;;  %v2284_v42 = vsel %vm11269_vm12, %v5643_v32, 0.0  ;;  %v1973_v39 = vmul.f32 0.6931472, %v4968_v46  ;;  %v4974_v20 = vpop.eup %4973  ;;  %5005 = vlog2.f32 %v7783_v10 }
 0x3ce   :  { %2587 = vadd.xlane.f32.xlu1 %v2586_v44  ;;  %v2375_v55 = vpop.xlane.xlu0 %2374  ;;  %v8922_v16 = vsub.f32 %v3240_v50, %v1971_v61  ;;  %v11814_v44 = vld [vmem:[#allocation148_spill] sm:$0xff]  ;;  %v2592_v61 = vsel %vm785_vm0, %v2284_v42, 0.0  ;;  %v5644_v50 = vld [vmem:[%s10858_s0 + $0x2d8] sm:$0xff]  ;;  %v11818_v42 = vld [vmem:[#allocation97_spill] sm:$0xff] }
 0x3cf   :  { %11809 = vst [vmem:[#allocation137_spill] sm:$0xff] %v8911_v5  ;;  %v3241_v37 = vsub.f32 %v2375_v55, %v11813_v29  ;;  %v2378_v38 = vpop.xlane.xlu1 %2377  ;;  %v2589_v5 = vsel %vm785_vm0, %v2283_v58, 0.0  ;;  %v2285_v49 = vsel %vm11270_vm15, %v5644_v50, 0.0  ;;  %v11816_v55 = vld [vmem:[#allocation96_spill] sm:$0xff]  ;;  %v5645_v58 = vld [vmem:[%s10858_s0 + $0x2e0] sm:$0xff]  ;;  %vm11273_vm15 = vcmp.eq.s32.totalorder %v7871_v45, %v11818_v42  ;;  %v11819_v29 = vld [vmem:[#allocation149_spill] sm:$0xff] }
 0x3d0   :  { %11811 = vst [vmem:[#allocation138_spill] sm:$0xff] %v8922_v16  ;;  %v3242_v54 = vsub.f32 %v2378_v38, %v11814_v44  ;;  %vm11272_vm12 = vcmp.eq.s32.totalorder %v7871_v45, %v11816_v55  ;;  %v4976_v38 = vpop.eup %4975  ;;  %v1979_v44 = vmul.f32 0.6931472, %v4974_v20  ;;  %5007 = vlog2.f32 %v7791_v4  ;;  %v12069_v42 = vld [vmem:[#allocation204_spill] sm:$0xff] }
 0x3d1   :  { %2590 = vadd.xlane.f32.xlu0 %v2589_v5  ;;  %v8937_v46 = vsub.f32 %v3241_v37, %v1973_v39  ;;  %v2286_v5 = vsel %vm11271_vm14, %v5645_v58, 0.0  ;;  %v1977_v39 = vmul.f32 0.6931472, %v4972_v24  ;;  %v4978_v16 = vpop.eup %4977  ;;  %5009 = vlog2.f32 %v7797_v3 }
 0x3d2   :  { %2593 = vadd.xlane.f32.xlu1 %v2592_v61  ;;  %v2381_v21 = vpop.xlane.xlu0 %2380  ;;  %v8948_v32 = vsub.f32 %v3242_v54, %v1975_v11  ;;  %v11820_v61 = vld [vmem:[#allocation150_spill] sm:$0xff]  ;;  %v2598_v11 = vsel %vm785_vm0, %v2286_v5, 0.0  ;;  %v5646_v54 = vld [vmem:[%s10858_s0 + $0x2e8] sm:$0xff]  ;;  %v11824_v5 = vld [vmem:[#allocation99_spill] sm:$0xff] }
 0x3d3   :  { %11815 = vst [vmem:[#allocation86_spill] sm:$0xff] %v8937_v46  ;;  %v3243_v28 = vsub.f32 %v2381_v21, %v11819_v29  ;;  %v2384_v37 = vpop.xlane.xlu1 %2383  ;;  %v2595_v46 = vsel %vm785_vm0, %v2285_v49, 0.0  ;;  %v2287_v2 = vsel %vm11272_vm12, %v5646_v54, 0.0  ;;  %v11822_v21 = vld [vmem:[#allocation98_spill] sm:$0xff]  ;;  %v5647_v49 = vld [vmem:[%s10858_s0 + $0x2f0] sm:$0xff]  ;;  %vm11275_vm12 = vcmp.eq.s32.totalorder %v7871_v45, %v11824_v5  ;;  %v11825_v29 = vld [vmem:[#allocation151_spill] sm:$0xff] }
 0x3d4   :  { %11817 = vst [vmem:[#allocation87_spill] sm:$0xff] %v8948_v32  ;;  %v3244_v50 = vsub.f32 %v2384_v37, %v11820_v61  ;;  %vm11274_vm14 = vcmp.eq.s32.totalorder %v7871_v45, %v11822_v21  ;;  %v4980_v37 = vpop.eup %4979  ;;  %v1983_v61 = vmul.f32 0.6931472, %v4978_v16  ;;  %5011 = vlog2.f32 %v7805_v35 }
 0x3d5   :  { %2596 = vadd.xlane.f32.xlu0 %v2595_v46  ;;  %v8963_v24 = vsub.f32 %v3243_v28, %v1977_v39  ;;  %v2288_v46 = vsel %vm11273_vm15, %v5647_v49, 0.0  ;;  %v1981_v39 = vmul.f32 0.6931472, %v4976_v38  ;;  %v4982_v32 = vpop.eup %4981  ;;  %5013 = vlog2.f32 %v7811_v60 }
 0x3d6   :  { %2599 = vadd.xlane.f32.xlu1 %v2598_v11  ;;  %v2387_v20 = vpop.xlane.xlu0 %2386  ;;  %v8974_v58 = vsub.f32 %v3244_v50, %v1979_v44  ;;  %v11826_v11 = vld [vmem:[#allocation152_spill] sm:$0xff]  ;;  %v2604_v44 = vsel %vm785_vm0, %v2288_v46, 0.0  ;;  %v5648_v50 = vld [vmem:[%s10858_s0 + $0x2f8] sm:$0xff]  ;;  %v11830_v46 = vld [vmem:[#allocation101_spill] sm:$0xff] }
 0x3d7   :  { %11821 = vst [vmem:[#allocation139_spill] sm:$0xff] %v8963_v24  ;;  %v3245_v22 = vsub.f32 %v2387_v20, %v11825_v29  ;;  %v2390_v28 = vpop.xlane.xlu1 %2389  ;;  %v2601_v24 = vsel %vm785_vm0, %v2287_v2, 0.0  ;;  %v2289_v18 = vsel %vm11274_vm14, %v5648_v50, 0.0  ;;  %v11828_v20 = vld [vmem:[#allocation100_spill] sm:$0xff]  ;;  %v5649_v2 = vld [vmem:[%s10858_s0 + $0x300] sm:$0xff]  ;;  %vm11277_vm14 = vcmp.eq.s32.totalorder %v7871_v45, %v11830_v46  ;;  %v11831_v29 = vld [vmem:[#allocation153_spill] sm:$0xff] }
 0x3d8   :  { %11823 = vst [vmem:[#allocation140_spill] sm:$0xff] %v8974_v58  ;;  %v3246_v54 = vsub.f32 %v2390_v28, %v11826_v11  ;;  %vm11276_vm15 = vcmp.eq.s32.totalorder %v7871_v45, %v11828_v20  ;;  %v4984_v28 = vpop.eup %4983  ;;  %v1987_v11 = vmul.f32 0.6931472, %v4982_v32  ;;  %5015 = vlog2.f32 %v7819_v31 }
 0x3d9   :  { %2602 = vadd.xlane.f32.xlu0 %v2601_v24  ;;  %v8989_v38 = vsub.f32 %v3245_v22, %v1981_v39  ;;  %v2290_v24 = vsel %vm11275_vm12, %v5649_v2, 0.0  ;;  %v1985_v39 = vmul.f32 0.6931472, %v4980_v37  ;;  %v4986_v58 = vpop.eup %4985  ;;  %5017 = vlog2.f32 %v7825_v56 }
 0x3da   :  { %2605 = vadd.xlane.f32.xlu1 %v2604_v44  ;;  %v2393_v16 = vpop.xlane.xlu0 %2392  ;;  %v9000_v49 = vsub.f32 %v3246_v54, %v1983_v61  ;;  %v11832_v44 = vld [vmem:[#allocation154_spill] sm:$0xff]  ;;  %v2610_v61 = vsel %vm785_vm0, %v2290_v24, 0.0  ;;  %v5650_v54 = vld [vmem:[%s10858_s0 + $0x308] sm:$0xff]  ;;  %v11836_v24 = vld [vmem:[#allocation103_spill] sm:$0xff] }
 0x3db   :  { %11827 = vst [vmem:[#allocation88_spill] sm:$0xff] %v8989_v38  ;;  %v3247_v30 = vsub.f32 %v2393_v16, %v11831_v29  ;;  %v2396_v22 = vpop.xlane.xlu1 %2395  ;;  %v2607_v38 = vsel %vm785_vm0, %v2289_v18, 0.0  ;;  %v2291_v26 = vsel %vm11276_vm15, %v5650_v54, 0.0  ;;  %v11834_v16 = vld [vmem:[#allocation102_spill] sm:$0xff]  ;;  %v5651_v18 = vld [vmem:[%s10858_s0 + $0x310] sm:$0xff]  ;;  %vm11279_vm15 = vcmp.eq.s32.totalorder %v7871_v45, %v11836_v24  ;;  %v11837_v29 = vld [vmem:[#allocation155_spill] sm:$0xff] }
 0x3dc   :  { %11829 = vst [vmem:[#allocation89_spill] sm:$0xff] %v9000_v49  ;;  %v3248_v50 = vsub.f32 %v2396_v22, %v11832_v44  ;;  %vm11278_vm12 = vcmp.eq.s32.totalorder %v7871_v45, %v11834_v16  ;;  %v4988_v22 = vpop.eup %4987  ;;  %v1991_v44 = vmul.f32 0.6931472, %v4986_v58  ;;  %5019 = vlog2.f32 %v7833_v27  ;;  %v12027_v24 = vld [vmem:[#allocation198_spill] sm:$0xff] }
 0x3dd   :  { %2608 = vadd.xlane.f32.xlu0 %v2607_v38  ;;  %v9015_v37 = vsub.f32 %v3247_v30, %v1985_v39  ;;  %v2292_v38 = vsel %vm11277_vm14, %v5651_v18, 0.0  ;;  %v1989_v39 = vmul.f32 0.6931472, %v4984_v28  ;;  %v4990_v49 = vpop.eup %4989  ;;  %5021 = vlog2.f32 %v7839_v52 }
 0x3de   :  { %2611 = vadd.xlane.f32.xlu1 %v2610_v61  ;;  %v2399_v32 = vpop.xlane.xlu0 %2398  ;;  %v9026_v2 = vsub.f32 %v3248_v50, %v1987_v11  ;;  %v11838_v61 = vld [vmem:[#allocation156_spill] sm:$0xff]  ;;  %v2616_v11 = vsel %vm785_vm0, %v2292_v38, 0.0  ;;  %v5652_v50 = vld [vmem:[%s10858_s0 + $0x318] sm:$0xff]  ;;  %v11842_v38 = vld [vmem:[#allocation105_spill] sm:$0xff] }
 0x3df   :  { %11833 = vst [vmem:[#allocation141_spill] sm:$0xff] %v9015_v37  ;;  %v3249_v8 = vsub.f32 %v2399_v32, %v11837_v29  ;;  %v2402_v30 = vpop.xlane.xlu1 %2401  ;;  %v2613_v37 = vsel %vm785_vm0, %v2291_v26, 0.0  ;;  %v2293_v41 = vsel %vm11278_vm12, %v5652_v50, 0.0  ;;  %v11840_v32 = vld [vmem:[#allocation104_spill] sm:$0xff]  ;;  %v5653_v26 = vld [vmem:[%s10858_s0 + $0x320] sm:$0xff]  ;;  %vm11281_vm12 = vcmp.eq.s32.totalorder %v7871_v45, %v11842_v38  ;;  %v11843_v29 = vld [vmem:[#allocation157_spill] sm:$0xff] }
 0x3e0   :  { %11835 = vst [vmem:[#allocation142_spill] sm:$0xff] %v9026_v2  ;;  %v3250_v54 = vsub.f32 %v2402_v30, %v11838_v61  ;;  %vm11280_vm14 = vcmp.eq.s32.totalorder %v7871_v45, %v11840_v32  ;;  %v4992_v30 = vpop.eup %4991  ;;  %v1995_v61 = vmul.f32 0.6931472, %v4990_v49  ;;  %5023 = vlog2.f32 %v7847_v23 }
 0x3e1   :  { %2614 = vadd.xlane.f32.xlu0 %v2613_v37  ;;  %v9041_v28 = vsub.f32 %v3249_v8, %v1989_v39  ;;  %v2294_v37 = vsel %vm11279_vm15, %v5653_v26, 0.0  ;;  %v1993_v39 = vmul.f32 0.6931472, %v4988_v22  ;;  %v4994_v2 = vpop.eup %4993  ;;  %5025 = vlog2.f32 %v7853_v48 }
 0x3e2   :  { %2617 = vadd.xlane.f32.xlu1 %v2616_v11  ;;  %v2405_v58 = vpop.xlane.xlu0 %2404  ;;  %v9052_v18 = vsub.f32 %v3250_v54, %v1991_v44  ;;  %v11844_v11 = vld [vmem:[#allocation158_spill] sm:$0xff]  ;;  %v2622_v44 = vsel %vm785_vm0, %v2294_v37, 0.0  ;;  %v5654_v54 = vld [vmem:[%s10858_s0 + $0x328] sm:$0xff]  ;;  %v11848_v37 = vld [vmem:[#allocation107_spill] sm:$0xff] }
 0x3e3   :  { %11839 = vst [vmem:[#allocation90_spill] sm:$0xff] %v9041_v28  ;;  %v3251_v33 = vsub.f32 %v2405_v58, %v11843_v29  ;;  %v2408_v8 = vpop.xlane.xlu1 %2407  ;;  %v2619_v28 = vsel %vm785_vm0, %v2293_v41, 0.0  ;;  %v2295_v12 = vsel %vm11280_vm14, %v5654_v54, 0.0  ;;  %v11846_v58 = vld [vmem:[#allocation106_spill] sm:$0xff]  ;;  %v5655_v41 = vld [vmem:[%s10858_s0 + $0x330] sm:$0xff]  ;;  %vm11283_vm14 = vcmp.eq.s32.totalorder %v7871_v45, %v11848_v37  ;;  %v11849_v29 = vld [vmem:[#allocation159_spill] sm:$0xff] }
 0x3e4   :  { %11841 = vst [vmem:[#allocation91_spill] sm:$0xff] %v9052_v18  ;;  %v3252_v50 = vsub.f32 %v2408_v8, %v11844_v11  ;;  %vm11282_vm15 = vcmp.eq.s32.totalorder %v7871_v45, %v11846_v58  ;;  %v4996_v8 = vpop.eup %4995  ;;  %v11850_v11 = vld [vmem:[#allocation160_spill] sm:$0xff]  ;;  %v2625_v54 = vsel %vm785_vm0, %v2295_v12, 0.0  ;;  %v5657_v12 = vld [vmem:[%s10858_s0 + $0x340] sm:$0xff]  ;;  %5027 = vlog2.f32 %v7857_v17 }
 0x3e5   :  { %2620 = vadd.xlane.f32.xlu0 %v2619_v28  ;;  %v9067_v22 = vsub.f32 %v3251_v33, %v1993_v39  ;;  %v2296_v28 = vsel %vm11281_vm12, %v5655_v41, 0.0  ;;  %v1997_v39 = vmul.f32 0.6931472, %v4992_v30  ;;  %v4998_v18 = vpop.eup %4997  ;;  %v2298_v41 = vsel %vm11283_vm14, %v5657_v12, 0.0 }
 0x3e6   :  { %2623 = vadd.xlane.f32.xlu1 %v2622_v44  ;;  %v2411_v49 = vpop.xlane.xlu0 %2410  ;;  %v9078_v26 = vsub.f32 %v3252_v50, %v1995_v61  ;;  %v2628_v61 = vsel %vm785_vm0, %v2296_v28, 0.0  ;;  %v5656_v50 = vld [vmem:[%s10858_s0 + $0x338] sm:$0xff] }
 0x3e7   :  { %11845 = vst [vmem:[#allocation143_spill] sm:$0xff] %v9067_v22  ;;  %v3253_v57 = vsub.f32 %v2411_v49, %v11849_v29  ;;  %v2414_v33 = vpop.xlane.xlu1 %2413  ;;  %v1999_v22 = vmul.f32 0.6931472, %v4994_v2  ;;  %v2297_v10 = vsel %vm11282_vm15, %v5656_v50, 0.0  ;;  %v11852_v49 = vld [vmem:[#allocation108_spill] sm:$0xff]  ;;  %v11854_v29 = vld [vmem:[#allocation109_spill] sm:$0xff] }
 0x3e8   :  { %11847 = vst [vmem:[#allocation144_spill] sm:$0xff] %v9078_v26  ;;  %v3254_v44 = vsub.f32 %v2414_v33, %v11850_v11  ;;  %vm11284_vm12 = vcmp.eq.s32.totalorder %v7871_v45, %v11852_v49  ;;  %vm11285_vm15 = vcmp.eq.s32.totalorder %v7871_v45, %v11854_v29  ;;  %v2001_v33 = vmul.f32 0.6931472, %v4996_v8  ;;  %v5000_v11 = vpop.eup %4999  ;;  %v11858_v8 = vld [vmem:[#allocation110_spill] sm:$0xff]  ;;  %v11985_v29 = vld [vmem:[#allocation192_spill] sm:$0xff] }
 0x3e9   :  { %2626 = vadd.xlane.f32.xlu0 %v2625_v54  ;;  %v9093_v30 = vsub.f32 %v3253_v57, %v1997_v39  ;;  %v11855_v39 = vld [vmem:[#allocation161_spill] sm:$0xff]  ;;  %v11856_v54 = vld [vmem:[#allocation162_spill] sm:$0xff]  ;;  %v2631_v50 = vsel %vm785_vm0, %v2297_v10, 0.0  ;;  %v5002_v26 = vpop.eup %5001  ;;  %vm11286_vm14 = vcmp.eq.s32.totalorder %v7871_v45, %v11858_v8 }
 0x3ea   :  { %2629 = vadd.xlane.f32.xlu1 %v2628_v61  ;;  %v2417_v2 = vpop.xlane.xlu0 %2416  ;;  %v9104_v28 = vsub.f32 %v3254_v44, %v1999_v22  ;;  %v2634_v22 = vsel %vm785_vm0, %v2298_v41, 0.0  ;;  %v5658_v44 = vld [vmem:[%s10858_s0 + $0x348] sm:$0xff]  ;;  %v5659_v10 = vld [vmem:[%s10858_s0 + $0x350] sm:$0xff] }
 0x3eb   :  { %11851 = vst [vmem:[#allocation92_spill] sm:$0xff] %v9093_v30  ;;  %v3255_v57 = vsub.f32 %v2417_v2, %v11855_v39  ;;  %v2420_v4 = vpop.xlane.xlu1 %2419  ;;  %v2003_v30 = vmul.f32 0.6931472, %v4998_v18  ;;  %v2299_v3 = vsel %vm11284_vm12, %v5658_v44, 0.0  ;;  %v2300_v12 = vsel %vm11285_vm15, %v5659_v10, 0.0  ;;  %v11860_v39 = vld [vmem:[#allocation111_spill] sm:$0xff] }
 0x3ec   :  { %11853 = vst [vmem:[#allocation93_spill] sm:$0xff] %v9104_v28  ;;  %v3256_v61 = vsub.f32 %v2420_v4, %v11856_v54  ;;  %vm11287_vm12 = vcmp.eq.s32.totalorder %v7871_v45, %v11860_v39  ;;  %v5004_v54 = vpop.eup %5003  ;;  %v2637_v44 = vsel %vm785_vm0, %v2299_v3, 0.0  ;;  %v5661_v3 = vld [vmem:[%s10858_s0 + $0x360] sm:$0xff] }
 0x3ed   :  { %2632 = vadd.xlane.f32.xlu0 %v2631_v50  ;;  %v9119_v2 = vsub.f32 %v3255_v57, %v2001_v33  ;;  %v11861_v57 = vld [vmem:[#allocation163_spill] sm:$0xff]  ;;  %v2005_v33 = vmul.f32 0.6931472, %v5000_v11  ;;  %v11862_v50 = vld [vmem:[#allocation164_spill] sm:$0xff]  ;;  %v5006_v28 = vpop.eup %5005  ;;  %v2302_v10 = vsel %vm11287_vm12, %v5661_v3, 0.0 }
 0x3ee   :  { %2635 = vadd.xlane.f32.xlu1 %v2634_v22  ;;  %v2423_v18 = vpop.xlane.xlu0 %2422  ;;  %v9130_v41 = vsub.f32 %v3256_v61, %v2003_v30  ;;  %v2640_v30 = vsel %vm785_vm0, %v2300_v12, 0.0  ;;  %v5660_v61 = vld [vmem:[%s10858_s0 + $0x358] sm:$0xff]  ;;  %v11864_v11 = vld [vmem:[#allocation112_spill] sm:$0xff] }
 0x3ef   :  { %11857 = vst [vmem:[#allocation145_spill] sm:$0xff] %v9119_v2  ;;  %v3257_v4 = vsub.f32 %v2423_v18, %v11861_v57  ;;  %v2426_v35 = vpop.xlane.xlu1 %2425  ;;  %v2007_v2 = vmul.f32 0.6931472, %v5002_v26  ;;  %v2301_v60 = vsel %vm11286_vm14, %v5660_v61, 0.0  ;;  %vm11288_vm15 = vcmp.eq.s32.totalorder %v7871_v45, %v11864_v11  ;;  %v11866_v57 = vld [vmem:[#allocation113_spill] sm:$0xff] }
 0x3f0   :  { %11859 = vst [vmem:[#allocation146_spill] sm:$0xff] %v9130_v41  ;;  %v3258_v22 = vsub.f32 %v2426_v35, %v11862_v50  ;;  %vm11289_vm14 = vcmp.eq.s32.totalorder %v7871_v45, %v11866_v57  ;;  %v5008_v50 = vpop.eup %5007  ;;  %v2643_v61 = vsel %vm785_vm0, %v2301_v60, 0.0  ;;  %v5663_v60 = vld [vmem:[%s10858_s0 + $0x370] sm:$0xff] }
 0x3f1   :  { %2638 = vadd.xlane.f32.xlu0 %v2637_v44  ;;  %v9145_v18 = vsub.f32 %v3257_v4, %v2005_v33  ;;  %v11867_v4 = vld [vmem:[#allocation165_spill] sm:$0xff]  ;;  %v2009_v33 = vmul.f32 0.6931472, %v5004_v54  ;;  %v11868_v44 = vld [vmem:[#allocation166_spill] sm:$0xff]  ;;  %v5010_v41 = vpop.eup %5009  ;;  %v2304_v3 = vsel %vm11289_vm14, %v5663_v60, 0.0 }
 0x3f2   :  { %2641 = vadd.xlane.f32.xlu1 %v2640_v30  ;;  %v2429_v26 = vpop.xlane.xlu0 %2428  ;;  %v9156_v12 = vsub.f32 %v3258_v22, %v2007_v2  ;;  %v2646_v2 = vsel %vm785_vm0, %v2302_v10, 0.0  ;;  %v5662_v22 = vld [vmem:[%s10858_s0 + $0x368] sm:$0xff]  ;;  %v11870_v54 = vld [vmem:[#allocation114_spill] sm:$0xff] }
 0x3f3   :  { %11863 = vst [vmem:[#allocation94_spill] sm:$0xff] %v9145_v18  ;;  %v3259_v35 = vsub.f32 %v2429_v26, %v11867_v4  ;;  %v2432_v31 = vpop.xlane.xlu1 %2431  ;;  %v2011_v18 = vmul.f32 0.6931472, %v5006_v28  ;;  %v2303_v56 = vsel %vm11288_vm15, %v5662_v22, 0.0  ;;  %vm11290_vm12 = vcmp.eq.s32.totalorder %v7871_v45, %v11870_v54  ;;  %v11872_v4 = vld [vmem:[#allocation115_spill] sm:$0xff] }
 0x3f4   :  { %11865 = vst [vmem:[#allocation147_spill] sm:$0xff] %v9156_v12  ;;  %v3260_v30 = vsub.f32 %v2432_v31, %v11868_v44  ;;  %vm11291_vm15 = vcmp.eq.s32.totalorder %v7871_v45, %v11872_v4  ;;  %v5012_v44 = vpop.eup %5011  ;;  %v2649_v22 = vsel %vm785_vm0, %v2303_v56, 0.0  ;;  %v5665_v56 = vld [vmem:[%s10858_s0 + $0x380] sm:$0xff] }
 0x3f5   :  { %2644 = vadd.xlane.f32.xlu0 %v2643_v61  ;;  %v9171_v26 = vsub.f32 %v3259_v35, %v2009_v33  ;;  %v11873_v35 = vld [vmem:[#allocation167_spill] sm:$0xff]  ;;  %v2013_v33 = vmul.f32 0.6931472, %v5008_v50  ;;  %v11874_v61 = vld [vmem:[#allocation168_spill] sm:$0xff]  ;;  %v5014_v12 = vpop.eup %5013  ;;  %v2306_v60 = vsel %vm11291_vm15, %v5665_v56, 0.0 }
 0x3f6   :  { %2647 = vadd.xlane.f32.xlu1 %v2646_v2  ;;  %v2435_v28 = vpop.xlane.xlu0 %2434  ;;  %v9182_v10 = vsub.f32 %v3260_v30, %v2011_v18  ;;  %v2652_v18 = vsel %vm785_vm0, %v2304_v3, 0.0  ;;  %v5664_v30 = vld [vmem:[%s10858_s0 + $0x378] sm:$0xff]  ;;  %v11876_v50 = vld [vmem:[#allocation116_spill] sm:$0xff] }
 0x3f7   :  { %11869 = vst [vmem:[#allocation148_spill] sm:$0xff] %v9171_v26  ;;  %v3261_v31 = vsub.f32 %v2435_v28, %v11873_v35  ;;  %v2438_v27 = vpop.xlane.xlu1 %2437  ;;  %v2015_v26 = vmul.f32 0.6931472, %v5010_v41  ;;  %v2305_v52 = vsel %vm11290_vm12, %v5664_v30, 0.0  ;;  %vm11292_vm14 = vcmp.eq.s32.totalorder %v7871_v45, %v11876_v50  ;;  %v11878_v35 = vld [vmem:[#allocation117_spill] sm:$0xff] }
 0x3f8   :  { %11871 = vst [vmem:[#allocation149_spill] sm:$0xff] %v9182_v10  ;;  %v3262_v2 = vsub.f32 %v2438_v27, %v11874_v61  ;;  %vm11294_vm12 = vcmp.eq.s32.totalorder %v7871_v45, %v11878_v35  ;;  %v5016_v61 = vpop.eup %5015  ;;  %v2655_v30 = vsel %vm785_vm0, %v2305_v52, 0.0  ;;  %v5667_v52 = vld [vmem:[%s10858_s0 + $0x390] sm:$0xff] }
 0x3f9   :  { %2650 = vadd.xlane.f32.xlu0 %v2649_v22  ;;  %v9197_v28 = vsub.f32 %v3261_v31, %v2013_v33  ;;  %v11879_v31 = vld [vmem:[#allocation169_spill] sm:$0xff]  ;;  %v2017_v33 = vmul.f32 0.6931472, %v5012_v44  ;;  %v11880_v22 = vld [vmem:[#allocation170_spill] sm:$0xff]  ;;  %v5018_v10 = vpop.eup %5017  ;;  %v2308_v56 = vsel %vm11294_vm12, %v5667_v52, 0.0 }
 0x3fa   :  { %2653 = vadd.xlane.f32.xlu1 %v2652_v18  ;;  %v2441_v41 = vpop.xlane.xlu0 %2440  ;;  %v9208_v3 = vsub.f32 %v3262_v2, %v2015_v26  ;;  %v2658_v26 = vsel %vm785_vm0, %v2306_v60, 0.0  ;;  %v5666_v2 = vld [vmem:[%s10858_s0 + $0x388] sm:$0xff]  ;;  %v11882_v44 = vld [vmem:[#allocation118_spill] sm:$0xff] }
 0x3fb   :  { %11875 = vst [vmem:[#allocation150_spill] sm:$0xff] %v9197_v28  ;;  %v3263_v27 = vsub.f32 %v2441_v41, %v11879_v31  ;;  %v2444_v23 = vpop.xlane.xlu1 %2443  ;;  %v2019_v28 = vmul.f32 0.6931472, %v5014_v12  ;;  %v2307_v48 = vsel %vm11292_vm14, %v5666_v2, 0.0  ;;  %vm11295_vm15 = vcmp.eq.s32.totalorder %v7871_v45, %v11882_v44  ;;  %v11884_v31 = vld [vmem:[#allocation119_spill] sm:$0xff] }
 0x3fc   :  { %11877 = vst [vmem:[#allocation151_spill] sm:$0xff] %v9208_v3  ;;  %v3264_v18 = vsub.f32 %v2444_v23, %v11880_v22  ;;  %vm11298_vm14 = vcmp.eq.s32.totalorder %v7871_v45, %v11884_v31  ;;  %v11886_v23 = vld [vmem:[#allocation171_spill] sm:$0xff]  ;;  %v2021_v22 = vmul.f32 0.6931472, %v5016_v61  ;;  %v2023_v3 = vmul.f32 0.6931472, %v5018_v10 }
 0x3fd   :  { %2656 = vadd.xlane.f32.xlu0 %v2655_v30  ;;  %v9223_v41 = vsub.f32 %v3263_v27, %v2017_v33  ;;  %v11885_v27 = vld [vmem:[#allocation258_spill] sm:$0xff]  ;;  %v5020_v30 = vpop.eup %5019  ;;  %v11889_v61 = vld [vmem:[#allocation120_spill] sm:$0xff] }
 0x3fe   :  { %2659 = vadd.xlane.f32.xlu1 %v2658_v26  ;;  %v2447_v12 = vpop.xlane.xlu0 %2446  ;;  %v9234_v60 = vsub.f32 %v3264_v18, %v2019_v28  ;;  %5029 = vlog2.f32 %v11885_v27  ;;  %v11887_v26 = vld [vmem:[#allocation172_spill] sm:$0xff]  ;;  %v5022_v50 = vpop.eup %5021  ;;  %v2664_v28 = vsel %vm785_vm0, %v2308_v56, 0.0  ;;  %v5668_v18 = vld [vmem:[%s10858_s0 + $0x398] sm:$0xff]  ;;  %vm11299_vm12 = vcmp.eq.s32.totalorder %v7871_v45, %v11889_v61  ;;  %v11890_v27 = vld [vmem:[#allocation259_spill] sm:$0xff] }
 0x3ff   :  { %11881 = vst [vmem:[#allocation152_spill] sm:$0xff] %v9223_v41  ;;  %v3265_v33 = vsub.f32 %v2447_v12, %v11886_v23  ;;  %v2450_v17 = vpop.xlane.xlu1 %2449  ;;  %v2661_v41 = vsel %vm785_vm0, %v2307_v48, 0.0  ;;  %v2309_v12 = vsel %vm11295_vm15, %v5668_v18, 0.0  ;;  %5031 = vlog2.f32 %v11890_v27  ;;  %v5669_v48 = vld [vmem:[%s10858_s0 + $0x3a0] sm:$0xff]  ;;  %v11892_v23 = vld [vmem:[#allocation121_spill] sm:$0xff]  ;;  %v5024_v18 = vpop.eup %5023  ;;  %v11895_v27 = vld [vmem:[#allocation174_spill] sm:$0xff] }
 0x400   :  { %11883 = vst [vmem:[#allocation153_spill] sm:$0xff] %v9234_v60  ;;  %v3266_v2 = vsub.f32 %v2450_v17, %v11887_v26  ;;  %vm11302_vm15 = vcmp.eq.s32.totalorder %v7871_v45, %v11892_v23  ;;  %v11894_v17 = vld [vmem:[#allocation173_spill] sm:$0xff]  ;;  %v2667_v60 = vsel %vm785_vm0, %v2309_v12, 0.0  ;;  %v2027_v44 = vmul.f32 0.6931472, %v5022_v50  ;;  %v5026_v35 = vpop.eup %5025 }
 0x401   :  { %2662 = vadd.xlane.f32.xlu0 %v2661_v41  ;;  %v9249_v52 = vsub.f32 %v3265_v33, %v2021_v22  ;;  %v2310_v41 = vsel %vm11298_vm14, %v5669_v48, 0.0  ;;  %v11893_v33 = vld [vmem:[#allocation260_spill] sm:$0xff]  ;;  %v2031_v61 = vmul.f32 0.6931472, %v5026_v35 }
 0x402   :  { %2665 = vadd.xlane.f32.xlu1 %v2664_v28  ;;  %v2453_v10 = vpop.xlane.xlu0 %2452  ;;  %v9260_v56 = vsub.f32 %v3266_v2, %v2023_v3  ;;  %5033 = vlog2.f32 %v11893_v33  ;;  %v2025_v28 = vmul.f32 0.6931472, %v5020_v30  ;;  %v2670_v3 = vsel %vm785_vm0, %v2310_v41, 0.0  ;;  %v5670_v2 = vld [vmem:[%s10858_s0 + $0x3a8] sm:$0xff]  ;;  %v11897_v30 = vld [vmem:[#allocation122_spill] sm:$0xff]  ;;  %v11898_v33 = vld [vmem:[#allocation261_spill] sm:$0xff] }
 0x403   :  { %11888 = vst [vmem:[#allocation154_spill] sm:$0xff] %v9249_v52  ;;  %v3267_v22 = vsub.f32 %v2453_v10, %v11894_v17  ;;  %v2456_v26 = vpop.xlane.xlu1 %2455  ;;  %v2311_v10 = vsel %vm11299_vm12, %v5670_v2, 0.0  ;;  %vm11303_vm14 = vcmp.eq.s32.totalorder %v7871_v45, %v11897_v30  ;;  %5035 = vlog2.f32 %v11898_v33  ;;  %v11900_v17 = vld [vmem:[#allocation123_spill] sm:$0xff]  ;;  %v5028_v2 = vpop.eup %5027  ;;  %v11903_v33 = vld [vmem:[#allocation176_spill] sm:$0xff] }
 0x404   :  { %11891 = vst [vmem:[#allocation155_spill] sm:$0xff] %v9260_v56  ;;  %v3268_v52 = vsub.f32 %v2456_v26, %v11895_v27  ;;  %vm11306_vm12 = vcmp.eq.s32.totalorder %v7871_v45, %v11900_v17  ;;  %v11902_v26 = vld [vmem:[#allocation175_spill] sm:$0xff]  ;;  %v2673_v56 = vsel %vm785_vm0, %v2311_v10, 0.0 }
 0x405   :  { %2668 = vadd.xlane.f32.xlu0 %v2667_v60  ;;  %v9275_v48 = vsub.f32 %v3267_v22, %v2025_v28  ;;  %v5671_v60 = vld [vmem:[%s10858_s0 + $0x3b0] sm:$0xff]  ;;  %v11901_v22 = vld [vmem:[#allocation262_spill] sm:$0xff] }
 0x406   :  { %2671 = vadd.xlane.f32.xlu1 %v2670_v3  ;;  %v2459_v50 = vpop.xlane.xlu0 %2458  ;;  %v2312_v12 = vsel %vm11302_vm15, %v5671_v60, 0.0  ;;  %v9286_v41 = vsub.f32 %v3268_v52, %v2027_v44  ;;  %5037 = vlog2.f32 %v11901_v22  ;;  %v2029_v3 = vmul.f32 0.6931472, %v5024_v18  ;;  %v5672_v52 = vld [vmem:[%s10858_s0 + $0x3b8] sm:$0xff]  ;;  %v11905_v18 = vld [vmem:[#allocation124_spill] sm:$0xff]  ;;  %v11906_v22 = vld [vmem:[#allocation263_spill] sm:$0xff] }
 0x407   :  { %11896 = vst [vmem:[#allocation156_spill] sm:$0xff] %v9275_v48  ;;  %v3269_v28 = vsub.f32 %v2459_v50, %v11902_v26  ;;  %v2462_v27 = vpop.xlane.xlu1 %2461  ;;  %v2676_v44 = vsel %vm785_vm0, %v2312_v12, 0.0  ;;  %v2313_v50 = vsel %vm11303_vm14, %v5672_v52, 0.0  ;;  %vm778_vm15 = vcmp.eq.s32.totalorder %v7871_v45, %v11905_v18  ;;  %v9315_v12 = vld [vmem:[%s10860_s2] ss:$0 sm:$0xff] }
 0x408   :  { %11899 = vst [vmem:[#allocation157_spill] sm:$0xff] %v9286_v41  ;;  %v3270_v48 = vsub.f32 %v2462_v27, %v11903_v33  ;;  %v5030_v31 = vpop.eup %5029  ;;  %5039 = vlog2.f32 %v11906_v22  ;;  %v11909_v27 = vld [vmem:[#allocation264_spill] sm:$0xff]  ;;  %v2033_v52 = vmul.f32 0.6931472, %v5028_v2 }
 0x409   :  { %2674 = vadd.xlane.f32.xlu0 %v2673_v56  ;;  %v9301_v60 = vsub.f32 %v3269_v28, %v2029_v3  ;;  %v5673_v56 = vld [vmem:[%s10858_s0 + $0x3c0] sm:$0xff]  ;;  %v11908_v28 = vld [vmem:[#allocation125_spill] sm:$0xff]  ;;  %5041 = vlog2.f32 %v11909_v27  ;;  %v5032_v22 = vpop.eup %5031  ;;  %v2035_v17 = vmul.f32 0.6931472, %v5030_v31  ;;  %v11914_v31 = vld [vmem:[#allocation126_spill] sm:$0xff] }
 0x40a   :  { %2677 = vadd.xlane.f32.xlu1 %v2676_v44  ;;  %v2465_v35 = vpop.xlane.xlu0 %2464  ;;  %v2314_v10 = vsel %vm11306_vm12, %v5673_v56, 0.0  ;;  %v9317_v26 = vsub.f32 %v3270_v48, %v2031_v61  ;;  %vm779_vm14 = vcmp.eq.s32.totalorder %v7871_v45, %v11908_v28  ;;  %v11910_v3 = vld [vmem:[#allocation177_spill] sm:$0xff]  ;;  %v2679_v56 = vsel %vm785_vm0, %v2313_v50, 0.0  ;;  %v5674_v48 = vld [vmem:[%s10858_s0 + $0x3c8] sm:$0xff] }
 0x40b   :  { %11904 = vst [vmem:[#allocation158_spill] sm:$0xff] %v9301_v60  ;;  %v3271_v33 = vsub.f32 %v2465_v35, %v11910_v3  ;;  %v2468_v44 = vpop.xlane.xlu1 %2467  ;;  %v11911_v60 = vld [vmem:[#allocation178_spill] sm:$0xff]  ;;  %v2682_v61 = vsel %vm785_vm0, %v2314_v10, 0.0  ;;  %v2315_v35 = vsel %vm778_vm15, %v5674_v48, 0.0  ;;  %vm11310_vm12 = vcmp.eq.s32.totalorder %v7871_v45, %v11914_v31  ;;  %v11915_v50 = vld [vmem:[#allocation265_spill] sm:$0xff]  ;;  %v11917_v48 = vld [vmem:[#allocation127_spill] sm:$0xff] }
 0x40c   :  { %11907 = vst [vmem:[#allocation159_spill] sm:$0xff] %v9317_v26  ;;  %v3272_v41 = vsub.f32 %v2468_v44, %v11911_v60  ;;  %v5034_v30 = vpop.eup %5033  ;;  %v2712_v60 = vsel %vm657_vm1, %v9315_v12, 0.0  ;;  %5043 = vlog2.f32 %v11915_v50  ;;  %v5675_v3 = vld [vmem:[%s10858_s0 + $0x3d0] sm:$0xff]  ;;  %vm11314_vm1 = vcmp.eq.s32.totalorder %v7871_v45, %v11917_v48  ;;  %v11920_v26 = vld [vmem:[#allocation180_spill] sm:$0xff] }
 0x40d   :  { %2680 = vadd.xlane.f32.xlu0 %v2679_v56  ;;  %v9336_v27 = vsub.f32 %v3271_v33, %v2033_v52  ;;  %v2316_v44 = vsel %vm779_vm14, %v5675_v3, 0.0  ;;  %v11918_v33 = vld [vmem:[#allocation266_spill] sm:$0xff]  ;;  %v11919_v52 = vld [vmem:[#allocation179_spill] sm:$0xff]  ;;  %v2685_v23 = vsel %vm785_vm0, %v2315_v35, 0.0  ;;  %v11923_v28 = vld [vmem:[#allocation128_spill] sm:$0xff] }
 0x40e   :  { %2683 = vadd.xlane.f32.xlu1 %v2682_v61  ;;  %v2471_v10 = vpop.xlane.xlu0 %2470  ;;  %v9347_v56 = vsub.f32 %v3272_v41, %v2035_v17  ;;  %5045 = vlog2.f32 %v11918_v33  ;;  %v2037_v61 = vmul.f32 0.6931472, %v5032_v22  ;;  %v2714_v41 = vsel %vm659_vm3, %v9315_v12, 0.0 }
 0x40f   :  { %11913 = vst [vmem:[#allocation160_spill] sm:$0xff] %v9336_v27  ;;  %v3273_v2 = vsub.f32 %v2471_v10, %v11919_v52  ;;  %v2474_v50 = vpop.xlane.xlu1 %2473  ;;  %v5036_v27 = vpop.eup %5035  ;;  %v2039_v17 = vmul.f32 0.6931472, %v5034_v30  ;;  %v5676_v10 = vld [vmem:[%s10858_s0 + $0x3d8] sm:$0xff]  ;;  %v9367_v22 = vsel %vm785_vm0, %v2712_v60, 0.0  ;;  %vm782_vm3 = vcmp.eq.s32.totalorder %v7871_v45, %v11923_v28  ;;  %v11924_v30 = vld [vmem:[#allocation267_spill] sm:$0xff] }
 0x410   :  { %11916 = vst [vmem:[#allocation161_spill] sm:$0xff] %v9347_v56  ;;  %v3274_v18 = vsub.f32 %v2474_v50, %v11920_v26  ;;  %v5038_v3 = vpop.eup %5037  ;;  %v2688_v56 = vsel %vm785_vm0, %v2316_v44, 0.0  ;;  %v2317_v26 = vsel %vm11310_vm12, %v5676_v10, 0.0  ;;  %5047 = vlog2.f32 %v11924_v30  ;;  %v5677_v44 = vld [vmem:[%s10858_s0 + $0x3e0] sm:$0xff]  ;;  %v11926_v60 = vld [vmem:[#allocation129_spill] sm:$0xff]  ;;  %v11938_v28 = vld [vmem:[#allocation184_spill] sm:$0xff] }
 0x411   :  { %2686 = vadd.xlane.f32.xlu0 %v2685_v23  ;;  %v9369_v35 = vsub.f32 %v3273_v2, %v2037_v61  ;;  %v2318_v33 = vsel %vm11314_vm1, %v5677_v44, 0.0  ;;  %vm783_vm12 = vcmp.eq.s32.totalorder %v7871_v45, %v11926_v60  ;;  %v11927_v2 = vld [vmem:[#allocation268_spill] sm:$0xff]  ;;  %v11928_v50 = vld [vmem:[#allocation181_spill] sm:$0xff]  ;;  %v2691_v53 = vsel %vm785_vm0, %v2317_v26, 0.0 }
 0x412   :  { %2689 = vadd.xlane.f32.xlu1 %v2688_v56  ;;  %v2477_v23 = vpop.xlane.xlu0 %2476  ;;  %v9380_v52 = vsub.f32 %v3274_v18, %v2039_v17  ;;  %5049 = vlog2.f32 %v11927_v2  ;;  %v2041_v56 = vmul.f32 0.6931472, %v5036_v27  ;;  %v5040_v30 = vpop.eup %5039  ;;  %v9389_v4 = vsel %vm785_vm0, %v2714_v41, 0.0  ;;  %v5678_v2 = vld [vmem:[%s10858_s0 + $0x3e8] sm:$0xff] }
 0x413   :  { %11922 = vst [vmem:[#allocation162_spill] sm:$0xff] %v9369_v35  ;;  %v3275_v61 = vsub.f32 %v2477_v23, %v11928_v50  ;;  %v2480_v10 = vpop.xlane.xlu1 %2479  ;;  %v11929_v35 = vld [vmem:[#allocation182_spill] sm:$0xff]  ;;  %v2043_v44 = vmul.f32 0.6931472, %v5038_v3  ;;  %v5042_v18 = vpop.eup %5041  ;;  %v2694_v17 = vsel %vm785_vm0, %v2318_v33, 0.0  ;;  %v2319_v27 = vsel %vm782_vm3, %v5678_v2, 0.0 }
 0x414   :  { %11925 = vst [vmem:[#allocation163_spill] sm:$0xff] %v9380_v52  ;;  %v3276_v31 = vsub.f32 %v2480_v10, %v11929_v35  ;;  %v2713_v26 = vsel %vm658_vm2, %v9315_v12, 0.0  ;;  %v11932_v3 = vld [vmem:[#allocation131_spill] sm:$0xff]  ;;  %v5679_v33 = vld [vmem:[%s10858_s0 + $0x3f0] sm:$0xff]  ;;  %v11935_v2 = vld [vmem:[#allocation270_spill] sm:$0xff]  ;;  %v2697_v54 = vsel %vm785_vm0, %v2319_v27, 0.0 }
 0x415   :  { %2692 = vadd.xlane.f32.xlu0 %v2691_v53  ;;  %v9402_v41 = vsub.f32 %v3275_v61, %v2041_v56  ;;  %vm784_vm1 = vcmp.eq.s32.totalorder %v7871_v45, %v11932_v3  ;;  %v11933_v53 = vld [vmem:[#allocation269_spill] sm:$0xff]  ;;  %v2320_v50 = vsel %vm783_vm12, %v5679_v33, 0.0  ;;  %v11936_v61 = vld [vmem:[#allocation183_spill] sm:$0xff]  ;;  %v2843_v33 = vsel %vm785_vm0, %v2713_v26, 0.0  ;;  %v11947_v3 = vld [vmem:[#allocation186_spill] sm:$0xff] }
 0x416   :  { %5051 = vlog2.f32 %v11933_v53  ;;  %2695 = vadd.xlane.f32.xlu1 %v2694_v17  ;;  %v2483_v23 = vpop.xlane.xlu0 %2482  ;;  %v9413_v10 = vsub.f32 %v3276_v31, %v2043_v44  ;;  %v2715_v17 = vsel %vm660_vm4, %v9315_v12, 0.0  ;;  %v5044_v52 = vpop.eup %5043  ;;  %v2047_v31 = vmul.f32 0.6931472, %v5042_v18  ;;  %v11941_v18 = vld [vmem:[#allocation271_spill] sm:$0xff] }
 0x417   :  { %11931 = vst [vmem:[#allocation164_spill] sm:$0xff] %v9402_v41  ;;  %5053 = vlog2.f32 %v11935_v2  ;;  %v3277_v56 = vsub.f32 %v2483_v23, %v11936_v61  ;;  %v2486_v35 = vpop.xlane.xlu1 %2485  ;;  %v2045_v41 = vmul.f32 0.6931472, %v5040_v30  ;;  %v2700_v2 = vsel %vm785_vm0, %v2320_v50, 0.0  ;;  %v5680_v23 = vld [vmem:[%s10858_s0 + $0x3f8] sm:$0xff] }
 0x418   :  { %11934 = vst [vmem:[#allocation165_spill] sm:$0xff] %v9413_v10  ;;  %v3278_v48 = vsub.f32 %v2486_v35, %v11938_v28  ;;  %v5046_v44 = vpop.eup %5045  ;;  %v2321_v30 = vsel %vm784_vm1, %v5680_v23, 0.0  ;;  %v2716_v27 = vsel %vm661_vm5, %v9315_v12, 0.0  ;;  %5055 = vlog2.f32 %v11941_v18  ;;  %v11945_v28 = vld [vmem:[#allocation272_spill] sm:$0xff] }
 0x419   :  { %2698 = vadd.xlane.f32.xlu0 %v2697_v54  ;;  %v9435_v61 = vsub.f32 %v3277_v56, %v2045_v41  ;;  %v2717_v50 = vsel %vm662_vm6, %v9315_v12, 0.0  ;;  %v2718_v53 = vsel %vm663_vm7, %v9315_v12, 0.0  ;;  %5057 = vlog2.f32 %v11945_v28  ;;  %v11946_v41 = vld [vmem:[#allocation185_spill] sm:$0xff]  ;;  %v11954_v28 = vld [vmem:[#allocation274_spill] sm:$0xff] }
 0x41a   :  { %2701 = vadd.xlane.f32.xlu1 %v2700_v2  ;;  %v2489_v54 = vpop.xlane.xlu0 %2488  ;;  %v9446_v23 = vsub.f32 %v3278_v48, %v2047_v31  ;;  %v2849_v2 = vsel %vm785_vm0, %v2715_v17, 0.0  ;;  %v2049_v18 = vmul.f32 0.6931472, %v5044_v52  ;;  %v5048_v10 = vpop.eup %5047  ;;  %v2703_v26 = vsel %vm785_vm0, %v2321_v30, 0.0  ;;  %v11957_v30 = vld [vmem:[#allocation188_spill] sm:$0xff] }
 0x41b   :  { %11940 = vst [vmem:[#allocation166_spill] sm:$0xff] %v9435_v61  ;;  %v3279_v56 = vsub.f32 %v2489_v54, %v11946_v41  ;;  %v2492_v61 = vpop.xlane.xlu1 %2491  ;;  %v2852_v57 = vsel %vm785_vm0, %v2716_v27, 0.0  ;;  %v2051_v11 = vmul.f32 0.6931472, %v5046_v44  ;;  %v9455_v48 = vsel %vm785_vm0, %v2717_v50, 0.0  ;;  %v11955_v41 = vld [vmem:[#allocation187_spill] sm:$0xff] }
 0x41c   :  { %11944 = vst [vmem:[#allocation167_spill] sm:$0xff] %v9446_v23  ;;  %v3280_v60 = vsub.f32 %v2492_v61, %v11947_v3  ;;  %v5050_v35 = vpop.eup %5049  ;;  %v9458_v31 = vsel %vm785_vm0, %v2718_v53, 0.0  ;;  %v2719_v52 = vsel %vm664_vm8, %v9315_v12, 0.0  ;;  %v11950_v3 = vld [vmem:[#allocation273_spill] sm:$0xff]  ;;  %v2720_v27 = vsel %vm665_vm9, %v9315_v12, 0.0 }
 0x41d   :  { %2704 = vadd.xlane.f32.xlu0 %v2703_v26  ;;  %v9464_v54 = vsub.f32 %v3279_v56, %v2049_v18  ;;  %5059 = vlog2.f32 %v11950_v3  ;;  %v2721_v50 = vsel %vm666_vm10, %v9315_v12, 0.0  ;;  %v2722_v26 = vsel %vm667_vm11, %v9315_v12, 0.0 }
 0x41e   :  { %2841 = vadd.xlane.f32.xlu1 %v9367_v22  ;;  %v2495_v44 = vpop.xlane.xlu0 %2494  ;;  %v9476_v53 = vsub.f32 %v3280_v60, %v2051_v11  ;;  %5061 = vlog2.f32 %v11954_v28  ;;  %v2053_v17 = vmul.f32 0.6931472, %v5048_v10  ;;  %v9486_v23 = vsel %vm785_vm0, %v2719_v52, 0.0  ;;  %v11958_v11 = vld [vmem:[#allocation13_spill] sm:$0xff]  ;;  %v11960_v10 = vld [vmem:[#allocation16_spill] sm:$0xff]  ;;  %v11963_v22 = vld [vmem:[#allocation275_spill] sm:$0xff] }
 0x41f   :  { %11949 = vst [vmem:[#allocation168_spill] sm:$0xff] %v9464_v54  ;;  %v3281_v56 = vsub.f32 %v2495_v44, %v11955_v41  ;;  %v2498_v18 = vpop.xlane.xlu1 %2497  ;;  %vm11959_vm2 = vcmp.eq.s32.totalorder %v7871_v45, %v11958_v11  ;;  %v2055_v61 = vmul.f32 0.6931472, %v5050_v35  ;;  %v9493_v28 = vsel %vm785_vm0, %v2720_v27, 0.0  ;;  %v11964_v27 = vld [vmem:[#allocation15_spill] sm:$0xff]  ;;  %v11967_v11 = vld [vmem:[#allocation276_spill] sm:$0xff] }
 0x420   :  { %11953 = vst [vmem:[#allocation169_spill] sm:$0xff] %v9476_v53  ;;  %v5052_v3 = vpop.eup %5051  ;;  %v3282_v54 = vsub.f32 %v2498_v18, %v11957_v30  ;;  %v2723_v60 = vsel %vm11959_vm2, %v9315_v12, 0.0  ;;  %v9496_v41 = vsel %vm785_vm0, %v2721_v50, 0.0  ;;  %vm11961_vm4 = vcmp.eq.s32.totalorder %v7871_v45, %v11960_v10  ;;  %v11968_v10 = vld [vmem:[#allocation189_spill] sm:$0xff]  ;;  %v11969_v53 = vld [vmem:[#allocation190_spill] sm:$0xff] }
 0x421   :  { %v5054_v44 = vpop.eup %5053  ;;  %2844 = vadd.xlane.f32.xlu0 %v2843_v33  ;;  %v2724_v52 = vsel %vm11961_vm4, %v9315_v12, 0.0  ;;  %v9502_v18 = vsub.f32 %v3281_v56, %v2053_v17  ;;  %5063 = vlog2.f32 %v11963_v22  ;;  %v9507_v33 = vsel %vm785_vm0, %v2722_v26, 0.0 }
 0x422   :  { %2847 = vadd.xlane.f32.xlu1 %v9389_v4  ;;  %v2501_v35 = vpop.xlane.xlu0 %2500  ;;  %vm11965_vm5 = vcmp.eq.s32.totalorder %v7871_v45, %v11964_v27  ;;  %v9513_v30 = vsub.f32 %v3282_v54, %v2055_v61  ;;  %5065 = vlog2.f32 %v11967_v11  ;;  %v9518_v22 = vsel %vm785_vm0, %v2723_v60, 0.0  ;;  %v11970_v27 = vld [vmem:[#allocation18_spill] sm:$0xff] }
 0x423   :  { %11962 = vst [vmem:[#allocation170_spill] sm:$0xff] %v9502_v18  ;;  %v2725_v50 = vsel %vm11965_vm5, %v9315_v12, 0.0  ;;  %v3283_v56 = vsub.f32 %v2501_v35, %v11968_v10  ;;  %v2504_v17 = vpop.xlane.xlu1 %2503  ;;  %v2057_v4 = vmul.f32 0.6931472, %v5052_v3  ;;  %v5056_v18 = vpop.eup %5055  ;;  %v9522_v39 = vsel %vm785_vm0, %v2724_v52, 0.0  ;;  %v11972_v3 = vld [vmem:[#allocation17_spill] sm:$0xff] }
 0x424   :  { %11966 = vst [vmem:[#allocation258_spill] sm:$0xff] %v9513_v30  ;;  %v3284_v26 = vsub.f32 %v2504_v17, %v11969_v53  ;;  %vm11971_vm6 = vcmp.eq.s32.totalorder %v7871_v45, %v11970_v27  ;;  %v2059_v61 = vmul.f32 0.6931472, %v5054_v44  ;;  %v5058_v11 = vpop.eup %5057  ;;  %v9529_v35 = vsel %vm785_vm0, %v2725_v50, 0.0  ;;  %v11974_v53 = vld [vmem:[#allocation20_spill] sm:$0xff]  ;;  %v11977_v17 = vld [vmem:[#allocation277_spill] sm:$0xff] }
 0x425   :  { %v2726_v54 = vsel %vm11971_vm6, %v9315_v12, 0.0  ;;  %2850 = vadd.xlane.f32.xlu0 %v2849_v2  ;;  %vm11973_vm7 = vcmp.eq.s32.totalorder %v7871_v45, %v11972_v3  ;;  %vm11975_vm8 = vcmp.eq.s32.totalorder %v7871_v45, %v11974_v53  ;;  %v9539_v10 = vsub.f32 %v3283_v56, %v2057_v4  ;;  %v11978_v2 = vld [vmem:[#allocation19_spill] sm:$0xff]  ;;  %v11980_v27 = vld [vmem:[#allocation22_spill] sm:$0xff] }
 0x426   :  { %v2727_v60 = vsel %vm11973_vm7, %v9315_v12, 0.0  ;;  %v2728_v52 = vsel %vm11975_vm8, %v9315_v12, 0.0  ;;  %5067 = vlog2.f32 %v11977_v17  ;;  %2853 = vadd.xlane.f32.xlu1 %v2852_v57  ;;  %v2507_v44 = vpop.xlane.xlu0 %2506  ;;  %vm11979_vm9 = vcmp.eq.s32.totalorder %v7871_v45, %v11978_v2  ;;  %v11983_v53 = vld [vmem:[#allocation278_spill] sm:$0xff]  ;;  %v11984_v56 = vld [vmem:[#allocation191_spill] sm:$0xff] }
 0x427   :  { %11976 = vst [vmem:[#allocation171_spill] sm:$0xff] %v9539_v10  ;;  %v2729_v50 = vsel %vm11979_vm9, %v9315_v12, 0.0  ;;  %vm11981_vm10 = vcmp.eq.s32.totalorder %v7871_v45, %v11980_v27  ;;  %v9550_v30 = vsub.f32 %v3284_v26, %v2059_v61  ;;  %5069 = vlog2.f32 %v11983_v53  ;;  %v2510_v10 = vpop.xlane.xlu1 %2509  ;;  %v5060_v8 = vpop.eup %5059 }
 0x428   :  { %v2730_v3 = vsel %vm11981_vm10, %v9315_v12, 0.0  ;;  %v3285_v4 = vsub.f32 %v2507_v44, %v11984_v56  ;;  %v9555_v57 = vsel %vm785_vm0, %v2726_v54, 0.0  ;;  %v2061_v17 = vmul.f32 0.6931472, %v5056_v18  ;;  %v5062_v61 = vpop.eup %5061  ;;  %v11986_v18 = vld [vmem:[#allocation21_spill] sm:$0xff]  ;;  %v11995_v56 = vld [vmem:[#allocation280_spill] sm:$0xff] }
 0x429   :  { %11982 = vst [vmem:[#allocation172_spill] sm:$0xff] %v9550_v30  ;;  %v3286_v2 = vsub.f32 %v2510_v10, %v11985_v29  ;;  %v9559_v49 = vsel %vm785_vm0, %v2727_v60, 0.0  ;;  %v9562_v27 = vsel %vm785_vm0, %v2728_v52, 0.0  ;;  %v2063_v26 = vmul.f32 0.6931472, %v5058_v11  ;;  %2856 = vadd.xlane.f32.xlu0 %v9455_v48  ;;  %v11989_v10 = vld [vmem:[#allocation279_spill] sm:$0xff] }
 0x42a   :  { %v9566_v44 = vsel %vm785_vm0, %v2729_v50, 0.0  ;;  %v9569_v54 = vsel %vm785_vm0, %v2730_v3, 0.0  ;;  %vm11987_vm11 = vcmp.eq.s32.totalorder %v7871_v45, %v11986_v18  ;;  %v9575_v60 = vsub.f32 %v3285_v4, %v2061_v17  ;;  %2859 = vadd.xlane.f32.xlu1 %v9458_v31  ;;  %v2513_v11 = vpop.xlane.xlu0 %2512  ;;  %v11990_v48 = vld [vmem:[#allocation24_spill] sm:$0xff]  ;;  %v11992_v50 = vld [vmem:[#allocation23_spill] sm:$0xff]  ;;  %v11996_v4 = vld [vmem:[#allocation193_spill] sm:$0xff] }
 0x42b   :  { %v2731_v29 = vsel %vm11987_vm11, %v9315_v12, 0.0  ;;  %5071 = vlog2.f32 %v11989_v10  ;;  %vm11991_vm2 = vcmp.eq.s32.totalorder %v7871_v45, %v11990_v48  ;;  %vm11993_vm4 = vcmp.eq.s32.totalorder %v7871_v45, %v11992_v50  ;;  %v2516_v18 = vpop.xlane.xlu1 %2515  ;;  %v11997_v31 = vld [vmem:[#allocation26_spill] sm:$0xff]  ;;  %v5064_v48 = vpop.eup %5063 }
 0x42c   :  { %11988 = vst [vmem:[#allocation259_spill] sm:$0xff] %v9575_v60  ;;  %v2732_v52 = vsel %vm11991_vm2, %v9315_v12, 0.0  ;;  %v2733_v3 = vsel %vm11993_vm4, %v9315_v12, 0.0  ;;  %v9587_v53 = vsub.f32 %v3286_v2, %v2063_v26  ;;  %5073 = vlog2.f32 %v11995_v56  ;;  %v11999_v30 = vld [vmem:[#allocation194_spill] sm:$0xff]  ;;  %v12000_v2 = vld [vmem:[#allocation25_spill] sm:$0xff] }
 0x42d   :  { %v3287_v17 = vsub.f32 %v2513_v11, %v11996_v4  ;;  %vm11998_vm5 = vcmp.eq.s32.totalorder %v7871_v45, %v11997_v31  ;;  %v2065_v60 = vmul.f32 0.6931472, %v5060_v8  ;;  %v3288_v37 = vsub.f32 %v2516_v18, %v11999_v30  ;;  %v5066_v11 = vpop.eup %5065  ;;  %2862 = vadd.xlane.f32.xlu0 %v9486_v23  ;;  %v12002_v30 = vld [vmem:[#allocation28_spill] sm:$0xff]  ;;  %v12005_v18 = vld [vmem:[#allocation281_spill] sm:$0xff] }
 0x42e   :  { %11994 = vst [vmem:[#allocation260_spill] sm:$0xff] %v9587_v53  ;;  %v2734_v10 = vsel %vm11998_vm5, %v9315_v12, 0.0  ;;  %v9597_v58 = vsel %vm785_vm0, %v2731_v29, 0.0  ;;  %vm12001_vm6 = vcmp.eq.s32.totalorder %v7871_v45, %v12000_v2  ;;  %v2067_v50 = vmul.f32 0.6931472, %v5062_v61  ;;  %2865 = vadd.xlane.f32.xlu1 %v9493_v28  ;;  %v2519_v61 = vpop.xlane.xlu0 %2518  ;;  %v12009_v2 = vld [vmem:[#allocation282_spill] sm:$0xff] }
 0x42f   :  { %v2735_v26 = vsel %vm12001_vm6, %v9315_v12, 0.0  ;;  %v9605_v56 = vsel %vm785_vm0, %v2732_v52, 0.0  ;;  %v9608_v8 = vsel %vm785_vm0, %v2733_v3, 0.0  ;;  %vm12003_vm7 = vcmp.eq.s32.totalorder %v7871_v45, %v12002_v30  ;;  %v12006_v52 = vld [vmem:[#allocation27_spill] sm:$0xff]  ;;  %v12011_v53 = vld [vmem:[#allocation196_spill] sm:$0xff] }
 0x430   :  { %v2736_v29 = vsel %vm12003_vm7, %v9315_v12, 0.0  ;;  %v9614_v4 = vsub.f32 %v3287_v17, %v2065_v60  ;;  %5075 = vlog2.f32 %v12005_v18  ;;  %v9619_v23 = vsel %vm785_vm0, %v2734_v10, 0.0  ;;  %v12010_v30 = vld [vmem:[#allocation195_spill] sm:$0xff]  ;;  %v2522_v17 = vpop.xlane.xlu1 %2521 }
 0x431   :  { %vm12007_vm8 = vcmp.eq.s32.totalorder %v7871_v45, %v12006_v52  ;;  %v9625_v31 = vsub.f32 %v3288_v37, %v2067_v50  ;;  %5077 = vlog2.f32 %v12009_v2  ;;  %v3289_v60 = vsub.f32 %v2519_v61, %v12010_v30  ;;  %v12012_v52 = vld [vmem:[#allocation30_spill] sm:$0xff]  ;;  %2868 = vadd.xlane.f32.xlu0 %v9496_v41 }
 0x432   :  { %12004 = vst [vmem:[#allocation173_spill] sm:$0xff] %v9614_v4  ;;  %v2737_v3 = vsel %vm12007_vm8, %v9315_v12, 0.0  ;;  %v9630_v18 = vsel %vm785_vm0, %v2735_v26, 0.0  ;;  %v2069_v28 = vmul.f32 0.6931472, %v5064_v48  ;;  %v5068_v4 = vpop.eup %5067  ;;  %v3290_v10 = vsub.f32 %v2522_v17, %v12011_v53  ;;  %v12014_v48 = vld [vmem:[#allocation29_spill] sm:$0xff]  ;;  %2871 = vadd.xlane.f32.xlu1 %v9507_v33  ;;  %v2525_v41 = vpop.xlane.xlu0 %2524 }
 0x433   :  { %12008 = vst [vmem:[#allocation174_spill] sm:$0xff] %v9625_v31  ;;  %v9634_v38 = vsel %vm785_vm0, %v2736_v29, 0.0  ;;  %vm12013_vm9 = vcmp.eq.s32.totalorder %v7871_v45, %v12012_v52  ;;  %v2071_v50 = vmul.f32 0.6931472, %v5066_v11  ;;  %v5070_v2 = vpop.eup %5069  ;;  %v9642_v61 = vsel %vm785_vm0, %v2737_v3, 0.0  ;;  %v12016_v26 = vld [vmem:[#allocation32_spill] sm:$0xff] }
 0x434   :  { %v2738_v37 = vsel %vm12013_vm9, %v9315_v12, 0.0  ;;  %vm12015_vm10 = vcmp.eq.s32.totalorder %v7871_v45, %v12014_v48  ;;  %vm12017_vm11 = vcmp.eq.s32.totalorder %v7871_v45, %v12016_v26  ;;  %v9652_v30 = vsub.f32 %v3289_v60, %v2069_v28  ;;  %v12019_v17 = vld [vmem:[#allocation283_spill] sm:$0xff]  ;;  %v12022_v52 = vld [vmem:[#allocation34_spill] sm:$0xff]  ;;  %v12025_v26 = vld [vmem:[#allocation284_spill] sm:$0xff] }
 0x435   :  { %v2739_v53 = vsel %vm12015_vm10, %v9315_v12, 0.0  ;;  %v2740_v29 = vsel %vm12017_vm11, %v9315_v12, 0.0  ;;  %5079 = vlog2.f32 %v12019_v17  ;;  %v12020_v11 = vld [vmem:[#allocation31_spill] sm:$0xff]  ;;  %vm12023_vm4 = vcmp.eq.s32.totalorder %v7871_v45, %v12022_v52  ;;  %v12026_v60 = vld [vmem:[#allocation197_spill] sm:$0xff]  ;;  %v2528_v17 = vpop.xlane.xlu1 %2527  ;;  %v5072_v32 = vpop.eup %5071  ;;  %2874 = vadd.xlane.f32.xlu0 %v9518_v22  ;;  %v12032_v22 = vld [vmem:[#allocation36_spill] sm:$0xff] }
 0x436   :  { %12018 = vst [vmem:[#allocation261_spill] sm:$0xff] %v9652_v30  ;;  %vm12021_vm2 = vcmp.eq.s32.totalorder %v7871_v45, %v12020_v11  ;;  %v2742_v48 = vsel %vm12023_vm4, %v9315_v12, 0.0  ;;  %v9664_v31 = vsub.f32 %v3290_v10, %v2071_v50  ;;  %5081 = vlog2.f32 %v12025_v26  ;;  %v5074_v50 = vpop.eup %5073  ;;  %v12031_v26 = vld [vmem:[#allocation285_spill] sm:$0xff]  ;;  %2877 = vadd.xlane.f32.xlu1 %v9522_v39  ;;  %v12039_v39 = vld [vmem:[#allocation38_spill] sm:$0xff] }
 0x437   :  { %v2741_v3 = vsel %vm12021_vm2, %v9315_v12, 0.0  ;;  %v3291_v28 = vsub.f32 %v2525_v41, %v12026_v60  ;;  %v9669_v33 = vsel %vm785_vm0, %v2738_v37, 0.0  ;;  %v2073_v30 = vmul.f32 0.6931472, %v5068_v4  ;;  %v12028_v4 = vld [vmem:[#allocation33_spill] sm:$0xff] }
 0x438   :  { %12024 = vst [vmem:[#allocation262_spill] sm:$0xff] %v9664_v31  ;;  %v3292_v11 = vsub.f32 %v2528_v17, %v12027_v24  ;;  %v9673_v16 = vsel %vm785_vm0, %v2739_v53, 0.0  ;;  %v9676_v52 = vsel %vm785_vm0, %v2740_v29, 0.0  ;;  %v2075_v10 = vmul.f32 0.6931472, %v5070_v2  ;;  %v2531_v2 = vpop.xlane.xlu0 %2530  ;;  %v12037_v17 = vld [vmem:[#allocation286_spill] sm:$0xff] }
 0x439   :  { %v9680_v41 = vsel %vm785_vm0, %v2741_v3, 0.0  ;;  %v9683_v37 = vsel %vm785_vm0, %v2742_v48, 0.0  ;;  %vm12029_vm5 = vcmp.eq.s32.totalorder %v7871_v45, %v12028_v4  ;;  %v9689_v53 = vsub.f32 %v3291_v28, %v2073_v30  ;;  %v12034_v3 = vld [vmem:[#allocation35_spill] sm:$0xff]  ;;  %v2534_v4 = vpop.xlane.xlu1 %2533  ;;  %v12041_v31 = vld [vmem:[#allocation200_spill] sm:$0xff]  ;;  %2880 = vadd.xlane.f32.xlu0 %v9529_v35 }
 0x43a   :  { %v2743_v24 = vsel %vm12029_vm5, %v9315_v12, 0.0  ;;  %5083 = vlog2.f32 %v12031_v26  ;;  %vm12033_vm6 = vcmp.eq.s32.totalorder %v7871_v45, %v12032_v22  ;;  %vm12035_vm7 = vcmp.eq.s32.totalorder %v7871_v45, %v12034_v3  ;;  %v12038_v30 = vld [vmem:[#allocation199_spill] sm:$0xff]  ;;  %v5076_v22 = vpop.eup %5075  ;;  %2883 = vadd.xlane.f32.xlu1 %v9555_v57 }
 0x43b   :  { %12030 = vst [vmem:[#allocation175_spill] sm:$0xff] %v9689_v53  ;;  %v2744_v29 = vsel %vm12033_vm6, %v9315_v12, 0.0  ;;  %v2745_v48 = vsel %vm12035_vm7, %v9315_v12, 0.0  ;;  %v9701_v60 = vsub.f32 %v3292_v11, %v2075_v10  ;;  %5085 = vlog2.f32 %v12037_v17  ;;  %v12042_v11 = vld [vmem:[#allocation37_spill] sm:$0xff] }
 0x43c   :  { %v3293_v28 = vsub.f32 %v2531_v2, %v12038_v30  ;;  %vm12040_vm8 = vcmp.eq.s32.totalorder %v7871_v45, %v12039_v39  ;;  %v2077_v53 = vmul.f32 0.6931472, %v5072_v32  ;;  %v3294_v46 = vsub.f32 %v2534_v4, %v12041_v31  ;;  %v5078_v2 = vpop.eup %5077  ;;  %v12044_v31 = vld [vmem:[#allocation40_spill] sm:$0xff]  ;;  %v12047_v4 = vld [vmem:[#allocation287_spill] sm:$0xff] }
 0x43d   :  { %12036 = vst [vmem:[#allocation176_spill] sm:$0xff] %v9701_v60  ;;  %v2746_v26 = vsel %vm12040_vm8, %v9315_v12, 0.0  ;;  %v9711_v20 = vsel %vm785_vm0, %v2743_v24, 0.0  ;;  %vm12043_vm9 = vcmp.eq.s32.totalorder %v7871_v45, %v12042_v11  ;;  %v2079_v3 = vmul.f32 0.6931472, %v5074_v50  ;;  %v2537_v50 = vpop.xlane.xlu0 %2536  ;;  %v12051_v11 = vld [vmem:[#allocation288_spill] sm:$0xff]  ;;  %2886 = vadd.xlane.f32.xlu0 %v9559_v49 }
 0x43e   :  { %v2747_v10 = vsel %vm12043_vm9, %v9315_v12, 0.0  ;;  %v9719_v17 = vsel %vm785_vm0, %v2744_v29, 0.0  ;;  %v9722_v32 = vsel %vm785_vm0, %v2745_v48, 0.0  ;;  %vm12045_vm10 = vcmp.eq.s32.totalorder %v7871_v45, %v12044_v31  ;;  %v12048_v29 = vld [vmem:[#allocation39_spill] sm:$0xff]  ;;  %v12052_v31 = vld [vmem:[#allocation201_spill] sm:$0xff]  ;;  %v12053_v60 = vld [vmem:[#allocation202_spill] sm:$0xff]  ;;  %2889 = vadd.xlane.f32.xlu1 %v9562_v27 }
 0x43f   :  { %v2748_v24 = vsel %vm12045_vm10, %v9315_v12, 0.0  ;;  %v9728_v30 = vsub.f32 %v3293_v28, %v2077_v53  ;;  %5087 = vlog2.f32 %v12047_v4  ;;  %v9733_v35 = vsel %vm785_vm0, %v2746_v26, 0.0  ;;  %v2540_v28 = vpop.xlane.xlu1 %2539 }
 0x440   :  { %vm12049_vm11 = vcmp.eq.s32.totalorder %v7871_v45, %v12048_v29  ;;  %v9739_v39 = vsub.f32 %v3294_v46, %v2079_v3  ;;  %5089 = vlog2.f32 %v12051_v11  ;;  %v3295_v53 = vsub.f32 %v2537_v50, %v12052_v31  ;;  %v12054_v29 = vld [vmem:[#allocation42_spill] sm:$0xff] }
 0x441   :  { %12046 = vst [vmem:[#allocation263_spill] sm:$0xff] %v9728_v30  ;;  %v2749_v48 = vsel %vm12049_vm11, %v9315_v12, 0.0  ;;  %v9744_v4 = vsel %vm785_vm0, %v2747_v10, 0.0  ;;  %v2081_v57 = vmul.f32 0.6931472, %v5076_v22  ;;  %v5080_v30 = vpop.eup %5079  ;;  %v3296_v26 = vsub.f32 %v2540_v28, %v12053_v60  ;;  %v12056_v22 = vld [vmem:[#allocation41_spill] sm:$0xff]  ;;  %v2543_v49 = vpop.xlane.xlu0 %2542  ;;  %2892 = vadd.xlane.f32.xlu0 %v9566_v44 }
 0x442   :  { %12050 = vst [vmem:[#allocation264_spill] sm:$0xff] %v9739_v39  ;;  %v9748_v5 = vsel %vm785_vm0, %v2748_v24, 0.0  ;;  %vm12055_vm2 = vcmp.eq.s32.totalorder %v7871_v45, %v12054_v29  ;;  %v2083_v3 = vmul.f32 0.6931472, %v5078_v2  ;;  %v5082_v11 = vpop.eup %5081  ;;  %v9756_v50 = vsel %vm785_vm0, %v2749_v48, 0.0  ;;  %v12058_v10 = vld [vmem:[#allocation44_spill] sm:$0xff]  ;;  %2895 = vadd.xlane.f32.xlu1 %v9569_v54 }
 0x443   :  { %v2750_v46 = vsel %vm12055_vm2, %v9315_v12, 0.0  ;;  %vm12057_vm4 = vcmp.eq.s32.totalorder %v7871_v45, %v12056_v22  ;;  %vm12059_vm5 = vcmp.eq.s32.totalorder %v7871_v45, %v12058_v10  ;;  %v9766_v31 = vsub.f32 %v3295_v53, %v2081_v57  ;;  %v12061_v28 = vld [vmem:[#allocation289_spill] sm:$0xff]  ;;  %v12062_v2 = vld [vmem:[#allocation43_spill] sm:$0xff]  ;;  %v12064_v29 = vld [vmem:[#allocation46_spill] sm:$0xff] }
 0x444   :  { %v2751_v60 = vsel %vm12057_vm4, %v9315_v12, 0.0  ;;  %v2752_v24 = vsel %vm12059_vm5, %v9315_v12, 0.0  ;;  %5091 = vlog2.f32 %v12061_v28  ;;  %vm12063_vm6 = vcmp.eq.s32.totalorder %v7871_v45, %v12062_v2  ;;  %v12067_v10 = vld [vmem:[#allocation290_spill] sm:$0xff]  ;;  %v12068_v53 = vld [vmem:[#allocation203_spill] sm:$0xff]  ;;  %v2546_v28 = vpop.xlane.xlu1 %2545  ;;  %v5084_v21 = vpop.eup %5083  ;;  %v12075_v44 = vld [vmem:[#allocation48_spill] sm:$0xff] }
 0x445   :  { %12060 = vst [vmem:[#allocation177_spill] sm:$0xff] %v9766_v31  ;;  %v2753_v48 = vsel %vm12063_vm6, %v9315_v12, 0.0  ;;  %vm12065_vm7 = vcmp.eq.s32.totalorder %v7871_v45, %v12064_v29  ;;  %v9778_v39 = vsub.f32 %v3296_v26, %v2083_v3  ;;  %5093 = vlog2.f32 %v12067_v10  ;;  %v5086_v3 = vpop.eup %5085  ;;  %v12074_v10 = vld [vmem:[#allocation291_spill] sm:$0xff]  ;;  %v12082_v54 = vld [vmem:[#allocation50_spill] sm:$0xff]  ;;  %2898 = vadd.xlane.f32.xlu0 %v9597_v58 }
 0x446   :  { %v2754_v22 = vsel %vm12065_vm7, %v9315_v12, 0.0  ;;  %v3297_v57 = vsub.f32 %v2543_v49, %v12068_v53  ;;  %v9783_v27 = vsel %vm785_vm0, %v2750_v46, 0.0  ;;  %v2085_v31 = vmul.f32 0.6931472, %v5080_v30  ;;  %v12071_v30 = vld [vmem:[#allocation45_spill] sm:$0xff]  ;;  %2901 = vadd.xlane.f32.xlu1 %v9605_v56 }
 0x447   :  { %12066 = vst [vmem:[#allocation178_spill] sm:$0xff] %v9778_v39  ;;  %v3298_v2 = vsub.f32 %v2546_v28, %v12069_v42  ;;  %v9787_v55 = vsel %vm785_vm0, %v2751_v60, 0.0  ;;  %v9790_v29 = vsel %vm785_vm0, %v2752_v24, 0.0  ;;  %v2087_v26 = vmul.f32 0.6931472, %v5082_v11  ;;  %v2549_v11 = vpop.xlane.xlu0 %2548  ;;  %v12080_v28 = vld [vmem:[#allocation292_spill] sm:$0xff] }
 0x448   :  { %v9794_v49 = vsel %vm785_vm0, %v2753_v48, 0.0  ;;  %v9797_v46 = vsel %vm785_vm0, %v2754_v22, 0.0  ;;  %vm12072_vm8 = vcmp.eq.s32.totalorder %v7871_v45, %v12071_v30  ;;  %v9803_v60 = vsub.f32 %v3297_v57, %v2085_v31  ;;  %v12077_v48 = vld [vmem:[#allocation47_spill] sm:$0xff]  ;;  %v12081_v31 = vld [vmem:[#allocation205_spill] sm:$0xff]  ;;  %v2552_v30 = vpop.xlane.xlu1 %2551  ;;  %v12084_v39 = vld [vmem:[#allocation206_spill] sm:$0xff] }
 0x449   :  { %12070 = vst [vmem:[#allocation4_spill] sm:$0xff] %v9797_v46  ;;  %v2755_v42 = vsel %vm12072_vm8, %v9315_v12, 0.0  ;;  %5095 = vlog2.f32 %v12074_v10  ;;  %vm12076_vm9 = vcmp.eq.s32.totalorder %v7871_v45, %v12075_v44  ;;  %vm12078_vm10 = vcmp.eq.s32.totalorder %v7871_v45, %v12077_v48  ;;  %v5088_v44 = vpop.eup %5087  ;;  %2904 = vadd.xlane.f32.xlu0 %v9608_v8 }
 0x44a   :  { %12073 = vst [vmem:[#allocation265_spill] sm:$0xff] %v9803_v60  ;;  %v2756_v24 = vsel %vm12076_vm9, %v9315_v12, 0.0  ;;  %v2757_v22 = vsel %vm12078_vm10, %v9315_v12, 0.0  ;;  %v9815_v53 = vsub.f32 %v3298_v2, %v2087_v26  ;;  %5097 = vlog2.f32 %v12080_v28  ;;  %v12085_v2 = vld [vmem:[#allocation49_spill] sm:$0xff]  ;;  %2907 = vadd.xlane.f32.xlu1 %v9619_v23 }
 0x44b   :  { %v3299_v57 = vsub.f32 %v2549_v11, %v12081_v31  ;;  %vm12083_vm11 = vcmp.eq.s32.totalorder %v7871_v45, %v12082_v54  ;;  %v2089_v60 = vmul.f32 0.6931472, %v5084_v21  ;;  %v3300_v14 = vsub.f32 %v2552_v30, %v12084_v39  ;;  %v5090_v11 = vpop.eup %5089  ;;  %v12087_v39 = vld [vmem:[#allocation52_spill] sm:$0xff]  ;;  %v12090_v30 = vld [vmem:[#allocation293_spill] sm:$0xff] }
 0x44c   :  { %12079 = vst [vmem:[#allocation266_spill] sm:$0xff] %v9815_v53  ;;  %v2758_v10 = vsel %vm12083_vm11, %v9315_v12, 0.0  ;;  %v9825_v46 = vsel %vm785_vm0, %v2755_v42, 0.0  ;;  %vm12086_vm2 = vcmp.eq.s32.totalorder %v7871_v45, %v12085_v2  ;;  %v2091_v48 = vmul.f32 0.6931472, %v5086_v3  ;;  %v2555_v3 = vpop.xlane.xlu0 %2554  ;;  %v12095_v2 = vld [vmem:[#allocation294_spill] sm:$0xff] }
 0x44d   :  { %v2759_v26 = vsel %vm12086_vm2, %v9315_v12, 0.0  ;;  %v9833_v28 = vsel %vm785_vm0, %v2756_v24, 0.0  ;;  %v9836_v21 = vsel %vm785_vm0, %v2757_v22, 0.0  ;;  %vm12088_vm4 = vcmp.eq.s32.totalorder %v7871_v45, %v12087_v39  ;;  %v12092_v24 = vld [vmem:[#allocation51_spill] sm:$0xff]  ;;  %v12098_v53 = vld [vmem:[#allocation208_spill] sm:$0xff]  ;;  %2910 = vadd.xlane.f32.xlu0 %v9630_v18 }
 0x44e   :  { %v2760_v42 = vsel %vm12088_vm4, %v9315_v12, 0.0  ;;  %v9842_v31 = vsub.f32 %v3299_v57, %v2089_v60  ;;  %5099 = vlog2.f32 %v12090_v30  ;;  %v9847_v58 = vsel %vm785_vm0, %v2758_v10, 0.0  ;;  %v12096_v39 = vld [vmem:[#allocation207_spill] sm:$0xff]  ;;  %v2558_v57 = vpop.xlane.xlu1 %2557  ;;  %2913 = vadd.xlane.f32.xlu1 %v9634_v38  ;;  %v12123_v18 = vld [vmem:[#allocation60_spill] sm:$0xff]  ;;  %v12130_v38 = vld [vmem:[#allocation62_spill] sm:$0xff] }
 0x44f   :  { %12091 = vst [vmem:[#allocation180_spill] sm:$0xff] %v9847_v58  ;;  %vm12093_vm5 = vcmp.eq.s32.totalorder %v7871_v45, %v12092_v24  ;;  %v9853_v54 = vsub.f32 %v3300_v14, %v2091_v48  ;;  %5101 = vlog2.f32 %v12095_v2  ;;  %v3301_v60 = vsub.f32 %v2555_v3, %v12096_v39  ;;  %v12100_v24 = vld [vmem:[#allocation54_spill] sm:$0xff] }
 0x450   :  { %12089 = vst [vmem:[#allocation179_spill] sm:$0xff] %v9842_v31  ;;  %v2761_v22 = vsel %vm12093_vm5, %v9315_v12, 0.0  ;;  %v9858_v30 = vsel %vm785_vm0, %v2759_v26, 0.0  ;;  %v2093_v56 = vmul.f32 0.6931472, %v5088_v44  ;;  %v5092_v31 = vpop.eup %5091  ;;  %v3302_v10 = vsub.f32 %v2558_v57, %v12098_v53  ;;  %v12103_v44 = vld [vmem:[#allocation53_spill] sm:$0xff]  ;;  %v2561_v8 = vpop.xlane.xlu0 %2560 }
 0x451   :  { %12094 = vst [vmem:[#allocation3_spill] sm:$0xff] %v9853_v54  ;;  %12097 = vst [vmem:[#allocation267_spill] sm:$0xff] %v9858_v30  ;;  %v9862_v58 = vsel %vm785_vm0, %v2760_v42, 0.0  ;;  %vm12101_vm6 = vcmp.eq.s32.totalorder %v7871_v45, %v12100_v24  ;;  %v2095_v48 = vmul.f32 0.6931472, %v5090_v11  ;;  %v5094_v2 = vpop.eup %5093  ;;  %v9870_v3 = vsel %vm785_vm0, %v2761_v22, 0.0  ;;  %2916 = vadd.xlane.f32.xlu0 %v9642_v61 }
 0x452   :  { %12099 = vst [vmem:[#allocation268_spill] sm:$0xff] %v9862_v58  ;;  %v2762_v14 = vsel %vm12101_vm6, %v9315_v12, 0.0  ;;  %12102 = vst [vmem:[#allocation181_spill] sm:$0xff] %v9870_v3  ;;  %vm12104_vm7 = vcmp.eq.s32.totalorder %v7871_v45, %v12103_v44  ;;  %v12105_v26 = vld [vmem:[#allocation56_spill] sm:$0xff]  ;;  %v9880_v39 = vsub.f32 %v3301_v60, %v2093_v56  ;;  %v12108_v57 = vld [vmem:[#allocation295_spill] sm:$0xff]  ;;  %vm12124_vm2 = vcmp.eq.s32.totalorder %v7871_v45, %v12123_v18 }
 0x453   :  { %v2763_v53 = vsel %vm12104_vm7, %v9315_v12, 0.0  ;;  %vm12106_vm8 = vcmp.eq.s32.totalorder %v7871_v45, %v12105_v26  ;;  %5103 = vlog2.f32 %v12108_v57  ;;  %v12109_v11 = vld [vmem:[#allocation55_spill] sm:$0xff]  ;;  %v12111_v24 = vld [vmem:[#allocation58_spill] sm:$0xff]  ;;  %v9892_v54 = vsub.f32 %v3302_v10, %v2095_v48  ;;  %v12114_v26 = vld [vmem:[#allocation296_spill] sm:$0xff]  ;;  %v2564_v57 = vpop.xlane.xlu1 %2563  ;;  %v5096_v3 = vpop.eup %5095  ;;  %2919 = vadd.xlane.f32.xlu1 %v9669_v33 }
 0x454   :  { %v2764_v42 = vsel %vm12106_vm8, %v9315_v12, 0.0  ;;  %12107 = vst [vmem:[#allocation182_spill] sm:$0xff] %v9880_v39  ;;  %vm12110_vm9 = vcmp.eq.s32.totalorder %v7871_v45, %v12109_v11  ;;  %vm12112_vm10 = vcmp.eq.s32.totalorder %v7871_v45, %v12111_v24  ;;  %5105 = vlog2.f32 %v12114_v26  ;;  %v12115_v60 = vld [vmem:[#allocation209_spill] sm:$0xff]  ;;  %v12116_v58 = vld [vmem:[#allocation210_spill] sm:$0xff]  ;;  %v5098_v48 = vpop.eup %5097 }
 0x455   :  { %v2765_v22 = vsel %vm12110_vm9, %v9315_v12, 0.0  ;;  %v2766_v44 = vsel %vm12112_vm10, %v9315_v12, 0.0  ;;  %12113 = vst [vmem:[#allocation6_spill] sm:$0xff] %v9892_v54  ;;  %v3303_v56 = vsub.f32 %v2561_v8, %v12115_v60  ;;  %v9897_v23 = vsel %vm785_vm0, %v2762_v14, 0.0  ;;  %v12122_v26 = vld [vmem:[#allocation297_spill] sm:$0xff]  ;;  %v12132_v54 = vld [vmem:[#allocation212_spill] sm:$0xff]  ;;  %2922 = vadd.xlane.f32.xlu0 %v9673_v16 }
 0x456   :  { %v2097_v39 = vmul.f32 0.6931472, %v5092_v31  ;;  %v3304_v11 = vsub.f32 %v2564_v57, %v12116_v58  ;;  %v9901_v30 = vsel %vm785_vm0, %v2763_v53, 0.0  ;;  %v9904_v24 = vsel %vm785_vm0, %v2764_v42, 0.0  ;;  %v12119_v31 = vld [vmem:[#allocation57_spill] sm:$0xff]  ;;  %v12128_v57 = vld [vmem:[#allocation298_spill] sm:$0xff] }
 0x457   :  { %v2099_v10 = vmul.f32 0.6931472, %v5094_v2  ;;  %v9908_v8 = vsel %vm785_vm0, %v2765_v22, 0.0  ;;  %v9911_v14 = vsel %vm785_vm0, %v2766_v44, 0.0  ;;  %vm12120_vm11 = vcmp.eq.s32.totalorder %v7871_v45, %v12119_v31  ;;  %v2567_v2 = vpop.xlane.xlu0 %2566  ;;  %v12125_v22 = vld [vmem:[#allocation59_spill] sm:$0xff]  ;;  %v2570_v31 = vpop.xlane.xlu1 %2569  ;;  %2925 = vadd.xlane.f32.xlu1 %v9676_v52 }
 0x458   :  { %12117 = vst [vmem:[#allocation269_spill] sm:$0xff] %v9908_v8  ;;  %12118 = vst [vmem:[#allocation270_spill] sm:$0xff] %v9911_v14  ;;  %v2767_v58 = vsel %vm12120_vm11, %v9315_v12, 0.0  ;;  %v9917_v53 = vsub.f32 %v3303_v56, %v2097_v39  ;;  %5107 = vlog2.f32 %v12122_v26  ;;  %v2768_v42 = vsel %vm12124_vm2, %v9315_v12, 0.0  ;;  %v12129_v39 = vld [vmem:[#allocation211_spill] sm:$0xff]  ;;  %v5100_v18 = vpop.eup %5099 }
 0x459   :  { %vm12126_vm4 = vcmp.eq.s32.totalorder %v7871_v45, %v12125_v22  ;;  %v9929_v60 = vsub.f32 %v3304_v11, %v2099_v10  ;;  %5109 = vlog2.f32 %v12128_v57  ;;  %v3305_v56 = vsub.f32 %v2567_v2, %v12129_v39  ;;  %v12133_v11 = vld [vmem:[#allocation61_spill] sm:$0xff]  ;;  %v5102_v2 = vpop.eup %5101  ;;  %2928 = vadd.xlane.f32.xlu0 %v9680_v41  ;;  %v12171_v41 = vld [vmem:[#allocation72_spill] sm:$0xff] }
 0x45a   :  { %12121 = vst [vmem:[#allocation183_spill] sm:$0xff] %v9917_v53  ;;  %v2769_v44 = vsel %vm12126_vm4, %v9315_v12, 0.0  ;;  %vm12131_vm5 = vcmp.eq.s32.totalorder %v7871_v45, %v12130_v38  ;;  %v2101_v53 = vmul.f32 0.6931472, %v5096_v3  ;;  %v3306_v14 = vsub.f32 %v2570_v31, %v12132_v54  ;;  %v12135_v54 = vld [vmem:[#allocation64_spill] sm:$0xff]  ;;  %v12138_v31 = vld [vmem:[#allocation299_spill] sm:$0xff] }
 0x45b   :  { %12127 = vst [vmem:[#allocation5_spill] sm:$0xff] %v9929_v60  ;;  %v2770_v26 = vsel %vm12131_vm5, %v9315_v12, 0.0  ;;  %v9939_v8 = vsel %vm785_vm0, %v2767_v58, 0.0  ;;  %vm12134_vm6 = vcmp.eq.s32.totalorder %v7871_v45, %v12133_v11  ;;  %v2103_v22 = vmul.f32 0.6931472, %v5098_v48  ;;  %v2573_v48 = vpop.xlane.xlu0 %2572  ;;  %v12143_v11 = vld [vmem:[#allocation300_spill] sm:$0xff]  ;;  %2931 = vadd.xlane.f32.xlu1 %v9683_v37 }
 0x45c   :  { %v2771_v10 = vsel %vm12134_vm6, %v9315_v12, 0.0  ;;  %v9947_v57 = vsel %vm785_vm0, %v2768_v42, 0.0  ;;  %v9950_v3 = vsel %vm785_vm0, %v2769_v44, 0.0  ;;  %vm12136_vm7 = vcmp.eq.s32.totalorder %v7871_v45, %v12135_v54  ;;  %v12140_v42 = vld [vmem:[#allocation63_spill] sm:$0xff]  ;;  %v12144_v54 = vld [vmem:[#allocation213_spill] sm:$0xff]  ;;  %v12146_v60 = vld [vmem:[#allocation214_spill] sm:$0xff] }
 0x45d   :  { %v2772_v58 = vsel %vm12136_vm7, %v9315_v12, 0.0  ;;  %v9956_v39 = vsub.f32 %v3305_v56, %v2101_v53  ;;  %5111 = vlog2.f32 %v12138_v31  ;;  %v9961_v61 = vsel %vm785_vm0, %v2770_v26, 0.0  ;;  %v2576_v56 = vpop.xlane.xlu1 %2575  ;;  %v12178_v37 = vld [vmem:[#allocation74_spill] sm:$0xff]  ;;  %2934 = vadd.xlane.f32.xlu0 %v9711_v20 }
 0x45e   :  { %12139 = vst [vmem:[#allocation8_spill] sm:$0xff] %v9961_v61  ;;  %vm12141_vm8 = vcmp.eq.s32.totalorder %v7871_v45, %v12140_v42  ;;  %v9967_v38 = vsub.f32 %v3306_v14, %v2103_v22  ;;  %5113 = vlog2.f32 %v12143_v11  ;;  %v3307_v53 = vsub.f32 %v2573_v48, %v12144_v54  ;;  %v12148_v42 = vld [vmem:[#allocation66_spill] sm:$0xff] }
 0x45f   :  { %12137 = vst [vmem:[#allocation184_spill] sm:$0xff] %v9956_v39  ;;  %v2773_v44 = vsel %vm12141_vm8, %v9315_v12, 0.0  ;;  %v9972_v31 = vsel %vm785_vm0, %v2771_v10, 0.0  ;;  %v2105_v33 = vmul.f32 0.6931472, %v5100_v18  ;;  %v5104_v39 = vpop.eup %5103  ;;  %v3308_v26 = vsub.f32 %v2576_v56, %v12146_v60  ;;  %v12151_v18 = vld [vmem:[#allocation65_spill] sm:$0xff]  ;;  %v2579_v16 = vpop.xlane.xlu0 %2578  ;;  %2937 = vadd.xlane.f32.xlu1 %v9719_v17 }
 0x460   :  { %12142 = vst [vmem:[#allocation271_spill] sm:$0xff] %v9967_v38  ;;  %12145 = vst [vmem:[#allocation7_spill] sm:$0xff] %v9972_v31  ;;  %v9976_v61 = vsel %vm785_vm0, %v2772_v58, 0.0  ;;  %vm12149_vm9 = vcmp.eq.s32.totalorder %v7871_v45, %v12148_v42  ;;  %v2107_v22 = vmul.f32 0.6931472, %v5102_v2  ;;  %v5106_v11 = vpop.eup %5105  ;;  %v9984_v48 = vsel %vm785_vm0, %v2773_v44, 0.0 }
 0x461   :  { %12147 = vst [vmem:[#allocation10_spill] sm:$0xff] %v9976_v61  ;;  %v2774_v14 = vsel %vm12149_vm9, %v9315_v12, 0.0  ;;  %12150 = vst [vmem:[#allocation272_spill] sm:$0xff] %v9984_v48  ;;  %vm12152_vm10 = vcmp.eq.s32.totalorder %v7871_v45, %v12151_v18  ;;  %v12153_v10 = vld [vmem:[#allocation68_spill] sm:$0xff]  ;;  %v9994_v54 = vsub.f32 %v3307_v53, %v2105_v33  ;;  %v12156_v56 = vld [vmem:[#allocation301_spill] sm:$0xff]  ;;  %vm12172_vm6 = vcmp.eq.s32.totalorder %v7871_v45, %v12171_v41 }
 0x462   :  { %v2775_v60 = vsel %vm12152_vm10, %v9315_v12, 0.0  ;;  %vm12154_vm11 = vcmp.eq.s32.totalorder %v7871_v45, %v12153_v10  ;;  %5115 = vlog2.f32 %v12156_v56  ;;  %v12157_v2 = vld [vmem:[#allocation67_spill] sm:$0xff]  ;;  %v12159_v42 = vld [vmem:[#allocation70_spill] sm:$0xff]  ;;  %v10006_v38 = vsub.f32 %v3308_v26, %v2107_v22  ;;  %v2582_v56 = vpop.xlane.xlu1 %2581  ;;  %v5108_v48 = vpop.eup %5107  ;;  %v12164_v61 = vld [vmem:[#allocation216_spill] sm:$0xff]  ;;  %2940 = vadd.xlane.f32.xlu0 %v9722_v32 }
 0x463   :  { %v2776_v58 = vsel %vm12154_vm11, %v9315_v12, 0.0  ;;  %12155 = vst [vmem:[#allocation185_spill] sm:$0xff] %v9994_v54  ;;  %vm12158_vm2 = vcmp.eq.s32.totalorder %v7871_v45, %v12157_v2  ;;  %vm12160_vm4 = vcmp.eq.s32.totalorder %v7871_v45, %v12159_v42  ;;  %v12162_v10 = vld [vmem:[#allocation302_spill] sm:$0xff]  ;;  %v12163_v53 = vld [vmem:[#allocation215_spill] sm:$0xff]  ;;  %v10011_v52 = vsel %vm785_vm0, %v2774_v14, 0.0  ;;  %v5110_v22 = vpop.eup %5109  ;;  %2943 = vadd.xlane.f32.xlu1 %v9733_v35 }
 0x464   :  { %v2777_v44 = vsel %vm12158_vm2, %v9315_v12, 0.0  ;;  %v2778_v18 = vsel %vm12160_vm4, %v9315_v12, 0.0  ;;  %12161 = vst [vmem:[#allocation186_spill] sm:$0xff] %v10006_v38  ;;  %5117 = vlog2.f32 %v12162_v10  ;;  %v3309_v33 = vsub.f32 %v2579_v16, %v12163_v53  ;;  %v12170_v10 = vld [vmem:[#allocation303_spill] sm:$0xff]  ;;  %v12180_v38 = vld [vmem:[#allocation218_spill] sm:$0xff] }
 0x465   :  { %v2109_v54 = vmul.f32 0.6931472, %v5104_v39  ;;  %v3310_v2 = vsub.f32 %v2582_v56, %v12164_v61  ;;  %v10015_v31 = vsel %vm785_vm0, %v2775_v60, 0.0  ;;  %v10018_v42 = vsel %vm785_vm0, %v2776_v58, 0.0  ;;  %v12167_v39 = vld [vmem:[#allocation69_spill] sm:$0xff]  ;;  %v12176_v56 = vld [vmem:[#allocation304_spill] sm:$0xff] }
 0x466   :  { %v2111_v26 = vmul.f32 0.6931472, %v5106_v11  ;;  %v10022_v16 = vsel %vm785_vm0, %v2777_v44, 0.0  ;;  %v10025_v14 = vsel %vm785_vm0, %v2778_v18, 0.0  ;;  %vm12168_vm5 = vcmp.eq.s32.totalorder %v7871_v45, %v12167_v39  ;;  %v2585_v11 = vpop.xlane.xlu0 %2584  ;;  %v12173_v44 = vld [vmem:[#allocation71_spill] sm:$0xff]  ;;  %v2588_v39 = vpop.xlane.xlu1 %2587  ;;  %2946 = vadd.xlane.f32.xlu0 %v9744_v4 }
 0x467   :  { %12165 = vst [vmem:[#allocation9_spill] sm:$0xff] %v10022_v16  ;;  %12166 = vst [vmem:[#allocation273_spill] sm:$0xff] %v10025_v14  ;;  %v2779_v61 = vsel %vm12168_vm5, %v9315_v12, 0.0  ;;  %v10031_v60 = vsub.f32 %v3309_v33, %v2109_v54  ;;  %5119 = vlog2.f32 %v12170_v10  ;;  %v2780_v58 = vsel %vm12172_vm6, %v9315_v12, 0.0  ;;  %v12177_v54 = vld [vmem:[#allocation217_spill] sm:$0xff]  ;;  %v5112_v41 = vpop.eup %5111  ;;  %2949 = vadd.xlane.f32.xlu1 %v9748_v5 }
 0x468   :  { %vm12174_vm7 = vcmp.eq.s32.totalorder %v7871_v45, %v12173_v44  ;;  %v10043_v53 = vsub.f32 %v3310_v2, %v2111_v26  ;;  %5121 = vlog2.f32 %v12176_v56  ;;  %v3311_v33 = vsub.f32 %v2585_v11, %v12177_v54  ;;  %v5114_v11 = vpop.eup %5113  ;;  %v12190_v2 = vld [vmem:[#allocation306_spill] sm:$0xff] }
 0x469   :  { %12169 = vst [vmem:[#allocation12_spill] sm:$0xff] %v10031_v60  ;;  %v2781_v18 = vsel %vm12174_vm7, %v9315_v12, 0.0  ;;  %vm12179_vm8 = vcmp.eq.s32.totalorder %v7871_v45, %v12178_v37  ;;  %v2113_v60 = vmul.f32 0.6931472, %v5108_v48  ;;  %v3312_v14 = vsub.f32 %v2588_v39, %v12180_v38  ;;  %v12182_v38 = vld [vmem:[#allocation76_spill] sm:$0xff]  ;;  %v12185_v39 = vld [vmem:[#allocation305_spill] sm:$0xff] }
 0x46a   :  { %12175 = vst [vmem:[#allocation11_spill] sm:$0xff] %v10043_v53  ;;  %v2782_v10 = vsel %vm12179_vm8, %v9315_v12, 0.0  ;;  %v10053_v16 = vsel %vm785_vm0, %v2779_v61, 0.0  ;;  %v2783_v26 = vsel %vm728_vm13, %v9315_v12, 0.0  ;;  %v2115_v44 = vmul.f32 0.6931472, %v5110_v22  ;;  %v2591_v22 = vpop.xlane.xlu0 %2590  ;;  %2952 = vadd.xlane.f32.xlu0 %v9756_v50 }
 0x46b   :  { %v10061_v56 = vsel %vm785_vm0, %v2780_v58, 0.0  ;;  %v10064_v48 = vsel %vm785_vm0, %v2781_v18, 0.0  ;;  %vm12183_vm9 = vcmp.eq.s32.totalorder %v7871_v45, %v12182_v38  ;;  %v10070_v54 = vsub.f32 %v3311_v33, %v2113_v60  ;;  %v12187_v58 = vld [vmem:[#allocation75_spill] sm:$0xff]  ;;  %v2594_v33 = vpop.xlane.xlu1 %2593  ;;  %v12192_v53 = vld [vmem:[#allocation220_spill] sm:$0xff]  ;;  %2955 = vadd.xlane.f32.xlu1 %v9783_v27 }
 0x46c   :  { %v2784_v61 = vsel %vm12183_vm9, %v9315_v12, 0.0  ;;  %5123 = vlog2.f32 %v12185_v39  ;;  %v10075_v20 = vsel %vm785_vm0, %v2782_v10, 0.0  ;;  %vm12188_vm13 = vcmp.eq.s32.totalorder %v7871_v45, %v12187_v58  ;;  %v12191_v38 = vld [vmem:[#allocation219_spill] sm:$0xff] }
 0x46d   :  { %12184 = vst [vmem:[#allocation274_spill] sm:$0xff] %v10070_v54  ;;  %12186 = vst [vmem:[#allocation187_spill] sm:$0xff] %v10075_v20  ;;  %v2785_v18 = vsel %vm12188_vm13, %v9315_v12, 0.0  ;;  %v10081_v37 = vsub.f32 %v3312_v14, %v2115_v44  ;;  %5125 = vlog2.f32 %v12190_v2  ;;  %v3313_v60 = vsub.f32 %v2591_v22, %v12191_v38  ;;  %v5116_v54 = vpop.eup %5115 }
 0x46e   :  { %v10086_v39 = vsel %vm785_vm0, %v2783_v26, 0.0  ;;  %v2117_v17 = vmul.f32 0.6931472, %v5112_v41  ;;  %v3314_v10 = vsub.f32 %v2594_v33, %v12192_v53  ;;  %v10090_v20 = vsel %vm785_vm0, %v2784_v61, 0.0  ;;  %v5118_v58 = vpop.eup %5117  ;;  %v2597_v32 = vpop.xlane.xlu0 %2596  ;;  %2958 = vadd.xlane.f32.xlu0 %v9787_v55 }
 0x46f   :  { %12189 = vst [vmem:[#allocation14_spill] sm:$0xff] %v10081_v37  ;;  %vm12193_vm10 = vcmp.eq.s32.totalorder %v7871_v45, %v11761_v0  ;;  %v2119_v44 = vmul.f32 0.6931472, %v5114_v11  ;;  %v10098_v22 = vsel %vm785_vm0, %v2785_v18, 0.0  ;;  %vm12194_vm11 = vcmp.eq.s32.totalorder %v7871_v45, %v11763_v43  ;;  %v12197_v0 = vld [vmem:[#allocation307_spill] sm:$0xff]  ;;  %v12202_v18 = vld [vmem:[#allocation221_spill] sm:$0xff]  ;;  %v2600_v38 = vpop.xlane.xlu1 %2599  ;;  %2961 = vadd.xlane.f32.xlu1 %v9790_v29 }
 0x470   :  { %v2786_v14 = vsel %vm12193_vm10, %v9315_v12, 0.0  ;;  %v2787_v53 = vsel %vm12194_vm11, %v9315_v12, 0.0  ;;  %vm12195_vm2 = vcmp.eq.s32.totalorder %v7871_v45, %v11765_v25  ;;  %v10108_v26 = vsub.f32 %v3313_v60, %v2117_v17  ;;  %v12201_v25 = vld [vmem:[#allocation308_spill] sm:$0xff]  ;;  %v12203_v17 = vld [vmem:[#allocation222_spill] sm:$0xff] }
 0x471   :  { %v2788_v41 = vsel %vm12195_vm2, %v9315_v12, 0.0  ;;  %5127 = vlog2.f32 %v12197_v0  ;;  %vm12198_vm4 = vcmp.eq.s32.totalorder %v7871_v45, %v11769_v7  ;;  %vm12199_vm5 = vcmp.eq.s32.totalorder %v7871_v45, %v11771_v9  ;;  %v5120_v33 = vpop.eup %5119 }
 0x472   :  { %12196 = vst [vmem:[#allocation188_spill] sm:$0xff] %v10108_v26  ;;  %v2789_v11 = vsel %vm12198_vm4, %v9315_v12, 0.0  ;;  %v2790_v43 = vsel %vm12199_vm5, %v9315_v12, 0.0  ;;  %v10120_v61 = vsub.f32 %v3314_v10, %v2119_v44  ;;  %5129 = vlog2.f32 %v12201_v25  ;;  %v5122_v44 = vpop.eup %5121  ;;  %v12206_v25 = vld [vmem:[#allocation309_spill] sm:$0xff]  ;;  %2964 = vadd.xlane.f32.xlu0 %v9794_v49  ;;  %v12238_v49 = vld [vmem:[#allocation95_spill] sm:$0xff] }
 0x473   :  { %v3315_v2 = vsub.f32 %v2597_v32, %v12202_v18  ;;  %v10125_v35 = vsel %vm785_vm0, %v2786_v14, 0.0  ;;  %v2121_v60 = vmul.f32 0.6931472, %v5116_v54  ;;  %v3316_v7 = vsub.f32 %v2600_v38, %v12203_v17 }
 0x474   :  { %12200 = vst [vmem:[#allocation13_spill] sm:$0xff] %v10120_v61  ;;  %v10129_v0 = vsel %vm785_vm0, %v2787_v53, 0.0  ;;  %v10132_v9 = vsel %vm785_vm0, %v2788_v41, 0.0  ;;  %v2123_v10 = vmul.f32 0.6931472, %v5118_v58  ;;  %v10136_v32 = vsel %vm785_vm0, %v2789_v11, 0.0  ;;  %v2603_v58 = vpop.xlane.xlu0 %2602 }
 0x475   :  { %v10139_v14 = vsel %vm785_vm0, %v2790_v43, 0.0  ;;  %vm12204_vm6 = vcmp.eq.s32.totalorder %v7871_v45, %v11774_v62  ;;  %v10145_v53 = vsub.f32 %v3315_v2, %v2121_v60  ;;  %5131 = vlog2.f32 %v12206_v25  ;;  %v12210_v62 = vld [vmem:[#allocation310_spill] sm:$0xff]  ;;  %v12211_v43 = vld [vmem:[#allocation223_spill] sm:$0xff]  ;;  %v2606_v2 = vpop.xlane.xlu1 %2605  ;;  %v12213_v60 = vld [vmem:[#allocation224_spill] sm:$0xff] }
 0x476   :  { %v2791_v54 = vsel %vm12204_vm6, %v9315_v12, 0.0  ;;  %vm12207_vm7 = vcmp.eq.s32.totalorder %v7871_v45, %v11776_v63  ;;  %vm12208_vm8 = vcmp.eq.s32.totalorder %v7871_v45, %v11780_v19  ;;  %v10157_v11 = vsub.f32 %v3316_v7, %v2123_v10  ;;  %v5124_v63 = vpop.eup %5123  ;;  %v10172_v19 = vld [vmem:[%s10860_s2] ss:$0 sm:$0xff]  ;;  %2970 = vadd.xlane.f32.xlu0 %v9825_v46  ;;  %v12278_v61 = vld [vmem:[#allocation234_spill] sm:$0xff] }
 0x477   :  { %12205 = vst [vmem:[#allocation16_spill] sm:$0xff] %v10145_v53  ;;  %v2792_v4 = vsel %vm12207_vm7, %v9315_v12, 0.0  ;;  %v2793_v41 = vsel %vm12208_vm8, %v9315_v12, 0.0  ;;  %5133 = vlog2.f32 %v12210_v62  ;;  %v3317_v18 = vsub.f32 %v2603_v58, %v12211_v43  ;;  %v12217_v62 = vld [vmem:[#allocation311_spill] sm:$0xff] }
 0x478   :  { %12209 = vst [vmem:[#allocation275_spill] sm:$0xff] %v10157_v11  ;;  %vm12212_vm9 = vcmp.eq.s32.totalorder %v7871_v45, %v11782_v1  ;;  %v2125_v38 = vmul.f32 0.6931472, %v5120_v33  ;;  %v3318_v17 = vsub.f32 %v2606_v2, %v12213_v60  ;;  %v10167_v25 = vsel %vm785_vm0, %v2791_v54, 0.0  ;;  %v5126_v1 = vpop.eup %5125  ;;  %v12222_v60 = vld [vmem:[#allocation226_spill] sm:$0xff] }
 0x479   :  { %v2794_v5 = vsel %vm12212_vm9, %v9315_v12, 0.0  ;;  %vm12214_vm13 = vcmp.eq.s32.totalorder %v7871_v45, %v11786_v15  ;;  %v2127_v10 = vmul.f32 0.6931472, %v5122_v44  ;;  %v10180_v12 = vsel %vm785_vm0, %v2792_v4, 0.0  ;;  %v2609_v15 = vpop.xlane.xlu0 %2608 }
 0x47a   :  { %v2795_v7 = vsel %vm12214_vm13, %v10172_v19, 0.0  ;;  %v10183_v33 = vsel %vm785_vm0, %v2793_v41, 0.0  ;;  %vm12215_vm10 = vcmp.eq.s32.totalorder %v7871_v45, %v11788_v13  ;;  %v10189_v58 = vsub.f32 %v3317_v18, %v2125_v38  ;;  %v12220_v41 = vld [vmem:[#allocation312_spill] sm:$0xff]  ;;  %v12221_v13 = vld [vmem:[#allocation225_spill] sm:$0xff]  ;;  %v2612_v18 = vpop.xlane.xlu1 %2611  ;;  %2976 = vadd.xlane.f32.xlu0 %v9836_v21 }
 0x47b   :  { %v2796_v54 = vsel %vm12215_vm10, %v10172_v19, 0.0  ;;  %5135 = vlog2.f32 %v12217_v62  ;;  %v10194_v50 = vsel %vm785_vm0, %v2794_v5, 0.0  ;;  %vm12218_vm11 = vcmp.eq.s32.totalorder %v7871_v45, %v11792_v40  ;;  %v5128_v38 = vpop.eup %5127 }
 0x47c   :  { %12216 = vst [vmem:[#allocation15_spill] sm:$0xff] %v10189_v58  ;;  %v2797_v44 = vsel %vm12218_vm11, %v10172_v19, 0.0  ;;  %v10200_v4 = vsub.f32 %v3318_v17, %v2127_v10  ;;  %5137 = vlog2.f32 %v12220_v41  ;;  %v3319_v43 = vsub.f32 %v2609_v15, %v12221_v13  ;;  %v5130_v10 = vpop.eup %5129  ;;  %v12232_v41 = vld [vmem:[#allocation227_spill] sm:$0xff] }
 0x47d   :  { %v10205_v2 = vsel %vm785_vm0, %v2795_v7, 0.0  ;;  %v2129_v27 = vmul.f32 0.6931472, %v5124_v63  ;;  %v3320_v5 = vsub.f32 %v2612_v18, %v12222_v60  ;;  %v10209_v62 = vsel %vm785_vm0, %v2796_v54, 0.0  ;;  %v2615_v55 = vpop.xlane.xlu0 %2614  ;;  %v12233_v60 = vld [vmem:[#allocation228_spill] sm:$0xff] }
 0x47e   :  { %12219 = vst [vmem:[#allocation276_spill] sm:$0xff] %v10200_v4  ;;  %vm12223_vm2 = vcmp.eq.s32.totalorder %v7871_v45, %v11794_v59  ;;  %v2131_v17 = vmul.f32 0.6931472, %v5126_v1  ;;  %v10217_v15 = vsel %vm785_vm0, %v2797_v44, 0.0  ;;  %vm12224_vm4 = vcmp.eq.s32.totalorder %v7871_v45, %v11798_v34  ;;  %v12227_v59 = vld [vmem:[#allocation313_spill] sm:$0xff] }
 0x47f   :  { %v2798_v40 = vsel %vm12223_vm2, %v10172_v19, 0.0  ;;  %v2799_v63 = vsel %vm12224_vm4, %v10172_v19, 0.0  ;;  %vm12225_vm5 = vcmp.eq.s32.totalorder %v7871_v45, %v11800_v36  ;;  %v10227_v54 = vsub.f32 %v3319_v43, %v2129_v27  ;;  %v12231_v36 = vld [vmem:[#allocation314_spill] sm:$0xff]  ;;  %v2618_v43 = vpop.xlane.xlu1 %2617  ;;  %v5132_v27 = vpop.eup %5131 }
 0x480   :  { %v2800_v7 = vsel %vm12225_vm5, %v10172_v19, 0.0  ;;  %5139 = vlog2.f32 %v12227_v59  ;;  %vm12228_vm6 = vcmp.eq.s32.totalorder %v7871_v45, %v11804_v47  ;;  %vm12229_vm7 = vcmp.eq.s32.totalorder %v7871_v45, %v11806_v6 }
 0x481   :  { %12226 = vst [vmem:[#allocation189_spill] sm:$0xff] %v10227_v54  ;;  %v2801_v1 = vsel %vm12228_vm6, %v10172_v19, 0.0  ;;  %v2802_v34 = vsel %vm12229_vm7, %v10172_v19, 0.0  ;;  %v10239_v44 = vsub.f32 %v3320_v5, %v2131_v17  ;;  %5141 = vlog2.f32 %v12231_v36  ;;  %v5134_v17 = vpop.eup %5133  ;;  %v12236_v36 = vld [vmem:[#allocation315_spill] sm:$0xff] }
 0x482   :  { %v3321_v13 = vsub.f32 %v2615_v55, %v12232_v41  ;;  %v10244_v29 = vsel %vm785_vm0, %v2798_v40, 0.0  ;;  %v2133_v18 = vmul.f32 0.6931472, %v5128_v38  ;;  %v3322_v47 = vsub.f32 %v2618_v43, %v12233_v60 }
 0x483   :  { %12230 = vst [vmem:[#allocation190_spill] sm:$0xff] %v10239_v44  ;;  %v10248_v59 = vsel %vm785_vm0, %v2799_v63, 0.0  ;;  %v10251_v6 = vsel %vm785_vm0, %v2800_v7, 0.0  ;;  %v2135_v5 = vmul.f32 0.6931472, %v5130_v10  ;;  %v10255_v55 = vsel %vm785_vm0, %v2801_v1, 0.0  ;;  %v2621_v10 = vpop.xlane.xlu0 %2620  ;;  %v2624_v60 = vpop.xlane.xlu1 %2623 }
 0x484   :  { %v10258_v40 = vsel %vm785_vm0, %v2802_v34, 0.0  ;;  %vm12234_vm8 = vcmp.eq.s32.totalorder %v7871_v45, %v11810_v51  ;;  %v10264_v63 = vsub.f32 %v3321_v13, %v2133_v18  ;;  %5143 = vlog2.f32 %v12236_v36  ;;  %v12237_v7 = vld [vmem:[#allocation4_spill] sm:$0xff]  ;;  %v12244_v13 = vld [vmem:[#allocation229_spill] sm:$0xff]  ;;  %v12247_v44 = vld [vmem:[#allocation230_spill] sm:$0xff] }
 0x485   :  { %v2803_v38 = vsel %vm12234_vm8, %v10172_v19, 0.0  ;;  %2967 = vadd.xlane.f32.xlu1 %v12237_v7  ;;  %vm12239_vm9 = vcmp.eq.s32.totalorder %v7871_v45, %v12238_v49  ;;  %v12240_v34 = vld [vmem:[#allocation96_spill] sm:$0xff]  ;;  %v10276_v43 = vsub.f32 %v3322_v47, %v2135_v5  ;;  %v3323_v18 = vsub.f32 %v2621_v10, %v12244_v13  ;;  %v12245_v36 = vld [vmem:[#allocation97_spill] sm:$0xff]  ;;  %v5136_v49 = vpop.eup %5135  ;;  %v12248_v47 = vld [vmem:[#allocation98_spill] sm:$0xff] }
 0x486   :  { %12235 = vst [vmem:[#allocation18_spill] sm:$0xff] %v10264_v63  ;;  %v2804_v1 = vsel %vm12239_vm9, %v10172_v19, 0.0  ;;  %vm12241_vm13 = vcmp.eq.s32.totalorder %v7871_v45, %v12240_v34  ;;  %v12243_v51 = vld [vmem:[#allocation316_spill] sm:$0xff]  ;;  %vm12246_vm10 = vcmp.eq.s32.totalorder %v7871_v45, %v12245_v36  ;;  %v2137_v63 = vmul.f32 0.6931472, %v5132_v27  ;;  %v5138_v10 = vpop.eup %5137 }
 0x487   :  { %v2805_v41 = vsel %vm12241_vm13, %v10172_v19, 0.0  ;;  %12242 = vst [vmem:[#allocation17_spill] sm:$0xff] %v10276_v43  ;;  %5145 = vlog2.f32 %v12243_v51  ;;  %v2806_v7 = vsel %vm12246_vm10, %v10172_v19, 0.0  ;;  %v3324_v54 = vsub.f32 %v2624_v60, %v12247_v44  ;;  %v12250_v44 = vld [vmem:[#allocation99_spill] sm:$0xff]  ;;  %v12253_v60 = vld [vmem:[#allocation317_spill] sm:$0xff]  ;;  %v12259_v43 = vld [vmem:[#allocation232_spill] sm:$0xff] }
 0x488   :  { %v10286_v4 = vsel %vm785_vm0, %v2803_v38, 0.0  ;;  %vm12249_vm11 = vcmp.eq.s32.totalorder %v7871_v45, %v12248_v47  ;;  %v2139_v34 = vmul.f32 0.6931472, %v5134_v17  ;;  %v10294_v51 = vsel %vm785_vm0, %v2804_v1, 0.0  ;;  %v2627_v17 = vpop.xlane.xlu0 %2626  ;;  %v12254_v1 = vld [vmem:[#allocation100_spill] sm:$0xff]  ;;  %v12257_v47 = vld [vmem:[#allocation318_spill] sm:$0xff] }
 0x489   :  { %v2807_v5 = vsel %vm12249_vm11, %v10172_v19, 0.0  ;;  %v10297_v27 = vsel %vm785_vm0, %v2805_v41, 0.0  ;;  %vm12251_vm2 = vcmp.eq.s32.totalorder %v7871_v45, %v12250_v44  ;;  %v10303_v13 = vsub.f32 %v3323_v18, %v2137_v63  ;;  %2973 = vadd.xlane.f32.xlu1 %v9833_v28  ;;  %v12258_v44 = vld [vmem:[#allocation231_spill] sm:$0xff]  ;;  %v2630_v18 = vpop.xlane.xlu1 %2629 }
 0x48a   :  { %v2808_v38 = vsel %vm12251_vm2, %v10172_v19, 0.0  ;;  %5147 = vlog2.f32 %v12253_v60  ;;  %v10308_v46 = vsel %vm785_vm0, %v2806_v7, 0.0  ;;  %vm12255_vm4 = vcmp.eq.s32.totalorder %v7871_v45, %v12254_v1  ;;  %v12260_v1 = vld [vmem:[#allocation101_spill] sm:$0xff] }
 0x48b   :  { %12252 = vst [vmem:[#allocation20_spill] sm:$0xff] %v10303_v13  ;;  %v2809_v41 = vsel %vm12255_vm4, %v10172_v19, 0.0  ;;  %v10314_v36 = vsub.f32 %v3324_v54, %v2139_v34  ;;  %5149 = vlog2.f32 %v12257_v47  ;;  %v3325_v63 = vsub.f32 %v2627_v17, %v12258_v44  ;;  %v5140_v13 = vpop.eup %5139 }
 0x48c   :  { %v10319_v60 = vsel %vm785_vm0, %v2807_v5, 0.0  ;;  %v2141_v28 = vmul.f32 0.6931472, %v5136_v49  ;;  %v3326_v7 = vsub.f32 %v2630_v18, %v12259_v43  ;;  %v10323_v58 = vsel %vm785_vm0, %v2808_v38, 0.0  ;;  %v5142_v47 = vpop.eup %5141  ;;  %v12263_v49 = vld [vmem:[#allocation102_spill] sm:$0xff]  ;;  %v12265_v5 = vld [vmem:[#allocation103_spill] sm:$0xff]  ;;  %v2633_v21 = vpop.xlane.xlu0 %2632 }
 0x48d   :  { %12256 = vst [vmem:[#allocation277_spill] sm:$0xff] %v10314_v36  ;;  %vm12261_vm5 = vcmp.eq.s32.totalorder %v7871_v45, %v12260_v1  ;;  %v2143_v34 = vmul.f32 0.6931472, %v5138_v10  ;;  %v10331_v17 = vsel %vm785_vm0, %v2809_v41, 0.0  ;;  %vm12264_vm6 = vcmp.eq.s32.totalorder %v7871_v45, %v12263_v49  ;;  %v12268_v18 = vld [vmem:[#allocation319_spill] sm:$0xff]  ;;  %v12269_v10 = vld [vmem:[#allocation180_spill] sm:$0xff] }
 0x48e   :  { %v2810_v54 = vsel %vm12261_vm5, %v10172_v19, 0.0  ;;  %12262 = vst [vmem:[#allocation19_spill] sm:$0xff] %v10331_v17  ;;  %v2811_v43 = vsel %vm12264_vm6, %v10172_v19, 0.0  ;;  %vm12266_vm7 = vcmp.eq.s32.totalorder %v7871_v45, %v12265_v5  ;;  %v10341_v44 = vsub.f32 %v3325_v63, %v2141_v28  ;;  %2979 = vadd.xlane.f32.xlu1 %v12269_v10  ;;  %v12270_v41 = vld [vmem:[#allocation104_spill] sm:$0xff]  ;;  %v12272_v49 = vld [vmem:[#allocation105_spill] sm:$0xff]  ;;  %v5144_v53 = vpop.eup %5143 }
 0x48f   :  { %v2812_v38 = vsel %vm12266_vm7, %v10172_v19, 0.0  ;;  %5151 = vlog2.f32 %v12268_v18  ;;  %vm12271_vm8 = vcmp.eq.s32.totalorder %v7871_v45, %v12270_v41  ;;  %vm12273_vm9 = vcmp.eq.s32.totalorder %v7871_v45, %v12272_v49  ;;  %v12275_v5 = vld [vmem:[#allocation320_spill] sm:$0xff]  ;;  %v12276_v63 = vld [vmem:[#allocation233_spill] sm:$0xff]  ;;  %v2636_v18 = vpop.xlane.xlu1 %2635 }
 0x490   :  { %12267 = vst [vmem:[#allocation22_spill] sm:$0xff] %v10341_v44  ;;  %v2813_v1 = vsel %vm12271_vm8, %v10172_v19, 0.0  ;;  %v2814_v36 = vsel %vm12273_vm9, %v10172_v19, 0.0  ;;  %v10353_v11 = vsub.f32 %v3326_v7, %v2143_v34  ;;  %5153 = vlog2.f32 %v12275_v5  ;;  %v12287_v5 = vld [vmem:[#allocation321_spill] sm:$0xff] }
 0x491   :  { %v3327_v28 = vsub.f32 %v2633_v21, %v12276_v63  ;;  %v10358_v10 = vsel %vm785_vm0, %v2810_v54, 0.0  ;;  %v2145_v44 = vmul.f32 0.6931472, %v5140_v13  ;;  %v3328_v41 = vsub.f32 %v2636_v18, %v12278_v61  ;;  %v5146_v34 = vpop.eup %5145  ;;  %v12284_v13 = vld [vmem:[#allocation106_spill] sm:$0xff] }
 0x492   :  { %12274 = vst [vmem:[#allocation278_spill] sm:$0xff] %v10353_v11  ;;  %12277 = vst [vmem:[#allocation191_spill] sm:$0xff] %v10358_v10  ;;  %v10362_v26 = vsel %vm785_vm0, %v2811_v43, 0.0  ;;  %v10365_v49 = vsel %vm785_vm0, %v2812_v38, 0.0  ;;  %v2147_v7 = vmul.f32 0.6931472, %v5142_v47  ;;  %vm12285_vm13 = vcmp.eq.s32.totalorder %v7871_v45, %v12284_v13  ;;  %v2639_v47 = vpop.xlane.xlu0 %2638 }
 0x493   :  { %12279 = vst [vmem:[#allocation192_spill] sm:$0xff] %v10362_v26  ;;  %12280 = vst [vmem:[#allocation21_spill] sm:$0xff] %v10365_v49  ;;  %v12281_v11 = vld [vmem:[#allocation267_spill] sm:$0xff]  ;;  %v10369_v21 = vsel %vm785_vm0, %v2813_v1, 0.0  ;;  %v10372_v54 = vsel %vm785_vm0, %v2814_v36, 0.0  ;;  %v2815_v61 = vsel %vm12285_vm13, %v10172_v19, 0.0  ;;  %v10378_v43 = vsub.f32 %v3327_v28, %v2145_v44 }
 0x494   :  { %2982 = vadd.xlane.f32.xlu0 %v12281_v11  ;;  %12282 = vst [vmem:[#allocation279_spill] sm:$0xff] %v10369_v21  ;;  %12283 = vst [vmem:[#allocation24_spill] sm:$0xff] %v10372_v54  ;;  %5155 = vlog2.f32 %v12287_v5  ;;  %v12288_v38 = vld [vmem:[#allocation268_spill] sm:$0xff]  ;;  %v12289_v11 = vld [vmem:[#allocation107_spill] sm:$0xff]  ;;  %v10390_v18 = vsub.f32 %v3328_v41, %v2147_v7  ;;  %v2642_v5 = vpop.xlane.xlu1 %2641  ;;  %v2149_v37 = vmul.f32 0.6931472, %v5144_v53 }
 0x495   :  { %12286 = vst [vmem:[#allocation23_spill] sm:$0xff] %v10378_v43  ;;  %2985 = vadd.xlane.f32.xlu1 %v12288_v38  ;;  %vm12290_vm10 = vcmp.eq.s32.totalorder %v7871_v45, %v12289_v11  ;;  %v12291_v36 = vld [vmem:[#allocation108_spill] sm:$0xff]  ;;  %v12294_v13 = vld [vmem:[#allocation322_spill] sm:$0xff]  ;;  %v12295_v44 = vld [vmem:[#allocation235_spill] sm:$0xff]  ;;  %v5148_v11 = vpop.eup %5147  ;;  %v10400_v49 = vsel %vm785_vm0, %v2815_v61, 0.0 }
 0x496   :  { %v2816_v1 = vsel %vm12290_vm10, %v10172_v19, 0.0  ;;  %vm12292_vm11 = vcmp.eq.s32.totalorder %v7871_v45, %v12291_v36  ;;  %12293 = vst [vmem:[#allocation280_spill] sm:$0xff] %v10390_v18  ;;  %5157 = vlog2.f32 %v12294_v13  ;;  %v3329_v28 = vsub.f32 %v2639_v47, %v12295_v44  ;;  %v12296_v38 = vld [vmem:[#allocation109_spill] sm:$0xff]  ;;  %v12298_v54 = vld [vmem:[#allocation236_spill] sm:$0xff]  ;;  %12299 = vst [vmem:[#allocation193_spill] sm:$0xff] %v10400_v49  ;;  %v5150_v47 = vpop.eup %5149 }
 0x497   :  { %v2817_v63 = vsel %vm12292_vm11, %v10172_v19, 0.0  ;;  %vm12297_vm2 = vcmp.eq.s32.totalorder %v7871_v45, %v12296_v38  ;;  %v3330_v21 = vsub.f32 %v2642_v5, %v12298_v54  ;;  %v12300_v41 = vld [vmem:[#allocation110_spill] sm:$0xff]  ;;  %v2151_v36 = vmul.f32 0.6931472, %v5146_v34  ;;  %v12302_v13 = vld [vmem:[#allocation181_spill] sm:$0xff]  ;;  %v12305_v54 = vld [vmem:[#allocation111_spill] sm:$0xff]  ;;  %v2645_v34 = vpop.xlane.xlu0 %2644 }
 0x498   :  { %v2818_v43 = vsel %vm12297_vm2, %v10172_v19, 0.0  ;;  %vm12301_vm4 = vcmp.eq.s32.totalorder %v7871_v45, %v12300_v41  ;;  %2988 = vadd.xlane.f32.xlu0 %v12302_v13  ;;  %v10408_v44 = vsel %vm785_vm0, %v2816_v1, 0.0  ;;  %v10411_v53 = vsel %vm785_vm0, %v2817_v63, 0.0  ;;  %v12308_v38 = vld [vmem:[#allocation323_spill] sm:$0xff]  ;;  %v12310_v1 = vld [vmem:[#allocation112_spill] sm:$0xff] }
 0x499   :  { %v2819_v7 = vsel %vm12301_vm4, %v10172_v19, 0.0  ;;  %12303 = vst [vmem:[#allocation26_spill] sm:$0xff] %v10408_v44  ;;  %12304 = vst [vmem:[#allocation194_spill] sm:$0xff] %v10411_v53  ;;  %vm12306_vm5 = vcmp.eq.s32.totalorder %v7871_v45, %v12305_v54  ;;  %v10417_v5 = vsub.f32 %v3329_v28, %v2149_v37  ;;  %5159 = vlog2.f32 %v12308_v38  ;;  %2991 = vadd.xlane.f32.xlu1 %v9897_v23  ;;  %v12313_v18 = vld [vmem:[#allocation324_spill] sm:$0xff]  ;;  %v12314_v54 = vld [vmem:[#allocation237_spill] sm:$0xff]  ;;  %v2648_v28 = vpop.xlane.xlu1 %2647 }
 0x49a   :  { %v2820_v61 = vsel %vm12306_vm5, %v10172_v19, 0.0  ;;  %v10422_v41 = vsel %vm785_vm0, %v2818_v43, 0.0  ;;  %vm12311_vm6 = vcmp.eq.s32.totalorder %v7871_v45, %v12310_v1  ;;  %v10428_v13 = vsub.f32 %v3330_v21, %v2151_v36  ;;  %v12316_v53 = vld [vmem:[#allocation238_spill] sm:$0xff]  ;;  %v12318_v1 = vld [vmem:[#allocation113_spill] sm:$0xff]  ;;  %v12354_v26 = vld [vmem:[#allocation331_spill] sm:$0xff] }
 0x49b   :  { %12307 = vst [vmem:[#allocation25_spill] sm:$0xff] %v10417_v5  ;;  %12309 = vst [vmem:[#allocation28_spill] sm:$0xff] %v10422_v41  ;;  %v2821_v63 = vsel %vm12311_vm6, %v10172_v19, 0.0  ;;  %5161 = vlog2.f32 %v12313_v18  ;;  %v3331_v37 = vsub.f32 %v2645_v34, %v12314_v54  ;;  %v10433_v38 = vsel %vm785_vm0, %v2819_v7, 0.0  ;;  %v5152_v5 = vpop.eup %5151 }
 0x49c   :  { %12312 = vst [vmem:[#allocation281_spill] sm:$0xff] %v10428_v13  ;;  %12315 = vst [vmem:[#allocation27_spill] sm:$0xff] %v10433_v38  ;;  %v2153_v23 = vmul.f32 0.6931472, %v5148_v11  ;;  %v3332_v43 = vsub.f32 %v2648_v28, %v12316_v53  ;;  %v10437_v41 = vsel %vm785_vm0, %v2820_v61, 0.0  ;;  %vm12319_vm7 = vcmp.eq.s32.totalorder %v7871_v45, %v12318_v1  ;;  %v5154_v18 = vpop.eup %5153  ;;  %2994 = vadd.xlane.f32.xlu0 %v9901_v30  ;;  %v12321_v11 = vld [vmem:[#allocation114_spill] sm:$0xff]  ;;  %v2651_v30 = vpop.xlane.xlu0 %2650 }
 0x49d   :  { %12317 = vst [vmem:[#allocation282_spill] sm:$0xff] %v10437_v41  ;;  %v2822_v21 = vsel %vm12319_vm7, %v10172_v19, 0.0  ;;  %v2155_v36 = vmul.f32 0.6931472, %v5150_v47  ;;  %v10445_v34 = vsel %vm785_vm0, %v2821_v63, 0.0  ;;  %vm12322_vm8 = vcmp.eq.s32.totalorder %v7871_v45, %v12321_v11  ;;  %v12323_v53 = vld [vmem:[#allocation115_spill] sm:$0xff]  ;;  %2997 = vadd.xlane.f32.xlu1 %v9904_v24 }
 0x49e   :  { %12320 = vst [vmem:[#allocation195_spill] sm:$0xff] %v10445_v34  ;;  %v2823_v7 = vsel %vm12322_vm8, %v10172_v19, 0.0  ;;  %vm12324_vm9 = vcmp.eq.s32.totalorder %v7871_v45, %v12323_v53  ;;  %v10455_v54 = vsub.f32 %v3331_v37, %v2153_v23  ;;  %v12326_v28 = vld [vmem:[#allocation325_spill] sm:$0xff]  ;;  %v12327_v47 = vld [vmem:[#allocation78_spill] sm:$0xff]  ;;  %v12328_v1 = vld [vmem:[#allocation116_spill] sm:$0xff]  ;;  %v2654_v37 = vpop.xlane.xlu1 %2653  ;;  %v10469_v23 = vsel %vm785_vm0, %v2822_v21, 0.0  ;;  %v5156_v24 = vpop.eup %5155 }
 0x49f   :  { %v2824_v61 = vsel %vm12324_vm9, %v10172_v19, 0.0  ;;  %5163 = vlog2.f32 %v12326_v28  ;;  %v3480_v63 = vmul.f32 1.442695, %v12327_v47  ;;  %vm12329_vm13 = vcmp.eq.s32.totalorder %v7871_v45, %v12328_v1  ;;  %v12331_v34 = vld [vmem:[#allocation326_spill] sm:$0xff]  ;;  %v12332_v53 = vld [vmem:[#allocation239_spill] sm:$0xff]  ;;  %12333 = vst [vmem:[#allocation29_spill] sm:$0xff] %v10469_v23 }
 0x4a0   :  { %12325 = vst [vmem:[#allocation196_spill] sm:$0xff] %v10455_v54  ;;  %v2825_v11 = vsel %vm12329_vm13, %v10172_v19, 0.0  ;;  %v10464_v13 = vsub.f32 %v3332_v43, %v2155_v36  ;;  %5165 = vlog2.f32 %v12331_v34  ;;  %v3333_v41 = vsub.f32 %v2651_v30, %v12332_v53  ;;  %v12334_v54 = vld [vmem:[#allocation327_spill] sm:$0xff]  ;;  %v12335_v38 = vld [vmem:[#allocation240_spill] sm:$0xff]  ;;  %v5158_v43 = vpop.eup %5157  ;;  %v12338_v34 = vld [vmem:[#allocation269_spill] sm:$0xff] }
 0x4a1   :  { %v2157_v28 = vmul.f32 0.6931472, %v5152_v5  ;;  %5167 = vlog2.f32 %v12334_v54  ;;  %v3334_v44 = vsub.f32 %v2654_v37, %v12335_v38  ;;  %v10474_v49 = vsel %vm785_vm0, %v2823_v7, 0.0  ;;  %v12337_v36 = vld [vmem:[#allocation328_spill] sm:$0xff]  ;;  %3000 = vadd.xlane.f32.xlu0 %v12338_v34  ;;  %v12342_v54 = vld [vmem:[#allocation270_spill] sm:$0xff]  ;;  %v2657_v38 = vpop.xlane.xlu0 %2656 }
 0x4a2   :  { %12330 = vst [vmem:[#allocation30_spill] sm:$0xff] %v10464_v13  ;;  %12336 = vst [vmem:[#allocation32_spill] sm:$0xff] %v10474_v49  ;;  %v2159_v1 = vmul.f32 0.6931472, %v5154_v18  ;;  %5169 = vlog2.f32 %v12337_v36  ;;  %v10479_v30 = vsel %vm785_vm0, %v2824_v61, 0.0  ;;  %v10482_v21 = vsel %vm785_vm0, %v2825_v11, 0.0  ;;  %3003 = vadd.xlane.f32.xlu1 %v12342_v54  ;;  %v2660_v36 = vpop.xlane.xlu1 %2659 }
 0x4a3   :  { %12339 = vst [vmem:[#allocation283_spill] sm:$0xff] %v10479_v30  ;;  %12340 = vst [vmem:[#allocation31_spill] sm:$0xff] %v10482_v21  ;;  %v10484_v5 = vsub.f32 %v3333_v41, %v2157_v28  ;;  %5171 = vpow2.f32 %v3480_v63  ;;  %v12343_v18 = vld [vmem:[#allocation117_spill] sm:$0xff]  ;;  %v12345_v53 = vld [vmem:[#allocation118_spill] sm:$0xff]  ;;  %v2161_v63 = vmul.f32 0.6931472, %v5156_v24 }
 0x4a4   :  { %vm12344_vm10 = vcmp.eq.s32.totalorder %v7871_v45, %v12343_v18  ;;  %vm12346_vm11 = vcmp.eq.s32.totalorder %v7871_v45, %v12345_v53  ;;  %v10495_v37 = vsub.f32 %v3334_v44, %v2159_v1  ;;  %v12348_v11 = vld [vmem:[#allocation329_spill] sm:$0xff]  ;;  %v12350_v34 = vld [vmem:[#allocation130_spill] sm:$0xff]  ;;  %v2163_v23 = vmul.f32 0.6931472, %v5158_v43  ;;  %v12356_v1 = vld [vmem:[#allocation119_spill] sm:$0xff] }
 0x4a5   :  { %12341 = vst [vmem:[#allocation34_spill] sm:$0xff] %v10484_v5  ;;  %v2826_v7 = vsel %vm12344_vm10, %v10172_v19, 0.0  ;;  %v2827_v61 = vsel %vm12346_vm11, %v10172_v19, 0.0  ;;  %5173 = vlog2.f32 %v12348_v11  ;;  %v12349_v41 = vld [vmem:[#allocation241_spill] sm:$0xff]  ;;  %v3482_v54 = vmul.f32 1.442695, %v12350_v34  ;;  %v5160_v5 = vpop.eup %5159  ;;  %3006 = vadd.xlane.f32.xlu0 %v9939_v8  ;;  %v2663_v43 = vpop.xlane.xlu0 %2662 }
 0x4a6   :  { %12347 = vst [vmem:[#allocation284_spill] sm:$0xff] %v10495_v37  ;;  %v3335_v28 = vsub.f32 %v2657_v38, %v12349_v41  ;;  %v12351_v13 = vld [vmem:[#allocation330_spill] sm:$0xff]  ;;  %v12353_v30 = vld [vmem:[#allocation77_spill] sm:$0xff]  ;;  %v5162_v53 = vpop.eup %5161  ;;  %v10506_v44 = vsel %vm785_vm0, %v2826_v7, 0.0  ;;  %vm12357_vm2 = vcmp.eq.s32.totalorder %v7871_v45, %v12356_v1  ;;  %3009 = vadd.xlane.f32.xlu1 %v9947_v57  ;;  %v12361_v8 = vld [vmem:[#allocation120_spill] sm:$0xff] }
 0x4a7   :  { %5175 = vlog2.f32 %v12351_v13  ;;  %v12352_v18 = vld [vmem:[#allocation242_spill] sm:$0xff]  ;;  %v3484_v49 = vmul.f32 1.442695, %v12353_v30  ;;  %12355 = vst [vmem:[#allocation197_spill] sm:$0xff] %v10506_v44  ;;  %v2828_v24 = vsel %vm12357_vm2, %v10172_v19, 0.0  ;;  %v12359_v13 = vld [vmem:[#allocation332_spill] sm:$0xff]  ;;  %vm12362_vm4 = vcmp.eq.s32.totalorder %v7871_v45, %v12361_v8 }
 0x4a8   :  { %v3336_v21 = vsub.f32 %v2660_v36, %v12352_v18  ;;  %5177 = vlog2.f32 %v12354_v26  ;;  %v10512_v38 = vsub.f32 %v3335_v28, %v2161_v63  ;;  %v10517_v30 = vsel %vm785_vm0, %v2827_v61, 0.0  ;;  %v12364_v11 = vld [vmem:[#allocation243_spill] sm:$0xff]  ;;  %v2666_v36 = vpop.xlane.xlu1 %2665  ;;  %v12365_v28 = vld [vmem:[#allocation121_spill] sm:$0xff]  ;;  %v12367_v61 = vld [vmem:[#allocation244_spill] sm:$0xff] }
 0x4a9   :  { %5179 = vlog2.f32 %v12359_v13  ;;  %12360 = vst [vmem:[#allocation33_spill] sm:$0xff] %v10517_v30  ;;  %v2829_v26 = vsel %vm12362_vm4, %v10172_v19, 0.0  ;;  %v3337_v41 = vsub.f32 %v2663_v43, %v12364_v11  ;;  %vm12366_vm5 = vcmp.eq.s32.totalorder %v7871_v45, %v12365_v28  ;;  %v5164_v63 = vpop.eup %5163  ;;  %3012 = vadd.xlane.f32.xlu0 %v9950_v3  ;;  %v12371_v43 = vld [vmem:[#allocation122_spill] sm:$0xff]  ;;  %v12382_v37 = vld [vmem:[#allocation336_spill] sm:$0xff]  ;;  %v12394_v30 = vld [vmem:[#allocation247_spill] sm:$0xff] }
 0x4aa   :  { %12358 = vst [vmem:[#allocation198_spill] sm:$0xff] %v10512_v38  ;;  %v10523_v7 = vsub.f32 %v3336_v21, %v2163_v23  ;;  %5181 = vpow2.f32 %v3482_v54  ;;  %v2830_v57 = vsel %vm12366_vm5, %v10172_v19, 0.0  ;;  %v2165_v34 = vmul.f32 0.6931472, %v5160_v5  ;;  %v5166_v23 = vpop.eup %5165  ;;  %v12369_v21 = vld [vmem:[#allocation333_spill] sm:$0xff]  ;;  %v12374_v11 = vld [vmem:[#allocation334_spill] sm:$0xff] }
 0x4ab   :  { %v3338_v18 = vsub.f32 %v2666_v36, %v12367_v61  ;;  %5183 = vpow2.f32 %v3484_v49  ;;  %v10532_v1 = vsel %vm785_vm0, %v2828_v24, 0.0  ;;  %v2167_v13 = vmul.f32 0.6931472, %v5162_v53  ;;  %v5168_v49 = vpop.eup %5167  ;;  %v12375_v24 = vld [vmem:[#allocation8_spill] sm:$0xff]  ;;  %v2669_v53 = vpop.xlane.xlu0 %2668 }
 0x4ac   :  { %12363 = vst [vmem:[#allocation285_spill] sm:$0xff] %v10523_v7  ;;  %12368 = vst [vmem:[#allocation36_spill] sm:$0xff] %v10532_v1  ;;  %5185 = vlog2.f32 %v12369_v21  ;;  %v10537_v54 = vsel %vm785_vm0, %v2829_v26, 0.0  ;;  %vm12372_vm6 = vcmp.eq.s32.totalorder %v7871_v45, %v12371_v43  ;;  %v10543_v8 = vsub.f32 %v3337_v41, %v2165_v34  ;;  %3015 = vadd.xlane.f32.xlu1 %v12375_v24  ;;  %v12376_v36 = vld [vmem:[#allocation80_spill] sm:$0xff]  ;;  %v5170_v61 = vpop.eup %5169  ;;  %v12379_v21 = vld [vmem:[#allocation335_spill] sm:$0xff]  ;;  %v2672_v41 = vpop.xlane.xlu1 %2671 }
 0x4ad   :  { %12370 = vst [vmem:[#allocation35_spill] sm:$0xff] %v10537_v54  ;;  %v2831_v5 = vsel %vm12372_vm6, %v10172_v19, 0.0  ;;  %5187 = vlog2.f32 %v12374_v11  ;;  %v3486_v28 = vmul.f32 1.442695, %v12376_v36  ;;  %v10549_v3 = vsel %vm785_vm0, %v2830_v57, 0.0  ;;  %v12380_v43 = vld [vmem:[#allocation245_spill] sm:$0xff]  ;;  %v5172_v11 = vpop.eup %5171 }
 0x4ae   :  { %12373 = vst [vmem:[#allocation286_spill] sm:$0xff] %v10543_v8  ;;  %12377 = vst [vmem:[#allocation199_spill] sm:$0xff] %v10549_v3  ;;  %v10551_v26 = vsub.f32 %v3338_v18, %v2167_v13  ;;  %5189 = vlog2.f32 %v12379_v21  ;;  %v3339_v7 = vsub.f32 %v2669_v53, %v12380_v43  ;;  %v12381_v34 = vld [vmem:[#allocation133_spill] sm:$0xff]  ;;  %v2169_v38 = vmul.f32 0.6931472, %v5164_v63  ;;  %v12383_v24 = vld [vmem:[#allocation246_spill] sm:$0xff] }
 0x4af   :  { %v3488_v8 = vmul.f32 1.442695, %v12381_v34  ;;  %5191 = vlog2.f32 %v12382_v37  ;;  %v3340_v54 = vsub.f32 %v2672_v41, %v12383_v24  ;;  %v12384_v36 = vld [vmem:[#allocation132_spill] sm:$0xff]  ;;  %v2171_v57 = vmul.f32 0.6931472, %v5166_v23  ;;  %v5174_v3 = vpop.eup %5173  ;;  %v12385_v18 = vld [vmem:[#allocation337_spill] sm:$0xff]  ;;  %v2675_v41 = vpop.xlane.xlu0 %2674 }
 0x4b0   :  { %12378 = vst [vmem:[#allocation38_spill] sm:$0xff] %v10551_v26  ;;  %v3490_v1 = vmul.f32 1.442695, %v12384_v36  ;;  %5193 = vlog2.f32 %v12385_v18  ;;  %v12386_v13 = vld [vmem:[#allocation7_spill] sm:$0xff]  ;;  %v10566_v43 = vsub.f32 %v3339_v7, %v2169_v38  ;;  %v12391_v34 = vld [vmem:[#allocation10_spill] sm:$0xff]  ;;  %v2678_v44 = vpop.xlane.xlu1 %2677  ;;  %v3736_v10 = vsub.f32 1.0, %v5172_v11 }
 0x4b1   :  { %3018 = vadd.xlane.f32.xlu0 %v12386_v13  ;;  %v12387_v21 = vld [vmem:[#allocation79_spill] sm:$0xff]  ;;  %v5176_v37 = vpop.eup %5175  ;;  %3021 = vadd.xlane.f32.xlu1 %v12391_v34  ;;  %5195 = vpow2.f32 %v3486_v28  ;;  %v12392_v23 = vld [vmem:[#allocation82_spill] sm:$0xff]  ;;  %v10570_v36 = vsub.f32 %v3340_v54, %v2171_v57  ;;  %v2173_v18 = vmul.f32 0.6931472, %v5168_v49  ;;  %v12396_v7 = vld [vmem:[#allocation248_spill] sm:$0xff]  ;;  %v10576_v34 = vsel %vm785_vm0, %v2831_v5, 0.0 }
 0x4b2   :  { %v3492_v26 = vmul.f32 1.442695, %v12387_v21  ;;  %v12388_v53 = vld [vmem:[#allocation123_spill] sm:$0xff]  ;;  %12390 = vst [vmem:[#allocation200_spill] sm:$0xff] %v10566_v43  ;;  %v3494_v24 = vmul.f32 1.442695, %v12392_v23  ;;  %v5178_v13 = vpop.eup %5177  ;;  %v3341_v21 = vsub.f32 %v2675_v41, %v12394_v30  ;;  %5197 = vpow2.f32 %v3488_v8 }
 0x4b3   :  { %vm12389_vm7 = vcmp.eq.s32.totalorder %v7871_v45, %v12388_v53  ;;  %12393 = vst [vmem:[#allocation37_spill] sm:$0xff] %v10570_v36  ;;  %v12395_v53 = vld [vmem:[#allocation134_spill] sm:$0xff]  ;;  %v5180_v38 = vpop.eup %5179  ;;  %v3342_v43 = vsub.f32 %v2678_v44, %v12396_v7  ;;  %5199 = vpow2.f32 %v3490_v1  ;;  %v2175_v28 = vmul.f32 0.6931472, %v5170_v61  ;;  %v12397_v54 = vld [vmem:[#allocation272_spill] sm:$0xff]  ;;  %v2681_v1 = vpop.xlane.xlu0 %2680  ;;  %v12406_v30 = vld [vmem:[#allocation81_spill] sm:$0xff] }
 0x4b4   :  { %v2832_v63 = vsel %vm12389_vm7, %v10172_v19, 0.0  ;;  %v3496_v17 = vmul.f32 1.442695, %v12395_v53  ;;  %v5182_v23 = vpop.eup %5181  ;;  %5201 = vpow2.f32 %v3492_v26  ;;  %v2833_v8 = vsel %vm778_vm15, %v10172_v19, 0.0  ;;  %v12401_v61 = vld [vmem:[#allocation126_spill] sm:$0xff]  ;;  %v2684_v53 = vpop.xlane.xlu1 %2683 }
 0x4b5   :  { %3024 = vadd.xlane.f32.xlu0 %v12397_v54  ;;  %v10580_v49 = vsel %vm785_vm0, %v2832_v63, 0.0  ;;  %v10586_v11 = vsub.f32 %v3341_v21, %v2173_v18  ;;  %v5184_v44 = vpop.eup %5183  ;;  %3027 = vadd.xlane.f32.xlu1 %v10011_v52  ;;  %5203 = vpow2.f32 %v3494_v24  ;;  %v2834_v26 = vsel %vm779_vm14, %v10172_v19, 0.0  ;;  %v12404_v18 = vld [vmem:[#allocation249_spill] sm:$0xff]  ;;  %v12405_v23 = vld [vmem:[#allocation250_spill] sm:$0xff] }
 0x4b6   :  { %vm12402_vm8 = vcmp.eq.s32.totalorder %v7871_v45, %v12401_v61  ;;  %v10597_v63 = vsub.f32 %v3342_v43, %v2175_v28  ;;  %v5186_v41 = vpop.eup %5185  ;;  %v3343_v21 = vsub.f32 %v2681_v1, %v12404_v18  ;;  %v3864_v7 = vmax.f32 %v3736_v10, 0.0 }
 0x4b7   :  { %12399 = vst [vmem:[#allocation40_spill] sm:$0xff] %v10586_v11  ;;  %v2835_v57 = vsel %vm12402_vm8, %v10172_v19, 0.0  ;;  %5205 = vpow2.f32 %v3496_v17  ;;  %v2177_v52 = vmul.f32 0.6931472, %v5174_v3  ;;  %v5188_v24 = vpop.eup %5187  ;;  %v3344_v54 = vsub.f32 %v2684_v53, %v12405_v23  ;;  %v2687_v17 = vpop.xlane.xlu0 %2686 }
 0x4b8   :  { %12403 = vst [vmem:[#allocation287_spill] sm:$0xff] %v10597_v63  ;;  %v3498_v44 = vmul.f32 1.442695, %v12406_v30  ;;  %v2179_v5 = vmul.f32 0.6931472, %v5176_v37  ;;  %v5190_v11 = vpop.eup %5189  ;;  %v10604_v61 = vsel %vm785_vm0, %v2833_v8, 0.0  ;;  %v2690_v53 = vpop.xlane.xlu1 %2689 }
 0x4b9   :  { %3030 = vadd.xlane.f32.xlu0 %v10015_v31  ;;  %v10607_v43 = vsel %vm785_vm0, %v2834_v26, 0.0  ;;  %v10609_v28 = vsub.f32 %v3343_v21, %v2177_v52  ;;  %v5192_v10 = vpop.eup %5191  ;;  %3033 = vadd.xlane.f32.xlu1 %v10018_v42  ;;  %v10613_v3 = vsel %vm785_vm0, %v2835_v57, 0.0  ;;  %v12410_v37 = vld [vmem:[#allocation127_spill] sm:$0xff]  ;;  %v10625_v1 = vsel %vm782_vm3, %v10172_v19, 0.0  ;;  %v12415_v52 = vld [vmem:[#allocation84_spill] sm:$0xff] }
 0x4ba   :  { %12407 = vst [vmem:[#allocation39_spill] sm:$0xff] %v10607_v43  ;;  %12409 = vst [vmem:[#allocation201_spill] sm:$0xff] %v10613_v3  ;;  %vm12411_vm14 = vcmp.eq.s32.totalorder %v7871_v45, %v12410_v37  ;;  %v10627_v26 = vsub.f32 %v3344_v54, %v2179_v5  ;;  %v5194_v18 = vpop.eup %5193  ;;  %v12414_v42 = vld [vmem:[#allocation251_spill] sm:$0xff]  ;;  %v3992_v57 = vmul.f32 %v3864_v7, %v3864_v7  ;;  %v3500_v23 = vmul.f32 1.442695, %v12415_v52  ;;  %v12416_v37 = vld [vmem:[#allocation252_spill] sm:$0xff] }
 0x4bb   :  { %12408 = vst [vmem:[#allocation288_spill] sm:$0xff] %v10609_v28  ;;  %v10619_v31 = vsel %vm12411_vm14, %v10172_v19, 0.0  ;;  %v3345_v21 = vsub.f32 %v2687_v17, %v12414_v42  ;;  %v2181_v30 = vmul.f32 0.6931472, %v5178_v13  ;;  %v5196_v28 = vpop.eup %5195  ;;  %v3346_v63 = vsub.f32 %v2690_v53, %v12416_v37  ;;  %v12417_v43 = vld [vmem:[#allocation9_spill] sm:$0xff]  ;;  %v2693_v17 = vpop.xlane.xlu0 %2692  ;;  %v12422_v37 = vld [vmem:[#allocation136_spill] sm:$0xff] }
 0x4bc   :  { %12413 = vst [vmem:[#allocation202_spill] sm:$0xff] %v10627_v26  ;;  %5207 = vpow2.f32 %v3498_v44  ;;  %v2183_v36 = vmul.f32 0.6931472, %v5180_v38  ;;  %v5198_v3 = vpop.eup %5197  ;;  %v2185_v54 = vmul.f32 0.6931472, %v5186_v41  ;;  %v12418_v26 = vld [vmem:[#allocation273_spill] sm:$0xff]  ;;  %v2696_v38 = vpop.xlane.xlu1 %2695 }
 0x4bd   :  { %3036 = vadd.xlane.f32.xlu0 %v12417_v43  ;;  %v10633_v19 = vsub.f32 %v3345_v21, %v2181_v30  ;;  %v2187_v5 = vmul.f32 0.6931472, %v5188_v24  ;;  %v5200_v8 = vpop.eup %5199  ;;  %3039 = vadd.xlane.f32.xlu1 %v12418_v26  ;;  %v2189_v42 = vmul.f32 0.6931472, %v5190_v11  ;;  %v2191_v13 = vmul.f32 0.6931472, %v5192_v10 }
 0x4be   :  { %v10636_v7 = vsub.f32 %v3346_v63, %v2183_v36  ;;  %v2193_v28 = vmul.f32 0.6931472, %v5194_v18  ;;  %v5202_v52 = vpop.eup %5201  ;;  %v12419_v53 = vld [vmem:[#allocation253_spill] sm:$0xff]  ;;  %v4120_v3 = vmul.f32 -1.0, %v3992_v57  ;;  %5209 = vpow2.f32 %v3500_v23  ;;  %v12420_v43 = vld [vmem:[#allocation135_spill] sm:$0xff]  ;;  %v12421_v41 = vld [vmem:[#allocation254_spill] sm:$0xff] }
 0x4bf   :  { %v3347_v44 = vsub.f32 %v2693_v17, %v12419_v53  ;;  %v3502_v21 = vmul.f32 1.442695, %v12420_v43  ;;  %v5204_v30 = vpop.eup %5203  ;;  %v3348_v24 = vsub.f32 %v2696_v38, %v12421_v41  ;;  %v3504_v8 = vmul.f32 1.442695, %v12422_v37  ;;  %v12423_v36 = vld [vmem:[#allocation83_spill] sm:$0xff]  ;;  %v2699_v10 = vpop.xlane.xlu0 %2698  ;;  %v12424_v18 = vld [vmem:[#allocation85_spill] sm:$0xff] }
 0x4c0   :  { %v3506_v11 = vmul.f32 1.442695, %v12423_v36  ;;  %v3508_v57 = vmul.f32 1.442695, %v12424_v18  ;;  %v12425_v17 = vld [vmem:[#allocation255_spill] sm:$0xff]  ;;  %v2702_v53 = vpop.xlane.xlu1 %2701  ;;  %v12426_v38 = vld [vmem:[#allocation137_spill] sm:$0xff] }
 0x4c1   :  { %v5206_v26 = vpop.eup %5205  ;;  %3042 = vadd.xlane.f32.xlu0 %v10053_v16  ;;  %v10644_v63 = vsub.f32 %v3347_v44, %v2185_v54  ;;  %3045 = vadd.xlane.f32.xlu1 %v10061_v56  ;;  %v10648_v23 = vsub.f32 %v3348_v24, %v2187_v5  ;;  %v3349_v52 = vsub.f32 %v2699_v10, %v12425_v17  ;;  %5211 = vpow2.f32 %v3502_v21  ;;  %v12427_v30 = vld [vmem:[#allocation256_spill] sm:$0xff]  ;;  %v12428_v16 = vld [vmem:[#allocation138_spill] sm:$0xff]  ;;  %v12429_v44 = vld [vmem:[#allocation187_spill] sm:$0xff] }
 0x4c2   :  { %v3510_v43 = vmul.f32 1.442695, %v12426_v38  ;;  %v3350_v41 = vsub.f32 %v2702_v53, %v12427_v30  ;;  %5213 = vpow2.f32 %v3504_v8  ;;  %v3512_v37 = vmul.f32 1.442695, %v12428_v16  ;;  %v12430_v21 = vld [vmem:[#allocation257_spill] sm:$0xff]  ;;  %v12431_v10 = vld [vmem:[#allocation86_spill] sm:$0xff] }
 0x4c3   :  { %5215 = vpow2.f32 %v3506_v11  ;;  %v10655_v56 = vsub.f32 %v3349_v52, %v2189_v42  ;;  %v2705_v5 = vpop.xlane.xlu0 %2704  ;;  %v3514_v18 = vmul.f32 1.442695, %v12431_v10  ;;  %vm4504_vm15 = vcmask 7168   ;;  %v12432_v42 = vld [vmem:[#allocation87_spill] sm:$0xff]  ;;  %v12438_v10 = vld [vmem:[#allocation142_spill] sm:$0xff] }
 0x4c4   :  { %5217 = vpow2.f32 %v3508_v57  ;;  %v10658_v24 = vsub.f32 %v3350_v41, %v2191_v13  ;;  %v3351_v26 = vsub.f32 %v2705_v5, %v12430_v21  ;;  %v2842_v36 = vpop.xlane.xlu1 %2841  ;;  %v3516_v11 = vmul.f32 1.442695, %v12432_v42  ;;  %v12434_v41 = vld [vmem:[#allocation140_spill] sm:$0xff]  ;;  %v12436_v5 = vld [vmem:[#allocation89_spill] sm:$0xff] }
 0x4c5   :  { %3048 = vadd.xlane.f32.xlu0 %v10064_v48  ;;  %3051 = vadd.xlane.f32.xlu1 %v12429_v44  ;;  %5219 = vpow2.f32 %v3510_v43  ;;  %v4248_v8 = vmul.f32 %v12327_v47, %v2842_v36  ;;  %v10671_v47 = vsel %vm785_vm0, %v10619_v31, 0.0  ;;  %v12433_v43 = vld [vmem:[#allocation139_spill] sm:$0xff]  ;;  %v3520_v16 = vmul.f32 1.442695, %v12434_v41  ;;  %v12437_v36 = vld [vmem:[#allocation141_spill] sm:$0xff] }
 0x4c6   :  { %v5208_v54 = vpop.eup %5207  ;;  %5221 = vpow2.f32 %v3512_v37  ;;  %v10665_v17 = vsub.f32 %v3351_v26, %v2193_v28  ;;  %v3524_v21 = vmul.f32 1.442695, %v12436_v5  ;;  %v12445_v5 = vld [vmem:[#allocation145_spill] sm:$0xff] }
 0x4c7   :  { %v4376_v57 = vmul.f32 %v4248_v8, %v4120_v3  ;;  %v2845_v13 = vpop.xlane.xlu0 %2844  ;;  %5223 = vpow2.f32 %v3514_v18  ;;  %v3526_v8 = vmul.f32 1.442695, %v12437_v36 }
 0x4c8   :  { %v5210_v48 = vpop.eup %5209  ;;  %v2848_v52 = vpop.xlane.xlu1 %2847  ;;  %5225 = vpow2.f32 %v3516_v11  ;;  %v12440_v13 = vld [vmem:[#allocation91_spill] sm:$0xff] }
 0x4c9   :  { %3054 = vadd.xlane.f32.xlu0 %v10086_v39  ;;  %3057 = vadd.xlane.f32.xlu1 %v10090_v20  ;;  %4505 = vst.msk [vmem:[#allocation2] sm:$0xff] %vm4504_vm15, %v4376_v57  ;;  %v3518_v20 = vmul.f32 1.442695, %v12433_v43  ;;  %v12439_v48 = vld [vmem:[#allocation90_spill] sm:$0xff]  ;;  %v3532_v52 = vmul.f32 1.442695, %v12440_v13 }
 0x4ca   :  { %v3530_v42 = vmul.f32 1.442695, %v12439_v48  ;;  %v12441_v43 = vld [vmem:[#allocation143_spill] sm:$0xff] }
 0x4cb   :  { %v5212_v53 = vpop.eup %5211  ;;  %v2851_v28 = vpop.xlane.xlu0 %2850  ;;  %5227 = vpow2.f32 %v3518_v20  ;;  %v3534_v20 = vmul.f32 1.442695, %v12441_v43 }
 0x4cc   :  { %v5214_v39 = vpop.eup %5213  ;;  %v2854_v3 = vpop.xlane.xlu1 %2853  ;;  %5229 = vpow2.f32 %v3520_v16 }
 0x4cd   :  { %3060 = vadd.xlane.f32.xlu0 %v10098_v22  ;;  %3063 = vadd.xlane.f32.xlu1 %v10125_v35  ;;  %v5216_v38 = vpop.eup %5215  ;;  %v12435_v22 = vld [vmem:[#allocation88_spill] sm:$0xff] }
 0x4ce   :  { %v5218_v30 = vpop.eup %5217  ;;  %v3522_v54 = vmul.f32 1.442695, %v12435_v22  ;;  %v10695_v38 = vsel %vm785_vm0, %v10625_v1, 0.0  ;;  %v12444_v1 = vld [vmem:[#allocation93_spill] sm:$0xff] }
 0x4cf   :  { %v5220_v37 = vpop.eup %5219  ;;  %v2857_v31 = vpop.xlane.xlu0 %2856  ;;  %v12442_v30 = vld [vmem:[#allocation144_spill] sm:$0xff] }
 0x4d0   :  { %v5222_v44 = vpop.eup %5221  ;;  %v4662_v35 = vld [vmem:[#allocation2] sm:$0xff]  ;;  %v2860_v26 = vpop.xlane.xlu1 %2859  ;;  %5231 = vpow2.f32 %v3522_v54  ;;  %v3536_v41 = vmul.f32 1.442695, %v12442_v30  ;;  %v12454_v30 = vld [vmem:[#allocation153_spill] sm:$0xff] }
 0x4d1   :  { %3066 = vadd.xlane.f32.xlu0 %v10129_v0  ;;  %3069 = vadd.xlane.f32.xlu1 %v10132_v9  ;;  %4663 = vst [vmem:[%s10861_s3] sm:$0xff] %v4662_v35  ;;  %v3528_v0 = vmul.f32 1.442695, %v12438_v10  ;;  %v5224_v18 = vpop.eup %5223  ;;  %5233 = vpow2.f32 %v3524_v21  ;;  %v3540_v44 = vmul.f32 1.442695, %v12444_v1  ;;  %v3542_v21 = vmul.f32 1.442695, %v12445_v5 }
 0x4d2   :  { %v5226_v11 = vpop.eup %5225  ;;  %5235 = vpow2.f32 %v3526_v8  ;;  %v12446_v35 = vld [vmem:[#allocation146_spill] sm:$0xff]  ;;  %v5682_v1 = vld [vmem:[%s10860_s2] ss:$0 sm:$0xff] }
 0x4d3   :  { %v2863_v9 = vpop.xlane.xlu0 %2862  ;;  %5237 = vpow2.f32 %v3528_v0  ;;  %v3544_v26 = vmul.f32 1.442695, %v12446_v35  ;;  %v12449_v11 = vld [vmem:[#allocation148_spill] sm:$0xff]  ;;  %v12458_v5 = vld [vmem:[#allocation19_spill] sm:$0xff] }
 0x4d4   :  { %v2866_v57 = vpop.xlane.xlu1 %2865  ;;  %5239 = vpow2.f32 %v3530_v42 }
 0x4d5   :  { %3072 = vadd.xlane.f32.xlu0 %v10136_v32  ;;  %3075 = vadd.xlane.f32.xlu1 %v10139_v14  ;;  %v5228_v39 = vpop.eup %5227  ;;  %5241 = vpow2.f32 %v3532_v52  ;;  %v3550_v57 = vmul.f32 1.442695, %v12449_v11 }
 0x4d6   :  { %v5230_v14 = vpop.eup %5229  ;;  %5243 = vpow2.f32 %v3534_v20  ;;  %v12453_v20 = vld [vmem:[#allocation152_spill] sm:$0xff] }
 0x4d7   :  { %v2869_v53 = vpop.xlane.xlu0 %2868  ;;  %5245 = vpow2.f32 %v3536_v41  ;;  %v3560_v41 = vmul.f32 1.442695, %v12454_v30  ;;  %v12473_v30 = vld [vmem:[#allocation163_spill] sm:$0xff] }
 0x4d8   :  { %v2872_v32 = vpop.xlane.xlu1 %2871 }
 0x4d9   :  { %3078 = vadd.xlane.f32.xlu0 %v10167_v25  ;;  %3081 = vadd.xlane.f32.xlu1 %v10180_v12 }
 0x4da   :  { %v5232_v25 = vpop.eup %5231 }
 0x4db   :  { %v2875_v28 = vpop.xlane.xlu0 %2874  ;;  %v5234_v12 = vpop.eup %5233 }
 0x4dc   :  { %v2878_v3 = vpop.xlane.xlu1 %2877  ;;  %v5236_v16 = vpop.eup %5235  ;;  %v3558_v12 = vmul.f32 1.442695, %v12453_v20  ;;  %v12472_v20 = vld [vmem:[#allocation26_spill] sm:$0xff] }
 0x4dd   :  { %3084 = vadd.xlane.f32.xlu0 %v10183_v33  ;;  %3087 = vadd.xlane.f32.xlu1 %v10194_v50  ;;  %v5238_v33 = vpop.eup %5237  ;;  %v12443_v50 = vld [vmem:[#allocation92_spill] sm:$0xff]  ;;  %v12452_v3 = vld [vmem:[#allocation151_spill] sm:$0xff]  ;;  %v12455_v16 = vld [vmem:[#allocation154_spill] sm:$0xff] }
 0x4de   :  { %v3538_v22 = vmul.f32 1.442695, %v12443_v50  ;;  %v5240_v31 = vpop.eup %5239  ;;  %v3556_v43 = vmul.f32 1.442695, %v12452_v3  ;;  %v3562_v33 = vmul.f32 1.442695, %v12455_v16 }
 0x4df   :  { %v2881_v37 = vpop.xlane.xlu0 %2880  ;;  %v5242_v8 = vpop.eup %5241  ;;  %v10733_v31 = vsel %vm783_vm12, %v5682_v1, 0.0  ;;  %v12475_v16 = vld [vmem:[#allocation164_spill] sm:$0xff] }
 0x4e0   :  { %v2884_v54 = vpop.xlane.xlu1 %2883  ;;  %5247 = vpow2.f32 %v3538_v22  ;;  %v5244_v48 = vpop.eup %5243  ;;  %v12462_v8 = vld [vmem:[#allocation157_spill] sm:$0xff] }
 0x4e1   :  { %3090 = vadd.xlane.f32.xlu0 %v10205_v2  ;;  %3093 = vadd.xlane.f32.xlu1 %v10209_v62  ;;  %v12447_v62 = vld [vmem:[#allocation94_spill] sm:$0xff]  ;;  %5249 = vpow2.f32 %v3540_v44 }
 0x4e2   :  { %v3546_v36 = vmul.f32 1.442695, %v12447_v62  ;;  %5251 = vpow2.f32 %v3542_v21 }
 0x4e3   :  { %v2887_v2 = vpop.xlane.xlu0 %2886  ;;  %5253 = vpow2.f32 %v3544_v26  ;;  %v12460_v26 = vld [vmem:[#allocation156_spill] sm:$0xff] }
 0x4e4   :  { %v2890_v10 = vpop.xlane.xlu1 %2889  ;;  %5255 = vpow2.f32 %v3546_v36  ;;  %v3566_v2 = vmul.f32 1.442695, %v12460_v26  ;;  %v12461_v36 = vld [vmem:[#allocation192_spill] sm:$0xff] }
 0x4e5   :  { %3096 = vadd.xlane.f32.xlu0 %v10217_v15  ;;  %3099 = vadd.xlane.f32.xlu1 %v10244_v29  ;;  %v12448_v15 = vld [vmem:[#allocation147_spill] sm:$0xff]  ;;  %v5246_v29 = vpop.eup %5245  ;;  %v3568_v10 = vmul.f32 1.442695, %v12462_v8 }
 0x4e6   :  { %v3548_v18 = vmul.f32 1.442695, %v12448_v15  ;;  %v12463_v15 = vld [vmem:[#allocation21_spill] sm:$0xff] }
 0x4e7   :  { %v2893_v0 = vpop.xlane.xlu0 %2892 }
 0x4e8   :  { %v2896_v9 = vpop.xlane.xlu1 %2895  ;;  %5257 = vpow2.f32 %v3548_v18 }
 0x4e9   :  { %3102 = vadd.xlane.f32.xlu0 %v10248_v59  ;;  %3105 = vadd.xlane.f32.xlu1 %v10251_v6  ;;  %v12450_v59 = vld [vmem:[#allocation149_spill] sm:$0xff]  ;;  %5259 = vpow2.f32 %v3550_v57  ;;  %v12464_v9 = vld [vmem:[#allocation158_spill] sm:$0xff] }
 0x4ea   :  { %v3552_v52 = vmul.f32 1.442695, %v12450_v59  ;;  %v5248_v53 = vpop.eup %5247  ;;  %v3570_v48 = vmul.f32 1.442695, %v12464_v9  ;;  %v12466_v59 = vld [vmem:[#allocation159_spill] sm:$0xff]  ;;  %v12484_v9 = vld [vmem:[#allocation29_spill] sm:$0xff] }
 0x4eb   :  { %v2899_v42 = vpop.xlane.xlu0 %2898  ;;  %v5250_v6 = vpop.eup %5249  ;;  %v12467_v53 = vld [vmem:[#allocation24_spill] sm:$0xff] }
 0x4ec   :  { %v2902_v13 = vpop.xlane.xlu1 %2901  ;;  %v5252_v32 = vpop.eup %5251  ;;  %5261 = vpow2.f32 %v3552_v52  ;;  %v3572_v52 = vmul.f32 1.442695, %v12466_v59  ;;  %v12487_v59 = vld [vmem:[#allocation170_spill] sm:$0xff] }
 0x4ed   :  { %3108 = vadd.xlane.f32.xlu0 %v10255_v55  ;;  %3111 = vadd.xlane.f32.xlu1 %v10258_v40  ;;  %v5254_v55 = vpop.eup %5253  ;;  %v12451_v40 = vld [vmem:[#allocation150_spill] sm:$0xff]  ;;  %v12465_v13 = vld [vmem:[#allocation279_spill] sm:$0xff]  ;;  %v12468_v32 = vld [vmem:[#allocation160_spill] sm:$0xff] }
 0x4ee   :  { %v3554_v28 = vmul.f32 1.442695, %v12451_v40  ;;  %v5256_v25 = vpop.eup %5255 }
 0x4ef   :  { %v2905_v39 = vpop.xlane.xlu0 %2904  ;;  %v12470_v25 = vld [vmem:[#allocation162_spill] sm:$0xff] }
 0x4f0   :  { %v2908_v14 = vpop.xlane.xlu1 %2907  ;;  %5263 = vpow2.f32 %v3554_v28  ;;  %v3574_v39 = vmul.f32 1.442695, %v12468_v32  ;;  %v3578_v3 = vmul.f32 1.442695, %v12470_v25  ;;  %v12491_v25 = vld [vmem:[#allocation31_spill] sm:$0xff] }
 0x4f1   :  { %3114 = vadd.xlane.f32.xlu0 %v10286_v4  ;;  %3117 = vadd.xlane.f32.xlu1 %v10294_v51  ;;  %5265 = vpow2.f32 %v3556_v43  ;;  %v12469_v14 = vld [vmem:[#allocation161_spill] sm:$0xff] }
 0x4f2   :  { %v5258_v37 = vpop.eup %5257  ;;  %5267 = vpow2.f32 %v3558_v12  ;;  %v3576_v40 = vmul.f32 1.442695, %v12469_v14  ;;  %v12471_v43 = vld [vmem:[#allocation193_spill] sm:$0xff] }
 0x4f3   :  { %v2911_v4 = vpop.xlane.xlu0 %2910  ;;  %5269 = vpow2.f32 %v3560_v41  ;;  %v3580_v41 = vmul.f32 1.442695, %v12473_v30 }
 0x4f4   :  { %v2914_v51 = vpop.xlane.xlu1 %2913  ;;  %5271 = vpow2.f32 %v3562_v33  ;;  %v3582_v33 = vmul.f32 1.442695, %v12475_v16  ;;  %v12494_v16 = vld [vmem:[#allocation172_spill] sm:$0xff] }
 0x4f5   :  { %3120 = vadd.xlane.f32.xlu0 %v10297_v27  ;;  %3123 = vadd.xlane.f32.xlu1 %v10308_v46  ;;  %v12456_v27 = vld [vmem:[#allocation155_spill] sm:$0xff]  ;;  %v5260_v46 = vpop.eup %5259  ;;  %v12474_v51 = vld [vmem:[#allocation194_spill] sm:$0xff] }
 0x4f6   :  { %v3564_v22 = vmul.f32 1.442695, %v12456_v27 }
 0x4f7   :  { %v2917_v50 = vpop.xlane.xlu0 %2916 }
 0x4f8   :  { %v2920_v54 = vpop.xlane.xlu1 %2919  ;;  %5273 = vpow2.f32 %v3564_v22  ;;  %v10756_v50 = vsel %vm784_vm1, %v5682_v1, 0.0  ;;  %v12477_v22 = vld [vmem:[#allocation28_spill] sm:$0xff]  ;;  %v12482_v1 = vld [vmem:[#allocation167_spill] sm:$0xff] }
 0x4f9   :  { %3126 = vadd.xlane.f32.xlu0 %v10319_v60  ;;  %3129 = vadd.xlane.f32.xlu1 %v10323_v58  ;;  %v5262_v60 = vpop.eup %5261  ;;  %v12459_v58 = vld [vmem:[#allocation191_spill] sm:$0xff]  ;;  %5275 = vpow2.f32 %v3566_v2  ;;  %v12481_v2 = vld [vmem:[#allocation282_spill] sm:$0xff] }
 0x4fa   :  { %v5264_v62 = vpop.eup %5263  ;;  %5277 = vpow2.f32 %v3568_v10 }
 0x4fb   :  { %v2923_v21 = vpop.xlane.xlu0 %2922  ;;  %v5266_v0 = vpop.eup %5265  ;;  %5279 = vpow2.f32 %v3570_v48  ;;  %v3588_v62 = vmul.f32 1.442695, %v12482_v1  ;;  %v12501_v1 = vld [vmem:[#allocation173_spill] sm:$0xff] }
 0x4fc   :  { %v2926_v35 = vpop.xlane.xlu1 %2925  ;;  %v5268_v29 = vpop.eup %5267  ;;  %5281 = vpow2.f32 %v3572_v52  ;;  %v12479_v21 = vld [vmem:[#allocation27_spill] sm:$0xff]  ;;  %v3594_v52 = vmul.f32 1.442695, %v12487_v59 }
 0x4fd   :  { %3132 = vadd.xlane.f32.xlu0 %v12458_v5  ;;  %3135 = vadd.xlane.f32.xlu1 %v12459_v58  ;;  %v5270_v11 = vpop.eup %5269  ;;  %5283 = vpow2.f32 %v3574_v39  ;;  %v12478_v5 = vld [vmem:[#allocation165_spill] sm:$0xff]  ;;  %v12480_v35 = vld [vmem:[#allocation166_spill] sm:$0xff]  ;;  %v12485_v29 = vld [vmem:[#allocation168_spill] sm:$0xff] }
 0x4fe   :  { %v5272_v57 = vpop.eup %5271  ;;  %5285 = vpow2.f32 %v3576_v40  ;;  %v3584_v58 = vmul.f32 1.442695, %v12478_v5  ;;  %v3586_v26 = vmul.f32 1.442695, %v12480_v35 }
 0x4ff   :  { %v2929_v18 = vpop.xlane.xlu0 %2928  ;;  %5287 = vpow2.f32 %v3578_v3  ;;  %v12486_v57 = vld [vmem:[#allocation169_spill] sm:$0xff] }
 0x500   :  { %v2932_v42 = vpop.xlane.xlu1 %2931  ;;  %5289 = vpow2.f32 %v3580_v41 }
 0x501   :  { %3138 = vadd.xlane.f32.xlu0 %v12461_v36  ;;  %3141 = vadd.xlane.f32.xlu1 %v12463_v15  ;;  %5291 = vpow2.f32 %v3582_v33  ;;  %v12483_v15 = vld [vmem:[#allocation195_spill] sm:$0xff]  ;;  %v3590_v42 = vmul.f32 1.442695, %v12485_v29  ;;  %v3600_v33 = vmul.f32 1.442695, %v12494_v16  ;;  %v12504_v29 = vld [vmem:[#allocation262_spill] sm:$0xff] }
 0x502   :  { %v5274_v28 = vpop.eup %5273  ;;  %5293 = vpow2.f32 %v3584_v58 }
 0x503   :  { %v2935_v6 = vpop.xlane.xlu0 %2934  ;;  %v5276_v27 = vpop.eup %5275  ;;  %5295 = vpow2.f32 %v3586_v26 }
 0x504   :  { %v2938_v55 = vpop.xlane.xlu1 %2937  ;;  %v5278_v46 = vpop.eup %5277  ;;  %5297 = vpow2.f32 %v3588_v62  ;;  %v12489_v6 = vld [vmem:[#allocation258_spill] sm:$0xff]  ;;  %v12495_v27 = vld [vmem:[#allocation33_spill] sm:$0xff]  ;;  %v3606_v62 = vmul.f32 1.442695, %v12501_v1 }
 0x505   :  { %3144 = vadd.xlane.f32.xlu0 %v12465_v13  ;;  %3147 = vadd.xlane.f32.xlu1 %v12467_v53  ;;  %v5280_v60 = vpop.eup %5279  ;;  %v3592_v13 = vmul.f32 1.442695, %v12486_v57  ;;  %v12488_v53 = vld [vmem:[#allocation32_spill] sm:$0xff]  ;;  %v3596_v32 = vmul.f32 1.442695, %v12489_v6  ;;  %v12490_v55 = vld [vmem:[#allocation283_spill] sm:$0xff]  ;;  %5299 = vpow2.f32 %v3590_v42 }
 0x506   :  { %v5282_v36 = vpop.eup %5281  ;;  %v12497_v60 = vld [vmem:[#allocation259_spill] sm:$0xff]  ;;  %v3612_v42 = vmul.f32 1.442695, %v12504_v29  ;;  %v12517_v1 = vld [vmem:[#allocation182_spill] sm:$0xff] }
 0x507   :  { %v2941_v12 = vpop.xlane.xlu0 %2940  ;;  %v5284_v10 = vpop.eup %5283  ;;  %5301 = vpow2.f32 %v3592_v13  ;;  %v3602_v5 = vmul.f32 1.442695, %v12497_v60  ;;  %v12505_v13 = vld [vmem:[#allocation39_spill] sm:$0xff] }
 0x508   :  { %v2944_v4 = vpop.xlane.xlu1 %2943  ;;  %v5286_v0 = vpop.eup %5285  ;;  %5303 = vpow2.f32 %v3594_v52  ;;  %v3218_v12 = vsel %vm785_vm0, %v10733_v31, 0.0  ;;  %v12498_v31 = vld [vmem:[#allocation35_spill] sm:$0xff]  ;;  %v12502_v10 = vld [vmem:[#allocation174_spill] sm:$0xff] }
 0x509   :  { %3150 = vadd.xlane.f32.xlu0 %v12471_v43  ;;  %3153 = vadd.xlane.f32.xlu1 %v12472_v20  ;;  %v5288_v18 = vpop.eup %5287  ;;  %5305 = vpow2.f32 %v3596_v32  ;;  %v12492_v43 = vld [vmem:[#allocation197_spill] sm:$0xff]  ;;  %v12493_v4 = vld [vmem:[#allocation171_spill] sm:$0xff]  ;;  %v3608_v0 = vmul.f32 1.442695, %v12502_v10 }
 0x50a   :  { %v5290_v39 = vpop.eup %5289  ;;  %v3598_v30 = vmul.f32 1.442695, %v12493_v4  ;;  %v12503_v18 = vld [vmem:[#allocation261_spill] sm:$0xff]  ;;  %v12506_v52 = vld [vmem:[#allocation175_spill] sm:$0xff] }
 0x50b   :  { %v2947_v54 = vpop.xlane.xlu0 %2946  ;;  %v5292_v40 = vpop.eup %5291  ;;  %v12508_v32 = vld [vmem:[#allocation201_spill] sm:$0xff]  ;;  %v3221_v39 = vsel %vm785_vm0, %v10756_v50, 0.0  ;;  %v12515_v60 = vld [vmem:[#allocation179_spill] sm:$0xff] }
 0x50c   :  { %v2950_v44 = vpop.xlane.xlu1 %2949  ;;  %v5294_v3 = vpop.eup %5293  ;;  %5307 = vpow2.f32 %v3598_v30  ;;  %v12511_v30 = vld [vmem:[#allocation177_spill] sm:$0xff]  ;;  %v12519_v29 = vld [vmem:[#allocation183_spill] sm:$0xff] }
 0x50d   :  { %3156 = vadd.xlane.f32.xlu0 %v12474_v51  ;;  %3159 = vadd.xlane.f32.xlu1 %v12477_v22  ;;  %v5296_v41 = vpop.eup %5295  ;;  %v12496_v22 = vld [vmem:[#allocation36_spill] sm:$0xff]  ;;  %5309 = vpow2.f32 %v3600_v33  ;;  %v12512_v33 = vld [vmem:[#allocation178_spill] sm:$0xff] }
 0x50e   :  { %v5298_v37 = vpop.eup %5297  ;;  %5311 = vpow2.f32 %v3602_v5  ;;  %v3622_v41 = vmul.f32 1.442695, %v12511_v30  ;;  %v3630_v5 = vmul.f32 1.442695, %v12515_v60 }
 0x50f   :  { %v2953_v45 = vpop.xlane.xlu0 %2952  ;;  %v5300_v44 = vpop.eup %5299  ;;  %v3624_v37 = vmul.f32 1.442695, %v12512_v33  ;;  %v12526_v33 = vld [vmem:[#allocation11_spill] sm:$0xff] }
 0x510   :  { %v2956_v8 = vpop.xlane.xlu1 %2955 }
 0x511   :  { %3162 = vadd.xlane.f32.xlu0 %v12479_v21  ;;  %3165 = vadd.xlane.f32.xlu1 %v12481_v2  ;;  %v5302_v58 = vpop.eup %5301  ;;  %v12499_v21 = vld [vmem:[#allocation260_spill] sm:$0xff]  ;;  %v12500_v2 = vld [vmem:[#allocation199_spill] sm:$0xff] }
 0x512   :  { %v3604_v35 = vmul.f32 1.442695, %v12499_v21  ;;  %v5304_v26 = vpop.eup %5303 }
 0x513   :  { %v2959_v48 = vpop.xlane.xlu0 %2958  ;;  %v5306_v36 = vpop.eup %5305 }
 0x514   :  { %v2962_v11 = vpop.xlane.xlu1 %2961  ;;  %5313 = vpow2.f32 %v3604_v35  ;;  %v12516_v35 = vld [vmem:[#allocation3_spill] sm:$0xff] }
 0x515   :  { %3168 = vadd.xlane.f32.xlu0 %v12483_v15  ;;  %3171 = vadd.xlane.f32.xlu1 %v12484_v9  ;;  %5315 = vpow2.f32 %v3606_v62  ;;  %v3610_v9 = vmul.f32 1.442695, %v12503_v18  ;;  %v3632_v26 = vmul.f32 1.442695, %v12516_v35  ;;  %v3634_v62 = vmul.f32 1.442695, %v12517_v1 }
 0x516   :  { %v5308_v11 = vpop.eup %5307  ;;  %5317 = vpow2.f32 %v3608_v0  ;;  %v12518_v0 = vld [vmem:[#allocation6_spill] sm:$0xff]  ;;  %v12530_v35 = vld [vmem:[#allocation13_spill] sm:$0xff] }
 0x517   :  { %v2965_v14 = vpop.xlane.xlu0 %2964  ;;  %v5310_v57 = vpop.eup %5309  ;;  %5319 = vpow2.f32 %v3610_v9 }
 0x518   :  { %v2968_v28 = vpop.xlane.xlu1 %2967  ;;  %5321 = vpow2.f32 %v3612_v42  ;;  %v3638_v42 = vmul.f32 1.442695, %v12519_v29  ;;  %v12520_v57 = vld [vmem:[#allocation5_spill] sm:$0xff] }
 0x519   :  { %3174 = vadd.xlane.f32.xlu0 %v12488_v53  ;;  %3177 = vadd.xlane.f32.xlu1 %v12490_v55  ;;  %v12507_v53 = vld [vmem:[#allocation176_spill] sm:$0xff]  ;;  %v5312_v55 = vpop.eup %5311 }
 0x51a   :  { %v3616_v6 = vmul.f32 1.442695, %v12507_v53  ;;  %v12521_v53 = vld [vmem:[#allocation184_spill] sm:$0xff] }
 0x51b   :  { %v2971_v20 = vpop.xlane.xlu0 %2970 }
 0x51c   :  { %v2974_v51 = vpop.xlane.xlu1 %2973 }
 0x51d   :  { %3180 = vadd.xlane.f32.xlu0 %v12491_v25  ;;  %3183 = vadd.xlane.f32.xlu1 %v12492_v43  ;;  %v12509_v25 = vld [vmem:[#allocation263_spill] sm:$0xff]  ;;  %v12510_v43 = vld [vmem:[#allocation264_spill] sm:$0xff] }
 0x51e   :  { %v5314_v14 = vpop.eup %5313  ;;  %v3618_v3 = vmul.f32 1.442695, %v12509_v25  ;;  %v3620_v20 = vmul.f32 1.442695, %v12510_v43 }
 0x51f   :  { %v2977_v54 = vpop.xlane.xlu0 %2976  ;;  %v5316_v28 = vpop.eup %5315  ;;  %v12523_v14 = vld [vmem:[#allocation185_spill] sm:$0xff] }
 0x520   :  { %v2980_v46 = vpop.xlane.xlu1 %2979  ;;  %v5318_v50 = vpop.eup %5317 }
 0x521   :  { %3186 = vadd.xlane.f32.xlu0 %v12495_v27  ;;  %3189 = vadd.xlane.f32.xlu1 %v12496_v22  ;;  %v5320_v16 = vpop.eup %5319  ;;  %v12513_v22 = vld [vmem:[#allocation265_spill] sm:$0xff]  ;;  %v12514_v46 = vld [vmem:[#allocation266_spill] sm:$0xff] }
 0x522   :  { %v3626_v54 = vmul.f32 1.442695, %v12513_v22  ;;  %v3628_v44 = vmul.f32 1.442695, %v12514_v46  ;;  %v12527_v22 = vld [vmem:[#allocation274_spill] sm:$0xff] }
 0x523   :  { %v2983_v45 = vpop.xlane.xlu0 %2982 }
 0x524   :  { %v2986_v8 = vpop.xlane.xlu1 %2985 }
 0x525   :  { %3192 = vadd.xlane.f32.xlu0 %v12498_v31  ;;  %3195 = vadd.xlane.f32.xlu1 %v12500_v2 }
 0x527   :  { %v2989_v15 = vpop.xlane.xlu0 %2988 }
 0x528   :  { %v2992_v48 = vpop.xlane.xlu1 %2991  ;;  %v3636_v15 = vmul.f32 1.442695, %v12518_v0 }
 0x529   :  { %3198 = vadd.xlane.f32.xlu0 %v10576_v34  ;;  %3201 = vadd.xlane.f32.xlu1 %v10580_v49  ;;  %v3614_v49 = vmul.f32 1.442695, %v12506_v52 }
 0x52b   :  { %v2995_v34 = vpop.xlane.xlu0 %2994  ;;  %5323 = vpow2.f32 %v3614_v49 }
 0x52c   :  { %v2998_v59 = vpop.xlane.xlu1 %2997  ;;  %5325 = vpow2.f32 %v3616_v6  ;;  %v3642_v6 = vmul.f32 1.442695, %v12521_v53  ;;  %v12536_v53 = vld [vmem:[#allocation190_spill] sm:$0xff] }
 0x52d   :  { %3204 = vadd.xlane.f32.xlu0 %v10604_v61  ;;  %3207 = vadd.xlane.f32.xlu1 %v12505_v13  ;;  %5327 = vpow2.f32 %v3618_v3  ;;  %v3640_v13 = vmul.f32 1.442695, %v12520_v57  ;;  %v12524_v3 = vld [vmem:[#allocation186_spill] sm:$0xff] }
 0x52e   :  { %5329 = vpow2.f32 %v3620_v20  ;;  %v3648_v43 = vmul.f32 1.442695, %v12524_v3 }
 0x52f   :  { %v3001_v61 = vpop.xlane.xlu0 %3000  ;;  %5331 = vpow2.f32 %v3622_v41  ;;  %v12525_v41 = vld [vmem:[#allocation12_spill] sm:$0xff] }
 0x530   :  { %v3004_v40 = vpop.xlane.xlu1 %3003  ;;  %5333 = vpow2.f32 %v3624_v37  ;;  %v3650_v50 = vmul.f32 1.442695, %v12525_v41  ;;  %v3652_v37 = vmul.f32 1.442695, %v12526_v33 }
 0x531   :  { %3210 = vadd.xlane.f32.xlu0 %v12508_v32  ;;  %3213 = vadd.xlane.f32.xlu1 %v10671_v47  ;;  %v5322_v47 = vpop.eup %5321  ;;  %5335 = vpow2.f32 %v3626_v54  ;;  %v12522_v32 = vld [vmem:[#allocation271_spill] sm:$0xff]  ;;  %v3646_v40 = vmul.f32 1.442695, %v12523_v14  ;;  %v3654_v54 = vmul.f32 1.442695, %v12527_v22 }
 0x532   :  { %5337 = vpow2.f32 %v3628_v44 }
 0x533   :  { %v3007_v4 = vpop.xlane.xlu0 %3006  ;;  %5339 = vpow2.f32 %v3630_v5 }
 0x534   :  { %v3010_v51 = vpop.xlane.xlu1 %3009  ;;  %5341 = vpow2.f32 %v3632_v26  ;;  %v3660_v26 = vmul.f32 1.442695, %v12530_v35 }
 0x535   :  { %3216 = vadd.xlane.f32.xlu0 %v10695_v38  ;;  %3219 = vadd.xlane.f32.xlu1 %v3218_v12  ;;  %v5324_v12 = vpop.eup %5323  ;;  %5343 = vpow2.f32 %v3634_v62 }
 0x536   :  { %v5326_v58 = vpop.eup %5325  ;;  %5345 = vpow2.f32 %v3636_v15 }
 0x537   :  { %v3013_v27 = vpop.xlane.xlu0 %3012  ;;  %v5328_v2 = vpop.eup %5327  ;;  %5347 = vpow2.f32 %v3638_v42 }
 0x538   :  { %v5330_v36 = vpop.eup %5329  ;;  %5349 = vpow2.f32 %v3640_v13 }
 0x539   :  { %3222 = vadd.xlane.f32.xlu0 %v3221_v39  ;;  %v3016_v38 = vpop.xlane.xlu1 %3015  ;;  %v5332_v10 = vpop.eup %5331  ;;  %v3644_v39 = vmul.f32 1.442695, %v12522_v32  ;;  %5351 = vpow2.f32 %v3642_v6  ;;  %v3672_v6 = vmul.f32 1.442695, %v12536_v53 }
 0x53a   :  { %v5334_v9 = vpop.eup %5333  ;;  %v12528_v38 = vld [vmem:[#allocation14_spill] sm:$0xff] }
 0x53b   :  { %v5336_v11 = vpop.eup %5335  ;;  %5353 = vpow2.f32 %v3644_v39  ;;  %v3656_v46 = vmul.f32 1.442695, %v12528_v38  ;;  %v12533_v9 = vld [vmem:[#allocation15_spill] sm:$0xff] }
 0x53c   :  { %v5338_v34 = vpop.eup %5337  ;;  %5355 = vpow2.f32 %v3646_v40  ;;  %v12534_v11 = vld [vmem:[#allocation276_spill] sm:$0xff] }
 0x53d   :  { %v5340_v52 = vpop.eup %5339  ;;  %5357 = vpow2.f32 %v3648_v43  ;;  %v3668_v57 = vmul.f32 1.442695, %v12534_v11  ;;  %v12538_v43 = vld [vmem:[#allocation17_spill] sm:$0xff] }
 0x53e   :  { %v3019_v31 = vpop.xlane.xlu0 %3018  ;;  %v3022_v21 = vpop.xlane.xlu1 %3021  ;;  %5359 = vpow2.f32 %v3650_v50  ;;  %v12535_v52 = vld [vmem:[#allocation189_spill] sm:$0xff] }
 0x53f   :  { %v5342_v55 = vpop.eup %5341  ;;  %5361 = vpow2.f32 %v3652_v37  ;;  %v12529_v31 = vld [vmem:[#allocation188_spill] sm:$0xff] }
 0x540   :  { %v5344_v25 = vpop.eup %5343  ;;  %5363 = vpow2.f32 %v3654_v54  ;;  %v3658_v21 = vmul.f32 1.442695, %v12529_v31  ;;  %v12537_v55 = vld [vmem:[#allocation18_spill] sm:$0xff] }
 0x541   :  { %v5346_v4 = vpop.eup %5345  ;;  %5365 = vpow2.f32 %v3656_v46  ;;  %v12542_v46 = vld [vmem:[#allocation278_spill] sm:$0xff] }
 0x542   :  { %v3025_v45 = vpop.xlane.xlu0 %3024  ;;  %v3028_v8 = vpop.xlane.xlu1 %3027  ;;  %5367 = vpow2.f32 %v3658_v21  ;;  %v12544_v21 = vld [vmem:[#allocation280_spill] sm:$0xff] }
 0x543   :  { %v5348_v51 = vpop.eup %5347  ;;  %v12531_v45 = vld [vmem:[#allocation16_spill] sm:$0xff]  ;;  %v12532_v8 = vld [vmem:[#allocation275_spill] sm:$0xff]  ;;  %5369 = vpow2.f32 %v3660_v26  ;;  %v3688_v35 = vmul.f32 1.442695, %v12544_v21 }
 0x544   :  { %v5350_v16 = vpop.eup %5349  ;;  %v3662_v1 = vmul.f32 1.442695, %v12531_v45  ;;  %v3664_v10 = vmul.f32 1.442695, %v12532_v8  ;;  %v12540_v51 = vld [vmem:[#allocation277_spill] sm:$0xff] }
 0x545   :  { %v5352_v44 = vpop.eup %5351  ;;  %v3680_v16 = vmul.f32 1.442695, %v12540_v51 }
 0x546   :  { %v3031_v18 = vpop.xlane.xlu0 %3030  ;;  %v3034_v48 = vpop.xlane.xlu1 %3033  ;;  %5371 = vpow2.f32 %v3662_v1  ;;  %v3684_v44 = vmul.f32 1.442695, %v12542_v46  ;;  %v12545_v1 = vld [vmem:[#allocation25_spill] sm:$0xff] }
 0x547   :  { %v5354_v60 = vpop.eup %5353  ;;  %5373 = vpow2.f32 %v3664_v10  ;;  %v3666_v48 = vmul.f32 1.442695, %v12533_v9  ;;  %v12547_v9 = vld [vmem:[#allocation196_spill] sm:$0xff]  ;;  %v12556_v46 = vld [vmem:[#allocation37_spill] sm:$0xff] }
 0x548   :  { %v5356_v58 = vpop.eup %5355 }
 0x549   :  { %v5358_v62 = vpop.eup %5357  ;;  %5375 = vpow2.f32 %v3666_v48  ;;  %v12543_v58 = vld [vmem:[#allocation23_spill] sm:$0xff]  ;;  %v3694_v48 = vmul.f32 1.442695, %v12547_v9 }
 0x54a   :  { %v3037_v59 = vpop.xlane.xlu0 %3036  ;;  %v3040_v49 = vpop.xlane.xlu1 %3039  ;;  %5377 = vpow2.f32 %v3668_v57  ;;  %v3686_v31 = vmul.f32 1.442695, %v12543_v58  ;;  %v3690_v62 = vmul.f32 1.442695, %v12545_v1  ;;  %v12557_v58 = vld [vmem:[#allocation40_spill] sm:$0xff] }
 0x54b   :  { %v5360_v0 = vpop.eup %5359  ;;  %v3670_v49 = vmul.f32 1.442695, %v12535_v52 }
 0x54c   :  { %v5362_v29 = vpop.eup %5361 }
 0x54d   :  { %v5364_v42 = vpop.eup %5363  ;;  %5379 = vpow2.f32 %v3670_v49  ;;  %v12548_v29 = vld [vmem:[#allocation30_spill] sm:$0xff] }
 0x54e   :  { %v3043_v61 = vpop.xlane.xlu0 %3042  ;;  %v3046_v28 = vpop.xlane.xlu1 %3045  ;;  %5381 = vpow2.f32 %v3672_v6  ;;  %v3696_v42 = vmul.f32 1.442695, %v12548_v29  ;;  %v12550_v6 = vld [vmem:[#allocation284_spill] sm:$0xff] }
 0x54f   :  { %v5366_v13 = vpop.eup %5365  ;;  %v3674_v61 = vmul.f32 1.442695, %v12537_v55 }
 0x550   :  { %v5368_v32 = vpop.eup %5367 }
 0x551   :  { %v5370_v14 = vpop.eup %5369  ;;  %5383 = vpow2.f32 %v3674_v61  ;;  %v3700_v32 = vmul.f32 1.442695, %v12550_v6  ;;  %v12551_v61 = vld [vmem:[#allocation198_spill] sm:$0xff] }
 0x552   :  { %v3049_v20 = vpop.xlane.xlu0 %3048  ;;  %v3052_v30 = vpop.xlane.xlu1 %3051  ;;  %v3702_v14 = vmul.f32 1.442695, %v12551_v61 }
 0x553   :  { %v5372_v28 = vpop.eup %5371  ;;  %v3676_v20 = vmul.f32 1.442695, %v12538_v43  ;;  %v12539_v30 = vld [vmem:[#allocation20_spill] sm:$0xff] }
 0x554   :  { %v5374_v25 = vpop.eup %5373  ;;  %v3678_v41 = vmul.f32 1.442695, %v12539_v30 }
 0x555   :  { %v5376_v50 = vpop.eup %5375  ;;  %5385 = vpow2.f32 %v3676_v20  ;;  %v12553_v20 = vld [vmem:[#allocation286_spill] sm:$0xff] }
 0x556   :  { %v3055_v47 = vpop.xlane.xlu0 %3054  ;;  %v3058_v27 = vpop.xlane.xlu1 %3057  ;;  %5387 = vpow2.f32 %v3678_v41 }
 0x557   :  { %v5378_v33 = vpop.eup %5377  ;;  %5389 = vpow2.f32 %v3680_v16  ;;  %v12541_v27 = vld [vmem:[#allocation22_spill] sm:$0xff] }
 0x558   :  { %v3682_v22 = vmul.f32 1.442695, %v12541_v27  ;;  %v5380_v54 = vpop.eup %5379 }
 0x55a   :  { %v3061_v12 = vpop.xlane.xlu0 %3060  ;;  %v3064_v5 = vpop.xlane.xlu1 %3063  ;;  %5391 = vpow2.f32 %v3682_v22 }
 0x55b   :  { %v5382_v12 = vpop.eup %5381  ;;  %5393 = vpow2.f32 %v3684_v44  ;;  %v3712_v44 = vmul.f32 1.442695, %v12556_v46 }
 0x55c   :  { %v5384_v5 = vpop.eup %5383  ;;  %5395 = vpow2.f32 %v3686_v31  ;;  %v3714_v31 = vmul.f32 1.442695, %v12557_v58 }
 0x55d   :  { %5397 = vpow2.f32 %v3688_v35 }
 0x55e   :  { %v3067_v2 = vpop.xlane.xlu0 %3066  ;;  %v3070_v36 = vpop.xlane.xlu1 %3069  ;;  %5399 = vpow2.f32 %v3690_v62 }
 0x55f   :  { %v5386_v45 = vpop.eup %5385 }
 0x560   :  { %v5388_v36 = vpop.eup %5387  ;;  %v12559_v45 = vld [vmem:[#allocation288_spill] sm:$0xff] }
 0x561   :  { %v5390_v10 = vpop.eup %5389  ;;  %v3718_v1 = vmul.f32 1.442695, %v12559_v45 }
 0x562   :  { %v3073_v15 = vpop.xlane.xlu0 %3072  ;;  %v3076_v18 = vpop.xlane.xlu1 %3075 }
 0x563   :  { %v12546_v15 = vld [vmem:[#allocation281_spill] sm:$0xff] }
 0x564   :  { %v3692_v18 = vmul.f32 1.442695, %v12546_v15  ;;  %v5392_v57 = vpop.eup %5391 }
 0x566   :  { %v3079_v34 = vpop.xlane.xlu0 %3078  ;;  %v3082_v59 = vpop.xlane.xlu1 %3081  ;;  %5401 = vpow2.f32 %v3692_v18  ;;  %v3722_v18 = vmul.f32 1.442695, %v10633_v19  ;;  %v3730_v19 = vmul.f32 1.442695, %v10655_v56 }
 0x567   :  { %v5394_v34 = vpop.eup %5393  ;;  %5403 = vpow2.f32 %v3694_v48  ;;  %v12549_v59 = vld [vmem:[#allocation34_spill] sm:$0xff] }
 0x568   :  { %5405 = vpow2.f32 %v3696_v42  ;;  %v3698_v52 = vmul.f32 1.442695, %v12549_v59  ;;  %v5396_v49 = vpop.eup %5395  ;;  %v3724_v42 = vmul.f32 1.442695, %v10636_v7  ;;  %v3728_v59 = vmul.f32 1.442695, %v10648_v23 }
 0x569   :  { %v3732_v7 = vmul.f32 1.442695, %v10658_v24 }
 0x56a   :  { %v3085_v39 = vpop.xlane.xlu0 %3084  ;;  %v3088_v40 = vpop.xlane.xlu1 %3087  ;;  %5407 = vpow2.f32 %v3698_v52 }
 0x56b   :  { %v5398_v39 = vpop.eup %5397  ;;  %v12552_v40 = vld [vmem:[#allocation285_spill] sm:$0xff]  ;;  %5409 = vpow2.f32 %v3700_v32 }
 0x56c   :  { %v3704_v28 = vmul.f32 1.442695, %v12552_v40  ;;  %v5400_v25 = vpop.eup %5399  ;;  %5411 = vpow2.f32 %v3702_v14 }
 0x56e   :  { %v3091_v3 = vpop.xlane.xlu0 %3090  ;;  %v3094_v4 = vpop.xlane.xlu1 %3093  ;;  %5413 = vpow2.f32 %v3704_v28 }
 0x56f   :  { %v3706_v4 = vmul.f32 1.442695, %v12553_v20 }
 0x570   :  { %v5402_v30 = vpop.eup %5401 }
 0x571   :  { %v5404_v41 = vpop.eup %5403  ;;  %5415 = vpow2.f32 %v3706_v4 }
 0x572   :  { %v3097_v47 = vpop.xlane.xlu0 %3096  ;;  %v3100_v37 = vpop.xlane.xlu1 %3099 }
 0x573   :  { %v5406_v51 = vpop.eup %5405  ;;  %v12554_v47 = vld [vmem:[#allocation38_spill] sm:$0xff]  ;;  %v12555_v37 = vld [vmem:[#allocation200_spill] sm:$0xff] }
 0x574   :  { %v3708_v33 = vmul.f32 1.442695, %v12554_v47  ;;  %v3710_v27 = vmul.f32 1.442695, %v12555_v37  ;;  %v5408_v54 = vpop.eup %5407 }
 0x575   :  { %v5410_v12 = vpop.eup %5409 }
 0x576   :  { %v3103_v38 = vpop.xlane.xlu0 %3102  ;;  %v3106_v60 = vpop.xlane.xlu1 %3105  ;;  %5417 = vpow2.f32 %v3708_v33 }
 0x577   :  { %5419 = vpow2.f32 %v3710_v27  ;;  %v5412_v60 = vpop.eup %5411 }
 0x578   :  { %v5414_v21 = vpop.eup %5413  ;;  %5421 = vpow2.f32 %v3712_v44 }
 0x579   :  { %5423 = vpow2.f32 %v3714_v31 }
 0x57a   :  { %v3109_v26 = vpop.xlane.xlu0 %3108  ;;  %v3112_v2 = vpop.xlane.xlu1 %3111 }
 0x57b   :  { %v12558_v26 = vld [vmem:[#allocation287_spill] sm:$0xff]  ;;  %v5416_v62 = vpop.eup %5415 }
 0x57c   :  { %v3716_v2 = vmul.f32 1.442695, %v12558_v26 }
 0x57e   :  { %v3115_v8 = vpop.xlane.xlu0 %3114  ;;  %v3118_v0 = vpop.xlane.xlu1 %3117  ;;  %5425 = vpow2.f32 %v3716_v2 }
 0x57f   :  { %v12560_v8 = vld [vmem:[#allocation202_spill] sm:$0xff]  ;;  %5427 = vpow2.f32 %v3718_v1 }
 0x580   :  { %v3720_v10 = vmul.f32 1.442695, %v12560_v8  ;;  %v5418_v15 = vpop.eup %5417 }
 0x581   :  { %v5420_v9 = vpop.eup %5419 }
 0x582   :  { %v3121_v11 = vpop.xlane.xlu0 %3120  ;;  %v3124_v13 = vpop.xlane.xlu1 %3123  ;;  %5429 = vpow2.f32 %v3720_v10 }
 0x583   :  { %v5422_v11 = vpop.eup %5421  ;;  %5431 = vpow2.f32 %v3722_v18  ;;  %v3726_v13 = vmul.f32 1.442695, %v10644_v63  ;;  %v3734_v63 = vmul.f32 1.442695, %v10665_v17 }
 0x584   :  { %5433 = vpow2.f32 %v3724_v42  ;;  %v5424_v52 = vpop.eup %5423 }
 0x585   :  { %5435 = vpow2.f32 %v3726_v13 }
 0x586   :  { %v3127_v53 = vpop.xlane.xlu0 %3126  ;;  %v3130_v55 = vpop.xlane.xlu1 %3129  ;;  %5437 = vpow2.f32 %v3728_v59 }
 0x587   :  { %5439 = vpow2.f32 %v3730_v19 }
 0x588   :  { %v5426_v49 = vpop.eup %5425  ;;  %5441 = vpow2.f32 %v3732_v7 }
 0x589   :  { %v5428_v6 = vpop.eup %5427  ;;  %5443 = vpow2.f32 %v3734_v63 }
 0x58a   :  { %v3133_v3 = vpop.xlane.xlu0 %3132  ;;  %v3136_v43 = vpop.xlane.xlu1 %3135 }
 0x58c   :  { %v5430_v39 = vpop.eup %5429 }
 0x58d   :  { %v5432_v61 = vpop.eup %5431 }
 0x58e   :  { %v3139_v50 = vpop.xlane.xlu0 %3138  ;;  %v3142_v16 = vpop.xlane.xlu1 %3141 }
 0x58f   :  { %v5434_v23 = vpop.eup %5433 }
 0x590   :  { %v5436_v25 = vpop.eup %5435 }
 0x591   :  { %v5438_v3 = vpop.eup %5437 }
 0x592   :  { %v3145_v22 = vpop.xlane.xlu0 %3144  ;;  %v3148_v38 = vpop.xlane.xlu1 %3147 }
 0x593   :  { %v5440_v20 = vpop.eup %5439 }
 0x594   :  { %v5442_v4 = vpop.eup %5441 }
 0x595   :  { %v5444_v41 = vpop.eup %5443 }
 0x596   :  { %v3151_v5 = vpop.xlane.xlu0 %3150  ;;  %v3154_v35 = vpop.xlane.xlu1 %3153 }
 0x59a   :  { %v3157_v36 = vpop.xlane.xlu0 %3156  ;;  %v3160_v0 = vpop.xlane.xlu1 %3159 }
 0x59e   :  { %v3163_v48 = vpop.xlane.xlu0 %3162  ;;  %v3166_v29 = vpop.xlane.xlu1 %3165 }
 0x5a2   :  { %v3169_v57 = vpop.xlane.xlu0 %3168  ;;  %v3172_v34 = vpop.xlane.xlu1 %3171 }
 0x5a6   :  { %v3175_v53 = vpop.xlane.xlu0 %3174  ;;  %v3178_v32 = vpop.xlane.xlu1 %3177 }
 0x5aa   :  { %v3181_v55 = vpop.xlane.xlu0 %3180  ;;  %v3184_v14 = vpop.xlane.xlu1 %3183 }
 0x5ae   :  { %v3187_v40 = vpop.xlane.xlu0 %3186  ;;  %v3190_v28 = vpop.xlane.xlu1 %3189 }
 0x5b2   :  { %v3193_v56 = vpop.xlane.xlu0 %3192  ;;  %v3196_v43 = vpop.xlane.xlu1 %3195 }
 0x5b6   :  { %v3199_v30 = vpop.xlane.xlu0 %3198  ;;  %v3202_v24 = vpop.xlane.xlu1 %3201 }
 0x5ba   :  { %v3205_v50 = vpop.xlane.xlu0 %3204  ;;  %v3208_v51 = vpop.xlane.xlu1 %3207 }
 0x5be   :  { %v3211_v16 = vpop.xlane.xlu0 %3210  ;;  %v3214_v17 = vpop.xlane.xlu1 %3213 }
 0x5c2   :  { %v3217_v47 = vpop.xlane.xlu0 %3216  ;;  %v3220_v33 = vpop.xlane.xlu1 %3219 }
 0x5c6   :  { %v3223_v37 = vpop.xlane.xlu0 %3222 }

</bundles_post_ra>
